<compile_context>
chip_gen: v7x
topology: tpu7x:2x2x1
jax: 0.10.0
libtpu: 0.0.40
codegen_flags: <defaults>
</compile_context>

<pallas_src>
import functools

import jax
import jax.numpy as jnp
from jax.experimental import pallas as pl
from jax.experimental.pallas import tpu as pltpu

D_IN = 2048 + 128      # 2176
D_HID = 1024


def _linear_kernel(x_ref, w_ref, b_ref, o_ref, *, apply_relu):
    """One (tm, tn) output tile: full-K matmul + bias (+ ReLU), no accumulator."""
    x = x_ref[...].astype(jnp.bfloat16)            # f32 activations -> bf16 for MXU
    acc = jnp.dot(x, w_ref[...], preferred_element_type=jnp.float32)
    r = acc + b_ref[...]
    if apply_relu:
        r = jnp.maximum(r, 0.0)
    o_ref[...] = r.astype(o_ref.dtype)


def linear(x, w_t, b, *, apply_relu, tm=8, tn=512):
    """y = relu?(x @ w_t + b); x:(M,K) f32, w_t:(K,N) bf16, b:(N,) f32."""
    M, K = x.shape
    K2, N = w_t.shape
    assert K == K2
    tm = min(tm, M)
    tn = min(tn, N)
    b2 = b.reshape(1, N)

    grid = (pl.cdiv(M, tm), pl.cdiv(N, tn))
    kernel = functools.partial(_linear_kernel, apply_relu=apply_relu)

    bytes_accessed = (
        x.size * x.dtype.itemsize
        + w_t.size * w_t.dtype.itemsize
        + b2.size * b2.dtype.itemsize
        + M * N * x.dtype.itemsize
    )

    return pl.pallas_call(
        kernel,
        out_shape=jax.ShapeDtypeStruct((M, N), x.dtype),
        grid_spec=pltpu.PrefetchScalarGridSpec(
            num_scalar_prefetch=0,
            grid=grid,
            in_specs=[
                pl.BlockSpec((tm, K), lambda i, j: (i, 0)),   # activations (full K)
                pl.BlockSpec((K, tn), lambda i, j: (0, j)),   # bf16 weight slab
                pl.BlockSpec((1, tn), lambda i, j: (0, j)),   # bias
            ],
            out_specs=pl.BlockSpec((tm, tn), lambda i, j: (i, j)),
        ),
        compiler_params=pltpu.CompilerParams(
            dimension_semantics=("parallel", "parallel"),
        ),
        cost_estimate=pl.CostEstimate(
            flops=2 * M * K * N,
            transcendentals=0,
            bytes_accessed=bytes_accessed,
        ),
    )(x, w_t, b2)


def init_params(key):
    """Deterministic synthetic params with PyTorch Linear shapes."""
    dims = [(D_IN, D_IN), (D_IN, D_HID), (D_HID, D_HID), (D_HID, D_HID)]
    params = []
    for i, (din, dout) in enumerate(dims):
        kw, kb = jax.random.split(jax.random.fold_in(key, i))
        bound = 1.0 / jnp.sqrt(din)
        # stored pre-transposed (in, out); bf16 in HBM halves weight traffic
        w_t = jax.random.uniform(
            kw, (din, dout), jnp.float32, -bound, bound
        ).astype(jnp.bfloat16)
        b = jax.random.uniform(kb, (dout,), jnp.float32, -bound, bound)
        params.append((w_t, b))
    return params


@jax.jit
def projector_forward(x, params):
    # Linear -> ReLU -> Dropout(identity, eval) -> Linear -> ReLU
    # -> Linear -> ReLU -> Linear
    h = linear(x, params[0][0], params[0][1], apply_relu=True)
    h = linear(h, params[1][0], params[1][1], apply_relu=True)
    h = linear(h, params[2][0], params[2][1], apply_relu=True)
    h = linear(h, params[3][0], params[3][1], apply_relu=False)
    return h


if __name__ == "__main__":
    key = jax.random.PRNGKey(0)
    kx, kp = jax.random.split(key)

    batch = 8  # small batch; feature dims fixed by the module (2176 / 1024)
    x = jax.random.normal(kx, (batch, D_IN), jnp.float32)
    params = init_params(kp)

    out = projector_forward(x, params)
    jax.block_until_ready(out)

    # reference in plain JAX, mirroring the kernel math (bf16 weights/acts,
    # f32 accumulation)
    ref = x
    for i, (w_t, b) in enumerate(params):
        ref = jnp.dot(
            ref.astype(jnp.bfloat16), w_t, preferred_element_type=jnp.float32
        ) + b
        if i < 3:
            ref = jnp.maximum(ref, 0.0)

    assert out.shape == (batch, D_HID)
    assert jnp.allclose(out, ref, atol=1e-2, rtol=1e-2)

    print("KERNEL_OK")
</pallas_src>

<mosaic_0001>
module attributes {stable_mosaic.version = 11 : i64} {
  func.func @_linear_kernel(%arg0: i32, %arg1: i32, %arg2: memref<8x1024xf32, #tpu.memory_space<vmem>>, %arg3: memref<1024x512xbf16, #tpu.memory_space<vmem>>, %arg4: memref<1x512xf32, #tpu.memory_space<vmem>>, %arg5: memref<8x512xf32, #tpu.memory_space<vmem>>) attributes {dimension_semantics = [#tpu.dimension_semantics<parallel>, #tpu.dimension_semantics<parallel>], iteration_bounds = array<i64: 1, 2>, scalar_prefetch = 0 : i64, scratch_operands = 0 : i64, tpu.core_type = #tpu.core_type<tc>, window_params = [{transform_indices = @transform_0, window_bounds = array<i64: 8, 1024>}, {transform_indices = @transform_1, window_bounds = array<i64: 1024, 512>}, {transform_indices = @transform_2, window_bounds = array<i64: 1, 512>}, {transform_indices = @transform_3, window_bounds = array<i64: 8, 512>}]} {
    %c0 = arith.constant 0 : index
    %c0_0 = arith.constant 0 : index
    %0 = vector.load %arg2[%c0, %c0_0] : memref<8x1024xf32, #tpu.memory_space<vmem>>, vector<8x1024xf32>
    %1 = arith.truncf %0 : vector<8x1024xf32> to vector<8x1024xbf16>
    %c0_1 = arith.constant 0 : index
    %c0_2 = arith.constant 0 : index
    %2 = vector.load %arg3[%c0_1, %c0_2] : memref<1024x512xbf16, #tpu.memory_space<vmem>>, vector<1024x512xbf16>
    %cst = arith.constant dense<0.000000e+00> : vector<8x512xf32>
    %3 = tpu.matmul %1, %2, %cst {dimension_numbers = #tpu.dot_dimension_numbers<[1], [0], [0], [1], [0, 0, 1, 1], [], []>} : vector<8x1024xbf16>, vector<1024x512xbf16>, vector<8x512xf32> -> vector<8x512xf32>
    %c0_3 = arith.constant 0 : index
    %c0_4 = arith.constant 0 : index
    %4 = vector.load %arg4[%c0_3, %c0_4] : memref<1x512xf32, #tpu.memory_space<vmem>>, vector<1x512xf32>
    %5 = vector.broadcast %4 : vector<1x512xf32> to vector<8x512xf32>
    %6 = arith.addf %3, %5 : vector<8x512xf32>
    %cst_5 = arith.constant 0.000000e+00 : f32
    %7 = vector.broadcast %cst_5 : f32 to vector<8x512xf32>
    %8 = arith.maximumf %6, %7 : vector<8x512xf32>
    %c0_6 = arith.constant 0 : index
    %c0_7 = arith.constant 0 : index
    %9 = vector.load %arg5[%c0_6, %c0_7] : memref<8x512xf32, #tpu.memory_space<vmem>>, vector<8x512xf32>
    tpu.vector_store %arg5[%c0_6, %c0_7], %8 {strides = array<i32>} : memref<8x512xf32, #tpu.memory_space<vmem>>, vector<8x512xf32>,
    return
  }
  func.func @transform_0(%arg0: i32, %arg1: i32) -> (i32, i32) {
    %c0_i32 = arith.constant 0 : i32
    %c0_i32_0 = arith.constant 0 : i32
    return %arg0, %c0_i32 : i32, i32
  }
  func.func @transform_1(%arg0: i32, %arg1: i32) -> (i32, i32) {
    %c0_i32 = arith.constant 0 : i32
    %c0_i32_0 = arith.constant 0 : i32
    return %c0_i32, %arg1 : i32, i32
  }
  func.func @transform_2(%arg0: i32, %arg1: i32) -> (i32, i32) {
    %c0_i32 = arith.constant 0 : i32
    %c0_i32_0 = arith.constant 0 : i32
    return %c0_i32, %arg1 : i32, i32
  }
  func.func @transform_3(%arg0: i32, %arg1: i32) -> (i32, i32) {
    %c0_i32 = arith.constant 0 : i32
    return %arg0, %arg1 : i32, i32
  }
}

module attributes {stable_mosaic.version = 11 : i64} {
  func.func @_linear_kernel(%arg0: i32, %arg1: i32, %arg2: memref<8x2176xf32, #tpu.memory_space<vmem>>, %arg3: memref<2176x512xbf16, #tpu.memory_space<vmem>>, %arg4: memref<1x512xf32, #tpu.memory_space<vmem>>, %arg5: memref<8x512xf32, #tpu.memory_space<vmem>>) attributes {dimension_semantics = [#tpu.dimension_semantics<parallel>, #tpu.dimension_semantics<parallel>], iteration_bounds = array<i64: 1, 2>, scalar_prefetch = 0 : i64, scratch_operands = 0 : i64, tpu.core_type = #tpu.core_type<tc>, window_params = [{transform_indices = @transform_0, window_bounds = array<i64: 8, 2176>}, {transform_indices = @transform_1, window_bounds = array<i64: 2176, 512>}, {transform_indices = @transform_2, window_bounds = array<i64: 1, 512>}, {transform_indices = @transform_3, window_bounds = array<i64: 8, 512>}]} {
    %c0 = arith.constant 0 : index
    %c0_0 = arith.constant 0 : index
    %0 = vector.load %arg2[%c0, %c0_0] : memref<8x2176xf32, #tpu.memory_space<vmem>>, vector<8x2176xf32>
    %1 = arith.truncf %0 : vector<8x2176xf32> to vector<8x2176xbf16>
    %c0_1 = arith.constant 0 : index
    %c0_2 = arith.constant 0 : index
    %2 = vector.load %arg3[%c0_1, %c0_2] : memref<2176x512xbf16, #tpu.memory_space<vmem>>, vector<2176x512xbf16>
    %cst = arith.constant dense<0.000000e+00> : vector<8x512xf32>
    %3 = tpu.matmul %1, %2, %cst {dimension_numbers = #tpu.dot_dimension_numbers<[1], [0], [0], [1], [0, 0, 1, 1], [], []>} : vector<8x2176xbf16>, vector<2176x512xbf16>, vector<8x512xf32> -> vector<8x512xf32>
    %c0_3 = arith.constant 0 : index
    %c0_4 = arith.constant 0 : index
    %4 = vector.load %arg4[%c0_3, %c0_4] : memref<1x512xf32, #tpu.memory_space<vmem>>, vector<1x512xf32>
    %5 = vector.broadcast %4 : vector<1x512xf32> to vector<8x512xf32>
    %6 = arith.addf %3, %5 : vector<8x512xf32>
    %cst_5 = arith.constant 0.000000e+00 : f32
    %7 = vector.broadcast %cst_5 : f32 to vector<8x512xf32>
    %8 = arith.maximumf %6, %7 : vector<8x512xf32>
    %c0_6 = arith.constant 0 : index
    %c0_7 = arith.constant 0 : index
    %9 = vector.load %arg5[%c0_6, %c0_7] : memref<8x512xf32, #tpu.memory_space<vmem>>, vector<8x512xf32>
    tpu.vector_store %arg5[%c0_6, %c0_7], %8 {strides = array<i32>} : memref<8x512xf32, #tpu.memory_space<vmem>>, vector<8x512xf32>,
    return
  }
  func.func @transform_0(%arg0: i32, %arg1: i32) -> (i32, i32) {
    %c0_i32 = arith.constant 0 : i32
    %c0_i32_0 = arith.constant 0 : i32
    return %arg0, %c0_i32 : i32, i32
  }
  func.func @transform_1(%arg0: i32, %arg1: i32) -> (i32, i32) {
    %c0_i32 = arith.constant 0 : i32
    %c0_i32_0 = arith.constant 0 : i32
    return %c0_i32, %arg1 : i32, i32
  }
  func.func @transform_2(%arg0: i32, %arg1: i32) -> (i32, i32) {
    %c0_i32 = arith.constant 0 : i32
    %c0_i32_0 = arith.constant 0 : i32
    return %c0_i32, %arg1 : i32, i32
  }
  func.func @transform_3(%arg0: i32, %arg1: i32) -> (i32, i32) {
    %c0_i32 = arith.constant 0 : i32
    return %arg0, %arg1 : i32, i32
  }
}

module attributes {stable_mosaic.version = 11 : i64} {
  func.func @_linear_kernel(%arg0: i32, %arg1: i32, %arg2: memref<8x2176xf32, #tpu.memory_space<vmem>>, %arg3: memref<2176x512xbf16, #tpu.memory_space<vmem>>, %arg4: memref<1x512xf32, #tpu.memory_space<vmem>>, %arg5: memref<8x512xf32, #tpu.memory_space<vmem>>) attributes {dimension_semantics = [#tpu.dimension_semantics<parallel>, #tpu.dimension_semantics<parallel>], iteration_bounds = array<i64: 1, 5>, scalar_prefetch = 0 : i64, scratch_operands = 0 : i64, tpu.core_type = #tpu.core_type<tc>, window_params = [{transform_indices = @transform_0, window_bounds = array<i64: 8, 2176>}, {transform_indices = @transform_1, window_bounds = array<i64: 2176, 512>}, {transform_indices = @transform_2, window_bounds = array<i64: 1, 512>}, {transform_indices = @transform_3, window_bounds = array<i64: 8, 512>}]} {
    %c0 = arith.constant 0 : index
    %c0_0 = arith.constant 0 : index
    %0 = vector.load %arg2[%c0, %c0_0] : memref<8x2176xf32, #tpu.memory_space<vmem>>, vector<8x2176xf32>
    %1 = arith.truncf %0 : vector<8x2176xf32> to vector<8x2176xbf16>
    %c0_1 = arith.constant 0 : index
    %c0_2 = arith.constant 0 : index
    %2 = vector.load %arg3[%c0_1, %c0_2] : memref<2176x512xbf16, #tpu.memory_space<vmem>>, vector<2176x512xbf16>
    %cst = arith.constant dense<0.000000e+00> : vector<8x512xf32>
    %3 = tpu.matmul %1, %2, %cst {dimension_numbers = #tpu.dot_dimension_numbers<[1], [0], [0], [1], [0, 0, 1, 1], [], []>} : vector<8x2176xbf16>, vector<2176x512xbf16>, vector<8x512xf32> -> vector<8x512xf32>
    %c0_3 = arith.constant 0 : index
    %c0_4 = arith.constant 0 : index
    %4 = vector.load %arg4[%c0_3, %c0_4] : memref<1x512xf32, #tpu.memory_space<vmem>>, vector<1x512xf32>
    %5 = vector.broadcast %4 : vector<1x512xf32> to vector<8x512xf32>
    %6 = arith.addf %3, %5 : vector<8x512xf32>
    %cst_5 = arith.constant 0.000000e+00 : f32
    %7 = vector.broadcast %cst_5 : f32 to vector<8x512xf32>
    %8 = arith.maximumf %6, %7 : vector<8x512xf32>
    %c0_6 = arith.constant 0 : index
    %c0_7 = arith.constant 0 : index
    %9 = vector.load %arg5[%c0_6, %c0_7] : memref<8x512xf32, #tpu.memory_space<vmem>>, vector<8x512xf32>
    tpu.vector_store %arg5[%c0_6, %c0_7], %8 {strides = array<i32>} : memref<8x512xf32, #tpu.memory_space<vmem>>, vector<8x512xf32>,
    return
  }
  func.func @transform_0(%arg0: i32, %arg1: i32) -> (i32, i32) {
    %c0_i32 = arith.constant 0 : i32
    %c0_i32_0 = arith.constant 0 : i32
    return %arg0, %c0_i32 : i32, i32
  }
  func.func @transform_1(%arg0: i32, %arg1: i32) -> (i32, i32) {
    %c0_i32 = arith.constant 0 : i32
    %c0_i32_0 = arith.constant 0 : i32
    return %c0_i32, %arg1 : i32, i32
  }
  func.func @transform_2(%arg0: i32, %arg1: i32) -> (i32, i32) {
    %c0_i32 = arith.constant 0 : i32
    %c0_i32_0 = arith.constant 0 : i32
    return %c0_i32, %arg1 : i32, i32
  }
  func.func @transform_3(%arg0: i32, %arg1: i32) -> (i32, i32) {
    %c0_i32 = arith.constant 0 : i32
    return %arg0, %arg1 : i32, i32
  }
}

module attributes {stable_mosaic.version = 11 : i64} {
  func.func @_linear_kernel(%arg0: i32, %arg1: i32, %arg2: memref<8x1024xf32, #tpu.memory_space<vmem>>, %arg3: memref<1024x512xbf16, #tpu.memory_space<vmem>>, %arg4: memref<1x512xf32, #tpu.memory_space<vmem>>, %arg5: memref<8x512xf32, #tpu.memory_space<vmem>>) attributes {dimension_semantics = [#tpu.dimension_semantics<parallel>, #tpu.dimension_semantics<parallel>], iteration_bounds = array<i64: 1, 2>, scalar_prefetch = 0 : i64, scratch_operands = 0 : i64, tpu.core_type = #tpu.core_type<tc>, window_params = [{transform_indices = @transform_0, window_bounds = array<i64: 8, 1024>}, {transform_indices = @transform_1, window_bounds = array<i64: 1024, 512>}, {transform_indices = @transform_2, window_bounds = array<i64: 1, 512>}, {transform_indices = @transform_3, window_bounds = array<i64: 8, 512>}]} {
    %c0 = arith.constant 0 : index
    %c0_0 = arith.constant 0 : index
    %0 = vector.load %arg2[%c0, %c0_0] : memref<8x1024xf32, #tpu.memory_space<vmem>>, vector<8x1024xf32>
    %1 = arith.truncf %0 : vector<8x1024xf32> to vector<8x1024xbf16>
    %c0_1 = arith.constant 0 : index
    %c0_2 = arith.constant 0 : index
    %2 = vector.load %arg3[%c0_1, %c0_2] : memref<1024x512xbf16, #tpu.memory_space<vmem>>, vector<1024x512xbf16>
    %cst = arith.constant dense<0.000000e+00> : vector<8x512xf32>
    %3 = tpu.matmul %1, %2, %cst {dimension_numbers = #tpu.dot_dimension_numbers<[1], [0], [0], [1], [0, 0, 1, 1], [], []>} : vector<8x1024xbf16>, vector<1024x512xbf16>, vector<8x512xf32> -> vector<8x512xf32>
    %c0_3 = arith.constant 0 : index
    %c0_4 = arith.constant 0 : index
    %4 = vector.load %arg4[%c0_3, %c0_4] : memref<1x512xf32, #tpu.memory_space<vmem>>, vector<1x512xf32>
    %5 = vector.broadcast %4 : vector<1x512xf32> to vector<8x512xf32>
    %6 = arith.addf %3, %5 : vector<8x512xf32>
    %c0_5 = arith.constant 0 : index
    %c0_6 = arith.constant 0 : index
    %7 = vector.load %arg5[%c0_5, %c0_6] : memref<8x512xf32, #tpu.memory_space<vmem>>, vector<8x512xf32>
    tpu.vector_store %arg5[%c0_5, %c0_6], %6 {strides = array<i32>} : memref<8x512xf32, #tpu.memory_space<vmem>>, vector<8x512xf32>,
    return
  }
  func.func @transform_0(%arg0: i32, %arg1: i32) -> (i32, i32) {
    %c0_i32 = arith.constant 0 : i32
    %c0_i32_0 = arith.constant 0 : i32
    return %arg0, %c0_i32 : i32, i32
  }
  func.func @transform_1(%arg0: i32, %arg1: i32) -> (i32, i32) {
    %c0_i32 = arith.constant 0 : i32
    %c0_i32_0 = arith.constant 0 : i32
    return %c0_i32, %arg1 : i32, i32
  }
  func.func @transform_2(%arg0: i32, %arg1: i32) -> (i32, i32) {
    %c0_i32 = arith.constant 0 : i32
    %c0_i32_0 = arith.constant 0 : i32
    return %c0_i32, %arg1 : i32, i32
  }
  func.func @transform_3(%arg0: i32, %arg1: i32) -> (i32, i32) {
    %c0_i32 = arith.constant 0 : i32
    return %arg0, %arg1 : i32, i32
  }
}

</mosaic_0001>

<bundles_post_ra>
// kernel: projector_forward.6
= control target key start
LH: loop header
LB: loop body
LE: loop exit
PB: predicated region body
PF: predicated region fallthrough
CT: control target
= control target key end

     0   :  { %s3569_s12 = smov 0   ;;  %s3571_s13 = smov 0   ;;  %s4435_s0 = inlined_call_operand.vmem [shape: f32[8,1024], index: 0, kind: input, shape index: {}]   ;;  %s4436_s1 = inlined_call_operand.vmem [shape: bf16[1024,1024], index: 1, kind: input, shape index: {}]   ;;  %s4437_s2 = inlined_call_operand.vmem [shape: f32[1,1024], index: 2, kind: input, shape index: {}]   ;;  %s4438_s3 = inlined_call_operand.vmem [shape: f32[8,1024], index: 3, kind: output, shape index: {}]  }
   0x1   :  { %s3573_s14 = smov 0   ;;  %s3575_s15 = smov 0  }
   0x2   :  { %s3577_s16 = smov 0  }
   0x3 LB: > { %s22_s17 = sadd.s32 1, %s3543_s15  ;;  %p65_p1 = scmp.ne.s32.totalorder %s3535_s13, %s3531_s12  ;;  %s3547_s16 = sphi %s3577_s16, %s13_s16   ;;  %s3543_s15 = sphi %s3575_s15, %s4442_s15   ;;  %s3539_s14 = sphi %s3573_s14, %s4441_s14   ;;  %s3535_s13 = sphi %s3571_s13, %s4440_s13   ;;  %s3531_s12 = sphi %s3569_s12, %s4439_s12  }
   0x4   : > { %p23_p0 = scmp.ge.s32.totalorder %s22_s17, 2  ;;  %p66_p2 = scmp.eq.s32.totalorder %s3547_s16, 0 }
   0x5   : > { %s58_s19 = sadd.s32 1, %s3535_s13  ;;  %p2789_p5 = scmp.ge.s32.totalorder %s3547_s16, 2 }
   0x6   : > { %s4444_s17 = smov (%p23_p0, %s22_s17), 0  ;;  %p67_p3 = por %p66_p2, %p65_p1 }
   0x7   : > { %s55_s18 = ssub.s32 %s3543_s15, %s4444_s17  ;;  %153 = sbr.rel (%p2789_p5) target bundleno = 146 (0x92), region = 20 }
   0x8   : > { %p56_p4 = scmp.eq.s32.totalorder %s55_s18, 0 }
   0xa   : > { %s3604_s20 = scalar_select %p56_p4, %s3535_s13, %s58_s19  }
   0xe   : > { %156 = sbr.rel (!%p67_p3) target bundleno = 146 (0x92), region = 24  ;;  %s158_s21 = sand.u32 (%p67_p3), 1, %s3535_s13  }
   0xf   : > { %s3056_s22 = sshll.u32 (%p67_p3), %s3543_s15, 4  ;;  %s2790_s23 = sshll.u32 (%p67_p3), %s158_s21, 11 }
  0x10   : > { %s3612_s26 = scalar_lea.vmem (%p67_p3), %s4436_s1, %s3056_s22  ;;  %s3617_s27 = scalar_lea.vmem (%p67_p3), [#allocation2], %s2790_s23 }
  0x11   : > { %v176_v0 = vld [vmem:[%s3612_s26] sm:$0xff] (%p67_p3)  ;;  %v178_v1 = vld [vmem:[%s3612_s26 + $0x8] sm:$0xff] (%p67_p3) }
  0x12   : > { %v180_v2 = vld [vmem:[%s3612_s26 + $0x20] sm:$0xff] (%p67_p3)  ;;  %177 = vst [vmem:[%s3617_s27] sm:$0xff] (%p67_p3), %v176_v0  ;;  %179 = vst [vmem:[%s3617_s27 + $0x8] sm:$0xff] (%p67_p3), %v178_v1  ;;  %v182_v3 = vld [vmem:[%s3612_s26 + $0x28] sm:$0xff] (%p67_p3) }
  0x13   : > { %181 = vst [vmem:[%s3617_s27 + $0x10] sm:$0xff] (%p67_p3), %v180_v2  ;;  %v184_v4 = vld [vmem:[%s3612_s26 + $0x40] sm:$0xff] (%p67_p3)  ;;  %v186_v5 = vld [vmem:[%s3612_s26 + $0x48] sm:$0xff] (%p67_p3)  ;;  %183 = vst [vmem:[%s3617_s27 + $0x18] sm:$0xff] (%p67_p3), %v182_v3 }
  0x14   : > { %185 = vst [vmem:[%s3617_s27 + $0x20] sm:$0xff] (%p67_p3), %v184_v4  ;;  %187 = vst [vmem:[%s3617_s27 + $0x28] sm:$0xff] (%p67_p3), %v186_v5  ;;  %v188_v6 = vld [vmem:[%s3612_s26 + $0x60] sm:$0xff] (%p67_p3)  ;;  %v190_v7 = vld [vmem:[%s3612_s26 + $0x68] sm:$0xff] (%p67_p3) }
  0x15   : > { %v192_v8 = vld [vmem:[%s3612_s26 + $0x80] sm:$0xff]  ;;  %189 = vst [vmem:[%s3617_s27 + $0x30] sm:$0xff] %v188_v6  ;;  %191 = vst [vmem:[%s3617_s27 + $0x38] sm:$0xff] %v190_v7  ;;  %v194_v9 = vld [vmem:[%s3612_s26 + $0x88] sm:$0xff] }
  0x16   : > { %193 = vst [vmem:[%s3617_s27 + $0x40] sm:$0xff] %v192_v8  ;;  %v196_v10 = vld [vmem:[%s3612_s26 + $0xa0] sm:$0xff]  ;;  %v198_v11 = vld [vmem:[%s3612_s26 + $0xa8] sm:$0xff]  ;;  %195 = vst [vmem:[%s3617_s27 + $0x48] sm:$0xff] %v194_v9 }
  0x17   : > { %197 = vst [vmem:[%s3617_s27 + $0x50] sm:$0xff] %v196_v10  ;;  %199 = vst [vmem:[%s3617_s27 + $0x58] sm:$0xff] %v198_v11  ;;  %v200_v12 = vld [vmem:[%s3612_s26 + $0xc0] sm:$0xff]  ;;  %v202_v13 = vld [vmem:[%s3612_s26 + $0xc8] sm:$0xff] }
  0x18   : > { %v204_v14 = vld [vmem:[%s3612_s26 + $0xe0] sm:$0xff]  ;;  %201 = vst [vmem:[%s3617_s27 + $0x60] sm:$0xff] %v200_v12  ;;  %203 = vst [vmem:[%s3617_s27 + $0x68] sm:$0xff] %v202_v13  ;;  %v206_v15 = vld [vmem:[%s3612_s26 + $0xe8] sm:$0xff] }
  0x19   : > { %205 = vst [vmem:[%s3617_s27 + $0x70] sm:$0xff] %v204_v14  ;;  %v208_v16 = vld [vmem:[%s3612_s26 + $0x100] sm:$0xff]  ;;  %v210_v17 = vld [vmem:[%s3612_s26 + $0x108] sm:$0xff]  ;;  %207 = vst [vmem:[%s3617_s27 + $0x78] sm:$0xff] %v206_v15 }
  0x1a   : > { %209 = vst [vmem:[%s3617_s27 + $0x80] sm:$0xff] %v208_v16  ;;  %211 = vst [vmem:[%s3617_s27 + $0x88] sm:$0xff] %v210_v17  ;;  %v212_v18 = vld [vmem:[%s3612_s26 + $0x120] sm:$0xff]  ;;  %v214_v19 = vld [vmem:[%s3612_s26 + $0x128] sm:$0xff] }
  0x1b   : > { %v216_v20 = vld [vmem:[%s3612_s26 + $0x140] sm:$0xff]  ;;  %213 = vst [vmem:[%s3617_s27 + $0x90] sm:$0xff] %v212_v18  ;;  %215 = vst [vmem:[%s3617_s27 + $0x98] sm:$0xff] %v214_v19  ;;  %v218_v21 = vld [vmem:[%s3612_s26 + $0x148] sm:$0xff] }
  0x1c   : > { %217 = vst [vmem:[%s3617_s27 + $0xa0] sm:$0xff] %v216_v20  ;;  %v220_v22 = vld [vmem:[%s3612_s26 + $0x160] sm:$0xff]  ;;  %v222_v23 = vld [vmem:[%s3612_s26 + $0x168] sm:$0xff]  ;;  %219 = vst [vmem:[%s3617_s27 + $0xa8] sm:$0xff] %v218_v21 }
  0x1d   : > { %221 = vst [vmem:[%s3617_s27 + $0xb0] sm:$0xff] %v220_v22  ;;  %223 = vst [vmem:[%s3617_s27 + $0xb8] sm:$0xff] %v222_v23  ;;  %v224_v24 = vld [vmem:[%s3612_s26 + $0x180] sm:$0xff]  ;;  %v226_v25 = vld [vmem:[%s3612_s26 + $0x188] sm:$0xff] }
  0x1e   : > { %v228_v26 = vld [vmem:[%s3612_s26 + $0x1a0] sm:$0xff]  ;;  %225 = vst [vmem:[%s3617_s27 + $0xc0] sm:$0xff] %v224_v24  ;;  %227 = vst [vmem:[%s3617_s27 + $0xc8] sm:$0xff] %v226_v25  ;;  %v230_v27 = vld [vmem:[%s3612_s26 + $0x1a8] sm:$0xff] }
  0x1f   : > { %229 = vst [vmem:[%s3617_s27 + $0xd0] sm:$0xff] %v228_v26  ;;  %v232_v28 = vld [vmem:[%s3612_s26 + $0x1c0] sm:$0xff]  ;;  %v234_v29 = vld [vmem:[%s3612_s26 + $0x1c8] sm:$0xff]  ;;  %231 = vst [vmem:[%s3617_s27 + $0xd8] sm:$0xff] %v230_v27 }
  0x20   : > { %233 = vst [vmem:[%s3617_s27 + $0xe0] sm:$0xff] %v232_v28  ;;  %235 = vst [vmem:[%s3617_s27 + $0xe8] sm:$0xff] %v234_v29  ;;  %v236_v30 = vld [vmem:[%s3612_s26 + $0x1e0] sm:$0xff]  ;;  %v238_v31 = vld [vmem:[%s3612_s26 + $0x1e8] sm:$0xff] }
  0x21   : > { %v240_v32 = vld [vmem:[%s3612_s26 + $0x200] sm:$0xff]  ;;  %237 = vst [vmem:[%s3617_s27 + $0xf0] sm:$0xff] %v236_v30  ;;  %239 = vst [vmem:[%s3617_s27 + $0xf8] sm:$0xff] %v238_v31  ;;  %v242_v33 = vld [vmem:[%s3612_s26 + $0x208] sm:$0xff] }
  0x22   : > { %241 = vst [vmem:[%s3617_s27 + $0x100] sm:$0xff] %v240_v32  ;;  %v244_v34 = vld [vmem:[%s3612_s26 + $0x220] sm:$0xff]  ;;  %v246_v35 = vld [vmem:[%s3612_s26 + $0x228] sm:$0xff]  ;;  %243 = vst [vmem:[%s3617_s27 + $0x108] sm:$0xff] %v242_v33 }
  0x23   : > { %245 = vst [vmem:[%s3617_s27 + $0x110] sm:$0xff] %v244_v34  ;;  %247 = vst [vmem:[%s3617_s27 + $0x118] sm:$0xff] %v246_v35  ;;  %v248_v36 = vld [vmem:[%s3612_s26 + $0x240] sm:$0xff]  ;;  %v250_v37 = vld [vmem:[%s3612_s26 + $0x248] sm:$0xff] }
  0x24   : > { %v252_v38 = vld [vmem:[%s3612_s26 + $0x260] sm:$0xff]  ;;  %249 = vst [vmem:[%s3617_s27 + $0x120] sm:$0xff] %v248_v36  ;;  %251 = vst [vmem:[%s3617_s27 + $0x128] sm:$0xff] %v250_v37  ;;  %v254_v39 = vld [vmem:[%s3612_s26 + $0x268] sm:$0xff] }
  0x25   : > { %253 = vst [vmem:[%s3617_s27 + $0x130] sm:$0xff] %v252_v38  ;;  %v256_v40 = vld [vmem:[%s3612_s26 + $0x280] sm:$0xff]  ;;  %v258_v41 = vld [vmem:[%s3612_s26 + $0x288] sm:$0xff]  ;;  %255 = vst [vmem:[%s3617_s27 + $0x138] sm:$0xff] %v254_v39 }
  0x26   : > { %257 = vst [vmem:[%s3617_s27 + $0x140] sm:$0xff] %v256_v40  ;;  %259 = vst [vmem:[%s3617_s27 + $0x148] sm:$0xff] %v258_v41  ;;  %v260_v42 = vld [vmem:[%s3612_s26 + $0x2a0] sm:$0xff]  ;;  %v262_v43 = vld [vmem:[%s3612_s26 + $0x2a8] sm:$0xff] }
  0x27   : > { %v264_v44 = vld [vmem:[%s3612_s26 + $0x2c0] sm:$0xff]  ;;  %261 = vst [vmem:[%s3617_s27 + $0x150] sm:$0xff] %v260_v42  ;;  %263 = vst [vmem:[%s3617_s27 + $0x158] sm:$0xff] %v262_v43  ;;  %v266_v45 = vld [vmem:[%s3612_s26 + $0x2c8] sm:$0xff] }
  0x28   : > { %265 = vst [vmem:[%s3617_s27 + $0x160] sm:$0xff] %v264_v44  ;;  %v268_v46 = vld [vmem:[%s3612_s26 + $0x2e0] sm:$0xff]  ;;  %v270_v47 = vld [vmem:[%s3612_s26 + $0x2e8] sm:$0xff]  ;;  %267 = vst [vmem:[%s3617_s27 + $0x168] sm:$0xff] %v266_v45 }
  0x29   : > { %269 = vst [vmem:[%s3617_s27 + $0x170] sm:$0xff] %v268_v46  ;;  %271 = vst [vmem:[%s3617_s27 + $0x178] sm:$0xff] %v270_v47  ;;  %v272_v48 = vld [vmem:[%s3612_s26 + $0x300] sm:$0xff]  ;;  %v274_v49 = vld [vmem:[%s3612_s26 + $0x308] sm:$0xff] }
  0x2a   : > { %v276_v50 = vld [vmem:[%s3612_s26 + $0x320] sm:$0xff]  ;;  %273 = vst [vmem:[%s3617_s27 + $0x180] sm:$0xff] %v272_v48  ;;  %275 = vst [vmem:[%s3617_s27 + $0x188] sm:$0xff] %v274_v49  ;;  %v278_v51 = vld [vmem:[%s3612_s26 + $0x328] sm:$0xff] }
  0x2b   : > { %277 = vst [vmem:[%s3617_s27 + $0x190] sm:$0xff] %v276_v50  ;;  %v280_v52 = vld [vmem:[%s3612_s26 + $0x340] sm:$0xff]  ;;  %v282_v53 = vld [vmem:[%s3612_s26 + $0x348] sm:$0xff]  ;;  %279 = vst [vmem:[%s3617_s27 + $0x198] sm:$0xff] %v278_v51 }
  0x2c   : > { %281 = vst [vmem:[%s3617_s27 + $0x1a0] sm:$0xff] %v280_v52  ;;  %283 = vst [vmem:[%s3617_s27 + $0x1a8] sm:$0xff] %v282_v53  ;;  %v284_v54 = vld [vmem:[%s3612_s26 + $0x360] sm:$0xff]  ;;  %v286_v55 = vld [vmem:[%s3612_s26 + $0x368] sm:$0xff] }
  0x2d   : > { %v288_v56 = vld [vmem:[%s3612_s26 + $0x380] sm:$0xff]  ;;  %285 = vst [vmem:[%s3617_s27 + $0x1b0] sm:$0xff] %v284_v54  ;;  %287 = vst [vmem:[%s3617_s27 + $0x1b8] sm:$0xff] %v286_v55  ;;  %v290_v57 = vld [vmem:[%s3612_s26 + $0x388] sm:$0xff] }
  0x2e   : > { %289 = vst [vmem:[%s3617_s27 + $0x1c0] sm:$0xff] %v288_v56  ;;  %v292_v58 = vld [vmem:[%s3612_s26 + $0x3a0] sm:$0xff]  ;;  %v294_v59 = vld [vmem:[%s3612_s26 + $0x3a8] sm:$0xff]  ;;  %291 = vst [vmem:[%s3617_s27 + $0x1c8] sm:$0xff] %v290_v57 }
  0x2f   : > { %293 = vst [vmem:[%s3617_s27 + $0x1d0] sm:$0xff] %v292_v58  ;;  %295 = vst [vmem:[%s3617_s27 + $0x1d8] sm:$0xff] %v294_v59  ;;  %v296_v60 = vld [vmem:[%s3612_s26 + $0x3c0] sm:$0xff]  ;;  %v298_v61 = vld [vmem:[%s3612_s26 + $0x3c8] sm:$0xff] }
  0x30   : > { %v300_v62 = vld [vmem:[%s3612_s26 + $0x3e0] sm:$0xff]  ;;  %297 = vst [vmem:[%s3617_s27 + $0x1e0] sm:$0xff] %v296_v60  ;;  %299 = vst [vmem:[%s3617_s27 + $0x1e8] sm:$0xff] %v298_v61  ;;  %v302_v63 = vld [vmem:[%s3612_s26 + $0x3e8] sm:$0xff] }
  0x31   : > { %301 = vst [vmem:[%s3617_s27 + $0x1f0] sm:$0xff] %v300_v62  ;;  %v304_v0 = vld [vmem:[%s3612_s26 + $0x400] sm:$0xff]  ;;  %v306_v1 = vld [vmem:[%s3612_s26 + $0x408] sm:$0xff]  ;;  %303 = vst [vmem:[%s3617_s27 + $0x1f8] sm:$0xff] %v302_v63 }
  0x32   : > { %305 = vst [vmem:[%s3617_s27 + $0x200] sm:$0xff] %v304_v0  ;;  %307 = vst [vmem:[%s3617_s27 + $0x208] sm:$0xff] %v306_v1  ;;  %v308_v2 = vld [vmem:[%s3612_s26 + $0x420] sm:$0xff]  ;;  %v310_v3 = vld [vmem:[%s3612_s26 + $0x428] sm:$0xff] }
  0x33   : > { %v312_v4 = vld [vmem:[%s3612_s26 + $0x440] sm:$0xff]  ;;  %309 = vst [vmem:[%s3617_s27 + $0x210] sm:$0xff] %v308_v2  ;;  %311 = vst [vmem:[%s3617_s27 + $0x218] sm:$0xff] %v310_v3  ;;  %v314_v5 = vld [vmem:[%s3612_s26 + $0x448] sm:$0xff] }
  0x34   : > { %313 = vst [vmem:[%s3617_s27 + $0x220] sm:$0xff] %v312_v4  ;;  %v316_v6 = vld [vmem:[%s3612_s26 + $0x460] sm:$0xff]  ;;  %v318_v7 = vld [vmem:[%s3612_s26 + $0x468] sm:$0xff]  ;;  %315 = vst [vmem:[%s3617_s27 + $0x228] sm:$0xff] %v314_v5 }
  0x35   : > { %317 = vst [vmem:[%s3617_s27 + $0x230] sm:$0xff] %v316_v6  ;;  %319 = vst [vmem:[%s3617_s27 + $0x238] sm:$0xff] %v318_v7  ;;  %v320_v8 = vld [vmem:[%s3612_s26 + $0x480] sm:$0xff]  ;;  %v322_v9 = vld [vmem:[%s3612_s26 + $0x488] sm:$0xff] }
  0x36   : > { %v324_v10 = vld [vmem:[%s3612_s26 + $0x4a0] sm:$0xff]  ;;  %321 = vst [vmem:[%s3617_s27 + $0x240] sm:$0xff] %v320_v8  ;;  %323 = vst [vmem:[%s3617_s27 + $0x248] sm:$0xff] %v322_v9  ;;  %v326_v11 = vld [vmem:[%s3612_s26 + $0x4a8] sm:$0xff] }
  0x37   : > { %325 = vst [vmem:[%s3617_s27 + $0x250] sm:$0xff] %v324_v10  ;;  %v328_v12 = vld [vmem:[%s3612_s26 + $0x4c0] sm:$0xff]  ;;  %v330_v13 = vld [vmem:[%s3612_s26 + $0x4c8] sm:$0xff]  ;;  %327 = vst [vmem:[%s3617_s27 + $0x258] sm:$0xff] %v326_v11 }
  0x38   : > { %329 = vst [vmem:[%s3617_s27 + $0x260] sm:$0xff] %v328_v12  ;;  %331 = vst [vmem:[%s3617_s27 + $0x268] sm:$0xff] %v330_v13  ;;  %v332_v14 = vld [vmem:[%s3612_s26 + $0x4e0] sm:$0xff]  ;;  %v334_v15 = vld [vmem:[%s3612_s26 + $0x4e8] sm:$0xff] }
  0x39   : > { %v336_v16 = vld [vmem:[%s3612_s26 + $0x500] sm:$0xff]  ;;  %333 = vst [vmem:[%s3617_s27 + $0x270] sm:$0xff] %v332_v14  ;;  %335 = vst [vmem:[%s3617_s27 + $0x278] sm:$0xff] %v334_v15  ;;  %v338_v17 = vld [vmem:[%s3612_s26 + $0x508] sm:$0xff] }
  0x3a   : > { %337 = vst [vmem:[%s3617_s27 + $0x280] sm:$0xff] %v336_v16  ;;  %v340_v18 = vld [vmem:[%s3612_s26 + $0x520] sm:$0xff]  ;;  %v342_v19 = vld [vmem:[%s3612_s26 + $0x528] sm:$0xff]  ;;  %339 = vst [vmem:[%s3617_s27 + $0x288] sm:$0xff] %v338_v17 }
  0x3b   : > { %341 = vst [vmem:[%s3617_s27 + $0x290] sm:$0xff] %v340_v18  ;;  %343 = vst [vmem:[%s3617_s27 + $0x298] sm:$0xff] %v342_v19  ;;  %v344_v20 = vld [vmem:[%s3612_s26 + $0x540] sm:$0xff]  ;;  %v346_v21 = vld [vmem:[%s3612_s26 + $0x548] sm:$0xff] }
  0x3c   : > { %v348_v22 = vld [vmem:[%s3612_s26 + $0x560] sm:$0xff]  ;;  %345 = vst [vmem:[%s3617_s27 + $0x2a0] sm:$0xff] %v344_v20  ;;  %347 = vst [vmem:[%s3617_s27 + $0x2a8] sm:$0xff] %v346_v21  ;;  %v350_v23 = vld [vmem:[%s3612_s26 + $0x568] sm:$0xff] }
  0x3d   : > { %349 = vst [vmem:[%s3617_s27 + $0x2b0] sm:$0xff] %v348_v22  ;;  %v352_v24 = vld [vmem:[%s3612_s26 + $0x580] sm:$0xff]  ;;  %v354_v25 = vld [vmem:[%s3612_s26 + $0x588] sm:$0xff]  ;;  %351 = vst [vmem:[%s3617_s27 + $0x2b8] sm:$0xff] %v350_v23 }
  0x3e   : > { %353 = vst [vmem:[%s3617_s27 + $0x2c0] sm:$0xff] %v352_v24  ;;  %355 = vst [vmem:[%s3617_s27 + $0x2c8] sm:$0xff] %v354_v25  ;;  %v356_v26 = vld [vmem:[%s3612_s26 + $0x5a0] sm:$0xff]  ;;  %v358_v27 = vld [vmem:[%s3612_s26 + $0x5a8] sm:$0xff] }
  0x3f   : > { %v360_v28 = vld [vmem:[%s3612_s26 + $0x5c0] sm:$0xff]  ;;  %357 = vst [vmem:[%s3617_s27 + $0x2d0] sm:$0xff] %v356_v26  ;;  %359 = vst [vmem:[%s3617_s27 + $0x2d8] sm:$0xff] %v358_v27  ;;  %v362_v29 = vld [vmem:[%s3612_s26 + $0x5c8] sm:$0xff] }
  0x40   : > { %361 = vst [vmem:[%s3617_s27 + $0x2e0] sm:$0xff] %v360_v28  ;;  %v364_v30 = vld [vmem:[%s3612_s26 + $0x5e0] sm:$0xff]  ;;  %v366_v31 = vld [vmem:[%s3612_s26 + $0x5e8] sm:$0xff]  ;;  %363 = vst [vmem:[%s3617_s27 + $0x2e8] sm:$0xff] %v362_v29 }
  0x41   : > { %365 = vst [vmem:[%s3617_s27 + $0x2f0] sm:$0xff] %v364_v30  ;;  %367 = vst [vmem:[%s3617_s27 + $0x2f8] sm:$0xff] %v366_v31  ;;  %v368_v32 = vld [vmem:[%s3612_s26 + $0x600] sm:$0xff]  ;;  %v370_v33 = vld [vmem:[%s3612_s26 + $0x608] sm:$0xff] }
  0x42   : > { %v372_v34 = vld [vmem:[%s3612_s26 + $0x620] sm:$0xff]  ;;  %369 = vst [vmem:[%s3617_s27 + $0x300] sm:$0xff] %v368_v32  ;;  %371 = vst [vmem:[%s3617_s27 + $0x308] sm:$0xff] %v370_v33  ;;  %v374_v35 = vld [vmem:[%s3612_s26 + $0x628] sm:$0xff] }
  0x43   : > { %373 = vst [vmem:[%s3617_s27 + $0x310] sm:$0xff] %v372_v34  ;;  %v376_v36 = vld [vmem:[%s3612_s26 + $0x640] sm:$0xff]  ;;  %v378_v37 = vld [vmem:[%s3612_s26 + $0x648] sm:$0xff]  ;;  %375 = vst [vmem:[%s3617_s27 + $0x318] sm:$0xff] %v374_v35 }
  0x44   : > { %377 = vst [vmem:[%s3617_s27 + $0x320] sm:$0xff] %v376_v36  ;;  %379 = vst [vmem:[%s3617_s27 + $0x328] sm:$0xff] %v378_v37  ;;  %v380_v38 = vld [vmem:[%s3612_s26 + $0x660] sm:$0xff]  ;;  %v382_v39 = vld [vmem:[%s3612_s26 + $0x668] sm:$0xff] }
  0x45   : > { %v384_v40 = vld [vmem:[%s3612_s26 + $0x680] sm:$0xff]  ;;  %381 = vst [vmem:[%s3617_s27 + $0x330] sm:$0xff] %v380_v38  ;;  %383 = vst [vmem:[%s3617_s27 + $0x338] sm:$0xff] %v382_v39  ;;  %v386_v41 = vld [vmem:[%s3612_s26 + $0x688] sm:$0xff] }
  0x46   : > { %385 = vst [vmem:[%s3617_s27 + $0x340] sm:$0xff] %v384_v40  ;;  %v388_v42 = vld [vmem:[%s3612_s26 + $0x6a0] sm:$0xff]  ;;  %v390_v43 = vld [vmem:[%s3612_s26 + $0x6a8] sm:$0xff]  ;;  %387 = vst [vmem:[%s3617_s27 + $0x348] sm:$0xff] %v386_v41 }
  0x47   : > { %389 = vst [vmem:[%s3617_s27 + $0x350] sm:$0xff] %v388_v42  ;;  %391 = vst [vmem:[%s3617_s27 + $0x358] sm:$0xff] %v390_v43  ;;  %v392_v44 = vld [vmem:[%s3612_s26 + $0x6c0] sm:$0xff]  ;;  %v394_v45 = vld [vmem:[%s3612_s26 + $0x6c8] sm:$0xff] }
  0x48   : > { %v396_v46 = vld [vmem:[%s3612_s26 + $0x6e0] sm:$0xff]  ;;  %393 = vst [vmem:[%s3617_s27 + $0x360] sm:$0xff] %v392_v44  ;;  %395 = vst [vmem:[%s3617_s27 + $0x368] sm:$0xff] %v394_v45  ;;  %v398_v47 = vld [vmem:[%s3612_s26 + $0x6e8] sm:$0xff] }
  0x49   : > { %397 = vst [vmem:[%s3617_s27 + $0x370] sm:$0xff] %v396_v46  ;;  %v400_v48 = vld [vmem:[%s3612_s26 + $0x700] sm:$0xff]  ;;  %v402_v49 = vld [vmem:[%s3612_s26 + $0x708] sm:$0xff]  ;;  %399 = vst [vmem:[%s3617_s27 + $0x378] sm:$0xff] %v398_v47 }
  0x4a   : > { %401 = vst [vmem:[%s3617_s27 + $0x380] sm:$0xff] %v400_v48  ;;  %403 = vst [vmem:[%s3617_s27 + $0x388] sm:$0xff] %v402_v49  ;;  %v404_v50 = vld [vmem:[%s3612_s26 + $0x720] sm:$0xff]  ;;  %v406_v51 = vld [vmem:[%s3612_s26 + $0x728] sm:$0xff] }
  0x4b   : > { %v408_v52 = vld [vmem:[%s3612_s26 + $0x740] sm:$0xff]  ;;  %405 = vst [vmem:[%s3617_s27 + $0x390] sm:$0xff] %v404_v50  ;;  %407 = vst [vmem:[%s3617_s27 + $0x398] sm:$0xff] %v406_v51  ;;  %v410_v53 = vld [vmem:[%s3612_s26 + $0x748] sm:$0xff] }
  0x4c   : > { %409 = vst [vmem:[%s3617_s27 + $0x3a0] sm:$0xff] %v408_v52  ;;  %v412_v54 = vld [vmem:[%s3612_s26 + $0x760] sm:$0xff]  ;;  %v414_v55 = vld [vmem:[%s3612_s26 + $0x768] sm:$0xff]  ;;  %411 = vst [vmem:[%s3617_s27 + $0x3a8] sm:$0xff] %v410_v53 }
  0x4d   : > { %413 = vst [vmem:[%s3617_s27 + $0x3b0] sm:$0xff] %v412_v54  ;;  %415 = vst [vmem:[%s3617_s27 + $0x3b8] sm:$0xff] %v414_v55  ;;  %v416_v56 = vld [vmem:[%s3612_s26 + $0x780] sm:$0xff]  ;;  %v418_v57 = vld [vmem:[%s3612_s26 + $0x788] sm:$0xff] }
  0x4e   : > { %v420_v58 = vld [vmem:[%s3612_s26 + $0x7a0] sm:$0xff]  ;;  %417 = vst [vmem:[%s3617_s27 + $0x3c0] sm:$0xff] %v416_v56  ;;  %419 = vst [vmem:[%s3617_s27 + $0x3c8] sm:$0xff] %v418_v57  ;;  %v422_v59 = vld [vmem:[%s3612_s26 + $0x7a8] sm:$0xff] }
  0x4f   : > { %421 = vst [vmem:[%s3617_s27 + $0x3d0] sm:$0xff] %v420_v58  ;;  %v424_v60 = vld [vmem:[%s3612_s26 + $0x7c0] sm:$0xff]  ;;  %v426_v61 = vld [vmem:[%s3612_s26 + $0x7c8] sm:$0xff]  ;;  %423 = vst [vmem:[%s3617_s27 + $0x3d8] sm:$0xff] %v422_v59 }
  0x50   : > { %425 = vst [vmem:[%s3617_s27 + $0x3e0] sm:$0xff] %v424_v60  ;;  %427 = vst [vmem:[%s3617_s27 + $0x3e8] sm:$0xff] %v426_v61  ;;  %v428_v62 = vld [vmem:[%s3612_s26 + $0x7e0] sm:$0xff]  ;;  %v430_v63 = vld [vmem:[%s3612_s26 + $0x7e8] sm:$0xff] }
  0x51   : > { %v432_v0 = vld [vmem:[%s3612_s26 + $0x800] sm:$0xff]  ;;  %429 = vst [vmem:[%s3617_s27 + $0x3f0] sm:$0xff] %v428_v62  ;;  %431 = vst [vmem:[%s3617_s27 + $0x3f8] sm:$0xff] %v430_v63  ;;  %v434_v1 = vld [vmem:[%s3612_s26 + $0x808] sm:$0xff] }
  0x52   : > { %433 = vst [vmem:[%s3617_s27 + $0x400] sm:$0xff] %v432_v0  ;;  %v436_v2 = vld [vmem:[%s3612_s26 + $0x820] sm:$0xff]  ;;  %v438_v3 = vld [vmem:[%s3612_s26 + $0x828] sm:$0xff]  ;;  %435 = vst [vmem:[%s3617_s27 + $0x408] sm:$0xff] %v434_v1 }
  0x53   : > { %437 = vst [vmem:[%s3617_s27 + $0x410] sm:$0xff] %v436_v2  ;;  %439 = vst [vmem:[%s3617_s27 + $0x418] sm:$0xff] %v438_v3  ;;  %v440_v4 = vld [vmem:[%s3612_s26 + $0x840] sm:$0xff]  ;;  %v442_v5 = vld [vmem:[%s3612_s26 + $0x848] sm:$0xff] }
  0x54   : > { %v444_v6 = vld [vmem:[%s3612_s26 + $0x860] sm:$0xff]  ;;  %441 = vst [vmem:[%s3617_s27 + $0x420] sm:$0xff] %v440_v4  ;;  %443 = vst [vmem:[%s3617_s27 + $0x428] sm:$0xff] %v442_v5  ;;  %v446_v7 = vld [vmem:[%s3612_s26 + $0x868] sm:$0xff] }
  0x55   : > { %445 = vst [vmem:[%s3617_s27 + $0x430] sm:$0xff] %v444_v6  ;;  %v448_v8 = vld [vmem:[%s3612_s26 + $0x880] sm:$0xff]  ;;  %v450_v9 = vld [vmem:[%s3612_s26 + $0x888] sm:$0xff]  ;;  %447 = vst [vmem:[%s3617_s27 + $0x438] sm:$0xff] %v446_v7 }
  0x56   : > { %449 = vst [vmem:[%s3617_s27 + $0x440] sm:$0xff] %v448_v8  ;;  %451 = vst [vmem:[%s3617_s27 + $0x448] sm:$0xff] %v450_v9  ;;  %v452_v10 = vld [vmem:[%s3612_s26 + $0x8a0] sm:$0xff]  ;;  %v454_v11 = vld [vmem:[%s3612_s26 + $0x8a8] sm:$0xff] }
  0x57   : > { %v456_v12 = vld [vmem:[%s3612_s26 + $0x8c0] sm:$0xff]  ;;  %453 = vst [vmem:[%s3617_s27 + $0x450] sm:$0xff] %v452_v10  ;;  %455 = vst [vmem:[%s3617_s27 + $0x458] sm:$0xff] %v454_v11  ;;  %v458_v13 = vld [vmem:[%s3612_s26 + $0x8c8] sm:$0xff] }
  0x58   : > { %457 = vst [vmem:[%s3617_s27 + $0x460] sm:$0xff] %v456_v12  ;;  %v460_v14 = vld [vmem:[%s3612_s26 + $0x8e0] sm:$0xff]  ;;  %v462_v15 = vld [vmem:[%s3612_s26 + $0x8e8] sm:$0xff]  ;;  %459 = vst [vmem:[%s3617_s27 + $0x468] sm:$0xff] %v458_v13 }
  0x59   : > { %461 = vst [vmem:[%s3617_s27 + $0x470] sm:$0xff] %v460_v14  ;;  %463 = vst [vmem:[%s3617_s27 + $0x478] sm:$0xff] %v462_v15  ;;  %v464_v16 = vld [vmem:[%s3612_s26 + $0x900] sm:$0xff]  ;;  %v466_v17 = vld [vmem:[%s3612_s26 + $0x908] sm:$0xff] }
  0x5a   : > { %v468_v18 = vld [vmem:[%s3612_s26 + $0x920] sm:$0xff]  ;;  %465 = vst [vmem:[%s3617_s27 + $0x480] sm:$0xff] %v464_v16  ;;  %467 = vst [vmem:[%s3617_s27 + $0x488] sm:$0xff] %v466_v17  ;;  %v470_v19 = vld [vmem:[%s3612_s26 + $0x928] sm:$0xff] }
  0x5b   : > { %469 = vst [vmem:[%s3617_s27 + $0x490] sm:$0xff] %v468_v18  ;;  %v472_v20 = vld [vmem:[%s3612_s26 + $0x940] sm:$0xff]  ;;  %v474_v21 = vld [vmem:[%s3612_s26 + $0x948] sm:$0xff]  ;;  %471 = vst [vmem:[%s3617_s27 + $0x498] sm:$0xff] %v470_v19 }
  0x5c   : > { %473 = vst [vmem:[%s3617_s27 + $0x4a0] sm:$0xff] %v472_v20  ;;  %475 = vst [vmem:[%s3617_s27 + $0x4a8] sm:$0xff] %v474_v21  ;;  %v476_v22 = vld [vmem:[%s3612_s26 + $0x960] sm:$0xff]  ;;  %v478_v23 = vld [vmem:[%s3612_s26 + $0x968] sm:$0xff] }
  0x5d   : > { %v480_v24 = vld [vmem:[%s3612_s26 + $0x980] sm:$0xff]  ;;  %477 = vst [vmem:[%s3617_s27 + $0x4b0] sm:$0xff] %v476_v22  ;;  %479 = vst [vmem:[%s3617_s27 + $0x4b8] sm:$0xff] %v478_v23  ;;  %v482_v25 = vld [vmem:[%s3612_s26 + $0x988] sm:$0xff] }
  0x5e   : > { %481 = vst [vmem:[%s3617_s27 + $0x4c0] sm:$0xff] %v480_v24  ;;  %v484_v26 = vld [vmem:[%s3612_s26 + $0x9a0] sm:$0xff]  ;;  %v486_v27 = vld [vmem:[%s3612_s26 + $0x9a8] sm:$0xff]  ;;  %483 = vst [vmem:[%s3617_s27 + $0x4c8] sm:$0xff] %v482_v25 }
  0x5f   : > { %485 = vst [vmem:[%s3617_s27 + $0x4d0] sm:$0xff] %v484_v26  ;;  %487 = vst [vmem:[%s3617_s27 + $0x4d8] sm:$0xff] %v486_v27  ;;  %v488_v28 = vld [vmem:[%s3612_s26 + $0x9c0] sm:$0xff]  ;;  %v490_v29 = vld [vmem:[%s3612_s26 + $0x9c8] sm:$0xff] }
  0x60   : > { %v492_v30 = vld [vmem:[%s3612_s26 + $0x9e0] sm:$0xff]  ;;  %489 = vst [vmem:[%s3617_s27 + $0x4e0] sm:$0xff] %v488_v28  ;;  %491 = vst [vmem:[%s3617_s27 + $0x4e8] sm:$0xff] %v490_v29  ;;  %v494_v31 = vld [vmem:[%s3612_s26 + $0x9e8] sm:$0xff] }
  0x61   : > { %493 = vst [vmem:[%s3617_s27 + $0x4f0] sm:$0xff] %v492_v30  ;;  %v496_v32 = vld [vmem:[%s3612_s26 + $0xa00] sm:$0xff]  ;;  %v498_v33 = vld [vmem:[%s3612_s26 + $0xa08] sm:$0xff]  ;;  %495 = vst [vmem:[%s3617_s27 + $0x4f8] sm:$0xff] %v494_v31 }
  0x62   : > { %497 = vst [vmem:[%s3617_s27 + $0x500] sm:$0xff] %v496_v32  ;;  %499 = vst [vmem:[%s3617_s27 + $0x508] sm:$0xff] %v498_v33  ;;  %v500_v34 = vld [vmem:[%s3612_s26 + $0xa20] sm:$0xff]  ;;  %v502_v35 = vld [vmem:[%s3612_s26 + $0xa28] sm:$0xff] }
  0x63   : > { %v504_v36 = vld [vmem:[%s3612_s26 + $0xa40] sm:$0xff]  ;;  %501 = vst [vmem:[%s3617_s27 + $0x510] sm:$0xff] %v500_v34  ;;  %503 = vst [vmem:[%s3617_s27 + $0x518] sm:$0xff] %v502_v35  ;;  %v506_v37 = vld [vmem:[%s3612_s26 + $0xa48] sm:$0xff] }
  0x64   : > { %505 = vst [vmem:[%s3617_s27 + $0x520] sm:$0xff] %v504_v36  ;;  %v508_v38 = vld [vmem:[%s3612_s26 + $0xa60] sm:$0xff]  ;;  %v510_v39 = vld [vmem:[%s3612_s26 + $0xa68] sm:$0xff]  ;;  %507 = vst [vmem:[%s3617_s27 + $0x528] sm:$0xff] %v506_v37 }
  0x65   : > { %509 = vst [vmem:[%s3617_s27 + $0x530] sm:$0xff] %v508_v38  ;;  %511 = vst [vmem:[%s3617_s27 + $0x538] sm:$0xff] %v510_v39  ;;  %v512_v40 = vld [vmem:[%s3612_s26 + $0xa80] sm:$0xff]  ;;  %v514_v41 = vld [vmem:[%s3612_s26 + $0xa88] sm:$0xff] }
  0x66   : > { %v516_v42 = vld [vmem:[%s3612_s26 + $0xaa0] sm:$0xff]  ;;  %513 = vst [vmem:[%s3617_s27 + $0x540] sm:$0xff] %v512_v40  ;;  %515 = vst [vmem:[%s3617_s27 + $0x548] sm:$0xff] %v514_v41  ;;  %v518_v43 = vld [vmem:[%s3612_s26 + $0xaa8] sm:$0xff] }
  0x67   : > { %517 = vst [vmem:[%s3617_s27 + $0x550] sm:$0xff] %v516_v42  ;;  %v520_v44 = vld [vmem:[%s3612_s26 + $0xac0] sm:$0xff]  ;;  %v522_v45 = vld [vmem:[%s3612_s26 + $0xac8] sm:$0xff]  ;;  %519 = vst [vmem:[%s3617_s27 + $0x558] sm:$0xff] %v518_v43 }
  0x68   : > { %521 = vst [vmem:[%s3617_s27 + $0x560] sm:$0xff] %v520_v44  ;;  %523 = vst [vmem:[%s3617_s27 + $0x568] sm:$0xff] %v522_v45  ;;  %v524_v46 = vld [vmem:[%s3612_s26 + $0xae0] sm:$0xff]  ;;  %v526_v47 = vld [vmem:[%s3612_s26 + $0xae8] sm:$0xff] }
  0x69   : > { %v528_v48 = vld [vmem:[%s3612_s26 + $0xb00] sm:$0xff]  ;;  %525 = vst [vmem:[%s3617_s27 + $0x570] sm:$0xff] %v524_v46  ;;  %527 = vst [vmem:[%s3617_s27 + $0x578] sm:$0xff] %v526_v47  ;;  %v530_v49 = vld [vmem:[%s3612_s26 + $0xb08] sm:$0xff] }
  0x6a   : > { %529 = vst [vmem:[%s3617_s27 + $0x580] sm:$0xff] %v528_v48  ;;  %v532_v50 = vld [vmem:[%s3612_s26 + $0xb20] sm:$0xff]  ;;  %v534_v51 = vld [vmem:[%s3612_s26 + $0xb28] sm:$0xff]  ;;  %531 = vst [vmem:[%s3617_s27 + $0x588] sm:$0xff] %v530_v49 }
  0x6b   : > { %533 = vst [vmem:[%s3617_s27 + $0x590] sm:$0xff] %v532_v50  ;;  %535 = vst [vmem:[%s3617_s27 + $0x598] sm:$0xff] %v534_v51  ;;  %v536_v52 = vld [vmem:[%s3612_s26 + $0xb40] sm:$0xff]  ;;  %v538_v53 = vld [vmem:[%s3612_s26 + $0xb48] sm:$0xff] }
  0x6c   : > { %v540_v54 = vld [vmem:[%s3612_s26 + $0xb60] sm:$0xff]  ;;  %537 = vst [vmem:[%s3617_s27 + $0x5a0] sm:$0xff] %v536_v52  ;;  %539 = vst [vmem:[%s3617_s27 + $0x5a8] sm:$0xff] %v538_v53  ;;  %v542_v55 = vld [vmem:[%s3612_s26 + $0xb68] sm:$0xff] }
  0x6d   : > { %541 = vst [vmem:[%s3617_s27 + $0x5b0] sm:$0xff] %v540_v54  ;;  %v544_v56 = vld [vmem:[%s3612_s26 + $0xb80] sm:$0xff]  ;;  %v546_v57 = vld [vmem:[%s3612_s26 + $0xb88] sm:$0xff]  ;;  %543 = vst [vmem:[%s3617_s27 + $0x5b8] sm:$0xff] %v542_v55 }
  0x6e   : > { %545 = vst [vmem:[%s3617_s27 + $0x5c0] sm:$0xff] %v544_v56  ;;  %547 = vst [vmem:[%s3617_s27 + $0x5c8] sm:$0xff] %v546_v57  ;;  %v548_v58 = vld [vmem:[%s3612_s26 + $0xba0] sm:$0xff]  ;;  %v550_v59 = vld [vmem:[%s3612_s26 + $0xba8] sm:$0xff] }
  0x6f   : > { %v552_v60 = vld [vmem:[%s3612_s26 + $0xbc0] sm:$0xff]  ;;  %549 = vst [vmem:[%s3617_s27 + $0x5d0] sm:$0xff] %v548_v58  ;;  %551 = vst [vmem:[%s3617_s27 + $0x5d8] sm:$0xff] %v550_v59  ;;  %v554_v61 = vld [vmem:[%s3612_s26 + $0xbc8] sm:$0xff] }
  0x70   : > { %553 = vst [vmem:[%s3617_s27 + $0x5e0] sm:$0xff] %v552_v60  ;;  %v556_v62 = vld [vmem:[%s3612_s26 + $0xbe0] sm:$0xff]  ;;  %v558_v63 = vld [vmem:[%s3612_s26 + $0xbe8] sm:$0xff]  ;;  %555 = vst [vmem:[%s3617_s27 + $0x5e8] sm:$0xff] %v554_v61 }
  0x71   : > { %557 = vst [vmem:[%s3617_s27 + $0x5f0] sm:$0xff] %v556_v62  ;;  %559 = vst [vmem:[%s3617_s27 + $0x5f8] sm:$0xff] %v558_v63  ;;  %v560_v0 = vld [vmem:[%s3612_s26 + $0xc00] sm:$0xff]  ;;  %v562_v1 = vld [vmem:[%s3612_s26 + $0xc08] sm:$0xff] }
  0x72   : > { %v564_v2 = vld [vmem:[%s3612_s26 + $0xc20] sm:$0xff]  ;;  %561 = vst [vmem:[%s3617_s27 + $0x600] sm:$0xff] %v560_v0  ;;  %563 = vst [vmem:[%s3617_s27 + $0x608] sm:$0xff] %v562_v1  ;;  %v566_v3 = vld [vmem:[%s3612_s26 + $0xc28] sm:$0xff] }
  0x73   : > { %565 = vst [vmem:[%s3617_s27 + $0x610] sm:$0xff] %v564_v2  ;;  %v568_v4 = vld [vmem:[%s3612_s26 + $0xc40] sm:$0xff]  ;;  %v570_v5 = vld [vmem:[%s3612_s26 + $0xc48] sm:$0xff]  ;;  %567 = vst [vmem:[%s3617_s27 + $0x618] sm:$0xff] %v566_v3 }
  0x74   : > { %569 = vst [vmem:[%s3617_s27 + $0x620] sm:$0xff] %v568_v4  ;;  %571 = vst [vmem:[%s3617_s27 + $0x628] sm:$0xff] %v570_v5  ;;  %v572_v6 = vld [vmem:[%s3612_s26 + $0xc60] sm:$0xff]  ;;  %v574_v7 = vld [vmem:[%s3612_s26 + $0xc68] sm:$0xff] }
  0x75   : > { %v576_v8 = vld [vmem:[%s3612_s26 + $0xc80] sm:$0xff]  ;;  %573 = vst [vmem:[%s3617_s27 + $0x630] sm:$0xff] %v572_v6  ;;  %575 = vst [vmem:[%s3617_s27 + $0x638] sm:$0xff] %v574_v7  ;;  %v578_v9 = vld [vmem:[%s3612_s26 + $0xc88] sm:$0xff] }
  0x76   : > { %577 = vst [vmem:[%s3617_s27 + $0x640] sm:$0xff] %v576_v8  ;;  %v580_v10 = vld [vmem:[%s3612_s26 + $0xca0] sm:$0xff]  ;;  %v582_v11 = vld [vmem:[%s3612_s26 + $0xca8] sm:$0xff]  ;;  %579 = vst [vmem:[%s3617_s27 + $0x648] sm:$0xff] %v578_v9 }
  0x77   : > { %581 = vst [vmem:[%s3617_s27 + $0x650] sm:$0xff] %v580_v10  ;;  %583 = vst [vmem:[%s3617_s27 + $0x658] sm:$0xff] %v582_v11  ;;  %v584_v12 = vld [vmem:[%s3612_s26 + $0xcc0] sm:$0xff]  ;;  %v586_v13 = vld [vmem:[%s3612_s26 + $0xcc8] sm:$0xff] }
  0x78   : > { %v588_v14 = vld [vmem:[%s3612_s26 + $0xce0] sm:$0xff]  ;;  %585 = vst [vmem:[%s3617_s27 + $0x660] sm:$0xff] %v584_v12  ;;  %587 = vst [vmem:[%s3617_s27 + $0x668] sm:$0xff] %v586_v13  ;;  %v590_v15 = vld [vmem:[%s3612_s26 + $0xce8] sm:$0xff] }
  0x79   : > { %589 = vst [vmem:[%s3617_s27 + $0x670] sm:$0xff] %v588_v14  ;;  %v592_v16 = vld [vmem:[%s3612_s26 + $0xd00] sm:$0xff]  ;;  %v594_v17 = vld [vmem:[%s3612_s26 + $0xd08] sm:$0xff]  ;;  %591 = vst [vmem:[%s3617_s27 + $0x678] sm:$0xff] %v590_v15 }
  0x7a   : > { %593 = vst [vmem:[%s3617_s27 + $0x680] sm:$0xff] %v592_v16  ;;  %595 = vst [vmem:[%s3617_s27 + $0x688] sm:$0xff] %v594_v17  ;;  %v596_v18 = vld [vmem:[%s3612_s26 + $0xd20] sm:$0xff]  ;;  %v598_v19 = vld [vmem:[%s3612_s26 + $0xd28] sm:$0xff] }
  0x7b   : > { %v600_v20 = vld [vmem:[%s3612_s26 + $0xd40] sm:$0xff]  ;;  %597 = vst [vmem:[%s3617_s27 + $0x690] sm:$0xff] %v596_v18  ;;  %599 = vst [vmem:[%s3617_s27 + $0x698] sm:$0xff] %v598_v19  ;;  %v602_v21 = vld [vmem:[%s3612_s26 + $0xd48] sm:$0xff] }
  0x7c   : > { %601 = vst [vmem:[%s3617_s27 + $0x6a0] sm:$0xff] %v600_v20  ;;  %v604_v22 = vld [vmem:[%s3612_s26 + $0xd60] sm:$0xff]  ;;  %v606_v23 = vld [vmem:[%s3612_s26 + $0xd68] sm:$0xff]  ;;  %603 = vst [vmem:[%s3617_s27 + $0x6a8] sm:$0xff] %v602_v21 }
  0x7d   : > { %605 = vst [vmem:[%s3617_s27 + $0x6b0] sm:$0xff] %v604_v22  ;;  %607 = vst [vmem:[%s3617_s27 + $0x6b8] sm:$0xff] %v606_v23  ;;  %v608_v24 = vld [vmem:[%s3612_s26 + $0xd80] sm:$0xff]  ;;  %v610_v25 = vld [vmem:[%s3612_s26 + $0xd88] sm:$0xff] }
  0x7e   : > { %v612_v26 = vld [vmem:[%s3612_s26 + $0xda0] sm:$0xff]  ;;  %609 = vst [vmem:[%s3617_s27 + $0x6c0] sm:$0xff] %v608_v24  ;;  %611 = vst [vmem:[%s3617_s27 + $0x6c8] sm:$0xff] %v610_v25  ;;  %v614_v27 = vld [vmem:[%s3612_s26 + $0xda8] sm:$0xff] }
  0x7f   : > { %613 = vst [vmem:[%s3617_s27 + $0x6d0] sm:$0xff] %v612_v26  ;;  %v616_v28 = vld [vmem:[%s3612_s26 + $0xdc0] sm:$0xff]  ;;  %v618_v29 = vld [vmem:[%s3612_s26 + $0xdc8] sm:$0xff]  ;;  %615 = vst [vmem:[%s3617_s27 + $0x6d8] sm:$0xff] %v614_v27 }
  0x80   : > { %617 = vst [vmem:[%s3617_s27 + $0x6e0] sm:$0xff] %v616_v28  ;;  %619 = vst [vmem:[%s3617_s27 + $0x6e8] sm:$0xff] %v618_v29  ;;  %v620_v30 = vld [vmem:[%s3612_s26 + $0xde0] sm:$0xff]  ;;  %v622_v31 = vld [vmem:[%s3612_s26 + $0xde8] sm:$0xff] }
  0x81   : > { %v624_v32 = vld [vmem:[%s3612_s26 + $0xe00] sm:$0xff]  ;;  %621 = vst [vmem:[%s3617_s27 + $0x6f0] sm:$0xff] %v620_v30  ;;  %623 = vst [vmem:[%s3617_s27 + $0x6f8] sm:$0xff] %v622_v31  ;;  %v626_v33 = vld [vmem:[%s3612_s26 + $0xe08] sm:$0xff] }
  0x82   : > { %625 = vst [vmem:[%s3617_s27 + $0x700] sm:$0xff] %v624_v32  ;;  %v628_v34 = vld [vmem:[%s3612_s26 + $0xe20] sm:$0xff]  ;;  %v630_v35 = vld [vmem:[%s3612_s26 + $0xe28] sm:$0xff]  ;;  %627 = vst [vmem:[%s3617_s27 + $0x708] sm:$0xff] %v626_v33 }
  0x83   : > { %629 = vst [vmem:[%s3617_s27 + $0x710] sm:$0xff] %v628_v34  ;;  %631 = vst [vmem:[%s3617_s27 + $0x718] sm:$0xff] %v630_v35  ;;  %v632_v36 = vld [vmem:[%s3612_s26 + $0xe40] sm:$0xff]  ;;  %v634_v37 = vld [vmem:[%s3612_s26 + $0xe48] sm:$0xff] }
  0x84   : > { %v636_v38 = vld [vmem:[%s3612_s26 + $0xe60] sm:$0xff]  ;;  %633 = vst [vmem:[%s3617_s27 + $0x720] sm:$0xff] %v632_v36  ;;  %635 = vst [vmem:[%s3617_s27 + $0x728] sm:$0xff] %v634_v37  ;;  %v638_v39 = vld [vmem:[%s3612_s26 + $0xe68] sm:$0xff] }
  0x85   : > { %637 = vst [vmem:[%s3617_s27 + $0x730] sm:$0xff] %v636_v38  ;;  %v640_v40 = vld [vmem:[%s3612_s26 + $0xe80] sm:$0xff]  ;;  %v642_v41 = vld [vmem:[%s3612_s26 + $0xe88] sm:$0xff]  ;;  %639 = vst [vmem:[%s3617_s27 + $0x738] sm:$0xff] %v638_v39 }
  0x86   : > { %641 = vst [vmem:[%s3617_s27 + $0x740] sm:$0xff] %v640_v40  ;;  %643 = vst [vmem:[%s3617_s27 + $0x748] sm:$0xff] %v642_v41  ;;  %v644_v42 = vld [vmem:[%s3612_s26 + $0xea0] sm:$0xff]  ;;  %v646_v43 = vld [vmem:[%s3612_s26 + $0xea8] sm:$0xff] }
  0x87   : > { %v648_v44 = vld [vmem:[%s3612_s26 + $0xec0] sm:$0xff]  ;;  %645 = vst [vmem:[%s3617_s27 + $0x750] sm:$0xff] %v644_v42  ;;  %647 = vst [vmem:[%s3617_s27 + $0x758] sm:$0xff] %v646_v43  ;;  %v650_v45 = vld [vmem:[%s3612_s26 + $0xec8] sm:$0xff] }
  0x88   : > { %649 = vst [vmem:[%s3617_s27 + $0x760] sm:$0xff] %v648_v44  ;;  %v652_v46 = vld [vmem:[%s3612_s26 + $0xee0] sm:$0xff]  ;;  %v654_v47 = vld [vmem:[%s3612_s26 + $0xee8] sm:$0xff]  ;;  %651 = vst [vmem:[%s3617_s27 + $0x768] sm:$0xff] %v650_v45 }
  0x89   : > { %653 = vst [vmem:[%s3617_s27 + $0x770] sm:$0xff] %v652_v46  ;;  %655 = vst [vmem:[%s3617_s27 + $0x778] sm:$0xff] %v654_v47  ;;  %v656_v48 = vld [vmem:[%s3612_s26 + $0xf00] sm:$0xff]  ;;  %v658_v49 = vld [vmem:[%s3612_s26 + $0xf08] sm:$0xff] }
  0x8a   : > { %v660_v50 = vld [vmem:[%s3612_s26 + $0xf20] sm:$0xff]  ;;  %657 = vst [vmem:[%s3617_s27 + $0x780] sm:$0xff] %v656_v48  ;;  %659 = vst [vmem:[%s3617_s27 + $0x788] sm:$0xff] %v658_v49  ;;  %v662_v51 = vld [vmem:[%s3612_s26 + $0xf28] sm:$0xff] }
  0x8b   : > { %661 = vst [vmem:[%s3617_s27 + $0x790] sm:$0xff] %v660_v50  ;;  %v664_v52 = vld [vmem:[%s3612_s26 + $0xf40] sm:$0xff]  ;;  %v666_v53 = vld [vmem:[%s3612_s26 + $0xf48] sm:$0xff]  ;;  %663 = vst [vmem:[%s3617_s27 + $0x798] sm:$0xff] %v662_v51 }
  0x8c   : > { %665 = vst [vmem:[%s3617_s27 + $0x7a0] sm:$0xff] %v664_v52  ;;  %667 = vst [vmem:[%s3617_s27 + $0x7a8] sm:$0xff] %v666_v53  ;;  %v668_v54 = vld [vmem:[%s3612_s26 + $0xf60] sm:$0xff]  ;;  %v670_v55 = vld [vmem:[%s3612_s26 + $0xf68] sm:$0xff] }
  0x8d   : > { %v672_v56 = vld [vmem:[%s3612_s26 + $0xf80] sm:$0xff]  ;;  %669 = vst [vmem:[%s3617_s27 + $0x7b0] sm:$0xff] %v668_v54  ;;  %671 = vst [vmem:[%s3617_s27 + $0x7b8] sm:$0xff] %v670_v55  ;;  %v674_v57 = vld [vmem:[%s3612_s26 + $0xf88] sm:$0xff] }
  0x8e   : > { %673 = vst [vmem:[%s3617_s27 + $0x7c0] sm:$0xff] %v672_v56  ;;  %v676_v58 = vld [vmem:[%s3612_s26 + $0xfa0] sm:$0xff]  ;;  %v678_v59 = vld [vmem:[%s3612_s26 + $0xfa8] sm:$0xff]  ;;  %675 = vst [vmem:[%s3617_s27 + $0x7c8] sm:$0xff] %v674_v57 }
  0x8f   : > { %677 = vst [vmem:[%s3617_s27 + $0x7d0] sm:$0xff] %v676_v58  ;;  %679 = vst [vmem:[%s3617_s27 + $0x7d8] sm:$0xff] %v678_v59  ;;  %v680_v60 = vld [vmem:[%s3612_s26 + $0xfc0] sm:$0xff]  ;;  %v682_v61 = vld [vmem:[%s3612_s26 + $0xfc8] sm:$0xff] }
  0x90   : > { %v684_v62 = vld [vmem:[%s3612_s26 + $0xfe0] sm:$0xff]  ;;  %681 = vst [vmem:[%s3617_s27 + $0x7e0] sm:$0xff] %v680_v60  ;;  %683 = vst [vmem:[%s3617_s27 + $0x7e8] sm:$0xff] %v682_v61  ;;  %v686_v63 = vld [vmem:[%s3612_s26 + $0xfe8] sm:$0xff] }
  0x91   : > { %685 = vst [vmem:[%s3617_s27 + $0x7f0] sm:$0xff] %v684_v62  ;;  %687 = vst [vmem:[%s3617_s27 + $0x7f8] sm:$0xff] %v686_v63 }
  0x92 PF: > { %p2793_p6 = scmp.ge.s32.totalorder %s3547_s16, 1  ;;  %p700_p7 = scmp.lt.s32.totalorder %s3547_s16, 3 }
  0x94   : > { %p701_p8 = pnand %p2793_p6, %p700_p7 }
  0x95   : > { %s707_s28 = sand.u32 (!%p701_p8), 1, %s3531_s12   ;;  %v765_v0 = vld [vmem:[%s4435_s0 + $0x8] sm:$0xff] (!%p701_p8)  ;;  %s2795_s26 = sshll.u32 (!%p701_p8), %s3539_s14, 2 }
  0x96   : > { %704 = sbr.rel (%p701_p8) target bundleno = 627 (0x273), region = 51  ;;  %s2794_s4 = sshll.u32 (!%p701_p8), %s707_s28, 11  ;;  %v773_v1 = vpack.c.bf16 (!%p701_p8), %v765_v0, %v765_v0  ;;  %v764_v0 = vld [vmem:[%s4435_s0] sm:$0xff] (!%p701_p8) }
  0x97   : > { %s4134_s5 = scalar_lea.vmem (!%p701_p8), [#allocation2], %s2794_s4  ;;  %p750_p9 = scmp.lt.s32.totalorder (!%p701_p8), %s2795_s26, 7 }
  0x98   : > { %v3125_v2 = vld [vmem:[%s4134_s5 + $0x4] ss:$16 sps:$4 sm:$0xff] (!%p701_p8)   ;;  %2370 = vmatprep.mubr.bf16.mxu0 (!%p701_p8), %v773_v1  ;;  %2534 = vmatprep.mubr.bf16.mxu1 (!%p701_p8), %v773_v1  ;;  %v3127_v3 = vld [vmem:[%s4134_s5 + $0xc] ss:$16 sps:$4 sm:$0xff] (!%p701_p8)   ;;  %v3129_v4 = vld [vmem:[%s4134_s5] ss:$16 sps:$4 sm:$0xff] (!%p701_p8)  }
  0x99   : > { %2338 = vmatprep.subr.bf16.mxu0 (!%p701_p8), %v3125_v2  ;;  %v3130_v5 = vld [vmem:[%s4134_s5 + $0x8] ss:$16 sps:$4 sm:$0xff] (!%p701_p8)   ;;  %2502 = vmatprep.subr.bf16.mxu1 (!%p701_p8), %v3127_v3  ;;  %v3131_v6 = vld [vmem:[%s4134_s5 + $0x24] ss:$16 sps:$4 sm:$0xff] (!%p701_p8)   ;;  %v3133_v7 = vld [vmem:[%s4134_s5 + $0x2c] ss:$16 sps:$4 sm:$0xff] (!%p701_p8)  }
  0x9a   : > { %2339 = vmatpush1.bf16.msra.mxu0 (!%p701_p8), %v3129_v4  ;;  %2503 = vmatpush1.bf16.msra.mxu1 (!%p701_p8), %v3130_v5  ;;  %v3135_v8 = vld [vmem:[%s4134_s5 + $0x20] ss:$16 sps:$4 sm:$0xff] (!%p701_p8)   ;;  %v3136_v9 = vld [vmem:[%s4134_s5 + $0x28] ss:$16 sps:$4 sm:$0xff] (!%p701_p8)   ;;  %v3137_v10 = vld [vmem:[%s4134_s5 + $0x44] ss:$16 sps:$4 sm:$0xff] (!%p701_p8)  }
  0x9b   : > { %2340 = vmatprep.subr.bf16.mxu0 (!%p701_p8), %v3131_v6  ;;  %2504 = vmatprep.subr.bf16.mxu1 (!%p701_p8), %v3133_v7  ;;  %v3139_v11 = vld [vmem:[%s4134_s5 + $0x4c] ss:$16 sps:$4 sm:$0xff] (!%p701_p8)   ;;  %v3141_v12 = vld [vmem:[%s4134_s5 + $0x40] ss:$16 sps:$4 sm:$0xff] (!%p701_p8)   ;;  %v3142_v13 = vld [vmem:[%s4134_s5 + $0x48] ss:$16 sps:$4 sm:$0xff] (!%p701_p8)   ;;  %v772_v7 = vpack.c.bf16 (!%p701_p8), %v764_v0, %v764_v0 }
  0x9c   : > { %v3143_v14 = vld [vmem:[%s4134_s5 + $0x64] ss:$16 sps:$4 sm:$0xff] (!%p701_p8)   ;;  %v3145_v15 = vld [vmem:[%s4134_s5 + $0x6c] ss:$16 sps:$4 sm:$0xff] (!%p701_p8)   ;;  %v3147_v16 = vld [vmem:[%s4134_s5 + $0x60] ss:$16 sps:$4 sm:$0xff] (!%p701_p8)  }
  0x9d   : > { %v3148_v17 = vld [vmem:[%s4134_s5 + $0x68] ss:$16 sps:$4 sm:$0xff]   ;;  %v3149_v18 = vld [vmem:[%s4134_s5 + $0x84] ss:$16 sps:$4 sm:$0xff]   ;;  %v3151_v19 = vld [vmem:[%s4134_s5 + $0x8c] ss:$16 sps:$4 sm:$0xff]  }
  0x9e   : > { %2341 = vmatpush1.bf16.msra.mxu0 %v3135_v8  ;;  %2505 = vmatpush1.bf16.msra.mxu1 %v3136_v9  ;;  %v3153_v20 = vld [vmem:[%s4134_s5 + $0x80] ss:$16 sps:$4 sm:$0xff]   ;;  %v3154_v21 = vld [vmem:[%s4134_s5 + $0x88] ss:$16 sps:$4 sm:$0xff]   ;;  %v3155_v22 = vld [vmem:[%s4134_s5 + $0xa4] ss:$16 sps:$4 sm:$0xff]  }
  0x9f   : > { %2342 = vmatprep.subr.bf16.mxu0 %v3137_v10  ;;  %2506 = vmatprep.subr.bf16.mxu1 %v3139_v11  ;;  %v3157_v23 = vld [vmem:[%s4134_s5 + $0xac] ss:$16 sps:$4 sm:$0xff]   ;;  %v3159_v24 = vld [vmem:[%s4134_s5 + $0xa0] ss:$16 sps:$4 sm:$0xff]   ;;  %v3160_v25 = vld [vmem:[%s4134_s5 + $0xa8] ss:$16 sps:$4 sm:$0xff]  }
  0xa0   : > { %v3161_v26 = vld [vmem:[%s4134_s5 + $0xc4] ss:$16 sps:$4 sm:$0xff]   ;;  %v3163_v27 = vld [vmem:[%s4134_s5 + $0xcc] ss:$16 sps:$4 sm:$0xff]   ;;  %v3165_v28 = vld [vmem:[%s4134_s5 + $0xc0] ss:$16 sps:$4 sm:$0xff]  }
  0xa1   : > { %v3166_v29 = vld [vmem:[%s4134_s5 + $0xc8] ss:$16 sps:$4 sm:$0xff]   ;;  %v3167_v30 = vld [vmem:[%s4134_s5 + $0xe4] ss:$16 sps:$4 sm:$0xff]   ;;  %v3169_v31 = vld [vmem:[%s4134_s5 + $0xec] ss:$16 sps:$4 sm:$0xff]  }
  0xa2   : > { %2343 = vmatpush1.bf16.msra.mxu0 %v3141_v12  ;;  %2507 = vmatpush1.bf16.msra.mxu1 %v3142_v13  ;;  %v3171_v32 = vld [vmem:[%s4134_s5 + $0xe0] ss:$16 sps:$4 sm:$0xff]   ;;  %v3172_v33 = vld [vmem:[%s4134_s5 + $0xe8] ss:$16 sps:$4 sm:$0xff]   ;;  %v3173_v34 = vld [vmem:[%s4134_s5 + $0x104] ss:$16 sps:$4 sm:$0xff]  }
  0xa3   : > { %2344 = vmatprep.subr.bf16.mxu0 %v3143_v14  ;;  %2508 = vmatprep.subr.bf16.mxu1 %v3145_v15  ;;  %v3175_v35 = vld [vmem:[%s4134_s5 + $0x10c] ss:$16 sps:$4 sm:$0xff]   ;;  %v3177_v36 = vld [vmem:[%s4134_s5 + $0x100] ss:$16 sps:$4 sm:$0xff]   ;;  %v3178_v37 = vld [vmem:[%s4134_s5 + $0x108] ss:$16 sps:$4 sm:$0xff]  }
  0xa4   : > { %v3179_v38 = vld [vmem:[%s4134_s5 + $0x124] ss:$16 sps:$4 sm:$0xff]   ;;  %v3181_v39 = vld [vmem:[%s4134_s5 + $0x12c] ss:$16 sps:$4 sm:$0xff]   ;;  %v3183_v40 = vld [vmem:[%s4134_s5 + $0x120] ss:$16 sps:$4 sm:$0xff]  }
  0xa5   : > { %v3184_v41 = vld [vmem:[%s4134_s5 + $0x128] ss:$16 sps:$4 sm:$0xff]   ;;  %v3185_v42 = vld [vmem:[%s4134_s5 + $0x144] ss:$16 sps:$4 sm:$0xff]   ;;  %v3187_v43 = vld [vmem:[%s4134_s5 + $0x14c] ss:$16 sps:$4 sm:$0xff]  }
  0xa6   : > { %2345 = vmatpush1.bf16.msra.mxu0 %v3147_v16  ;;  %2509 = vmatpush1.bf16.msra.mxu1 %v3148_v17  ;;  %v3189_v44 = vld [vmem:[%s4134_s5 + $0x140] ss:$16 sps:$4 sm:$0xff]   ;;  %v3190_v45 = vld [vmem:[%s4134_s5 + $0x148] ss:$16 sps:$4 sm:$0xff]   ;;  %v3191_v46 = vld [vmem:[%s4134_s5 + $0x164] ss:$16 sps:$4 sm:$0xff]  }
  0xa7   : > { %2346 = vmatprep.subr.bf16.mxu0 %v3149_v18  ;;  %2510 = vmatprep.subr.bf16.mxu1 %v3151_v19  ;;  %v3193_v47 = vld [vmem:[%s4134_s5 + $0x16c] ss:$16 sps:$4 sm:$0xff]   ;;  %v3195_v48 = vld [vmem:[%s4134_s5 + $0x160] ss:$16 sps:$4 sm:$0xff]   ;;  %v3196_v49 = vld [vmem:[%s4134_s5 + $0x168] ss:$16 sps:$4 sm:$0xff]  }
  0xa8   : > { %v3197_v50 = vld [vmem:[%s4134_s5 + $0x184] ss:$16 sps:$4 sm:$0xff]   ;;  %v3199_v51 = vld [vmem:[%s4134_s5 + $0x18c] ss:$16 sps:$4 sm:$0xff]   ;;  %v3201_v52 = vld [vmem:[%s4134_s5 + $0x180] ss:$16 sps:$4 sm:$0xff]  }
  0xa9   : > { %v3202_v53 = vld [vmem:[%s4134_s5 + $0x188] ss:$16 sps:$4 sm:$0xff]   ;;  %v3203_v54 = vld [vmem:[%s4134_s5 + $0x1a4] ss:$16 sps:$4 sm:$0xff]   ;;  %v3205_v55 = vld [vmem:[%s4134_s5 + $0x1ac] ss:$16 sps:$4 sm:$0xff]  }
  0xaa   : > { %2347 = vmatpush1.bf16.msra.mxu0 %v3153_v20  ;;  %2511 = vmatpush1.bf16.msra.mxu1 %v3154_v21  ;;  %v3207_v56 = vld [vmem:[%s4134_s5 + $0x1a0] ss:$16 sps:$4 sm:$0xff]   ;;  %v3208_v57 = vld [vmem:[%s4134_s5 + $0x1a8] ss:$16 sps:$4 sm:$0xff]   ;;  %v3209_v58 = vld [vmem:[%s4134_s5 + $0x1c4] ss:$16 sps:$4 sm:$0xff]  }
  0xab   : > { %2348 = vmatprep.subr.bf16.mxu0 %v3155_v22  ;;  %2512 = vmatprep.subr.bf16.mxu1 %v3157_v23  ;;  %v3211_v59 = vld [vmem:[%s4134_s5 + $0x1cc] ss:$16 sps:$4 sm:$0xff]   ;;  %v3213_v60 = vld [vmem:[%s4134_s5 + $0x1c0] ss:$16 sps:$4 sm:$0xff]   ;;  %v3214_v61 = vld [vmem:[%s4134_s5 + $0x1c8] ss:$16 sps:$4 sm:$0xff]  }
  0xac   : > { %v3215_v62 = vld [vmem:[%s4134_s5 + $0x1e4] ss:$16 sps:$4 sm:$0xff]   ;;  %v3217_v63 = vld [vmem:[%s4134_s5 + $0x1ec] ss:$16 sps:$4 sm:$0xff]   ;;  %v3219_v1 = vld [vmem:[%s4134_s5 + $0x1e0] ss:$16 sps:$4 sm:$0xff]  }
  0xad   : > { %v3220_v2 = vld [vmem:[%s4134_s5 + $0x1e8] ss:$16 sps:$4 sm:$0xff]   ;;  %v3223_v3 = vld [vmem:[%s4134_s5 + $0x204] ss:$16 sps:$4 sm:$0xff]   ;;  %v3226_v4 = vld [vmem:[%s4134_s5 + $0x20c] ss:$16 sps:$4 sm:$0xff]  }
  0xae   : > { %2349 = vmatpush1.bf16.msra.mxu0 %v3159_v24  ;;  %2513 = vmatpush1.bf16.msra.mxu1 %v3160_v25  ;;  %v3221_v5 = vld [vmem:[%s4134_s5 + $0x200] ss:$16 sps:$4 sm:$0xff]   ;;  %v3224_v6 = vld [vmem:[%s4134_s5 + $0x208] ss:$16 sps:$4 sm:$0xff]   ;;  %v3229_v8 = vld [vmem:[%s4134_s5 + $0x224] ss:$16 sps:$4 sm:$0xff]  }
  0xaf   : > { %2350 = vmatprep.subr.bf16.mxu0 %v3161_v26  ;;  %2514 = vmatprep.subr.bf16.mxu1 %v3163_v27  ;;  %v3232_v9 = vld [vmem:[%s4134_s5 + $0x22c] ss:$16 sps:$4 sm:$0xff]   ;;  %v3227_v10 = vld [vmem:[%s4134_s5 + $0x220] ss:$16 sps:$4 sm:$0xff]   ;;  %v3230_v11 = vld [vmem:[%s4134_s5 + $0x228] ss:$16 sps:$4 sm:$0xff]  }
  0xb0   : > { %v3235_v12 = vld [vmem:[%s4134_s5 + $0x244] ss:$16 sps:$4 sm:$0xff]   ;;  %v3238_v13 = vld [vmem:[%s4134_s5 + $0x24c] ss:$16 sps:$4 sm:$0xff]   ;;  %v3233_v14 = vld [vmem:[%s4134_s5 + $0x240] ss:$16 sps:$4 sm:$0xff]  }
  0xb1   : > { %v3236_v15 = vld [vmem:[%s4134_s5 + $0x248] ss:$16 sps:$4 sm:$0xff]   ;;  %v3241_v16 = vld [vmem:[%s4134_s5 + $0x264] ss:$16 sps:$4 sm:$0xff]   ;;  %v3244_v17 = vld [vmem:[%s4134_s5 + $0x26c] ss:$16 sps:$4 sm:$0xff]  }
  0xb2   : > { %2351 = vmatpush1.bf16.msra.mxu0 %v3165_v28  ;;  %2515 = vmatpush1.bf16.msra.mxu1 %v3166_v29  ;;  %v3239_v18 = vld [vmem:[%s4134_s5 + $0x260] ss:$16 sps:$4 sm:$0xff]   ;;  %v3242_v19 = vld [vmem:[%s4134_s5 + $0x268] ss:$16 sps:$4 sm:$0xff]   ;;  %v3247_v20 = vld [vmem:[%s4134_s5 + $0x284] ss:$16 sps:$4 sm:$0xff]  }
  0xb3   : > { %2352 = vmatprep.subr.bf16.mxu0 %v3167_v30  ;;  %2516 = vmatprep.subr.bf16.mxu1 %v3169_v31  ;;  %v3250_v21 = vld [vmem:[%s4134_s5 + $0x28c] ss:$16 sps:$4 sm:$0xff]   ;;  %v3245_v22 = vld [vmem:[%s4134_s5 + $0x280] ss:$16 sps:$4 sm:$0xff]   ;;  %v3248_v23 = vld [vmem:[%s4134_s5 + $0x288] ss:$16 sps:$4 sm:$0xff]  }
  0xb4   : > { %v3253_v24 = vld [vmem:[%s4134_s5 + $0x2a4] ss:$16 sps:$4 sm:$0xff]   ;;  %v3256_v25 = vld [vmem:[%s4134_s5 + $0x2ac] ss:$16 sps:$4 sm:$0xff]   ;;  %v3251_v26 = vld [vmem:[%s4134_s5 + $0x2a0] ss:$16 sps:$4 sm:$0xff]  }
  0xb5   : > { %v3254_v27 = vld [vmem:[%s4134_s5 + $0x2a8] ss:$16 sps:$4 sm:$0xff]   ;;  %v3259_v28 = vld [vmem:[%s4134_s5 + $0x2c4] ss:$16 sps:$4 sm:$0xff]   ;;  %v3262_v29 = vld [vmem:[%s4134_s5 + $0x2cc] ss:$16 sps:$4 sm:$0xff]  }
  0xb6   : > { %2353 = vmatpush1.bf16.msra.mxu0 %v3171_v32  ;;  %2517 = vmatpush1.bf16.msra.mxu1 %v3172_v33  ;;  %v767_v30 = vld [vmem:[%s4435_s0 + $0x18] sm:$0xff]  ;;  %v3257_v32 = vld [vmem:[%s4134_s5 + $0x2c0] ss:$16 sps:$4 sm:$0xff]   ;;  %s4446_s26 = smov (!%p750_p9, %s2795_s26), 7 }
  0xb7   : > { %2354 = vmatprep.subr.bf16.mxu0 %v3173_v34  ;;  %2518 = vmatprep.subr.bf16.mxu1 %v3175_v35  ;;  %v775_v31 = vpack.c.bf16 %v767_v30, %v767_v30  ;;  %v3260_v33 = vld [vmem:[%s4134_s5 + $0x2c8] ss:$16 sps:$4 sm:$0xff]   ;;  %v3265_v34 = vld [vmem:[%s4134_s5 + $0x2e4] ss:$16 sps:$4 sm:$0xff]   ;;  %v3268_v35 = vld [vmem:[%s4134_s5 + $0x2ec] ss:$16 sps:$4 sm:$0xff]   ;;  %s752_s29 = scalar_lea.vmem %s4437_s2, %s4446_s26 }
  0xb8   : > { %v3305_v0 = vld [vmem:[%s4134_s5 + $0x3c0] ss:$16 sps:$4 sm:$0xff]   ;;  %v3349_v30 = vld [vmem:[%s4134_s5 + $0x4a4] ss:$16 sps:$4 sm:$0xff]   ;;  %s2797_s30 = sshll.u32 %s4446_s26, 3 }
  0xba   : > { %2355 = vmatpush1.bf16.msra.mxu0 %v3177_v36  ;;  %2519 = vmatpush1.bf16.msra.mxu1 %v3178_v37  ;;  %v3263_v36 = vld [vmem:[%s4134_s5 + $0x2e0] ss:$16 sps:$4 sm:$0xff]   ;;  %v3266_v37 = vld [vmem:[%s4134_s5 + $0x2e8] ss:$16 sps:$4 sm:$0xff]  }
  0xbb   : > { %2356 = vmatprep.subr.bf16.mxu0 %v3179_v38  ;;  %2520 = vmatprep.subr.bf16.mxu1 %v3181_v39  ;;  %v3271_v38 = vld [vmem:[%s4134_s5 + $0x304] ss:$16 sps:$4 sm:$0xff]   ;;  %v3274_v39 = vld [vmem:[%s4134_s5 + $0x30c] ss:$16 sps:$4 sm:$0xff]  }
  0xbe   : > { %2357 = vmatpush1.bf16.msra.mxu0 %v3183_v40  ;;  %2521 = vmatpush1.bf16.msra.mxu1 %v3184_v41  ;;  %v3269_v40 = vld [vmem:[%s4134_s5 + $0x300] ss:$16 sps:$4 sm:$0xff]   ;;  %v3272_v41 = vld [vmem:[%s4134_s5 + $0x308] ss:$16 sps:$4 sm:$0xff]  }
  0xbf   : > { %2358 = vmatprep.subr.bf16.mxu0 %v3185_v42  ;;  %2522 = vmatprep.subr.bf16.mxu1 %v3187_v43  ;;  %v3277_v42 = vld [vmem:[%s4134_s5 + $0x324] ss:$16 sps:$4 sm:$0xff]   ;;  %v3280_v43 = vld [vmem:[%s4134_s5 + $0x32c] ss:$16 sps:$4 sm:$0xff]  }
  0xc2   : > { %2359 = vmatpush1.bf16.msra.mxu0 %v3189_v44  ;;  %2523 = vmatpush1.bf16.msra.mxu1 %v3190_v45  ;;  %v3275_v44 = vld [vmem:[%s4134_s5 + $0x320] ss:$16 sps:$4 sm:$0xff]   ;;  %v3278_v45 = vld [vmem:[%s4134_s5 + $0x328] ss:$16 sps:$4 sm:$0xff]  }
  0xc3   : > { %2360 = vmatprep.subr.bf16.mxu0 %v3191_v46  ;;  %2524 = vmatprep.subr.bf16.mxu1 %v3193_v47  ;;  %v3283_v46 = vld [vmem:[%s4134_s5 + $0x344] ss:$16 sps:$4 sm:$0xff]   ;;  %v3286_v47 = vld [vmem:[%s4134_s5 + $0x34c] ss:$16 sps:$4 sm:$0xff]  }
  0xc6   : > { %2361 = vmatpush1.bf16.msra.mxu0 %v3195_v48  ;;  %2525 = vmatpush1.bf16.msra.mxu1 %v3196_v49  ;;  %v3281_v48 = vld [vmem:[%s4134_s5 + $0x340] ss:$16 sps:$4 sm:$0xff]   ;;  %v3284_v49 = vld [vmem:[%s4134_s5 + $0x348] ss:$16 sps:$4 sm:$0xff]  }
  0xc7   : > { %2362 = vmatprep.subr.bf16.mxu0 %v3197_v50  ;;  %2526 = vmatprep.subr.bf16.mxu1 %v3199_v51  ;;  %v3289_v50 = vld [vmem:[%s4134_s5 + $0x364] ss:$16 sps:$4 sm:$0xff]   ;;  %v3292_v51 = vld [vmem:[%s4134_s5 + $0x36c] ss:$16 sps:$4 sm:$0xff]  }
  0xca   : > { %2363 = vmatpush1.bf16.msra.mxu0 %v3201_v52  ;;  %2527 = vmatpush1.bf16.msra.mxu1 %v3202_v53  ;;  %v3287_v52 = vld [vmem:[%s4134_s5 + $0x360] ss:$16 sps:$4 sm:$0xff]   ;;  %v3290_v53 = vld [vmem:[%s4134_s5 + $0x368] ss:$16 sps:$4 sm:$0xff]  }
  0xcb   : > { %2364 = vmatprep.subr.bf16.mxu0 %v3203_v54  ;;  %2528 = vmatprep.subr.bf16.mxu1 %v3205_v55  ;;  %v3295_v54 = vld [vmem:[%s4134_s5 + $0x384] ss:$16 sps:$4 sm:$0xff]   ;;  %v3298_v55 = vld [vmem:[%s4134_s5 + $0x38c] ss:$16 sps:$4 sm:$0xff]  }
  0xce   : > { %2365 = vmatpush1.bf16.msra.mxu0 %v3207_v56  ;;  %2529 = vmatpush1.bf16.msra.mxu1 %v3208_v57  ;;  %v3293_v56 = vld [vmem:[%s4134_s5 + $0x380] ss:$16 sps:$4 sm:$0xff]   ;;  %v3296_v57 = vld [vmem:[%s4134_s5 + $0x388] ss:$16 sps:$4 sm:$0xff]  }
  0xcf   : > { %2366 = vmatprep.subr.bf16.mxu0 %v3209_v58  ;;  %2530 = vmatprep.subr.bf16.mxu1 %v3211_v59  ;;  %v3301_v58 = vld [vmem:[%s4134_s5 + $0x3a4] ss:$16 sps:$4 sm:$0xff]   ;;  %v3304_v59 = vld [vmem:[%s4134_s5 + $0x3ac] ss:$16 sps:$4 sm:$0xff]  }
  0xd2   : > { %2367 = vmatpush1.bf16.msra.mxu0 %v3213_v60  ;;  %2531 = vmatpush1.bf16.msra.mxu1 %v3214_v61  ;;  %v3299_v60 = vld [vmem:[%s4134_s5 + $0x3a0] ss:$16 sps:$4 sm:$0xff]   ;;  %v3302_v61 = vld [vmem:[%s4134_s5 + $0x3a8] ss:$16 sps:$4 sm:$0xff]  }
  0xd3   : > { %2368 = vmatprep.subr.bf16.mxu0 %v3215_v62  ;;  %2532 = vmatprep.subr.bf16.mxu1 %v3217_v63  ;;  %v3307_v62 = vld [vmem:[%s4134_s5 + $0x3c4] ss:$16 sps:$4 sm:$0xff]   ;;  %v3310_v63 = vld [vmem:[%s4134_s5 + $0x3cc] ss:$16 sps:$4 sm:$0xff]  }
  0xd6   : > { %2369 = vmatpush1.bf16.msra.mxu0 %v3219_v1  ;;  %2533 = vmatpush1.bf16.msra.mxu1 %v3220_v2  ;;  %v3308_v1 = vld [vmem:[%s4134_s5 + $0x3c8] ss:$16 sps:$4 sm:$0xff]   ;;  %v3313_v2 = vld [vmem:[%s4134_s5 + $0x3e4] ss:$16 sps:$4 sm:$0xff]  }
  0xd7   : > { %2379 = vmatprep.subr.bf16.mxu0 %v3223_v3  ;;  %2543 = vmatprep.subr.bf16.mxu1 %v3226_v4  ;;  %v3316_v3 = vld [vmem:[%s4134_s5 + $0x3ec] ss:$16 sps:$4 sm:$0xff]   ;;  %v3311_v4 = vld [vmem:[%s4134_s5 + $0x3e0] ss:$16 sps:$4 sm:$0xff]  }
  0xd9   : > { %2371 = vmatmul.mubr.bf16.vlgmr.msra.gmra.mrb[0].mxu0 %v772_v7  ;;  %2535 = vmatmul.mubr.bf16.vlgmr.msra.gmra.mrb[0].mxu1 %v772_v7  ;;  %v3319_v7 = vld [vmem:[%s4134_s5 + $0x404] ss:$16 sps:$4 sm:$0xff]  }
  0xda   : > { %2380 = vmatpush1.bf16.msra.mxu0 %v3221_v5  ;;  %2544 = vmatpush1.bf16.msra.mxu1 %v3224_v6  ;;  %v3314_v5 = vld [vmem:[%s4134_s5 + $0x3e8] ss:$16 sps:$4 sm:$0xff]   ;;  %v766_v6 = vld [vmem:[%s4435_s0 + $0x10] sm:$0xff] }
  0xdb   : > { %2381 = vmatprep.subr.bf16.mxu0 %v3229_v8  ;;  %2545 = vmatprep.subr.bf16.mxu1 %v3232_v9  ;;  %v3322_v8 = vld [vmem:[%s4134_s5 + $0x40c] ss:$16 sps:$4 sm:$0xff]   ;;  %v3317_v9 = vld [vmem:[%s4134_s5 + $0x400] ss:$16 sps:$4 sm:$0xff]  }
  0xdc   : > { %2411 = vmatprep.mubr.bf16.mxu0 %v775_v31  ;;  %2575 = vmatprep.mubr.bf16.mxu1 %v775_v31  ;;  %v3352_v31 = vld [vmem:[%s4134_s5 + $0x4ac] ss:$16 sps:$4 sm:$0xff]  }
  0xde   : > { %2382 = vmatpush1.bf16.msra.mxu0 %v3227_v10  ;;  %2546 = vmatpush1.bf16.msra.mxu1 %v3230_v11  ;;  %v774_v10 = vpack.c.bf16 %v766_v6, %v766_v6  ;;  %v3320_v11 = vld [vmem:[%s4134_s5 + $0x408] ss:$16 sps:$4 sm:$0xff]   ;;  %v3409_v6 = vld [vmem:[%s4134_s5 + $0x5e4] ss:$16 sps:$4 sm:$0xff]  }
  0xdf   : > { %2383 = vmatprep.subr.bf16.mxu0 %v3235_v12  ;;  %2547 = vmatprep.subr.bf16.mxu1 %v3238_v13  ;;  %v3325_v12 = vld [vmem:[%s4134_s5 + $0x424] ss:$16 sps:$4 sm:$0xff]   ;;  %v769_v13 = vld [vmem:[%s4435_s0 + $0x28] sm:$0xff] }
  0xe2   : > { %2384 = vmatpush1.bf16.msra.mxu0 %v3233_v14  ;;  %2548 = vmatpush1.bf16.msra.mxu1 %v3236_v15  ;;  %v3328_v14 = vld [vmem:[%s4134_s5 + $0x42c] ss:$16 sps:$4 sm:$0xff]   ;;  %v777_v15 = vpack.c.bf16 %v769_v13, %v769_v13 }
  0xe3   : > { %2385 = vmatprep.subr.bf16.mxu0 %v3241_v16  ;;  %2549 = vmatprep.subr.bf16.mxu1 %v3244_v17  ;;  %v3323_v16 = vld [vmem:[%s4134_s5 + $0x420] ss:$16 sps:$4 sm:$0xff]   ;;  %v3326_v17 = vld [vmem:[%s4134_s5 + $0x428] ss:$16 sps:$4 sm:$0xff]  }
  0xe6   : > { %2386 = vmatpush1.bf16.msra.mxu0 %v3239_v18  ;;  %2550 = vmatpush1.bf16.msra.mxu1 %v3242_v19  ;;  %v3331_v18 = vld [vmem:[%s4134_s5 + $0x444] ss:$16 sps:$4 sm:$0xff]   ;;  %v3334_v19 = vld [vmem:[%s4134_s5 + $0x44c] ss:$16 sps:$4 sm:$0xff]  }
  0xe7   : > { %2387 = vmatprep.subr.bf16.mxu0 %v3247_v20  ;;  %2551 = vmatprep.subr.bf16.mxu1 %v3250_v21  ;;  %v3329_v20 = vld [vmem:[%s4134_s5 + $0x440] ss:$16 sps:$4 sm:$0xff]   ;;  %v3332_v21 = vld [vmem:[%s4134_s5 + $0x448] ss:$16 sps:$4 sm:$0xff]  }
  0xea   : > { %2388 = vmatpush1.bf16.msra.mxu0 %v3245_v22  ;;  %2552 = vmatpush1.bf16.msra.mxu1 %v3248_v23  ;;  %v3337_v22 = vld [vmem:[%s4134_s5 + $0x464] ss:$16 sps:$4 sm:$0xff]   ;;  %v3340_v23 = vld [vmem:[%s4134_s5 + $0x46c] ss:$16 sps:$4 sm:$0xff]  }
  0xeb   : > { %2389 = vmatprep.subr.bf16.mxu0 %v3253_v24  ;;  %2553 = vmatprep.subr.bf16.mxu1 %v3256_v25  ;;  %v3335_v24 = vld [vmem:[%s4134_s5 + $0x460] ss:$16 sps:$4 sm:$0xff]   ;;  %v3338_v25 = vld [vmem:[%s4134_s5 + $0x468] ss:$16 sps:$4 sm:$0xff]  }
  0xee   : > { %2390 = vmatpush1.bf16.msra.mxu0 %v3251_v26  ;;  %2554 = vmatpush1.bf16.msra.mxu1 %v3254_v27  ;;  %v3343_v26 = vld [vmem:[%s4134_s5 + $0x484] ss:$16 sps:$4 sm:$0xff]   ;;  %v3346_v27 = vld [vmem:[%s4134_s5 + $0x48c] ss:$16 sps:$4 sm:$0xff]  }
  0xef   : > { %2391 = vmatprep.subr.bf16.mxu0 %v3259_v28  ;;  %2555 = vmatprep.subr.bf16.mxu1 %v3262_v29  ;;  %v3341_v28 = vld [vmem:[%s4134_s5 + $0x480] ss:$16 sps:$4 sm:$0xff]   ;;  %v3344_v29 = vld [vmem:[%s4134_s5 + $0x488] ss:$16 sps:$4 sm:$0xff]  }
  0xf2   : > { %2392 = vmatpush1.bf16.msra.mxu0 %v3257_v32  ;;  %2556 = vmatpush1.bf16.msra.mxu1 %v3260_v33  ;;  %v3347_v32 = vld [vmem:[%s4134_s5 + $0x4a0] ss:$16 sps:$4 sm:$0xff]   ;;  %v3350_v33 = vld [vmem:[%s4134_s5 + $0x4a8] ss:$16 sps:$4 sm:$0xff]  }
  0xf3   : > { %2393 = vmatprep.subr.bf16.mxu0 %v3265_v34  ;;  %2557 = vmatprep.subr.bf16.mxu1 %v3268_v35  ;;  %v3355_v34 = vld [vmem:[%s4134_s5 + $0x4c4] ss:$16 sps:$4 sm:$0xff]   ;;  %v3358_v35 = vld [vmem:[%s4134_s5 + $0x4cc] ss:$16 sps:$4 sm:$0xff]  }
  0xf6   : > { %2394 = vmatpush1.bf16.msra.mxu0 %v3263_v36  ;;  %2558 = vmatpush1.bf16.msra.mxu1 %v3266_v37  ;;  %v3353_v36 = vld [vmem:[%s4134_s5 + $0x4c0] ss:$16 sps:$4 sm:$0xff]   ;;  %v3356_v37 = vld [vmem:[%s4134_s5 + $0x4c8] ss:$16 sps:$4 sm:$0xff]  }
  0xf7   : > { %2395 = vmatprep.subr.bf16.mxu0 %v3271_v38  ;;  %2559 = vmatprep.subr.bf16.mxu1 %v3274_v39  ;;  %v3361_v38 = vld [vmem:[%s4134_s5 + $0x4e4] ss:$16 sps:$4 sm:$0xff]   ;;  %v3364_v39 = vld [vmem:[%s4134_s5 + $0x4ec] ss:$16 sps:$4 sm:$0xff]  }
  0xfa   : > { %2396 = vmatpush1.bf16.msra.mxu0 %v3269_v40  ;;  %2560 = vmatpush1.bf16.msra.mxu1 %v3272_v41  ;;  %v3359_v40 = vld [vmem:[%s4134_s5 + $0x4e0] ss:$16 sps:$4 sm:$0xff]   ;;  %v3362_v41 = vld [vmem:[%s4134_s5 + $0x4e8] ss:$16 sps:$4 sm:$0xff]  }
  0xfb   : > { %2397 = vmatprep.subr.bf16.mxu0 %v3277_v42  ;;  %2561 = vmatprep.subr.bf16.mxu1 %v3280_v43  ;;  %v3367_v42 = vld [vmem:[%s4134_s5 + $0x504] ss:$16 sps:$4 sm:$0xff]   ;;  %v3370_v43 = vld [vmem:[%s4134_s5 + $0x50c] ss:$16 sps:$4 sm:$0xff]  }
  0xfe   : > { %2398 = vmatpush1.bf16.msra.mxu0 %v3275_v44  ;;  %2562 = vmatpush1.bf16.msra.mxu1 %v3278_v45  ;;  %v3365_v44 = vld [vmem:[%s4134_s5 + $0x500] ss:$16 sps:$4 sm:$0xff]   ;;  %v3368_v45 = vld [vmem:[%s4134_s5 + $0x508] ss:$16 sps:$4 sm:$0xff]  }
  0xff   : > { %2399 = vmatprep.subr.bf16.mxu0 %v3283_v46  ;;  %2563 = vmatprep.subr.bf16.mxu1 %v3286_v47  ;;  %v3373_v46 = vld [vmem:[%s4134_s5 + $0x524] ss:$16 sps:$4 sm:$0xff]   ;;  %v3376_v47 = vld [vmem:[%s4134_s5 + $0x52c] ss:$16 sps:$4 sm:$0xff]  }
 0x102   : > { %2400 = vmatpush1.bf16.msra.mxu0 %v3281_v48  ;;  %2564 = vmatpush1.bf16.msra.mxu1 %v3284_v49  ;;  %v3371_v48 = vld [vmem:[%s4134_s5 + $0x520] ss:$16 sps:$4 sm:$0xff]   ;;  %v3374_v49 = vld [vmem:[%s4134_s5 + $0x528] ss:$16 sps:$4 sm:$0xff]  }
 0x103   : > { %2401 = vmatprep.subr.bf16.mxu0 %v3289_v50  ;;  %2565 = vmatprep.subr.bf16.mxu1 %v3292_v51  ;;  %v3379_v50 = vld [vmem:[%s4134_s5 + $0x544] ss:$16 sps:$4 sm:$0xff]   ;;  %v3382_v51 = vld [vmem:[%s4134_s5 + $0x54c] ss:$16 sps:$4 sm:$0xff]  }
 0x106   : > { %2402 = vmatpush1.bf16.msra.mxu0 %v3287_v52  ;;  %2566 = vmatpush1.bf16.msra.mxu1 %v3290_v53  ;;  %v3377_v52 = vld [vmem:[%s4134_s5 + $0x540] ss:$16 sps:$4 sm:$0xff]   ;;  %v3380_v53 = vld [vmem:[%s4134_s5 + $0x548] ss:$16 sps:$4 sm:$0xff]  }
 0x107   : > { %2403 = vmatprep.subr.bf16.mxu0 %v3295_v54  ;;  %2567 = vmatprep.subr.bf16.mxu1 %v3298_v55  ;;  %v3385_v54 = vld [vmem:[%s4134_s5 + $0x564] ss:$16 sps:$4 sm:$0xff]   ;;  %v3388_v55 = vld [vmem:[%s4134_s5 + $0x56c] ss:$16 sps:$4 sm:$0xff]  }
 0x10a   : > { %2404 = vmatpush1.bf16.msra.mxu0 %v3293_v56  ;;  %2568 = vmatpush1.bf16.msra.mxu1 %v3296_v57  ;;  %v3383_v56 = vld [vmem:[%s4134_s5 + $0x560] ss:$16 sps:$4 sm:$0xff]   ;;  %v3386_v57 = vld [vmem:[%s4134_s5 + $0x568] ss:$16 sps:$4 sm:$0xff]  }
 0x10b   : > { %2405 = vmatprep.subr.bf16.mxu0 %v3301_v58  ;;  %2569 = vmatprep.subr.bf16.mxu1 %v3304_v59  ;;  %v3391_v58 = vld [vmem:[%s4134_s5 + $0x584] ss:$16 sps:$4 sm:$0xff]   ;;  %v3394_v59 = vld [vmem:[%s4134_s5 + $0x58c] ss:$16 sps:$4 sm:$0xff]  }
 0x10e   : > { %2406 = vmatpush1.bf16.msra.mxu0 %v3299_v60  ;;  %2570 = vmatpush1.bf16.msra.mxu1 %v3302_v61  ;;  %v3389_v60 = vld [vmem:[%s4134_s5 + $0x580] ss:$16 sps:$4 sm:$0xff]   ;;  %v3392_v61 = vld [vmem:[%s4134_s5 + $0x588] ss:$16 sps:$4 sm:$0xff]  }
 0x10f   : > { %2407 = vmatprep.subr.bf16.mxu0 %v3307_v62  ;;  %2571 = vmatprep.subr.bf16.mxu1 %v3310_v63  ;;  %v3397_v62 = vld [vmem:[%s4134_s5 + $0x5a4] ss:$16 sps:$4 sm:$0xff]   ;;  %v3400_v63 = vld [vmem:[%s4134_s5 + $0x5ac] ss:$16 sps:$4 sm:$0xff]  }
 0x112   : > { %2408 = vmatpush1.bf16.msra.mxu0 %v3305_v0  ;;  %2572 = vmatpush1.bf16.msra.mxu1 %v3308_v1  ;;  %v3395_v0 = vld [vmem:[%s4134_s5 + $0x5a0] ss:$16 sps:$4 sm:$0xff]   ;;  %v3398_v1 = vld [vmem:[%s4134_s5 + $0x5a8] ss:$16 sps:$4 sm:$0xff]  }
 0x113   : > { %2409 = vmatprep.subr.bf16.mxu0 %v3313_v2  ;;  %2573 = vmatprep.subr.bf16.mxu1 %v3316_v3  ;;  %v3403_v2 = vld [vmem:[%s4134_s5 + $0x5c4] ss:$16 sps:$4 sm:$0xff]   ;;  %v3406_v3 = vld [vmem:[%s4134_s5 + $0x5cc] ss:$16 sps:$4 sm:$0xff]  }
 0x116   : > { %2410 = vmatpush1.bf16.msra.mxu0 %v3311_v4  ;;  %2574 = vmatpush1.bf16.msra.mxu1 %v3314_v5  ;;  %v3401_v4 = vld [vmem:[%s4134_s5 + $0x5c0] ss:$16 sps:$4 sm:$0xff]   ;;  %v3404_v5 = vld [vmem:[%s4134_s5 + $0x5c8] ss:$16 sps:$4 sm:$0xff]  }
 0x117   : > { %2420 = vmatprep.subr.bf16.mxu0 %v3319_v7  ;;  %2584 = vmatprep.subr.bf16.mxu1 %v3322_v8  ;;  %v3412_v7 = vld [vmem:[%s4134_s5 + $0x5ec] ss:$16 sps:$4 sm:$0xff]   ;;  %v3407_v8 = vld [vmem:[%s4134_s5 + $0x5e0] ss:$16 sps:$4 sm:$0xff]  }
 0x119   : > { %2412 = vmatmul.mubr.bf16.vlgmr.msra.gmra.mrb[0].mxu0 %v774_v10  ;;  %2576 = vmatmul.mubr.bf16.vlgmr.msra.gmra.mrb[0].mxu1 %v774_v10  ;;  %v768_v10 = vld [vmem:[%s4435_s0 + $0x20] sm:$0xff] }
 0x11a   : > { %2421 = vmatpush1.bf16.msra.mxu0 %v3317_v9  ;;  %2585 = vmatpush1.bf16.msra.mxu1 %v3320_v11  ;;  %v3410_v9 = vld [vmem:[%s4134_s5 + $0x5e8] ss:$16 sps:$4 sm:$0xff]   ;;  %v3415_v11 = vld [vmem:[%s4134_s5 + $0x604] ss:$16 sps:$4 sm:$0xff]   ;;  %v776_v13 = vpack.c.bf16 %v768_v10, %v768_v10 }
 0x11b   : > { %2422 = vmatprep.subr.bf16.mxu0 %v3325_v12  ;;  %2586 = vmatprep.subr.bf16.mxu1 %v3328_v14  ;;  %v3418_v12 = vld [vmem:[%s4134_s5 + $0x60c] ss:$16 sps:$4 sm:$0xff]   ;;  %v3505_v10 = vld [vmem:[%s4134_s5 + $0x7e4] ss:$16 sps:$4 sm:$0xff]  }
 0x11c   : > { %2452 = vmatprep.mubr.bf16.mxu0 %v777_v15  ;;  %2616 = vmatprep.mubr.bf16.mxu1 %v777_v15  ;;  %v771_v14 = vld [vmem:[%s4435_s0 + $0x38] sm:$0xff]  ;;  %v3413_v15 = vld [vmem:[%s4134_s5 + $0x600] ss:$16 sps:$4 sm:$0xff]  }
 0x11e   : > { %2423 = vmatpush1.bf16.msra.mxu0 %v3323_v16  ;;  %2587 = vmatpush1.bf16.msra.mxu1 %v3326_v17  ;;  %v3416_v16 = vld [vmem:[%s4134_s5 + $0x608] ss:$16 sps:$4 sm:$0xff]   ;;  %v3421_v17 = vld [vmem:[%s4134_s5 + $0x624] ss:$16 sps:$4 sm:$0xff]  }
 0x11f   : > { %2424 = vmatprep.subr.bf16.mxu0 %v3331_v18  ;;  %2588 = vmatprep.subr.bf16.mxu1 %v3334_v19  ;;  %v3424_v18 = vld [vmem:[%s4134_s5 + $0x62c] ss:$16 sps:$4 sm:$0xff]   ;;  %v779_v19 = vpack.c.bf16 %v771_v14, %v771_v14  ;;  %v770_v14 = vld [vmem:[%s4435_s0 + $0x30] sm:$0xff] }
 0x122   : > { %2425 = vmatpush1.bf16.msra.mxu0 %v3329_v20  ;;  %2589 = vmatpush1.bf16.msra.mxu1 %v3332_v21  ;;  %v3419_v20 = vld [vmem:[%s4134_s5 + $0x620] ss:$16 sps:$4 sm:$0xff]   ;;  %v3422_v21 = vld [vmem:[%s4134_s5 + $0x628] ss:$16 sps:$4 sm:$0xff]  }
 0x123   : > { %2426 = vmatprep.subr.bf16.mxu0 %v3337_v22  ;;  %2590 = vmatprep.subr.bf16.mxu1 %v3340_v23  ;;  %v3427_v22 = vld [vmem:[%s4134_s5 + $0x644] ss:$16 sps:$4 sm:$0xff]   ;;  %v3430_v23 = vld [vmem:[%s4134_s5 + $0x64c] ss:$16 sps:$4 sm:$0xff]  }
 0x126   : > { %2427 = vmatpush1.bf16.msra.mxu0 %v3335_v24  ;;  %2591 = vmatpush1.bf16.msra.mxu1 %v3338_v25  ;;  %v3425_v24 = vld [vmem:[%s4134_s5 + $0x640] ss:$16 sps:$4 sm:$0xff]   ;;  %v3428_v25 = vld [vmem:[%s4134_s5 + $0x648] ss:$16 sps:$4 sm:$0xff]  }
 0x127   : > { %2428 = vmatprep.subr.bf16.mxu0 %v3343_v26  ;;  %2592 = vmatprep.subr.bf16.mxu1 %v3346_v27  ;;  %v3433_v26 = vld [vmem:[%s4134_s5 + $0x664] ss:$16 sps:$4 sm:$0xff]   ;;  %v3436_v27 = vld [vmem:[%s4134_s5 + $0x66c] ss:$16 sps:$4 sm:$0xff]  }
 0x12a   : > { %2429 = vmatpush1.bf16.msra.mxu0 %v3341_v28  ;;  %2593 = vmatpush1.bf16.msra.mxu1 %v3344_v29  ;;  %v3431_v28 = vld [vmem:[%s4134_s5 + $0x660] ss:$16 sps:$4 sm:$0xff]   ;;  %v3434_v29 = vld [vmem:[%s4134_s5 + $0x668] ss:$16 sps:$4 sm:$0xff]  }
 0x12b   : > { %2430 = vmatprep.subr.bf16.mxu0 %v3349_v30  ;;  %2594 = vmatprep.subr.bf16.mxu1 %v3352_v31  ;;  %v3439_v30 = vld [vmem:[%s4134_s5 + $0x684] ss:$16 sps:$4 sm:$0xff]   ;;  %v3442_v31 = vld [vmem:[%s4134_s5 + $0x68c] ss:$16 sps:$4 sm:$0xff]  }
 0x12e   : > { %2431 = vmatpush1.bf16.msra.mxu0 %v3347_v32  ;;  %2595 = vmatpush1.bf16.msra.mxu1 %v3350_v33  ;;  %v3437_v32 = vld [vmem:[%s4134_s5 + $0x680] ss:$16 sps:$4 sm:$0xff]   ;;  %v3440_v33 = vld [vmem:[%s4134_s5 + $0x688] ss:$16 sps:$4 sm:$0xff]  }
 0x12f   : > { %2432 = vmatprep.subr.bf16.mxu0 %v3355_v34  ;;  %2596 = vmatprep.subr.bf16.mxu1 %v3358_v35  ;;  %v3445_v34 = vld [vmem:[%s4134_s5 + $0x6a4] ss:$16 sps:$4 sm:$0xff]   ;;  %v3448_v35 = vld [vmem:[%s4134_s5 + $0x6ac] ss:$16 sps:$4 sm:$0xff]  }
 0x132   : > { %2433 = vmatpush1.bf16.msra.mxu0 %v3353_v36  ;;  %2597 = vmatpush1.bf16.msra.mxu1 %v3356_v37  ;;  %v3443_v36 = vld [vmem:[%s4134_s5 + $0x6a0] ss:$16 sps:$4 sm:$0xff]   ;;  %v3446_v37 = vld [vmem:[%s4134_s5 + $0x6a8] ss:$16 sps:$4 sm:$0xff]  }
 0x133   : > { %2434 = vmatprep.subr.bf16.mxu0 %v3361_v38  ;;  %2598 = vmatprep.subr.bf16.mxu1 %v3364_v39  ;;  %v3451_v38 = vld [vmem:[%s4134_s5 + $0x6c4] ss:$16 sps:$4 sm:$0xff]   ;;  %v3454_v39 = vld [vmem:[%s4134_s5 + $0x6cc] ss:$16 sps:$4 sm:$0xff]  }
 0x136   : > { %2435 = vmatpush1.bf16.msra.mxu0 %v3359_v40  ;;  %2599 = vmatpush1.bf16.msra.mxu1 %v3362_v41  ;;  %v3449_v40 = vld [vmem:[%s4134_s5 + $0x6c0] ss:$16 sps:$4 sm:$0xff]   ;;  %v3452_v41 = vld [vmem:[%s4134_s5 + $0x6c8] ss:$16 sps:$4 sm:$0xff]  }
 0x137   : > { %2436 = vmatprep.subr.bf16.mxu0 %v3367_v42  ;;  %2600 = vmatprep.subr.bf16.mxu1 %v3370_v43  ;;  %v3457_v42 = vld [vmem:[%s4134_s5 + $0x6e4] ss:$16 sps:$4 sm:$0xff]   ;;  %v3460_v43 = vld [vmem:[%s4134_s5 + $0x6ec] ss:$16 sps:$4 sm:$0xff]  }
 0x13a   : > { %2437 = vmatpush1.bf16.msra.mxu0 %v3365_v44  ;;  %2601 = vmatpush1.bf16.msra.mxu1 %v3368_v45  ;;  %v3455_v44 = vld [vmem:[%s4134_s5 + $0x6e0] ss:$16 sps:$4 sm:$0xff]   ;;  %v3458_v45 = vld [vmem:[%s4134_s5 + $0x6e8] ss:$16 sps:$4 sm:$0xff]  }
 0x13b   : > { %2438 = vmatprep.subr.bf16.mxu0 %v3373_v46  ;;  %2602 = vmatprep.subr.bf16.mxu1 %v3376_v47  ;;  %v3463_v46 = vld [vmem:[%s4134_s5 + $0x704] ss:$16 sps:$4 sm:$0xff]   ;;  %v3466_v47 = vld [vmem:[%s4134_s5 + $0x70c] ss:$16 sps:$4 sm:$0xff]  }
 0x13e   : > { %2439 = vmatpush1.bf16.msra.mxu0 %v3371_v48  ;;  %2603 = vmatpush1.bf16.msra.mxu1 %v3374_v49  ;;  %v3461_v48 = vld [vmem:[%s4134_s5 + $0x700] ss:$16 sps:$4 sm:$0xff]   ;;  %v3464_v49 = vld [vmem:[%s4134_s5 + $0x708] ss:$16 sps:$4 sm:$0xff]  }
 0x13f   : > { %2440 = vmatprep.subr.bf16.mxu0 %v3379_v50  ;;  %2604 = vmatprep.subr.bf16.mxu1 %v3382_v51  ;;  %v3469_v50 = vld [vmem:[%s4134_s5 + $0x724] ss:$16 sps:$4 sm:$0xff]   ;;  %v3472_v51 = vld [vmem:[%s4134_s5 + $0x72c] ss:$16 sps:$4 sm:$0xff]  }
 0x142   : > { %2441 = vmatpush1.bf16.msra.mxu0 %v3377_v52  ;;  %2605 = vmatpush1.bf16.msra.mxu1 %v3380_v53  ;;  %v3467_v52 = vld [vmem:[%s4134_s5 + $0x720] ss:$16 sps:$4 sm:$0xff]   ;;  %v3470_v53 = vld [vmem:[%s4134_s5 + $0x728] ss:$16 sps:$4 sm:$0xff]  }
 0x143   : > { %2442 = vmatprep.subr.bf16.mxu0 %v3385_v54  ;;  %2606 = vmatprep.subr.bf16.mxu1 %v3388_v55  ;;  %v3475_v54 = vld [vmem:[%s4134_s5 + $0x744] ss:$16 sps:$4 sm:$0xff]   ;;  %v3478_v55 = vld [vmem:[%s4134_s5 + $0x74c] ss:$16 sps:$4 sm:$0xff]  }
 0x146   : > { %2443 = vmatpush1.bf16.msra.mxu0 %v3383_v56  ;;  %2607 = vmatpush1.bf16.msra.mxu1 %v3386_v57  ;;  %v3473_v56 = vld [vmem:[%s4134_s5 + $0x740] ss:$16 sps:$4 sm:$0xff]   ;;  %v3476_v57 = vld [vmem:[%s4134_s5 + $0x748] ss:$16 sps:$4 sm:$0xff]  }
 0x147   : > { %2444 = vmatprep.subr.bf16.mxu0 %v3391_v58  ;;  %2608 = vmatprep.subr.bf16.mxu1 %v3394_v59  ;;  %v3481_v58 = vld [vmem:[%s4134_s5 + $0x764] ss:$16 sps:$4 sm:$0xff]   ;;  %v3484_v59 = vld [vmem:[%s4134_s5 + $0x76c] ss:$16 sps:$4 sm:$0xff]  }
 0x14a   : > { %2445 = vmatpush1.bf16.msra.mxu0 %v3389_v60  ;;  %2609 = vmatpush1.bf16.msra.mxu1 %v3392_v61  ;;  %v3479_v60 = vld [vmem:[%s4134_s5 + $0x760] ss:$16 sps:$4 sm:$0xff]   ;;  %v3482_v61 = vld [vmem:[%s4134_s5 + $0x768] ss:$16 sps:$4 sm:$0xff]  }
 0x14b   : > { %2446 = vmatprep.subr.bf16.mxu0 %v3397_v62  ;;  %2610 = vmatprep.subr.bf16.mxu1 %v3400_v63  ;;  %v3487_v62 = vld [vmem:[%s4134_s5 + $0x784] ss:$16 sps:$4 sm:$0xff]   ;;  %v3490_v63 = vld [vmem:[%s4134_s5 + $0x78c] ss:$16 sps:$4 sm:$0xff]  }
 0x14e   : > { %2447 = vmatpush1.bf16.msra.mxu0 %v3395_v0  ;;  %2611 = vmatpush1.bf16.msra.mxu1 %v3398_v1  ;;  %v3485_v0 = vld [vmem:[%s4134_s5 + $0x780] ss:$16 sps:$4 sm:$0xff]   ;;  %v3488_v1 = vld [vmem:[%s4134_s5 + $0x788] ss:$16 sps:$4 sm:$0xff]  }
 0x14f   : > { %2448 = vmatprep.subr.bf16.mxu0 %v3403_v2  ;;  %2612 = vmatprep.subr.bf16.mxu1 %v3406_v3  ;;  %v3493_v2 = vld [vmem:[%s4134_s5 + $0x7a4] ss:$16 sps:$4 sm:$0xff]   ;;  %v3496_v3 = vld [vmem:[%s4134_s5 + $0x7ac] ss:$16 sps:$4 sm:$0xff]  }
 0x152   : > { %2449 = vmatpush1.bf16.msra.mxu0 %v3401_v4  ;;  %2613 = vmatpush1.bf16.msra.mxu1 %v3404_v5  ;;  %v3491_v4 = vld [vmem:[%s4134_s5 + $0x7a0] ss:$16 sps:$4 sm:$0xff]   ;;  %v3494_v5 = vld [vmem:[%s4134_s5 + $0x7a8] ss:$16 sps:$4 sm:$0xff]  }
 0x153   : > { %2450 = vmatprep.subr.bf16.mxu0 %v3409_v6  ;;  %2614 = vmatprep.subr.bf16.mxu1 %v3412_v7  ;;  %v3499_v6 = vld [vmem:[%s4134_s5 + $0x7c4] ss:$16 sps:$4 sm:$0xff]   ;;  %v3502_v7 = vld [vmem:[%s4134_s5 + $0x7cc] ss:$16 sps:$4 sm:$0xff]  }
 0x156   : > { %2451 = vmatpush1.bf16.msra.mxu0 %v3407_v8  ;;  %2615 = vmatpush1.bf16.msra.mxu1 %v3410_v9  ;;  %v3497_v8 = vld [vmem:[%s4134_s5 + $0x7c0] ss:$16 sps:$4 sm:$0xff]   ;;  %v3500_v9 = vld [vmem:[%s4134_s5 + $0x7c8] ss:$16 sps:$4 sm:$0xff]  }
 0x157   : > { %2461 = vmatprep.subr.bf16.mxu0 %v3415_v11  ;;  %2625 = vmatprep.subr.bf16.mxu1 %v3418_v12  ;;  %v3508_v11 = vld [vmem:[%s4134_s5 + $0x7ec] ss:$16 sps:$4 sm:$0xff]   ;;  %v3503_v12 = vld [vmem:[%s4134_s5 + $0x7e0] ss:$16 sps:$4 sm:$0xff]  }
 0x159   : > { %2453 = vmatmul.mubr.bf16.vlgmr.msra.gmra.mrb[0].mxu0 %v776_v13  ;;  %2617 = vmatmul.mubr.bf16.vlgmr.msra.gmra.mrb[0].mxu1 %v776_v13  ;;  %v3506_v13 = vld [vmem:[%s4134_s5 + $0x7e8] ss:$16 sps:$4 sm:$0xff]   ;;  %s762_s5 = scalar_lea.vmem %s4438_s3, %s2797_s30 }
 0x15a   : > { %2462 = vmatpush1.bf16.msra.mxu0 %v3413_v15  ;;  %2626 = vmatpush1.bf16.msra.mxu1 %v3416_v16  ;;  %v778_v15 = vpack.c.bf16 %v770_v14, %v770_v14  ;;  %v1038_v16 = vlaneseq }
 0x15b   : > { %2463 = vmatprep.subr.bf16.mxu0 %v3421_v17  ;;  %2627 = vmatprep.subr.bf16.mxu1 %v3424_v18 }
 0x15c   : > { %2493 = vmatprep.mubr.bf16.mxu0 %v779_v19  ;;  %2657 = vmatprep.mubr.bf16.mxu1 %v779_v19  ;;  %v1039_v17 = vshrl.u32 %v1038_v16, 7 }
 0x15e   : > { %2464 = vmatpush1.bf16.msra.mxu0 %v3419_v20  ;;  %2628 = vmatpush1.bf16.msra.mxu1 %v3422_v21  ;;  %v1040_v18 = vsub.s32 0, %v1039_v17  ;;  %v1048_v19 = vsub.s32 2, %v1039_v17  ;;  %v1036_v20 = vld [vmem:[%s752_s29] sm:$0xf]  ;;  %v1044_v21 = vsub.s32 1, %v1039_v17 }
 0x15f   : > { %2465 = vmatprep.subr.bf16.mxu0 %v3427_v22  ;;  %2629 = vmatprep.subr.bf16.mxu1 %v3430_v23  ;;  %v1052_v22 = vsub.s32 3, %v1039_v17 }
 0x160   : > { %v1041_v23 = vrot.slane %v1036_v20, %v1040_v18 }
 0x162   : > { %2466 = vmatpush1.bf16.msra.mxu0 %v3425_v24  ;;  %2630 = vmatpush1.bf16.msra.mxu1 %v3428_v25  ;;  %v1049_v24 = vrot.slane %v1036_v20, %v1048_v19  ;;  %v1045_v25 = vrot.slane %v1036_v20, %v1044_v21 }
 0x163   : > { %2467 = vmatprep.subr.bf16.mxu0 %v3433_v26  ;;  %2631 = vmatprep.subr.bf16.mxu1 %v3436_v27  ;;  %v1053_v26 = vrot.slane %v1036_v20, %v1052_v22 }
 0x166   : > { %2468 = vmatpush1.bf16.msra.mxu0 %v3431_v28  ;;  %2632 = vmatpush1.bf16.msra.mxu1 %v3434_v29 }
 0x167   : > { %2469 = vmatprep.subr.bf16.mxu0 %v3439_v30  ;;  %2633 = vmatprep.subr.bf16.mxu1 %v3442_v31 }
 0x16a   : > { %2470 = vmatpush1.bf16.msra.mxu0 %v3437_v32  ;;  %2634 = vmatpush1.bf16.msra.mxu1 %v3440_v33 }
 0x16b   : > { %2471 = vmatprep.subr.bf16.mxu0 %v3445_v34  ;;  %2635 = vmatprep.subr.bf16.mxu1 %v3448_v35 }
 0x16e   : > { %2472 = vmatpush1.bf16.msra.mxu0 %v3443_v36  ;;  %2636 = vmatpush1.bf16.msra.mxu1 %v3446_v37 }
 0x16f   : > { %2473 = vmatprep.subr.bf16.mxu0 %v3451_v38  ;;  %2637 = vmatprep.subr.bf16.mxu1 %v3454_v39 }
 0x172   : > { %2474 = vmatpush1.bf16.msra.mxu0 %v3449_v40  ;;  %2638 = vmatpush1.bf16.msra.mxu1 %v3452_v41 }
 0x173   : > { %2475 = vmatprep.subr.bf16.mxu0 %v3457_v42  ;;  %2639 = vmatprep.subr.bf16.mxu1 %v3460_v43 }
 0x176   : > { %2476 = vmatpush1.bf16.msra.mxu0 %v3455_v44  ;;  %2640 = vmatpush1.bf16.msra.mxu1 %v3458_v45 }
 0x177   : > { %2477 = vmatprep.subr.bf16.mxu0 %v3463_v46  ;;  %2641 = vmatprep.subr.bf16.mxu1 %v3466_v47 }
 0x17a   : > { %2478 = vmatpush1.bf16.msra.mxu0 %v3461_v48  ;;  %2642 = vmatpush1.bf16.msra.mxu1 %v3464_v49 }
 0x17b   : > { %2479 = vmatprep.subr.bf16.mxu0 %v3469_v50  ;;  %2643 = vmatprep.subr.bf16.mxu1 %v3472_v51 }
 0x17e   : > { %2480 = vmatpush1.bf16.msra.mxu0 %v3467_v52  ;;  %2644 = vmatpush1.bf16.msra.mxu1 %v3470_v53 }
 0x17f   : > { %2481 = vmatprep.subr.bf16.mxu0 %v3475_v54  ;;  %2645 = vmatprep.subr.bf16.mxu1 %v3478_v55 }
 0x182   : > { %2482 = vmatpush1.bf16.msra.mxu0 %v3473_v56  ;;  %2646 = vmatpush1.bf16.msra.mxu1 %v3476_v57 }
 0x183   : > { %2483 = vmatprep.subr.bf16.mxu0 %v3481_v58  ;;  %2647 = vmatprep.subr.bf16.mxu1 %v3484_v59 }
 0x186   : > { %2484 = vmatpush1.bf16.msra.mxu0 %v3479_v60  ;;  %2648 = vmatpush1.bf16.msra.mxu1 %v3482_v61 }
 0x187   : > { %2485 = vmatprep.subr.bf16.mxu0 %v3487_v62  ;;  %2649 = vmatprep.subr.bf16.mxu1 %v3490_v63 }
 0x18a   : > { %2486 = vmatpush1.bf16.msra.mxu0 %v3485_v0  ;;  %2650 = vmatpush1.bf16.msra.mxu1 %v3488_v1 }
 0x18b   : > { %2487 = vmatprep.subr.bf16.mxu0 %v3493_v2  ;;  %2651 = vmatprep.subr.bf16.mxu1 %v3496_v3 }
 0x18e   : > { %2488 = vmatpush1.bf16.msra.mxu0 %v3491_v4  ;;  %2652 = vmatpush1.bf16.msra.mxu1 %v3494_v5 }
 0x18f   : > { %2489 = vmatprep.subr.bf16.mxu0 %v3499_v6  ;;  %2653 = vmatprep.subr.bf16.mxu1 %v3502_v7 }
 0x192   : > { %2490 = vmatpush1.bf16.msra.mxu0 %v3497_v8  ;;  %2654 = vmatpush1.bf16.msra.mxu1 %v3500_v9 }
 0x193   : > { %2491 = vmatprep.subr.bf16.mxu0 %v3505_v10  ;;  %2655 = vmatprep.subr.bf16.mxu1 %v3508_v11 }
 0x196   : > { %2492 = vmatpush1.bf16.msra.mxu0 %v3503_v12  ;;  %2656 = vmatpush1.bf16.msra.mxu1 %v3506_v13 }
 0x199   : > { %2494 = vmatmul.mubr.bf16.vlgmr.msra.gmra.mrb[0].mxu0 %v778_v15  ;;  %2658 = vmatmul.mubr.bf16.vlgmr.msra.gmra.mrb[0].mxu1 %v778_v15 }
 0x26c   : > { %v2495_v27 = vpop.f32.mrb[0].mxu0  ;;  %v2659_v28 = vpop.f32.mrb[0].mxu1 }
 0x26d   : > { %v3057_v29 = vadd.f32 %v2495_v27, %v1041_v23  ;;  %v3059_v30 = vadd.f32 %v2659_v28, %v1049_v24  ;;  %v2497_v31 = vpop.f32.mrb[1].mxu0  ;;  %v2661_v32 = vpop.f32.mrb[1].mxu1 }
 0x26e   : > { %v3058_v33 = vadd.f32 %v2497_v31, %v1045_v25  ;;  %v3060_v34 = vadd.f32 %v2661_v32, %v1053_v26  ;;  %v2499_v35 = vpop.f32.mrb[2].mxu0  ;;  %v2663_v36 = vpop.f32.mrb[2].mxu1 }
 0x26f   : > { %v2666_v37 = vmax.f32 %v3057_v29, 0.0  ;;  %v2500_v38 = vpop.f32.mrb[3].mxu0  ;;  %v2664_v39 = vpop.f32.mrb[3].mxu1  ;;  %v2668_v41 = vmax.f32 %v3059_v30, 0.0 }
 0x270   : > { %v2667_v40 = vmax.f32 %v3058_v33, 0.0  ;;  %v2669_v42 = vmax.f32 %v3060_v34, 0.0 }
 0x271   : > { %2670 = vst [vmem:[%s762_s5] sm:$0xff] %v2666_v37  ;;  %2672 = vst [vmem:[%s762_s5 + $0x10] sm:$0xff] %v2668_v41 }
 0x272   : > { %2671 = vst [vmem:[%s762_s5 + $0x8] sm:$0xff] %v2667_v40  ;;  %2673 = vst [vmem:[%s762_s5 + $0x18] sm:$0xff] %v2669_v42 }
 0x273 PF: > { %s13_s16 = sadd.s32 1, %s3547_s16   ;;  %s4439_s12 = smov %s3535_s13 }
 0x274   : > { %p10_p10 = scmp.ge.s32.totalorder %s13_s16, 4   ;;  %s4440_s13 = smov %s3604_s20 }
 0x275   : > { %s4441_s14 = smov %s3543_s15  ;;  %s4442_s15 = smov %s4444_s17 }
 0x276   :  { %12 = sbr.rel (!%p10_p10) target bundleno = 3 (0x3), region = 96 }

// kernel: projector_forward.7
= control target key start
LH: loop header
LB: loop body
LE: loop exit
PB: predicated region body
PF: predicated region fallthrough
CT: control target
= control target key end

     0   :  { %8 = vsyncpa [#allocation4], 0  ;;  %s4544_s0 = inlined_call_operand.vmem [shape: f32[8,1024], index: 0, kind: input, shape index: {}]   ;;  %s4545_s1 = inlined_call_operand.vmem [shape: bf16[1024,1024], index: 1, kind: input, shape index: {}]   ;;  %s4546_s2 = inlined_call_operand.vmem [shape: f32[1,1024], index: 2, kind: input, shape index: {}]   ;;  %s4547_s3 = inlined_call_operand.hbm [shape: f32[8,1024], index: 3, kind: output, shape index: {}]  }
   0x1   :  { %10 = vsyncpa [#allocation4 + $0x1], 0  ;;  %s3620_s12 = smov 0   ;;  %s3622_s13 = smov 0  }
   0x2   :  { %s3624_s14 = smov 0   ;;  %s3626_s15 = smov 0  }
   0x3   :  { %s3628_s16 = smov 0   ;;  %s3630_s17 = smov 0  }
   0x4 LB: > { %s2777_s18 = sadd.s32 4294967295, %s3597_s17   ;;  %s2778_s19 = sadd.s32 4294967294, %s3597_s17   ;;  %s3597_s17 = sphi %s3630_s17, %s16_s17   ;;  %s3593_s16 = sphi %s3628_s16, %s4554_s16   ;;  %s3589_s15 = sphi %s3626_s15, %s4553_s15   ;;  %s3585_s14 = sphi %s3624_s14, %s4552_s14   ;;  %s3581_s13 = sphi %s3622_s13, %s4551_s13   ;;  %s3577_s12 = sphi %s3620_s12, %s4550_s12  }
   0x5   : > { %s25_s20 = sadd.s32 1, %s3593_s16  ;;  %s61_s21 = sadd.s32 1, %s3585_s14 }
   0x6   : > { %p26_p0 = scmp.ge.s32.totalorder %s25_s20, 2  ;;  %p68_p1 = scmp.ne.s32.totalorder %s3585_s14, %s3581_s13 }
   0x7   : > { %p69_p2 = scmp.eq.s32.totalorder %s3597_s17, 0  ;;  %p126_p3 = scmp.eq.s32.totalorder %s2777_s18, 1 }
   0x8   : > { %s4556_s20 = smov (%p26_p0, %s25_s20), 0  ;;  %p131_p6 = scmp.ne.s32.totalorder %s3581_s13, %s3577_s12 }
   0x9   : > { %p70_p4 = por %p69_p2, %p68_p1  ;;  %p3659_p5 = por %p126_p3, %p68_p1 }
   0xa   : > { %s58_s23 = ssub.s32 %s3593_s16, %s4556_s20  ;;  %p132_p8 = scmp.eq.s32.totalorder %s2778_s19, 1 }
   0xb   : > { %p59_p7 = scmp.eq.s32.totalorder %s58_s23, 0  ;;  %p2781_p10 = scmp.ge.s32.totalorder %s3597_s17, 2 }
   0xc   : > { %p3670_p9 = por %p132_p8, %p131_p6 }
   0xd   : > { %s3668_s24 = scalar_select %p59_p7, %s3585_s14, %s61_s21  }
   0xe   : > { %156 = sbr.rel (%p2781_p10) target bundleno = 153 (0x99), region = 20 }
  0x15   : > { %159 = sbr.rel (!%p70_p4) target bundleno = 153 (0x99), region = 24  ;;  %s161_s26 = sand.u32 (%p70_p4), 1, %s3585_s14  }
  0x16   : > { %s3050_s27 = sshll.u32 (%p70_p4), %s3593_s16, 4  ;;  %s2782_s28 = sshll.u32 (%p70_p4), %s161_s26, 11 }
  0x17   : > { %s3682_s4 = scalar_lea.vmem (%p70_p4), %s4545_s1, %s3050_s27  ;;  %s3687_s5 = scalar_lea.vmem (%p70_p4), [#allocation2], %s2782_s28 }
  0x18   : > { %v179_v0 = vld [vmem:[%s3682_s4] sm:$0xff] (%p70_p4)  ;;  %v181_v1 = vld [vmem:[%s3682_s4 + $0x8] sm:$0xff] (%p70_p4) }
  0x19   : > { %v183_v2 = vld [vmem:[%s3682_s4 + $0x20] sm:$0xff] (%p70_p4)  ;;  %180 = vst [vmem:[%s3687_s5] sm:$0xff] (%p70_p4), %v179_v0  ;;  %182 = vst [vmem:[%s3687_s5 + $0x8] sm:$0xff] (%p70_p4), %v181_v1  ;;  %v185_v3 = vld [vmem:[%s3682_s4 + $0x28] sm:$0xff] (%p70_p4) }
  0x1a   : > { %184 = vst [vmem:[%s3687_s5 + $0x10] sm:$0xff] (%p70_p4), %v183_v2  ;;  %v187_v4 = vld [vmem:[%s3682_s4 + $0x40] sm:$0xff] (%p70_p4)  ;;  %v189_v5 = vld [vmem:[%s3682_s4 + $0x48] sm:$0xff] (%p70_p4)  ;;  %186 = vst [vmem:[%s3687_s5 + $0x18] sm:$0xff] (%p70_p4), %v185_v3 }
  0x1b   : > { %188 = vst [vmem:[%s3687_s5 + $0x20] sm:$0xff] (%p70_p4), %v187_v4  ;;  %190 = vst [vmem:[%s3687_s5 + $0x28] sm:$0xff] (%p70_p4), %v189_v5  ;;  %v191_v6 = vld [vmem:[%s3682_s4 + $0x60] sm:$0xff] (%p70_p4)  ;;  %v193_v7 = vld [vmem:[%s3682_s4 + $0x68] sm:$0xff] (%p70_p4) }
  0x1c   : > { %v195_v8 = vld [vmem:[%s3682_s4 + $0x80] sm:$0xff]  ;;  %192 = vst [vmem:[%s3687_s5 + $0x30] sm:$0xff] %v191_v6  ;;  %194 = vst [vmem:[%s3687_s5 + $0x38] sm:$0xff] %v193_v7  ;;  %v197_v9 = vld [vmem:[%s3682_s4 + $0x88] sm:$0xff] }
  0x1d   : > { %196 = vst [vmem:[%s3687_s5 + $0x40] sm:$0xff] %v195_v8  ;;  %v199_v10 = vld [vmem:[%s3682_s4 + $0xa0] sm:$0xff]  ;;  %v201_v11 = vld [vmem:[%s3682_s4 + $0xa8] sm:$0xff]  ;;  %198 = vst [vmem:[%s3687_s5 + $0x48] sm:$0xff] %v197_v9 }
  0x1e   : > { %200 = vst [vmem:[%s3687_s5 + $0x50] sm:$0xff] %v199_v10  ;;  %202 = vst [vmem:[%s3687_s5 + $0x58] sm:$0xff] %v201_v11  ;;  %v203_v12 = vld [vmem:[%s3682_s4 + $0xc0] sm:$0xff]  ;;  %v205_v13 = vld [vmem:[%s3682_s4 + $0xc8] sm:$0xff] }
  0x1f   : > { %v207_v14 = vld [vmem:[%s3682_s4 + $0xe0] sm:$0xff]  ;;  %204 = vst [vmem:[%s3687_s5 + $0x60] sm:$0xff] %v203_v12  ;;  %206 = vst [vmem:[%s3687_s5 + $0x68] sm:$0xff] %v205_v13  ;;  %v209_v15 = vld [vmem:[%s3682_s4 + $0xe8] sm:$0xff] }
  0x20   : > { %208 = vst [vmem:[%s3687_s5 + $0x70] sm:$0xff] %v207_v14  ;;  %v211_v16 = vld [vmem:[%s3682_s4 + $0x100] sm:$0xff]  ;;  %v213_v17 = vld [vmem:[%s3682_s4 + $0x108] sm:$0xff]  ;;  %210 = vst [vmem:[%s3687_s5 + $0x78] sm:$0xff] %v209_v15 }
  0x21   : > { %212 = vst [vmem:[%s3687_s5 + $0x80] sm:$0xff] %v211_v16  ;;  %214 = vst [vmem:[%s3687_s5 + $0x88] sm:$0xff] %v213_v17  ;;  %v215_v18 = vld [vmem:[%s3682_s4 + $0x120] sm:$0xff]  ;;  %v217_v19 = vld [vmem:[%s3682_s4 + $0x128] sm:$0xff] }
  0x22   : > { %v219_v20 = vld [vmem:[%s3682_s4 + $0x140] sm:$0xff]  ;;  %216 = vst [vmem:[%s3687_s5 + $0x90] sm:$0xff] %v215_v18  ;;  %218 = vst [vmem:[%s3687_s5 + $0x98] sm:$0xff] %v217_v19  ;;  %v221_v21 = vld [vmem:[%s3682_s4 + $0x148] sm:$0xff] }
  0x23   : > { %220 = vst [vmem:[%s3687_s5 + $0xa0] sm:$0xff] %v219_v20  ;;  %v223_v22 = vld [vmem:[%s3682_s4 + $0x160] sm:$0xff]  ;;  %v225_v23 = vld [vmem:[%s3682_s4 + $0x168] sm:$0xff]  ;;  %222 = vst [vmem:[%s3687_s5 + $0xa8] sm:$0xff] %v221_v21 }
  0x24   : > { %224 = vst [vmem:[%s3687_s5 + $0xb0] sm:$0xff] %v223_v22  ;;  %226 = vst [vmem:[%s3687_s5 + $0xb8] sm:$0xff] %v225_v23  ;;  %v227_v24 = vld [vmem:[%s3682_s4 + $0x180] sm:$0xff]  ;;  %v229_v25 = vld [vmem:[%s3682_s4 + $0x188] sm:$0xff] }
  0x25   : > { %v231_v26 = vld [vmem:[%s3682_s4 + $0x1a0] sm:$0xff]  ;;  %228 = vst [vmem:[%s3687_s5 + $0xc0] sm:$0xff] %v227_v24  ;;  %230 = vst [vmem:[%s3687_s5 + $0xc8] sm:$0xff] %v229_v25  ;;  %v233_v27 = vld [vmem:[%s3682_s4 + $0x1a8] sm:$0xff] }
  0x26   : > { %232 = vst [vmem:[%s3687_s5 + $0xd0] sm:$0xff] %v231_v26  ;;  %v235_v28 = vld [vmem:[%s3682_s4 + $0x1c0] sm:$0xff]  ;;  %v237_v29 = vld [vmem:[%s3682_s4 + $0x1c8] sm:$0xff]  ;;  %234 = vst [vmem:[%s3687_s5 + $0xd8] sm:$0xff] %v233_v27 }
  0x27   : > { %236 = vst [vmem:[%s3687_s5 + $0xe0] sm:$0xff] %v235_v28  ;;  %238 = vst [vmem:[%s3687_s5 + $0xe8] sm:$0xff] %v237_v29  ;;  %v239_v30 = vld [vmem:[%s3682_s4 + $0x1e0] sm:$0xff]  ;;  %v241_v31 = vld [vmem:[%s3682_s4 + $0x1e8] sm:$0xff] }
  0x28   : > { %v243_v32 = vld [vmem:[%s3682_s4 + $0x200] sm:$0xff]  ;;  %240 = vst [vmem:[%s3687_s5 + $0xf0] sm:$0xff] %v239_v30  ;;  %242 = vst [vmem:[%s3687_s5 + $0xf8] sm:$0xff] %v241_v31  ;;  %v245_v33 = vld [vmem:[%s3682_s4 + $0x208] sm:$0xff] }
  0x29   : > { %244 = vst [vmem:[%s3687_s5 + $0x100] sm:$0xff] %v243_v32  ;;  %v247_v34 = vld [vmem:[%s3682_s4 + $0x220] sm:$0xff]  ;;  %v249_v35 = vld [vmem:[%s3682_s4 + $0x228] sm:$0xff]  ;;  %246 = vst [vmem:[%s3687_s5 + $0x108] sm:$0xff] %v245_v33 }
  0x2a   : > { %248 = vst [vmem:[%s3687_s5 + $0x110] sm:$0xff] %v247_v34  ;;  %250 = vst [vmem:[%s3687_s5 + $0x118] sm:$0xff] %v249_v35  ;;  %v251_v36 = vld [vmem:[%s3682_s4 + $0x240] sm:$0xff]  ;;  %v253_v37 = vld [vmem:[%s3682_s4 + $0x248] sm:$0xff] }
  0x2b   : > { %v255_v38 = vld [vmem:[%s3682_s4 + $0x260] sm:$0xff]  ;;  %252 = vst [vmem:[%s3687_s5 + $0x120] sm:$0xff] %v251_v36  ;;  %254 = vst [vmem:[%s3687_s5 + $0x128] sm:$0xff] %v253_v37  ;;  %v257_v39 = vld [vmem:[%s3682_s4 + $0x268] sm:$0xff] }
  0x2c   : > { %256 = vst [vmem:[%s3687_s5 + $0x130] sm:$0xff] %v255_v38  ;;  %v259_v40 = vld [vmem:[%s3682_s4 + $0x280] sm:$0xff]  ;;  %v261_v41 = vld [vmem:[%s3682_s4 + $0x288] sm:$0xff]  ;;  %258 = vst [vmem:[%s3687_s5 + $0x138] sm:$0xff] %v257_v39 }
  0x2d   : > { %260 = vst [vmem:[%s3687_s5 + $0x140] sm:$0xff] %v259_v40  ;;  %262 = vst [vmem:[%s3687_s5 + $0x148] sm:$0xff] %v261_v41  ;;  %v263_v42 = vld [vmem:[%s3682_s4 + $0x2a0] sm:$0xff]  ;;  %v265_v43 = vld [vmem:[%s3682_s4 + $0x2a8] sm:$0xff] }
  0x2e   : > { %v267_v44 = vld [vmem:[%s3682_s4 + $0x2c0] sm:$0xff]  ;;  %264 = vst [vmem:[%s3687_s5 + $0x150] sm:$0xff] %v263_v42  ;;  %266 = vst [vmem:[%s3687_s5 + $0x158] sm:$0xff] %v265_v43  ;;  %v269_v45 = vld [vmem:[%s3682_s4 + $0x2c8] sm:$0xff] }
  0x2f   : > { %268 = vst [vmem:[%s3687_s5 + $0x160] sm:$0xff] %v267_v44  ;;  %v271_v46 = vld [vmem:[%s3682_s4 + $0x2e0] sm:$0xff]  ;;  %v273_v47 = vld [vmem:[%s3682_s4 + $0x2e8] sm:$0xff]  ;;  %270 = vst [vmem:[%s3687_s5 + $0x168] sm:$0xff] %v269_v45 }
  0x30   : > { %272 = vst [vmem:[%s3687_s5 + $0x170] sm:$0xff] %v271_v46  ;;  %274 = vst [vmem:[%s3687_s5 + $0x178] sm:$0xff] %v273_v47  ;;  %v275_v48 = vld [vmem:[%s3682_s4 + $0x300] sm:$0xff]  ;;  %v277_v49 = vld [vmem:[%s3682_s4 + $0x308] sm:$0xff] }
  0x31   : > { %v279_v50 = vld [vmem:[%s3682_s4 + $0x320] sm:$0xff]  ;;  %276 = vst [vmem:[%s3687_s5 + $0x180] sm:$0xff] %v275_v48  ;;  %278 = vst [vmem:[%s3687_s5 + $0x188] sm:$0xff] %v277_v49  ;;  %v281_v51 = vld [vmem:[%s3682_s4 + $0x328] sm:$0xff] }
  0x32   : > { %280 = vst [vmem:[%s3687_s5 + $0x190] sm:$0xff] %v279_v50  ;;  %v283_v52 = vld [vmem:[%s3682_s4 + $0x340] sm:$0xff]  ;;  %v285_v53 = vld [vmem:[%s3682_s4 + $0x348] sm:$0xff]  ;;  %282 = vst [vmem:[%s3687_s5 + $0x198] sm:$0xff] %v281_v51 }
  0x33   : > { %284 = vst [vmem:[%s3687_s5 + $0x1a0] sm:$0xff] %v283_v52  ;;  %286 = vst [vmem:[%s3687_s5 + $0x1a8] sm:$0xff] %v285_v53  ;;  %v287_v54 = vld [vmem:[%s3682_s4 + $0x360] sm:$0xff]  ;;  %v289_v55 = vld [vmem:[%s3682_s4 + $0x368] sm:$0xff] }
  0x34   : > { %v291_v56 = vld [vmem:[%s3682_s4 + $0x380] sm:$0xff]  ;;  %288 = vst [vmem:[%s3687_s5 + $0x1b0] sm:$0xff] %v287_v54  ;;  %290 = vst [vmem:[%s3687_s5 + $0x1b8] sm:$0xff] %v289_v55  ;;  %v293_v57 = vld [vmem:[%s3682_s4 + $0x388] sm:$0xff] }
  0x35   : > { %292 = vst [vmem:[%s3687_s5 + $0x1c0] sm:$0xff] %v291_v56  ;;  %v295_v58 = vld [vmem:[%s3682_s4 + $0x3a0] sm:$0xff]  ;;  %v297_v59 = vld [vmem:[%s3682_s4 + $0x3a8] sm:$0xff]  ;;  %294 = vst [vmem:[%s3687_s5 + $0x1c8] sm:$0xff] %v293_v57 }
  0x36   : > { %296 = vst [vmem:[%s3687_s5 + $0x1d0] sm:$0xff] %v295_v58  ;;  %298 = vst [vmem:[%s3687_s5 + $0x1d8] sm:$0xff] %v297_v59  ;;  %v299_v60 = vld [vmem:[%s3682_s4 + $0x3c0] sm:$0xff]  ;;  %v301_v61 = vld [vmem:[%s3682_s4 + $0x3c8] sm:$0xff] }
  0x37   : > { %v303_v62 = vld [vmem:[%s3682_s4 + $0x3e0] sm:$0xff]  ;;  %300 = vst [vmem:[%s3687_s5 + $0x1e0] sm:$0xff] %v299_v60  ;;  %302 = vst [vmem:[%s3687_s5 + $0x1e8] sm:$0xff] %v301_v61  ;;  %v305_v63 = vld [vmem:[%s3682_s4 + $0x3e8] sm:$0xff] }
  0x38   : > { %304 = vst [vmem:[%s3687_s5 + $0x1f0] sm:$0xff] %v303_v62  ;;  %v307_v0 = vld [vmem:[%s3682_s4 + $0x400] sm:$0xff]  ;;  %v309_v1 = vld [vmem:[%s3682_s4 + $0x408] sm:$0xff]  ;;  %306 = vst [vmem:[%s3687_s5 + $0x1f8] sm:$0xff] %v305_v63 }
  0x39   : > { %308 = vst [vmem:[%s3687_s5 + $0x200] sm:$0xff] %v307_v0  ;;  %310 = vst [vmem:[%s3687_s5 + $0x208] sm:$0xff] %v309_v1  ;;  %v311_v2 = vld [vmem:[%s3682_s4 + $0x420] sm:$0xff]  ;;  %v313_v3 = vld [vmem:[%s3682_s4 + $0x428] sm:$0xff] }
  0x3a   : > { %v315_v4 = vld [vmem:[%s3682_s4 + $0x440] sm:$0xff]  ;;  %312 = vst [vmem:[%s3687_s5 + $0x210] sm:$0xff] %v311_v2  ;;  %314 = vst [vmem:[%s3687_s5 + $0x218] sm:$0xff] %v313_v3  ;;  %v317_v5 = vld [vmem:[%s3682_s4 + $0x448] sm:$0xff] }
  0x3b   : > { %316 = vst [vmem:[%s3687_s5 + $0x220] sm:$0xff] %v315_v4  ;;  %v319_v6 = vld [vmem:[%s3682_s4 + $0x460] sm:$0xff]  ;;  %v321_v7 = vld [vmem:[%s3682_s4 + $0x468] sm:$0xff]  ;;  %318 = vst [vmem:[%s3687_s5 + $0x228] sm:$0xff] %v317_v5 }
  0x3c   : > { %320 = vst [vmem:[%s3687_s5 + $0x230] sm:$0xff] %v319_v6  ;;  %322 = vst [vmem:[%s3687_s5 + $0x238] sm:$0xff] %v321_v7  ;;  %v323_v8 = vld [vmem:[%s3682_s4 + $0x480] sm:$0xff]  ;;  %v325_v9 = vld [vmem:[%s3682_s4 + $0x488] sm:$0xff] }
  0x3d   : > { %v327_v10 = vld [vmem:[%s3682_s4 + $0x4a0] sm:$0xff]  ;;  %324 = vst [vmem:[%s3687_s5 + $0x240] sm:$0xff] %v323_v8  ;;  %326 = vst [vmem:[%s3687_s5 + $0x248] sm:$0xff] %v325_v9  ;;  %v329_v11 = vld [vmem:[%s3682_s4 + $0x4a8] sm:$0xff] }
  0x3e   : > { %328 = vst [vmem:[%s3687_s5 + $0x250] sm:$0xff] %v327_v10  ;;  %v331_v12 = vld [vmem:[%s3682_s4 + $0x4c0] sm:$0xff]  ;;  %v333_v13 = vld [vmem:[%s3682_s4 + $0x4c8] sm:$0xff]  ;;  %330 = vst [vmem:[%s3687_s5 + $0x258] sm:$0xff] %v329_v11 }
  0x3f   : > { %332 = vst [vmem:[%s3687_s5 + $0x260] sm:$0xff] %v331_v12  ;;  %334 = vst [vmem:[%s3687_s5 + $0x268] sm:$0xff] %v333_v13  ;;  %v335_v14 = vld [vmem:[%s3682_s4 + $0x4e0] sm:$0xff]  ;;  %v337_v15 = vld [vmem:[%s3682_s4 + $0x4e8] sm:$0xff] }
  0x40   : > { %v339_v16 = vld [vmem:[%s3682_s4 + $0x500] sm:$0xff]  ;;  %336 = vst [vmem:[%s3687_s5 + $0x270] sm:$0xff] %v335_v14  ;;  %338 = vst [vmem:[%s3687_s5 + $0x278] sm:$0xff] %v337_v15  ;;  %v341_v17 = vld [vmem:[%s3682_s4 + $0x508] sm:$0xff] }
  0x41   : > { %340 = vst [vmem:[%s3687_s5 + $0x280] sm:$0xff] %v339_v16  ;;  %v343_v18 = vld [vmem:[%s3682_s4 + $0x520] sm:$0xff]  ;;  %v345_v19 = vld [vmem:[%s3682_s4 + $0x528] sm:$0xff]  ;;  %342 = vst [vmem:[%s3687_s5 + $0x288] sm:$0xff] %v341_v17 }
  0x42   : > { %344 = vst [vmem:[%s3687_s5 + $0x290] sm:$0xff] %v343_v18  ;;  %346 = vst [vmem:[%s3687_s5 + $0x298] sm:$0xff] %v345_v19  ;;  %v347_v20 = vld [vmem:[%s3682_s4 + $0x540] sm:$0xff]  ;;  %v349_v21 = vld [vmem:[%s3682_s4 + $0x548] sm:$0xff] }
  0x43   : > { %v351_v22 = vld [vmem:[%s3682_s4 + $0x560] sm:$0xff]  ;;  %348 = vst [vmem:[%s3687_s5 + $0x2a0] sm:$0xff] %v347_v20  ;;  %350 = vst [vmem:[%s3687_s5 + $0x2a8] sm:$0xff] %v349_v21  ;;  %v353_v23 = vld [vmem:[%s3682_s4 + $0x568] sm:$0xff] }
  0x44   : > { %352 = vst [vmem:[%s3687_s5 + $0x2b0] sm:$0xff] %v351_v22  ;;  %v355_v24 = vld [vmem:[%s3682_s4 + $0x580] sm:$0xff]  ;;  %v357_v25 = vld [vmem:[%s3682_s4 + $0x588] sm:$0xff]  ;;  %354 = vst [vmem:[%s3687_s5 + $0x2b8] sm:$0xff] %v353_v23 }
  0x45   : > { %356 = vst [vmem:[%s3687_s5 + $0x2c0] sm:$0xff] %v355_v24  ;;  %358 = vst [vmem:[%s3687_s5 + $0x2c8] sm:$0xff] %v357_v25  ;;  %v359_v26 = vld [vmem:[%s3682_s4 + $0x5a0] sm:$0xff]  ;;  %v361_v27 = vld [vmem:[%s3682_s4 + $0x5a8] sm:$0xff] }
  0x46   : > { %v363_v28 = vld [vmem:[%s3682_s4 + $0x5c0] sm:$0xff]  ;;  %360 = vst [vmem:[%s3687_s5 + $0x2d0] sm:$0xff] %v359_v26  ;;  %362 = vst [vmem:[%s3687_s5 + $0x2d8] sm:$0xff] %v361_v27  ;;  %v365_v29 = vld [vmem:[%s3682_s4 + $0x5c8] sm:$0xff] }
  0x47   : > { %364 = vst [vmem:[%s3687_s5 + $0x2e0] sm:$0xff] %v363_v28  ;;  %v367_v30 = vld [vmem:[%s3682_s4 + $0x5e0] sm:$0xff]  ;;  %v369_v31 = vld [vmem:[%s3682_s4 + $0x5e8] sm:$0xff]  ;;  %366 = vst [vmem:[%s3687_s5 + $0x2e8] sm:$0xff] %v365_v29 }
  0x48   : > { %368 = vst [vmem:[%s3687_s5 + $0x2f0] sm:$0xff] %v367_v30  ;;  %370 = vst [vmem:[%s3687_s5 + $0x2f8] sm:$0xff] %v369_v31  ;;  %v371_v32 = vld [vmem:[%s3682_s4 + $0x600] sm:$0xff]  ;;  %v373_v33 = vld [vmem:[%s3682_s4 + $0x608] sm:$0xff] }
  0x49   : > { %v375_v34 = vld [vmem:[%s3682_s4 + $0x620] sm:$0xff]  ;;  %372 = vst [vmem:[%s3687_s5 + $0x300] sm:$0xff] %v371_v32  ;;  %374 = vst [vmem:[%s3687_s5 + $0x308] sm:$0xff] %v373_v33  ;;  %v377_v35 = vld [vmem:[%s3682_s4 + $0x628] sm:$0xff] }
  0x4a   : > { %376 = vst [vmem:[%s3687_s5 + $0x310] sm:$0xff] %v375_v34  ;;  %v379_v36 = vld [vmem:[%s3682_s4 + $0x640] sm:$0xff]  ;;  %v381_v37 = vld [vmem:[%s3682_s4 + $0x648] sm:$0xff]  ;;  %378 = vst [vmem:[%s3687_s5 + $0x318] sm:$0xff] %v377_v35 }
  0x4b   : > { %380 = vst [vmem:[%s3687_s5 + $0x320] sm:$0xff] %v379_v36  ;;  %382 = vst [vmem:[%s3687_s5 + $0x328] sm:$0xff] %v381_v37  ;;  %v383_v38 = vld [vmem:[%s3682_s4 + $0x660] sm:$0xff]  ;;  %v385_v39 = vld [vmem:[%s3682_s4 + $0x668] sm:$0xff] }
  0x4c   : > { %v387_v40 = vld [vmem:[%s3682_s4 + $0x680] sm:$0xff]  ;;  %384 = vst [vmem:[%s3687_s5 + $0x330] sm:$0xff] %v383_v38  ;;  %386 = vst [vmem:[%s3687_s5 + $0x338] sm:$0xff] %v385_v39  ;;  %v389_v41 = vld [vmem:[%s3682_s4 + $0x688] sm:$0xff] }
  0x4d   : > { %388 = vst [vmem:[%s3687_s5 + $0x340] sm:$0xff] %v387_v40  ;;  %v391_v42 = vld [vmem:[%s3682_s4 + $0x6a0] sm:$0xff]  ;;  %v393_v43 = vld [vmem:[%s3682_s4 + $0x6a8] sm:$0xff]  ;;  %390 = vst [vmem:[%s3687_s5 + $0x348] sm:$0xff] %v389_v41 }
  0x4e   : > { %392 = vst [vmem:[%s3687_s5 + $0x350] sm:$0xff] %v391_v42  ;;  %394 = vst [vmem:[%s3687_s5 + $0x358] sm:$0xff] %v393_v43  ;;  %v395_v44 = vld [vmem:[%s3682_s4 + $0x6c0] sm:$0xff]  ;;  %v397_v45 = vld [vmem:[%s3682_s4 + $0x6c8] sm:$0xff] }
  0x4f   : > { %v399_v46 = vld [vmem:[%s3682_s4 + $0x6e0] sm:$0xff]  ;;  %396 = vst [vmem:[%s3687_s5 + $0x360] sm:$0xff] %v395_v44  ;;  %398 = vst [vmem:[%s3687_s5 + $0x368] sm:$0xff] %v397_v45  ;;  %v401_v47 = vld [vmem:[%s3682_s4 + $0x6e8] sm:$0xff] }
  0x50   : > { %400 = vst [vmem:[%s3687_s5 + $0x370] sm:$0xff] %v399_v46  ;;  %v403_v48 = vld [vmem:[%s3682_s4 + $0x700] sm:$0xff]  ;;  %v405_v49 = vld [vmem:[%s3682_s4 + $0x708] sm:$0xff]  ;;  %402 = vst [vmem:[%s3687_s5 + $0x378] sm:$0xff] %v401_v47 }
  0x51   : > { %404 = vst [vmem:[%s3687_s5 + $0x380] sm:$0xff] %v403_v48  ;;  %406 = vst [vmem:[%s3687_s5 + $0x388] sm:$0xff] %v405_v49  ;;  %v407_v50 = vld [vmem:[%s3682_s4 + $0x720] sm:$0xff]  ;;  %v409_v51 = vld [vmem:[%s3682_s4 + $0x728] sm:$0xff] }
  0x52   : > { %v411_v52 = vld [vmem:[%s3682_s4 + $0x740] sm:$0xff]  ;;  %408 = vst [vmem:[%s3687_s5 + $0x390] sm:$0xff] %v407_v50  ;;  %410 = vst [vmem:[%s3687_s5 + $0x398] sm:$0xff] %v409_v51  ;;  %v413_v53 = vld [vmem:[%s3682_s4 + $0x748] sm:$0xff] }
  0x53   : > { %412 = vst [vmem:[%s3687_s5 + $0x3a0] sm:$0xff] %v411_v52  ;;  %v415_v54 = vld [vmem:[%s3682_s4 + $0x760] sm:$0xff]  ;;  %v417_v55 = vld [vmem:[%s3682_s4 + $0x768] sm:$0xff]  ;;  %414 = vst [vmem:[%s3687_s5 + $0x3a8] sm:$0xff] %v413_v53 }
  0x54   : > { %416 = vst [vmem:[%s3687_s5 + $0x3b0] sm:$0xff] %v415_v54  ;;  %418 = vst [vmem:[%s3687_s5 + $0x3b8] sm:$0xff] %v417_v55  ;;  %v419_v56 = vld [vmem:[%s3682_s4 + $0x780] sm:$0xff]  ;;  %v421_v57 = vld [vmem:[%s3682_s4 + $0x788] sm:$0xff] }
  0x55   : > { %v423_v58 = vld [vmem:[%s3682_s4 + $0x7a0] sm:$0xff]  ;;  %420 = vst [vmem:[%s3687_s5 + $0x3c0] sm:$0xff] %v419_v56  ;;  %422 = vst [vmem:[%s3687_s5 + $0x3c8] sm:$0xff] %v421_v57  ;;  %v425_v59 = vld [vmem:[%s3682_s4 + $0x7a8] sm:$0xff] }
  0x56   : > { %424 = vst [vmem:[%s3687_s5 + $0x3d0] sm:$0xff] %v423_v58  ;;  %v427_v60 = vld [vmem:[%s3682_s4 + $0x7c0] sm:$0xff]  ;;  %v429_v61 = vld [vmem:[%s3682_s4 + $0x7c8] sm:$0xff]  ;;  %426 = vst [vmem:[%s3687_s5 + $0x3d8] sm:$0xff] %v425_v59 }
  0x57   : > { %428 = vst [vmem:[%s3687_s5 + $0x3e0] sm:$0xff] %v427_v60  ;;  %430 = vst [vmem:[%s3687_s5 + $0x3e8] sm:$0xff] %v429_v61  ;;  %v431_v62 = vld [vmem:[%s3682_s4 + $0x7e0] sm:$0xff]  ;;  %v433_v63 = vld [vmem:[%s3682_s4 + $0x7e8] sm:$0xff] }
  0x58   : > { %v435_v0 = vld [vmem:[%s3682_s4 + $0x800] sm:$0xff]  ;;  %432 = vst [vmem:[%s3687_s5 + $0x3f0] sm:$0xff] %v431_v62  ;;  %434 = vst [vmem:[%s3687_s5 + $0x3f8] sm:$0xff] %v433_v63  ;;  %v437_v1 = vld [vmem:[%s3682_s4 + $0x808] sm:$0xff] }
  0x59   : > { %436 = vst [vmem:[%s3687_s5 + $0x400] sm:$0xff] %v435_v0  ;;  %v439_v2 = vld [vmem:[%s3682_s4 + $0x820] sm:$0xff]  ;;  %v441_v3 = vld [vmem:[%s3682_s4 + $0x828] sm:$0xff]  ;;  %438 = vst [vmem:[%s3687_s5 + $0x408] sm:$0xff] %v437_v1 }
  0x5a   : > { %440 = vst [vmem:[%s3687_s5 + $0x410] sm:$0xff] %v439_v2  ;;  %442 = vst [vmem:[%s3687_s5 + $0x418] sm:$0xff] %v441_v3  ;;  %v443_v4 = vld [vmem:[%s3682_s4 + $0x840] sm:$0xff]  ;;  %v445_v5 = vld [vmem:[%s3682_s4 + $0x848] sm:$0xff] }
  0x5b   : > { %v447_v6 = vld [vmem:[%s3682_s4 + $0x860] sm:$0xff]  ;;  %444 = vst [vmem:[%s3687_s5 + $0x420] sm:$0xff] %v443_v4  ;;  %446 = vst [vmem:[%s3687_s5 + $0x428] sm:$0xff] %v445_v5  ;;  %v449_v7 = vld [vmem:[%s3682_s4 + $0x868] sm:$0xff] }
  0x5c   : > { %448 = vst [vmem:[%s3687_s5 + $0x430] sm:$0xff] %v447_v6  ;;  %v451_v8 = vld [vmem:[%s3682_s4 + $0x880] sm:$0xff]  ;;  %v453_v9 = vld [vmem:[%s3682_s4 + $0x888] sm:$0xff]  ;;  %450 = vst [vmem:[%s3687_s5 + $0x438] sm:$0xff] %v449_v7 }
  0x5d   : > { %452 = vst [vmem:[%s3687_s5 + $0x440] sm:$0xff] %v451_v8  ;;  %454 = vst [vmem:[%s3687_s5 + $0x448] sm:$0xff] %v453_v9  ;;  %v455_v10 = vld [vmem:[%s3682_s4 + $0x8a0] sm:$0xff]  ;;  %v457_v11 = vld [vmem:[%s3682_s4 + $0x8a8] sm:$0xff] }
  0x5e   : > { %v459_v12 = vld [vmem:[%s3682_s4 + $0x8c0] sm:$0xff]  ;;  %456 = vst [vmem:[%s3687_s5 + $0x450] sm:$0xff] %v455_v10  ;;  %458 = vst [vmem:[%s3687_s5 + $0x458] sm:$0xff] %v457_v11  ;;  %v461_v13 = vld [vmem:[%s3682_s4 + $0x8c8] sm:$0xff] }
  0x5f   : > { %460 = vst [vmem:[%s3687_s5 + $0x460] sm:$0xff] %v459_v12  ;;  %v463_v14 = vld [vmem:[%s3682_s4 + $0x8e0] sm:$0xff]  ;;  %v465_v15 = vld [vmem:[%s3682_s4 + $0x8e8] sm:$0xff]  ;;  %462 = vst [vmem:[%s3687_s5 + $0x468] sm:$0xff] %v461_v13 }
  0x60   : > { %464 = vst [vmem:[%s3687_s5 + $0x470] sm:$0xff] %v463_v14  ;;  %466 = vst [vmem:[%s3687_s5 + $0x478] sm:$0xff] %v465_v15  ;;  %v467_v16 = vld [vmem:[%s3682_s4 + $0x900] sm:$0xff]  ;;  %v469_v17 = vld [vmem:[%s3682_s4 + $0x908] sm:$0xff] }
  0x61   : > { %v471_v18 = vld [vmem:[%s3682_s4 + $0x920] sm:$0xff]  ;;  %468 = vst [vmem:[%s3687_s5 + $0x480] sm:$0xff] %v467_v16  ;;  %470 = vst [vmem:[%s3687_s5 + $0x488] sm:$0xff] %v469_v17  ;;  %v473_v19 = vld [vmem:[%s3682_s4 + $0x928] sm:$0xff] }
  0x62   : > { %472 = vst [vmem:[%s3687_s5 + $0x490] sm:$0xff] %v471_v18  ;;  %v475_v20 = vld [vmem:[%s3682_s4 + $0x940] sm:$0xff]  ;;  %v477_v21 = vld [vmem:[%s3682_s4 + $0x948] sm:$0xff]  ;;  %474 = vst [vmem:[%s3687_s5 + $0x498] sm:$0xff] %v473_v19 }
  0x63   : > { %476 = vst [vmem:[%s3687_s5 + $0x4a0] sm:$0xff] %v475_v20  ;;  %478 = vst [vmem:[%s3687_s5 + $0x4a8] sm:$0xff] %v477_v21  ;;  %v479_v22 = vld [vmem:[%s3682_s4 + $0x960] sm:$0xff]  ;;  %v481_v23 = vld [vmem:[%s3682_s4 + $0x968] sm:$0xff] }
  0x64   : > { %v483_v24 = vld [vmem:[%s3682_s4 + $0x980] sm:$0xff]  ;;  %480 = vst [vmem:[%s3687_s5 + $0x4b0] sm:$0xff] %v479_v22  ;;  %482 = vst [vmem:[%s3687_s5 + $0x4b8] sm:$0xff] %v481_v23  ;;  %v485_v25 = vld [vmem:[%s3682_s4 + $0x988] sm:$0xff] }
  0x65   : > { %484 = vst [vmem:[%s3687_s5 + $0x4c0] sm:$0xff] %v483_v24  ;;  %v487_v26 = vld [vmem:[%s3682_s4 + $0x9a0] sm:$0xff]  ;;  %v489_v27 = vld [vmem:[%s3682_s4 + $0x9a8] sm:$0xff]  ;;  %486 = vst [vmem:[%s3687_s5 + $0x4c8] sm:$0xff] %v485_v25 }
  0x66   : > { %488 = vst [vmem:[%s3687_s5 + $0x4d0] sm:$0xff] %v487_v26  ;;  %490 = vst [vmem:[%s3687_s5 + $0x4d8] sm:$0xff] %v489_v27  ;;  %v491_v28 = vld [vmem:[%s3682_s4 + $0x9c0] sm:$0xff]  ;;  %v493_v29 = vld [vmem:[%s3682_s4 + $0x9c8] sm:$0xff] }
  0x67   : > { %v495_v30 = vld [vmem:[%s3682_s4 + $0x9e0] sm:$0xff]  ;;  %492 = vst [vmem:[%s3687_s5 + $0x4e0] sm:$0xff] %v491_v28  ;;  %494 = vst [vmem:[%s3687_s5 + $0x4e8] sm:$0xff] %v493_v29  ;;  %v497_v31 = vld [vmem:[%s3682_s4 + $0x9e8] sm:$0xff] }
  0x68   : > { %496 = vst [vmem:[%s3687_s5 + $0x4f0] sm:$0xff] %v495_v30  ;;  %v499_v32 = vld [vmem:[%s3682_s4 + $0xa00] sm:$0xff]  ;;  %v501_v33 = vld [vmem:[%s3682_s4 + $0xa08] sm:$0xff]  ;;  %498 = vst [vmem:[%s3687_s5 + $0x4f8] sm:$0xff] %v497_v31 }
  0x69   : > { %500 = vst [vmem:[%s3687_s5 + $0x500] sm:$0xff] %v499_v32  ;;  %502 = vst [vmem:[%s3687_s5 + $0x508] sm:$0xff] %v501_v33  ;;  %v503_v34 = vld [vmem:[%s3682_s4 + $0xa20] sm:$0xff]  ;;  %v505_v35 = vld [vmem:[%s3682_s4 + $0xa28] sm:$0xff] }
  0x6a   : > { %v507_v36 = vld [vmem:[%s3682_s4 + $0xa40] sm:$0xff]  ;;  %504 = vst [vmem:[%s3687_s5 + $0x510] sm:$0xff] %v503_v34  ;;  %506 = vst [vmem:[%s3687_s5 + $0x518] sm:$0xff] %v505_v35  ;;  %v509_v37 = vld [vmem:[%s3682_s4 + $0xa48] sm:$0xff] }
  0x6b   : > { %508 = vst [vmem:[%s3687_s5 + $0x520] sm:$0xff] %v507_v36  ;;  %v511_v38 = vld [vmem:[%s3682_s4 + $0xa60] sm:$0xff]  ;;  %v513_v39 = vld [vmem:[%s3682_s4 + $0xa68] sm:$0xff]  ;;  %510 = vst [vmem:[%s3687_s5 + $0x528] sm:$0xff] %v509_v37 }
  0x6c   : > { %512 = vst [vmem:[%s3687_s5 + $0x530] sm:$0xff] %v511_v38  ;;  %514 = vst [vmem:[%s3687_s5 + $0x538] sm:$0xff] %v513_v39  ;;  %v515_v40 = vld [vmem:[%s3682_s4 + $0xa80] sm:$0xff]  ;;  %v517_v41 = vld [vmem:[%s3682_s4 + $0xa88] sm:$0xff] }
  0x6d   : > { %v519_v42 = vld [vmem:[%s3682_s4 + $0xaa0] sm:$0xff]  ;;  %516 = vst [vmem:[%s3687_s5 + $0x540] sm:$0xff] %v515_v40  ;;  %518 = vst [vmem:[%s3687_s5 + $0x548] sm:$0xff] %v517_v41  ;;  %v521_v43 = vld [vmem:[%s3682_s4 + $0xaa8] sm:$0xff] }
  0x6e   : > { %520 = vst [vmem:[%s3687_s5 + $0x550] sm:$0xff] %v519_v42  ;;  %v523_v44 = vld [vmem:[%s3682_s4 + $0xac0] sm:$0xff]  ;;  %v525_v45 = vld [vmem:[%s3682_s4 + $0xac8] sm:$0xff]  ;;  %522 = vst [vmem:[%s3687_s5 + $0x558] sm:$0xff] %v521_v43 }
  0x6f   : > { %524 = vst [vmem:[%s3687_s5 + $0x560] sm:$0xff] %v523_v44  ;;  %526 = vst [vmem:[%s3687_s5 + $0x568] sm:$0xff] %v525_v45  ;;  %v527_v46 = vld [vmem:[%s3682_s4 + $0xae0] sm:$0xff]  ;;  %v529_v47 = vld [vmem:[%s3682_s4 + $0xae8] sm:$0xff] }
  0x70   : > { %v531_v48 = vld [vmem:[%s3682_s4 + $0xb00] sm:$0xff]  ;;  %528 = vst [vmem:[%s3687_s5 + $0x570] sm:$0xff] %v527_v46  ;;  %530 = vst [vmem:[%s3687_s5 + $0x578] sm:$0xff] %v529_v47  ;;  %v533_v49 = vld [vmem:[%s3682_s4 + $0xb08] sm:$0xff] }
  0x71   : > { %532 = vst [vmem:[%s3687_s5 + $0x580] sm:$0xff] %v531_v48  ;;  %v535_v50 = vld [vmem:[%s3682_s4 + $0xb20] sm:$0xff]  ;;  %v537_v51 = vld [vmem:[%s3682_s4 + $0xb28] sm:$0xff]  ;;  %534 = vst [vmem:[%s3687_s5 + $0x588] sm:$0xff] %v533_v49 }
  0x72   : > { %536 = vst [vmem:[%s3687_s5 + $0x590] sm:$0xff] %v535_v50  ;;  %538 = vst [vmem:[%s3687_s5 + $0x598] sm:$0xff] %v537_v51  ;;  %v539_v52 = vld [vmem:[%s3682_s4 + $0xb40] sm:$0xff]  ;;  %v541_v53 = vld [vmem:[%s3682_s4 + $0xb48] sm:$0xff] }
  0x73   : > { %v543_v54 = vld [vmem:[%s3682_s4 + $0xb60] sm:$0xff]  ;;  %540 = vst [vmem:[%s3687_s5 + $0x5a0] sm:$0xff] %v539_v52  ;;  %542 = vst [vmem:[%s3687_s5 + $0x5a8] sm:$0xff] %v541_v53  ;;  %v545_v55 = vld [vmem:[%s3682_s4 + $0xb68] sm:$0xff] }
  0x74   : > { %544 = vst [vmem:[%s3687_s5 + $0x5b0] sm:$0xff] %v543_v54  ;;  %v547_v56 = vld [vmem:[%s3682_s4 + $0xb80] sm:$0xff]  ;;  %v549_v57 = vld [vmem:[%s3682_s4 + $0xb88] sm:$0xff]  ;;  %546 = vst [vmem:[%s3687_s5 + $0x5b8] sm:$0xff] %v545_v55 }
  0x75   : > { %548 = vst [vmem:[%s3687_s5 + $0x5c0] sm:$0xff] %v547_v56  ;;  %550 = vst [vmem:[%s3687_s5 + $0x5c8] sm:$0xff] %v549_v57  ;;  %v551_v58 = vld [vmem:[%s3682_s4 + $0xba0] sm:$0xff]  ;;  %v553_v59 = vld [vmem:[%s3682_s4 + $0xba8] sm:$0xff] }
  0x76   : > { %v555_v60 = vld [vmem:[%s3682_s4 + $0xbc0] sm:$0xff]  ;;  %552 = vst [vmem:[%s3687_s5 + $0x5d0] sm:$0xff] %v551_v58  ;;  %554 = vst [vmem:[%s3687_s5 + $0x5d8] sm:$0xff] %v553_v59  ;;  %v557_v61 = vld [vmem:[%s3682_s4 + $0xbc8] sm:$0xff] }
  0x77   : > { %556 = vst [vmem:[%s3687_s5 + $0x5e0] sm:$0xff] %v555_v60  ;;  %v559_v62 = vld [vmem:[%s3682_s4 + $0xbe0] sm:$0xff]  ;;  %v561_v63 = vld [vmem:[%s3682_s4 + $0xbe8] sm:$0xff]  ;;  %558 = vst [vmem:[%s3687_s5 + $0x5e8] sm:$0xff] %v557_v61 }
  0x78   : > { %560 = vst [vmem:[%s3687_s5 + $0x5f0] sm:$0xff] %v559_v62  ;;  %562 = vst [vmem:[%s3687_s5 + $0x5f8] sm:$0xff] %v561_v63  ;;  %v563_v0 = vld [vmem:[%s3682_s4 + $0xc00] sm:$0xff]  ;;  %v565_v1 = vld [vmem:[%s3682_s4 + $0xc08] sm:$0xff] }
  0x79   : > { %v567_v2 = vld [vmem:[%s3682_s4 + $0xc20] sm:$0xff]  ;;  %564 = vst [vmem:[%s3687_s5 + $0x600] sm:$0xff] %v563_v0  ;;  %566 = vst [vmem:[%s3687_s5 + $0x608] sm:$0xff] %v565_v1  ;;  %v569_v3 = vld [vmem:[%s3682_s4 + $0xc28] sm:$0xff] }
  0x7a   : > { %568 = vst [vmem:[%s3687_s5 + $0x610] sm:$0xff] %v567_v2  ;;  %v571_v4 = vld [vmem:[%s3682_s4 + $0xc40] sm:$0xff]  ;;  %v573_v5 = vld [vmem:[%s3682_s4 + $0xc48] sm:$0xff]  ;;  %570 = vst [vmem:[%s3687_s5 + $0x618] sm:$0xff] %v569_v3 }
  0x7b   : > { %572 = vst [vmem:[%s3687_s5 + $0x620] sm:$0xff] %v571_v4  ;;  %574 = vst [vmem:[%s3687_s5 + $0x628] sm:$0xff] %v573_v5  ;;  %v575_v6 = vld [vmem:[%s3682_s4 + $0xc60] sm:$0xff]  ;;  %v577_v7 = vld [vmem:[%s3682_s4 + $0xc68] sm:$0xff] }
  0x7c   : > { %v579_v8 = vld [vmem:[%s3682_s4 + $0xc80] sm:$0xff]  ;;  %576 = vst [vmem:[%s3687_s5 + $0x630] sm:$0xff] %v575_v6  ;;  %578 = vst [vmem:[%s3687_s5 + $0x638] sm:$0xff] %v577_v7  ;;  %v581_v9 = vld [vmem:[%s3682_s4 + $0xc88] sm:$0xff] }
  0x7d   : > { %580 = vst [vmem:[%s3687_s5 + $0x640] sm:$0xff] %v579_v8  ;;  %v583_v10 = vld [vmem:[%s3682_s4 + $0xca0] sm:$0xff]  ;;  %v585_v11 = vld [vmem:[%s3682_s4 + $0xca8] sm:$0xff]  ;;  %582 = vst [vmem:[%s3687_s5 + $0x648] sm:$0xff] %v581_v9 }
  0x7e   : > { %584 = vst [vmem:[%s3687_s5 + $0x650] sm:$0xff] %v583_v10  ;;  %586 = vst [vmem:[%s3687_s5 + $0x658] sm:$0xff] %v585_v11  ;;  %v587_v12 = vld [vmem:[%s3682_s4 + $0xcc0] sm:$0xff]  ;;  %v589_v13 = vld [vmem:[%s3682_s4 + $0xcc8] sm:$0xff] }
  0x7f   : > { %v591_v14 = vld [vmem:[%s3682_s4 + $0xce0] sm:$0xff]  ;;  %588 = vst [vmem:[%s3687_s5 + $0x660] sm:$0xff] %v587_v12  ;;  %590 = vst [vmem:[%s3687_s5 + $0x668] sm:$0xff] %v589_v13  ;;  %v593_v15 = vld [vmem:[%s3682_s4 + $0xce8] sm:$0xff] }
  0x80   : > { %592 = vst [vmem:[%s3687_s5 + $0x670] sm:$0xff] %v591_v14  ;;  %v595_v16 = vld [vmem:[%s3682_s4 + $0xd00] sm:$0xff]  ;;  %v597_v17 = vld [vmem:[%s3682_s4 + $0xd08] sm:$0xff]  ;;  %594 = vst [vmem:[%s3687_s5 + $0x678] sm:$0xff] %v593_v15 }
  0x81   : > { %596 = vst [vmem:[%s3687_s5 + $0x680] sm:$0xff] %v595_v16  ;;  %598 = vst [vmem:[%s3687_s5 + $0x688] sm:$0xff] %v597_v17  ;;  %v599_v18 = vld [vmem:[%s3682_s4 + $0xd20] sm:$0xff]  ;;  %v601_v19 = vld [vmem:[%s3682_s4 + $0xd28] sm:$0xff] }
  0x82   : > { %v603_v20 = vld [vmem:[%s3682_s4 + $0xd40] sm:$0xff]  ;;  %600 = vst [vmem:[%s3687_s5 + $0x690] sm:$0xff] %v599_v18  ;;  %602 = vst [vmem:[%s3687_s5 + $0x698] sm:$0xff] %v601_v19  ;;  %v605_v21 = vld [vmem:[%s3682_s4 + $0xd48] sm:$0xff] }
  0x83   : > { %604 = vst [vmem:[%s3687_s5 + $0x6a0] sm:$0xff] %v603_v20  ;;  %v607_v22 = vld [vmem:[%s3682_s4 + $0xd60] sm:$0xff]  ;;  %v609_v23 = vld [vmem:[%s3682_s4 + $0xd68] sm:$0xff]  ;;  %606 = vst [vmem:[%s3687_s5 + $0x6a8] sm:$0xff] %v605_v21 }
  0x84   : > { %608 = vst [vmem:[%s3687_s5 + $0x6b0] sm:$0xff] %v607_v22  ;;  %610 = vst [vmem:[%s3687_s5 + $0x6b8] sm:$0xff] %v609_v23  ;;  %v611_v24 = vld [vmem:[%s3682_s4 + $0xd80] sm:$0xff]  ;;  %v613_v25 = vld [vmem:[%s3682_s4 + $0xd88] sm:$0xff] }
  0x85   : > { %v615_v26 = vld [vmem:[%s3682_s4 + $0xda0] sm:$0xff]  ;;  %612 = vst [vmem:[%s3687_s5 + $0x6c0] sm:$0xff] %v611_v24  ;;  %614 = vst [vmem:[%s3687_s5 + $0x6c8] sm:$0xff] %v613_v25  ;;  %v617_v27 = vld [vmem:[%s3682_s4 + $0xda8] sm:$0xff] }
  0x86   : > { %616 = vst [vmem:[%s3687_s5 + $0x6d0] sm:$0xff] %v615_v26  ;;  %v619_v28 = vld [vmem:[%s3682_s4 + $0xdc0] sm:$0xff]  ;;  %v621_v29 = vld [vmem:[%s3682_s4 + $0xdc8] sm:$0xff]  ;;  %618 = vst [vmem:[%s3687_s5 + $0x6d8] sm:$0xff] %v617_v27 }
  0x87   : > { %620 = vst [vmem:[%s3687_s5 + $0x6e0] sm:$0xff] %v619_v28  ;;  %622 = vst [vmem:[%s3687_s5 + $0x6e8] sm:$0xff] %v621_v29  ;;  %v623_v30 = vld [vmem:[%s3682_s4 + $0xde0] sm:$0xff]  ;;  %v625_v31 = vld [vmem:[%s3682_s4 + $0xde8] sm:$0xff] }
  0x88   : > { %v627_v32 = vld [vmem:[%s3682_s4 + $0xe00] sm:$0xff]  ;;  %624 = vst [vmem:[%s3687_s5 + $0x6f0] sm:$0xff] %v623_v30  ;;  %626 = vst [vmem:[%s3687_s5 + $0x6f8] sm:$0xff] %v625_v31  ;;  %v629_v33 = vld [vmem:[%s3682_s4 + $0xe08] sm:$0xff] }
  0x89   : > { %628 = vst [vmem:[%s3687_s5 + $0x700] sm:$0xff] %v627_v32  ;;  %v631_v34 = vld [vmem:[%s3682_s4 + $0xe20] sm:$0xff]  ;;  %v633_v35 = vld [vmem:[%s3682_s4 + $0xe28] sm:$0xff]  ;;  %630 = vst [vmem:[%s3687_s5 + $0x708] sm:$0xff] %v629_v33 }
  0x8a   : > { %632 = vst [vmem:[%s3687_s5 + $0x710] sm:$0xff] %v631_v34  ;;  %634 = vst [vmem:[%s3687_s5 + $0x718] sm:$0xff] %v633_v35  ;;  %v635_v36 = vld [vmem:[%s3682_s4 + $0xe40] sm:$0xff]  ;;  %v637_v37 = vld [vmem:[%s3682_s4 + $0xe48] sm:$0xff] }
  0x8b   : > { %v639_v38 = vld [vmem:[%s3682_s4 + $0xe60] sm:$0xff]  ;;  %636 = vst [vmem:[%s3687_s5 + $0x720] sm:$0xff] %v635_v36  ;;  %638 = vst [vmem:[%s3687_s5 + $0x728] sm:$0xff] %v637_v37  ;;  %v641_v39 = vld [vmem:[%s3682_s4 + $0xe68] sm:$0xff] }
  0x8c   : > { %640 = vst [vmem:[%s3687_s5 + $0x730] sm:$0xff] %v639_v38  ;;  %v643_v40 = vld [vmem:[%s3682_s4 + $0xe80] sm:$0xff]  ;;  %v645_v41 = vld [vmem:[%s3682_s4 + $0xe88] sm:$0xff]  ;;  %642 = vst [vmem:[%s3687_s5 + $0x738] sm:$0xff] %v641_v39 }
  0x8d   : > { %644 = vst [vmem:[%s3687_s5 + $0x740] sm:$0xff] %v643_v40  ;;  %646 = vst [vmem:[%s3687_s5 + $0x748] sm:$0xff] %v645_v41  ;;  %v647_v42 = vld [vmem:[%s3682_s4 + $0xea0] sm:$0xff]  ;;  %v649_v43 = vld [vmem:[%s3682_s4 + $0xea8] sm:$0xff] }
  0x8e   : > { %v651_v44 = vld [vmem:[%s3682_s4 + $0xec0] sm:$0xff]  ;;  %648 = vst [vmem:[%s3687_s5 + $0x750] sm:$0xff] %v647_v42  ;;  %650 = vst [vmem:[%s3687_s5 + $0x758] sm:$0xff] %v649_v43  ;;  %v653_v45 = vld [vmem:[%s3682_s4 + $0xec8] sm:$0xff] }
  0x8f   : > { %652 = vst [vmem:[%s3687_s5 + $0x760] sm:$0xff] %v651_v44  ;;  %v655_v46 = vld [vmem:[%s3682_s4 + $0xee0] sm:$0xff]  ;;  %v657_v47 = vld [vmem:[%s3682_s4 + $0xee8] sm:$0xff]  ;;  %654 = vst [vmem:[%s3687_s5 + $0x768] sm:$0xff] %v653_v45 }
  0x90   : > { %656 = vst [vmem:[%s3687_s5 + $0x770] sm:$0xff] %v655_v46  ;;  %658 = vst [vmem:[%s3687_s5 + $0x778] sm:$0xff] %v657_v47  ;;  %v659_v48 = vld [vmem:[%s3682_s4 + $0xf00] sm:$0xff]  ;;  %v661_v49 = vld [vmem:[%s3682_s4 + $0xf08] sm:$0xff] }
  0x91   : > { %v663_v50 = vld [vmem:[%s3682_s4 + $0xf20] sm:$0xff]  ;;  %660 = vst [vmem:[%s3687_s5 + $0x780] sm:$0xff] %v659_v48  ;;  %662 = vst [vmem:[%s3687_s5 + $0x788] sm:$0xff] %v661_v49  ;;  %v665_v51 = vld [vmem:[%s3682_s4 + $0xf28] sm:$0xff] }
  0x92   : > { %664 = vst [vmem:[%s3687_s5 + $0x790] sm:$0xff] %v663_v50  ;;  %v667_v52 = vld [vmem:[%s3682_s4 + $0xf40] sm:$0xff]  ;;  %v669_v53 = vld [vmem:[%s3682_s4 + $0xf48] sm:$0xff]  ;;  %666 = vst [vmem:[%s3687_s5 + $0x798] sm:$0xff] %v665_v51 }
  0x93   : > { %668 = vst [vmem:[%s3687_s5 + $0x7a0] sm:$0xff] %v667_v52  ;;  %670 = vst [vmem:[%s3687_s5 + $0x7a8] sm:$0xff] %v669_v53  ;;  %v671_v54 = vld [vmem:[%s3682_s4 + $0xf60] sm:$0xff]  ;;  %v673_v55 = vld [vmem:[%s3682_s4 + $0xf68] sm:$0xff] }
  0x94   : > { %v675_v56 = vld [vmem:[%s3682_s4 + $0xf80] sm:$0xff]  ;;  %672 = vst [vmem:[%s3687_s5 + $0x7b0] sm:$0xff] %v671_v54  ;;  %674 = vst [vmem:[%s3687_s5 + $0x7b8] sm:$0xff] %v673_v55  ;;  %v677_v57 = vld [vmem:[%s3682_s4 + $0xf88] sm:$0xff] }
  0x95   : > { %676 = vst [vmem:[%s3687_s5 + $0x7c0] sm:$0xff] %v675_v56  ;;  %v679_v58 = vld [vmem:[%s3682_s4 + $0xfa0] sm:$0xff]  ;;  %v681_v59 = vld [vmem:[%s3682_s4 + $0xfa8] sm:$0xff]  ;;  %678 = vst [vmem:[%s3687_s5 + $0x7c8] sm:$0xff] %v677_v57 }
  0x96   : > { %680 = vst [vmem:[%s3687_s5 + $0x7d0] sm:$0xff] %v679_v58  ;;  %682 = vst [vmem:[%s3687_s5 + $0x7d8] sm:$0xff] %v681_v59  ;;  %v683_v60 = vld [vmem:[%s3682_s4 + $0xfc0] sm:$0xff]  ;;  %v685_v61 = vld [vmem:[%s3682_s4 + $0xfc8] sm:$0xff] }
  0x97   : > { %v687_v62 = vld [vmem:[%s3682_s4 + $0xfe0] sm:$0xff]  ;;  %684 = vst [vmem:[%s3687_s5 + $0x7e0] sm:$0xff] %v683_v60  ;;  %686 = vst [vmem:[%s3687_s5 + $0x7e8] sm:$0xff] %v685_v61  ;;  %v689_v63 = vld [vmem:[%s3682_s4 + $0xfe8] sm:$0xff] }
  0x98   : > { %688 = vst [vmem:[%s3687_s5 + $0x7f0] sm:$0xff] %v687_v62  ;;  %690 = vst [vmem:[%s3687_s5 + $0x7f8] sm:$0xff] %v689_v63 }
  0x99 PF: > { %p2785_p11 = scmp.ge.s32.totalorder %s3597_s17, 1  ;;  %p703_p12 = scmp.lt.s32.totalorder %s3597_s17, 3 }
  0x9b   : > { %p704_p13 = pnand %p2785_p11, %p703_p12 }
  0x9c   : > { %s4201_s6 = sand.u32 (!%p704_p13), 1, %s3581_s13   ;;  %v755_v0 = vld [vmem:[%s4544_s0 + $0x8] sm:$0xff] (!%p704_p13)  ;;  %s3051_s21 = sshll.u32 (!%p704_p13), %s3589_s15, 9 }
  0x9d   : > { %707 = sbr.rel (%p704_p13) target bundleno = 645 (0x285), region = 51  ;;  %s2786_s9 = sshll.u32 (!%p704_p13), %s4201_s6, 11  ;;  %v763_v1 = vpack.c.bf16 (!%p704_p13), %v755_v0, %v755_v0  ;;  %v754_v0 = vld [vmem:[%s4544_s0] sm:$0xff] (!%p704_p13) }
  0x9e   : > { %s4207_s10 = scalar_lea.vmem (!%p704_p13), [#allocation2], %s2786_s9  ;;  %s2788_s9 = sshll.u32 (!%p704_p13), %s3589_s15, 2 }
  0x9f   : > { %v3135_v2 = vld [vmem:[%s4207_s10 + $0x4] ss:$16 sps:$4 sm:$0xff] (!%p704_p13)   ;;  %2360 = vmatprep.mubr.bf16.mxu0 (!%p704_p13), %v763_v1  ;;  %2524 = vmatprep.mubr.bf16.mxu1 (!%p704_p13), %v763_v1  ;;  %v3137_v3 = vld [vmem:[%s4207_s10 + $0xc] ss:$16 sps:$4 sm:$0xff] (!%p704_p13)   ;;  %v3139_v4 = vld [vmem:[%s4207_s10] ss:$16 sps:$4 sm:$0xff] (!%p704_p13)   ;;  %s4495_s29 = scalar_lea.hbm (!%p704_p13), %s4547_s3, %s3051_s21 }
  0xa0   : > { %2328 = vmatprep.subr.bf16.mxu0 (!%p704_p13), %v3135_v2  ;;  %v3140_v5 = vld [vmem:[%s4207_s10 + $0x8] ss:$16 sps:$4 sm:$0xff] (!%p704_p13)   ;;  %2492 = vmatprep.subr.bf16.mxu1 (!%p704_p13), %v3137_v3  ;;  %v3141_v6 = vld [vmem:[%s4207_s10 + $0x24] ss:$16 sps:$4 sm:$0xff] (!%p704_p13)   ;;  %v3143_v7 = vld [vmem:[%s4207_s10 + $0x2c] ss:$16 sps:$4 sm:$0xff] (!%p704_p13)  }
  0xa1   : > { %2329 = vmatpush1.bf16.msra.mxu0 (!%p704_p13), %v3139_v4  ;;  %2493 = vmatpush1.bf16.msra.mxu1 (!%p704_p13), %v3140_v5  ;;  %v3145_v8 = vld [vmem:[%s4207_s10 + $0x20] ss:$16 sps:$4 sm:$0xff] (!%p704_p13)   ;;  %v3146_v9 = vld [vmem:[%s4207_s10 + $0x28] ss:$16 sps:$4 sm:$0xff] (!%p704_p13)   ;;  %v3147_v10 = vld [vmem:[%s4207_s10 + $0x44] ss:$16 sps:$4 sm:$0xff] (!%p704_p13)  }
  0xa2   : > { %2330 = vmatprep.subr.bf16.mxu0 (!%p704_p13), %v3141_v6  ;;  %2494 = vmatprep.subr.bf16.mxu1 (!%p704_p13), %v3143_v7  ;;  %v3149_v11 = vld [vmem:[%s4207_s10 + $0x4c] ss:$16 sps:$4 sm:$0xff] (!%p704_p13)   ;;  %v3151_v12 = vld [vmem:[%s4207_s10 + $0x40] ss:$16 sps:$4 sm:$0xff] (!%p704_p13)   ;;  %v3152_v13 = vld [vmem:[%s4207_s10 + $0x48] ss:$16 sps:$4 sm:$0xff] (!%p704_p13)   ;;  %v762_v7 = vpack.c.bf16 (!%p704_p13), %v754_v0, %v754_v0 }
  0xa3   : > { %v3153_v14 = vld [vmem:[%s4207_s10 + $0x64] ss:$16 sps:$4 sm:$0xff] (!%p704_p13)   ;;  %v3155_v15 = vld [vmem:[%s4207_s10 + $0x6c] ss:$16 sps:$4 sm:$0xff] (!%p704_p13)   ;;  %v3157_v16 = vld [vmem:[%s4207_s10 + $0x60] ss:$16 sps:$4 sm:$0xff] (!%p704_p13)  }
  0xa4   : > { %v3158_v17 = vld [vmem:[%s4207_s10 + $0x68] ss:$16 sps:$4 sm:$0xff]   ;;  %v3159_v18 = vld [vmem:[%s4207_s10 + $0x84] ss:$16 sps:$4 sm:$0xff]   ;;  %v3161_v19 = vld [vmem:[%s4207_s10 + $0x8c] ss:$16 sps:$4 sm:$0xff]  }
  0xa5   : > { %2331 = vmatpush1.bf16.msra.mxu0 %v3145_v8  ;;  %2495 = vmatpush1.bf16.msra.mxu1 %v3146_v9  ;;  %v3163_v20 = vld [vmem:[%s4207_s10 + $0x80] ss:$16 sps:$4 sm:$0xff]   ;;  %v3164_v21 = vld [vmem:[%s4207_s10 + $0x88] ss:$16 sps:$4 sm:$0xff]   ;;  %v3165_v22 = vld [vmem:[%s4207_s10 + $0xa4] ss:$16 sps:$4 sm:$0xff]  }
  0xa6   : > { %2332 = vmatprep.subr.bf16.mxu0 %v3147_v10  ;;  %2496 = vmatprep.subr.bf16.mxu1 %v3149_v11  ;;  %v3167_v23 = vld [vmem:[%s4207_s10 + $0xac] ss:$16 sps:$4 sm:$0xff]   ;;  %v3169_v24 = vld [vmem:[%s4207_s10 + $0xa0] ss:$16 sps:$4 sm:$0xff]   ;;  %v3170_v25 = vld [vmem:[%s4207_s10 + $0xa8] ss:$16 sps:$4 sm:$0xff]  }
  0xa7   : > { %v3171_v26 = vld [vmem:[%s4207_s10 + $0xc4] ss:$16 sps:$4 sm:$0xff]   ;;  %v3173_v27 = vld [vmem:[%s4207_s10 + $0xcc] ss:$16 sps:$4 sm:$0xff]   ;;  %v3175_v28 = vld [vmem:[%s4207_s10 + $0xc0] ss:$16 sps:$4 sm:$0xff]  }
  0xa8   : > { %v3176_v29 = vld [vmem:[%s4207_s10 + $0xc8] ss:$16 sps:$4 sm:$0xff]   ;;  %v3177_v30 = vld [vmem:[%s4207_s10 + $0xe4] ss:$16 sps:$4 sm:$0xff]   ;;  %v3179_v31 = vld [vmem:[%s4207_s10 + $0xec] ss:$16 sps:$4 sm:$0xff]  }
  0xa9   : > { %2333 = vmatpush1.bf16.msra.mxu0 %v3151_v12  ;;  %2497 = vmatpush1.bf16.msra.mxu1 %v3152_v13  ;;  %v3181_v32 = vld [vmem:[%s4207_s10 + $0xe0] ss:$16 sps:$4 sm:$0xff]   ;;  %v3182_v33 = vld [vmem:[%s4207_s10 + $0xe8] ss:$16 sps:$4 sm:$0xff]   ;;  %v3183_v34 = vld [vmem:[%s4207_s10 + $0x104] ss:$16 sps:$4 sm:$0xff]  }
  0xaa   : > { %2334 = vmatprep.subr.bf16.mxu0 %v3153_v14  ;;  %2498 = vmatprep.subr.bf16.mxu1 %v3155_v15  ;;  %v3185_v35 = vld [vmem:[%s4207_s10 + $0x10c] ss:$16 sps:$4 sm:$0xff]   ;;  %v3187_v36 = vld [vmem:[%s4207_s10 + $0x100] ss:$16 sps:$4 sm:$0xff]   ;;  %v3188_v37 = vld [vmem:[%s4207_s10 + $0x108] ss:$16 sps:$4 sm:$0xff]  }
  0xab   : > { %v3189_v38 = vld [vmem:[%s4207_s10 + $0x124] ss:$16 sps:$4 sm:$0xff]   ;;  %v3191_v39 = vld [vmem:[%s4207_s10 + $0x12c] ss:$16 sps:$4 sm:$0xff]   ;;  %v3193_v40 = vld [vmem:[%s4207_s10 + $0x120] ss:$16 sps:$4 sm:$0xff]  }
  0xac   : > { %v3194_v41 = vld [vmem:[%s4207_s10 + $0x128] ss:$16 sps:$4 sm:$0xff]   ;;  %v3195_v42 = vld [vmem:[%s4207_s10 + $0x144] ss:$16 sps:$4 sm:$0xff]   ;;  %v3197_v43 = vld [vmem:[%s4207_s10 + $0x14c] ss:$16 sps:$4 sm:$0xff]  }
  0xad   : > { %2335 = vmatpush1.bf16.msra.mxu0 %v3157_v16  ;;  %2499 = vmatpush1.bf16.msra.mxu1 %v3158_v17  ;;  %v3199_v44 = vld [vmem:[%s4207_s10 + $0x140] ss:$16 sps:$4 sm:$0xff]   ;;  %v3200_v45 = vld [vmem:[%s4207_s10 + $0x148] ss:$16 sps:$4 sm:$0xff]   ;;  %v3201_v46 = vld [vmem:[%s4207_s10 + $0x164] ss:$16 sps:$4 sm:$0xff]  }
  0xae   : > { %2336 = vmatprep.subr.bf16.mxu0 %v3159_v18  ;;  %2500 = vmatprep.subr.bf16.mxu1 %v3161_v19  ;;  %v3203_v47 = vld [vmem:[%s4207_s10 + $0x16c] ss:$16 sps:$4 sm:$0xff]   ;;  %v3205_v48 = vld [vmem:[%s4207_s10 + $0x160] ss:$16 sps:$4 sm:$0xff]   ;;  %v3206_v49 = vld [vmem:[%s4207_s10 + $0x168] ss:$16 sps:$4 sm:$0xff]  }
  0xaf   : > { %v3207_v50 = vld [vmem:[%s4207_s10 + $0x184] ss:$16 sps:$4 sm:$0xff]   ;;  %v3209_v51 = vld [vmem:[%s4207_s10 + $0x18c] ss:$16 sps:$4 sm:$0xff]   ;;  %v3211_v52 = vld [vmem:[%s4207_s10 + $0x180] ss:$16 sps:$4 sm:$0xff]  }
  0xb0   : > { %v3212_v53 = vld [vmem:[%s4207_s10 + $0x188] ss:$16 sps:$4 sm:$0xff]   ;;  %v3213_v54 = vld [vmem:[%s4207_s10 + $0x1a4] ss:$16 sps:$4 sm:$0xff]   ;;  %v3215_v55 = vld [vmem:[%s4207_s10 + $0x1ac] ss:$16 sps:$4 sm:$0xff]  }
  0xb1   : > { %2337 = vmatpush1.bf16.msra.mxu0 %v3163_v20  ;;  %2501 = vmatpush1.bf16.msra.mxu1 %v3164_v21  ;;  %v3217_v56 = vld [vmem:[%s4207_s10 + $0x1a0] ss:$16 sps:$4 sm:$0xff]   ;;  %v3218_v57 = vld [vmem:[%s4207_s10 + $0x1a8] ss:$16 sps:$4 sm:$0xff]   ;;  %v3219_v58 = vld [vmem:[%s4207_s10 + $0x1c4] ss:$16 sps:$4 sm:$0xff]  }
  0xb2   : > { %2338 = vmatprep.subr.bf16.mxu0 %v3165_v22  ;;  %2502 = vmatprep.subr.bf16.mxu1 %v3167_v23  ;;  %v3221_v59 = vld [vmem:[%s4207_s10 + $0x1cc] ss:$16 sps:$4 sm:$0xff]   ;;  %v3223_v60 = vld [vmem:[%s4207_s10 + $0x1c0] ss:$16 sps:$4 sm:$0xff]   ;;  %v3224_v61 = vld [vmem:[%s4207_s10 + $0x1c8] ss:$16 sps:$4 sm:$0xff]  }
  0xb3   : > { %v3225_v62 = vld [vmem:[%s4207_s10 + $0x1e4] ss:$16 sps:$4 sm:$0xff]   ;;  %v3227_v63 = vld [vmem:[%s4207_s10 + $0x1ec] ss:$16 sps:$4 sm:$0xff]   ;;  %v3229_v1 = vld [vmem:[%s4207_s10 + $0x1e0] ss:$16 sps:$4 sm:$0xff]  }
  0xb4   : > { %v3230_v2 = vld [vmem:[%s4207_s10 + $0x1e8] ss:$16 sps:$4 sm:$0xff]   ;;  %v3233_v3 = vld [vmem:[%s4207_s10 + $0x204] ss:$16 sps:$4 sm:$0xff]   ;;  %v3236_v4 = vld [vmem:[%s4207_s10 + $0x20c] ss:$16 sps:$4 sm:$0xff]  }
  0xb5   : > { %2339 = vmatpush1.bf16.msra.mxu0 %v3169_v24  ;;  %2503 = vmatpush1.bf16.msra.mxu1 %v3170_v25  ;;  %v3231_v5 = vld [vmem:[%s4207_s10 + $0x200] ss:$16 sps:$4 sm:$0xff]   ;;  %v3234_v6 = vld [vmem:[%s4207_s10 + $0x208] ss:$16 sps:$4 sm:$0xff]   ;;  %v3239_v8 = vld [vmem:[%s4207_s10 + $0x224] ss:$16 sps:$4 sm:$0xff]  }
  0xb6   : > { %2340 = vmatprep.subr.bf16.mxu0 %v3171_v26  ;;  %2504 = vmatprep.subr.bf16.mxu1 %v3173_v27  ;;  %v3242_v9 = vld [vmem:[%s4207_s10 + $0x22c] ss:$16 sps:$4 sm:$0xff]   ;;  %v3237_v10 = vld [vmem:[%s4207_s10 + $0x220] ss:$16 sps:$4 sm:$0xff]   ;;  %v3240_v11 = vld [vmem:[%s4207_s10 + $0x228] ss:$16 sps:$4 sm:$0xff]  }
  0xb7   : > { %v3245_v12 = vld [vmem:[%s4207_s10 + $0x244] ss:$16 sps:$4 sm:$0xff]   ;;  %v3248_v13 = vld [vmem:[%s4207_s10 + $0x24c] ss:$16 sps:$4 sm:$0xff]   ;;  %v3243_v14 = vld [vmem:[%s4207_s10 + $0x240] ss:$16 sps:$4 sm:$0xff]  }
  0xb8   : > { %v3246_v15 = vld [vmem:[%s4207_s10 + $0x248] ss:$16 sps:$4 sm:$0xff]   ;;  %v3251_v16 = vld [vmem:[%s4207_s10 + $0x264] ss:$16 sps:$4 sm:$0xff]   ;;  %v3254_v17 = vld [vmem:[%s4207_s10 + $0x26c] ss:$16 sps:$4 sm:$0xff]  }
  0xb9   : > { %2341 = vmatpush1.bf16.msra.mxu0 %v3175_v28  ;;  %2505 = vmatpush1.bf16.msra.mxu1 %v3176_v29  ;;  %v3249_v18 = vld [vmem:[%s4207_s10 + $0x260] ss:$16 sps:$4 sm:$0xff]   ;;  %v3252_v19 = vld [vmem:[%s4207_s10 + $0x268] ss:$16 sps:$4 sm:$0xff]   ;;  %v3257_v20 = vld [vmem:[%s4207_s10 + $0x284] ss:$16 sps:$4 sm:$0xff]  }
  0xba   : > { %2342 = vmatprep.subr.bf16.mxu0 %v3177_v30  ;;  %2506 = vmatprep.subr.bf16.mxu1 %v3179_v31  ;;  %v3260_v21 = vld [vmem:[%s4207_s10 + $0x28c] ss:$16 sps:$4 sm:$0xff]   ;;  %v3255_v22 = vld [vmem:[%s4207_s10 + $0x280] ss:$16 sps:$4 sm:$0xff]   ;;  %v3258_v23 = vld [vmem:[%s4207_s10 + $0x288] ss:$16 sps:$4 sm:$0xff]  }
  0xbb   : > { %v3263_v24 = vld [vmem:[%s4207_s10 + $0x2a4] ss:$16 sps:$4 sm:$0xff]   ;;  %v3266_v25 = vld [vmem:[%s4207_s10 + $0x2ac] ss:$16 sps:$4 sm:$0xff]   ;;  %v3261_v26 = vld [vmem:[%s4207_s10 + $0x2a0] ss:$16 sps:$4 sm:$0xff]  }
  0xbc   : > { %v3264_v27 = vld [vmem:[%s4207_s10 + $0x2a8] ss:$16 sps:$4 sm:$0xff]   ;;  %v3269_v28 = vld [vmem:[%s4207_s10 + $0x2c4] ss:$16 sps:$4 sm:$0xff]   ;;  %v3272_v29 = vld [vmem:[%s4207_s10 + $0x2cc] ss:$16 sps:$4 sm:$0xff]  }
  0xbd   : > { %2343 = vmatpush1.bf16.msra.mxu0 %v3181_v32  ;;  %2507 = vmatpush1.bf16.msra.mxu1 %v3182_v33  ;;  %v757_v30 = vld [vmem:[%s4544_s0 + $0x18] sm:$0xff]  ;;  %v3267_v32 = vld [vmem:[%s4207_s10 + $0x2c0] ss:$16 sps:$4 sm:$0xff]   ;;  %p749_p0 = scmp.lt.s32.totalorder %s2788_s9, 7  ;;  %s2787_s19 = sshll.u32 %s4201_s6, 5 }
  0xbe   : > { %2344 = vmatprep.subr.bf16.mxu0 %v3183_v34  ;;  %2508 = vmatprep.subr.bf16.mxu1 %v3185_v35  ;;  %v765_v31 = vpack.c.bf16 %v757_v30, %v757_v30  ;;  %v3270_v33 = vld [vmem:[%s4207_s10 + $0x2c8] ss:$16 sps:$4 sm:$0xff]   ;;  %v3275_v34 = vld [vmem:[%s4207_s10 + $0x2e4] ss:$16 sps:$4 sm:$0xff]   ;;  %v3278_v35 = vld [vmem:[%s4207_s10 + $0x2ec] ss:$16 sps:$4 sm:$0xff]  }
  0xbf   : > { %v3315_v0 = vld [vmem:[%s4207_s10 + $0x3c0] ss:$16 sps:$4 sm:$0xff]   ;;  %v3359_v30 = vld [vmem:[%s4207_s10 + $0x4a4] ss:$16 sps:$4 sm:$0xff]   ;;  %s4558_s9 = smov (!%p749_p0, %s2788_s9), 7  ;;  %s741_s23 = scalar_lea.vmem [#allocation3], %s2787_s19 }
  0xc0   : > { %s2677_s26 = sshll.u32 %s741_s23, 4  ;;  %s2661_s15 = scalar_lea.sflag [#allocation4], %s4201_s6  ;;  %s4497_s26 = int_to_ptr.vmem [resolvable:$true] %s2677_s26 }
  0xc1   : > { %2345 = vmatpush1.bf16.msra.mxu0 %v3187_v36  ;;  %2509 = vmatpush1.bf16.msra.mxu1 %v3188_v37  ;;  %v3273_v36 = vld [vmem:[%s4207_s10 + $0x2e0] ss:$16 sps:$4 sm:$0xff]   ;;  %v3276_v37 = vld [vmem:[%s4207_s10 + $0x2e8] ss:$16 sps:$4 sm:$0xff]   ;;  %s3519_s30 = scalar_lea.vmem %s4497_s26, 512  ;;  %s3599_s4 = smov [#allocation3]  }
  0xc2   : > { %2346 = vmatprep.subr.bf16.mxu0 %v3189_v38  ;;  %2510 = vmatprep.subr.bf16.mxu1 %v3191_v39  ;;  %v3281_v38 = vld [vmem:[%s4207_s10 + $0x304] ss:$16 sps:$4 sm:$0xff]   ;;  %v3284_v39 = vld [vmem:[%s4207_s10 + $0x30c] ss:$16 sps:$4 sm:$0xff]   ;;  %p3520_p1 = scmp.ne.s32.totalorder %s4497_s26, %s3519_s30  ;;  %s3523_s5 = sshll.u32 %s3599_s4, 4  ;;  %s3524_s5 = int_to_ptr.vmem [resolvable:$false] %s3523_s5 }
  0xc3   : > { %s3525_s7 = scalar_lea.vmem %s3524_s5, 1024  ;;  %p3526_p4 = scmp.lt.s32.totalorder %s4497_s26, %s3524_s5 }
  0xc4   : > { %p3521_p2 = pnand %p3520_p1, %p3659_p5  ;;  %p3527_p6 = scmp.lt.s32.totalorder %s3525_s7, %s3519_s30 }
  0xc5   : > { %2347 = vmatpush1.bf16.msra.mxu0 %v3193_v40  ;;  %2511 = vmatpush1.bf16.msra.mxu1 %v3194_v41  ;;  %v3279_v40 = vld [vmem:[%s4207_s10 + $0x300] ss:$16 sps:$4 sm:$0xff]   ;;  %v3282_v41 = vld [vmem:[%s4207_s10 + $0x308] ss:$16 sps:$4 sm:$0xff]  }
  0xc6   : > { %2348 = vmatprep.subr.bf16.mxu0 %v3195_v42  ;;  %2512 = vmatprep.subr.bf16.mxu1 %v3197_v43  ;;  %v3287_v42 = vld [vmem:[%s4207_s10 + $0x324] ss:$16 sps:$4 sm:$0xff]   ;;  %v3290_v43 = vld [vmem:[%s4207_s10 + $0x32c] ss:$16 sps:$4 sm:$0xff]   ;;  %p3522_p3 = pneg %p3521_p2  ;;  %p3528_p7 = por %p3527_p6, %p3526_p4 }
  0xc8   : > { %p3529_p8 = pnand %p3528_p7, %p3522_p3 }
  0xc9   : > { %2349 = vmatpush1.bf16.msra.mxu0 %v3199_v44  ;;  %2513 = vmatpush1.bf16.msra.mxu1 %v3200_v45  ;;  %v3285_v44 = vld [vmem:[%s4207_s10 + $0x320] ss:$16 sps:$4 sm:$0xff]   ;;  %v3288_v45 = vld [vmem:[%s4207_s10 + $0x328] ss:$16 sps:$4 sm:$0xff]  }
  0xca   : > { %2350 = vmatprep.subr.bf16.mxu0 %v3201_v46  ;;  %2514 = vmatprep.subr.bf16.mxu1 %v3203_v47  ;;  %v3293_v46 = vld [vmem:[%s4207_s10 + $0x344] ss:$16 sps:$4 sm:$0xff]   ;;  %v3296_v47 = vld [vmem:[%s4207_s10 + $0x34c] ss:$16 sps:$4 sm:$0xff]  }
  0xcd   : > { %2351 = vmatpush1.bf16.msra.mxu0 %v3205_v48  ;;  %2515 = vmatpush1.bf16.msra.mxu1 %v3206_v49  ;;  %v3291_v48 = vld [vmem:[%s4207_s10 + $0x340] ss:$16 sps:$4 sm:$0xff]   ;;  %v3294_v49 = vld [vmem:[%s4207_s10 + $0x348] ss:$16 sps:$4 sm:$0xff]  }
  0xce   : > { %2352 = vmatprep.subr.bf16.mxu0 %v3207_v50  ;;  %2516 = vmatprep.subr.bf16.mxu1 %v3209_v51  ;;  %v3299_v50 = vld [vmem:[%s4207_s10 + $0x364] ss:$16 sps:$4 sm:$0xff]   ;;  %v3302_v51 = vld [vmem:[%s4207_s10 + $0x36c] ss:$16 sps:$4 sm:$0xff]  }
  0xd1   : > { %2353 = vmatpush1.bf16.msra.mxu0 %v3211_v52  ;;  %2517 = vmatpush1.bf16.msra.mxu1 %v3212_v53  ;;  %v3297_v52 = vld [vmem:[%s4207_s10 + $0x360] ss:$16 sps:$4 sm:$0xff]   ;;  %v3300_v53 = vld [vmem:[%s4207_s10 + $0x368] ss:$16 sps:$4 sm:$0xff]  }
  0xd2   : > { %2354 = vmatprep.subr.bf16.mxu0 %v3213_v54  ;;  %2518 = vmatprep.subr.bf16.mxu1 %v3215_v55  ;;  %v3305_v54 = vld [vmem:[%s4207_s10 + $0x384] ss:$16 sps:$4 sm:$0xff]   ;;  %v3308_v55 = vld [vmem:[%s4207_s10 + $0x38c] ss:$16 sps:$4 sm:$0xff]  }
  0xd5   : > { %2355 = vmatpush1.bf16.msra.mxu0 %v3217_v56  ;;  %2519 = vmatpush1.bf16.msra.mxu1 %v3218_v57  ;;  %v3303_v56 = vld [vmem:[%s4207_s10 + $0x380] ss:$16 sps:$4 sm:$0xff]   ;;  %v3306_v57 = vld [vmem:[%s4207_s10 + $0x388] ss:$16 sps:$4 sm:$0xff]  }
  0xd6   : > { %2356 = vmatprep.subr.bf16.mxu0 %v3219_v58  ;;  %2520 = vmatprep.subr.bf16.mxu1 %v3221_v59  ;;  %v3311_v58 = vld [vmem:[%s4207_s10 + $0x3a4] ss:$16 sps:$4 sm:$0xff]   ;;  %v3314_v59 = vld [vmem:[%s4207_s10 + $0x3ac] ss:$16 sps:$4 sm:$0xff]  }
  0xd9   : > { %2357 = vmatpush1.bf16.msra.mxu0 %v3223_v60  ;;  %2521 = vmatpush1.bf16.msra.mxu1 %v3224_v61  ;;  %v3309_v60 = vld [vmem:[%s4207_s10 + $0x3a0] ss:$16 sps:$4 sm:$0xff]   ;;  %v3312_v61 = vld [vmem:[%s4207_s10 + $0x3a8] ss:$16 sps:$4 sm:$0xff]  }
  0xda   : > { %2358 = vmatprep.subr.bf16.mxu0 %v3225_v62  ;;  %2522 = vmatprep.subr.bf16.mxu1 %v3227_v63  ;;  %v3317_v62 = vld [vmem:[%s4207_s10 + $0x3c4] ss:$16 sps:$4 sm:$0xff]   ;;  %v3320_v63 = vld [vmem:[%s4207_s10 + $0x3cc] ss:$16 sps:$4 sm:$0xff]  }
  0xdd   : > { %2359 = vmatpush1.bf16.msra.mxu0 %v3229_v1  ;;  %2523 = vmatpush1.bf16.msra.mxu1 %v3230_v2  ;;  %v3318_v1 = vld [vmem:[%s4207_s10 + $0x3c8] ss:$16 sps:$4 sm:$0xff]   ;;  %v3323_v2 = vld [vmem:[%s4207_s10 + $0x3e4] ss:$16 sps:$4 sm:$0xff]  }
  0xde   : > { %2369 = vmatprep.subr.bf16.mxu0 %v3233_v3  ;;  %2533 = vmatprep.subr.bf16.mxu1 %v3236_v4  ;;  %v3326_v3 = vld [vmem:[%s4207_s10 + $0x3ec] ss:$16 sps:$4 sm:$0xff]   ;;  %v3321_v4 = vld [vmem:[%s4207_s10 + $0x3e0] ss:$16 sps:$4 sm:$0xff]  }
  0xe0   : > { %2361 = vmatmul.mubr.bf16.vlgmr.msra.gmra.mrb[0].mxu0 %v762_v7  ;;  %2525 = vmatmul.mubr.bf16.vlgmr.msra.gmra.mrb[0].mxu1 %v762_v7  ;;  %v3329_v7 = vld [vmem:[%s4207_s10 + $0x404] ss:$16 sps:$4 sm:$0xff]  }
  0xe1   : > { %2370 = vmatpush1.bf16.msra.mxu0 %v3231_v5  ;;  %2534 = vmatpush1.bf16.msra.mxu1 %v3234_v6  ;;  %v3324_v5 = vld [vmem:[%s4207_s10 + $0x3e8] ss:$16 sps:$4 sm:$0xff]   ;;  %v756_v6 = vld [vmem:[%s4544_s0 + $0x10] sm:$0xff] }
  0xe2   : > { %2371 = vmatprep.subr.bf16.mxu0 %v3239_v8  ;;  %2535 = vmatprep.subr.bf16.mxu1 %v3242_v9  ;;  %v3332_v8 = vld [vmem:[%s4207_s10 + $0x40c] ss:$16 sps:$4 sm:$0xff]   ;;  %v3327_v9 = vld [vmem:[%s4207_s10 + $0x400] ss:$16 sps:$4 sm:$0xff]  }
  0xe3   : > { %2401 = vmatprep.mubr.bf16.mxu0 %v765_v31  ;;  %2565 = vmatprep.mubr.bf16.mxu1 %v765_v31  ;;  %v3362_v31 = vld [vmem:[%s4207_s10 + $0x4ac] ss:$16 sps:$4 sm:$0xff]  }
  0xe5   : > { %2372 = vmatpush1.bf16.msra.mxu0 %v3237_v10  ;;  %2536 = vmatpush1.bf16.msra.mxu1 %v3240_v11  ;;  %v764_v10 = vpack.c.bf16 %v756_v6, %v756_v6  ;;  %v3330_v11 = vld [vmem:[%s4207_s10 + $0x408] ss:$16 sps:$4 sm:$0xff]   ;;  %v3419_v6 = vld [vmem:[%s4207_s10 + $0x5e4] ss:$16 sps:$4 sm:$0xff]  }
  0xe6   : > { %2373 = vmatprep.subr.bf16.mxu0 %v3245_v12  ;;  %2537 = vmatprep.subr.bf16.mxu1 %v3248_v13  ;;  %v3335_v12 = vld [vmem:[%s4207_s10 + $0x424] ss:$16 sps:$4 sm:$0xff]   ;;  %v759_v13 = vld [vmem:[%s4544_s0 + $0x28] sm:$0xff] }
  0xe9   : > { %2374 = vmatpush1.bf16.msra.mxu0 %v3243_v14  ;;  %2538 = vmatpush1.bf16.msra.mxu1 %v3246_v15  ;;  %v3338_v14 = vld [vmem:[%s4207_s10 + $0x42c] ss:$16 sps:$4 sm:$0xff]   ;;  %v767_v15 = vpack.c.bf16 %v759_v13, %v759_v13 }
  0xea   : > { %2375 = vmatprep.subr.bf16.mxu0 %v3251_v16  ;;  %2539 = vmatprep.subr.bf16.mxu1 %v3254_v17  ;;  %v3333_v16 = vld [vmem:[%s4207_s10 + $0x420] ss:$16 sps:$4 sm:$0xff]   ;;  %v3336_v17 = vld [vmem:[%s4207_s10 + $0x428] ss:$16 sps:$4 sm:$0xff]  }
  0xed   : > { %2376 = vmatpush1.bf16.msra.mxu0 %v3249_v18  ;;  %2540 = vmatpush1.bf16.msra.mxu1 %v3252_v19  ;;  %v3341_v18 = vld [vmem:[%s4207_s10 + $0x444] ss:$16 sps:$4 sm:$0xff]   ;;  %v3344_v19 = vld [vmem:[%s4207_s10 + $0x44c] ss:$16 sps:$4 sm:$0xff]  }
  0xee   : > { %2377 = vmatprep.subr.bf16.mxu0 %v3257_v20  ;;  %2541 = vmatprep.subr.bf16.mxu1 %v3260_v21  ;;  %v3339_v20 = vld [vmem:[%s4207_s10 + $0x440] ss:$16 sps:$4 sm:$0xff]   ;;  %v3342_v21 = vld [vmem:[%s4207_s10 + $0x448] ss:$16 sps:$4 sm:$0xff]  }
  0xf1   : > { %2378 = vmatpush1.bf16.msra.mxu0 %v3255_v22  ;;  %2542 = vmatpush1.bf16.msra.mxu1 %v3258_v23  ;;  %v3347_v22 = vld [vmem:[%s4207_s10 + $0x464] ss:$16 sps:$4 sm:$0xff]   ;;  %v3350_v23 = vld [vmem:[%s4207_s10 + $0x46c] ss:$16 sps:$4 sm:$0xff]  }
  0xf2   : > { %2379 = vmatprep.subr.bf16.mxu0 %v3263_v24  ;;  %2543 = vmatprep.subr.bf16.mxu1 %v3266_v25  ;;  %v3345_v24 = vld [vmem:[%s4207_s10 + $0x460] ss:$16 sps:$4 sm:$0xff]   ;;  %v3348_v25 = vld [vmem:[%s4207_s10 + $0x468] ss:$16 sps:$4 sm:$0xff]  }
  0xf5   : > { %2380 = vmatpush1.bf16.msra.mxu0 %v3261_v26  ;;  %2544 = vmatpush1.bf16.msra.mxu1 %v3264_v27  ;;  %v3353_v26 = vld [vmem:[%s4207_s10 + $0x484] ss:$16 sps:$4 sm:$0xff]   ;;  %v3356_v27 = vld [vmem:[%s4207_s10 + $0x48c] ss:$16 sps:$4 sm:$0xff]  }
  0xf6   : > { %2381 = vmatprep.subr.bf16.mxu0 %v3269_v28  ;;  %2545 = vmatprep.subr.bf16.mxu1 %v3272_v29  ;;  %v3351_v28 = vld [vmem:[%s4207_s10 + $0x480] ss:$16 sps:$4 sm:$0xff]   ;;  %v3354_v29 = vld [vmem:[%s4207_s10 + $0x488] ss:$16 sps:$4 sm:$0xff]  }
  0xf9   : > { %2382 = vmatpush1.bf16.msra.mxu0 %v3267_v32  ;;  %2546 = vmatpush1.bf16.msra.mxu1 %v3270_v33  ;;  %v3357_v32 = vld [vmem:[%s4207_s10 + $0x4a0] ss:$16 sps:$4 sm:$0xff]   ;;  %v3360_v33 = vld [vmem:[%s4207_s10 + $0x4a8] ss:$16 sps:$4 sm:$0xff]  }
  0xfa   : > { %2383 = vmatprep.subr.bf16.mxu0 %v3275_v34  ;;  %2547 = vmatprep.subr.bf16.mxu1 %v3278_v35  ;;  %v3365_v34 = vld [vmem:[%s4207_s10 + $0x4c4] ss:$16 sps:$4 sm:$0xff]   ;;  %v3368_v35 = vld [vmem:[%s4207_s10 + $0x4cc] ss:$16 sps:$4 sm:$0xff]  }
  0xfd   : > { %2384 = vmatpush1.bf16.msra.mxu0 %v3273_v36  ;;  %2548 = vmatpush1.bf16.msra.mxu1 %v3276_v37  ;;  %v3363_v36 = vld [vmem:[%s4207_s10 + $0x4c0] ss:$16 sps:$4 sm:$0xff]   ;;  %v3366_v37 = vld [vmem:[%s4207_s10 + $0x4c8] ss:$16 sps:$4 sm:$0xff]  }
  0xfe   : > { %2385 = vmatprep.subr.bf16.mxu0 %v3281_v38  ;;  %2549 = vmatprep.subr.bf16.mxu1 %v3284_v39  ;;  %v3371_v38 = vld [vmem:[%s4207_s10 + $0x4e4] ss:$16 sps:$4 sm:$0xff]   ;;  %v3374_v39 = vld [vmem:[%s4207_s10 + $0x4ec] ss:$16 sps:$4 sm:$0xff]  }
 0x101   : > { %2386 = vmatpush1.bf16.msra.mxu0 %v3279_v40  ;;  %2550 = vmatpush1.bf16.msra.mxu1 %v3282_v41  ;;  %v3369_v40 = vld [vmem:[%s4207_s10 + $0x4e0] ss:$16 sps:$4 sm:$0xff]   ;;  %v3372_v41 = vld [vmem:[%s4207_s10 + $0x4e8] ss:$16 sps:$4 sm:$0xff]  }
 0x102   : > { %2387 = vmatprep.subr.bf16.mxu0 %v3287_v42  ;;  %2551 = vmatprep.subr.bf16.mxu1 %v3290_v43  ;;  %v3377_v42 = vld [vmem:[%s4207_s10 + $0x504] ss:$16 sps:$4 sm:$0xff]   ;;  %v3380_v43 = vld [vmem:[%s4207_s10 + $0x50c] ss:$16 sps:$4 sm:$0xff]  }
 0x105   : > { %2388 = vmatpush1.bf16.msra.mxu0 %v3285_v44  ;;  %2552 = vmatpush1.bf16.msra.mxu1 %v3288_v45  ;;  %v3375_v44 = vld [vmem:[%s4207_s10 + $0x500] ss:$16 sps:$4 sm:$0xff]   ;;  %v3378_v45 = vld [vmem:[%s4207_s10 + $0x508] ss:$16 sps:$4 sm:$0xff]  }
 0x106   : > { %2389 = vmatprep.subr.bf16.mxu0 %v3293_v46  ;;  %2553 = vmatprep.subr.bf16.mxu1 %v3296_v47  ;;  %v3383_v46 = vld [vmem:[%s4207_s10 + $0x524] ss:$16 sps:$4 sm:$0xff]   ;;  %v3386_v47 = vld [vmem:[%s4207_s10 + $0x52c] ss:$16 sps:$4 sm:$0xff]  }
 0x109   : > { %2390 = vmatpush1.bf16.msra.mxu0 %v3291_v48  ;;  %2554 = vmatpush1.bf16.msra.mxu1 %v3294_v49  ;;  %v3381_v48 = vld [vmem:[%s4207_s10 + $0x520] ss:$16 sps:$4 sm:$0xff]   ;;  %v3384_v49 = vld [vmem:[%s4207_s10 + $0x528] ss:$16 sps:$4 sm:$0xff]  }
 0x10a   : > { %2391 = vmatprep.subr.bf16.mxu0 %v3299_v50  ;;  %2555 = vmatprep.subr.bf16.mxu1 %v3302_v51  ;;  %v3389_v50 = vld [vmem:[%s4207_s10 + $0x544] ss:$16 sps:$4 sm:$0xff]   ;;  %v3392_v51 = vld [vmem:[%s4207_s10 + $0x54c] ss:$16 sps:$4 sm:$0xff]  }
 0x10d   : > { %2392 = vmatpush1.bf16.msra.mxu0 %v3297_v52  ;;  %2556 = vmatpush1.bf16.msra.mxu1 %v3300_v53  ;;  %v3387_v52 = vld [vmem:[%s4207_s10 + $0x540] ss:$16 sps:$4 sm:$0xff]   ;;  %v3390_v53 = vld [vmem:[%s4207_s10 + $0x548] ss:$16 sps:$4 sm:$0xff]  }
 0x10e   : > { %2393 = vmatprep.subr.bf16.mxu0 %v3305_v54  ;;  %2557 = vmatprep.subr.bf16.mxu1 %v3308_v55  ;;  %v3395_v54 = vld [vmem:[%s4207_s10 + $0x564] ss:$16 sps:$4 sm:$0xff]   ;;  %v3398_v55 = vld [vmem:[%s4207_s10 + $0x56c] ss:$16 sps:$4 sm:$0xff]  }
 0x111   : > { %2394 = vmatpush1.bf16.msra.mxu0 %v3303_v56  ;;  %2558 = vmatpush1.bf16.msra.mxu1 %v3306_v57  ;;  %v3393_v56 = vld [vmem:[%s4207_s10 + $0x560] ss:$16 sps:$4 sm:$0xff]   ;;  %v3396_v57 = vld [vmem:[%s4207_s10 + $0x568] ss:$16 sps:$4 sm:$0xff]  }
 0x112   : > { %2395 = vmatprep.subr.bf16.mxu0 %v3311_v58  ;;  %2559 = vmatprep.subr.bf16.mxu1 %v3314_v59  ;;  %v3401_v58 = vld [vmem:[%s4207_s10 + $0x584] ss:$16 sps:$4 sm:$0xff]   ;;  %v3404_v59 = vld [vmem:[%s4207_s10 + $0x58c] ss:$16 sps:$4 sm:$0xff]  }
 0x115   : > { %2396 = vmatpush1.bf16.msra.mxu0 %v3309_v60  ;;  %2560 = vmatpush1.bf16.msra.mxu1 %v3312_v61  ;;  %v3399_v60 = vld [vmem:[%s4207_s10 + $0x580] ss:$16 sps:$4 sm:$0xff]   ;;  %v3402_v61 = vld [vmem:[%s4207_s10 + $0x588] ss:$16 sps:$4 sm:$0xff]  }
 0x116   : > { %2397 = vmatprep.subr.bf16.mxu0 %v3317_v62  ;;  %2561 = vmatprep.subr.bf16.mxu1 %v3320_v63  ;;  %v3407_v62 = vld [vmem:[%s4207_s10 + $0x5a4] ss:$16 sps:$4 sm:$0xff]   ;;  %v3410_v63 = vld [vmem:[%s4207_s10 + $0x5ac] ss:$16 sps:$4 sm:$0xff]  }
 0x119   : > { %2398 = vmatpush1.bf16.msra.mxu0 %v3315_v0  ;;  %2562 = vmatpush1.bf16.msra.mxu1 %v3318_v1  ;;  %v3405_v0 = vld [vmem:[%s4207_s10 + $0x5a0] ss:$16 sps:$4 sm:$0xff]   ;;  %v3408_v1 = vld [vmem:[%s4207_s10 + $0x5a8] ss:$16 sps:$4 sm:$0xff]  }
 0x11a   : > { %2399 = vmatprep.subr.bf16.mxu0 %v3323_v2  ;;  %2563 = vmatprep.subr.bf16.mxu1 %v3326_v3  ;;  %v3413_v2 = vld [vmem:[%s4207_s10 + $0x5c4] ss:$16 sps:$4 sm:$0xff]   ;;  %v3416_v3 = vld [vmem:[%s4207_s10 + $0x5cc] ss:$16 sps:$4 sm:$0xff]  }
 0x11d   : > { %2400 = vmatpush1.bf16.msra.mxu0 %v3321_v4  ;;  %2564 = vmatpush1.bf16.msra.mxu1 %v3324_v5  ;;  %v3411_v4 = vld [vmem:[%s4207_s10 + $0x5c0] ss:$16 sps:$4 sm:$0xff]   ;;  %v3414_v5 = vld [vmem:[%s4207_s10 + $0x5c8] ss:$16 sps:$4 sm:$0xff]  }
 0x11e   : > { %2410 = vmatprep.subr.bf16.mxu0 %v3329_v7  ;;  %2574 = vmatprep.subr.bf16.mxu1 %v3332_v8  ;;  %v3422_v7 = vld [vmem:[%s4207_s10 + $0x5ec] ss:$16 sps:$4 sm:$0xff]   ;;  %v3417_v8 = vld [vmem:[%s4207_s10 + $0x5e0] ss:$16 sps:$4 sm:$0xff]  }
 0x120   : > { %2402 = vmatmul.mubr.bf16.vlgmr.msra.gmra.mrb[0].mxu0 %v764_v10  ;;  %2566 = vmatmul.mubr.bf16.vlgmr.msra.gmra.mrb[0].mxu1 %v764_v10  ;;  %v758_v10 = vld [vmem:[%s4544_s0 + $0x20] sm:$0xff] }
 0x121   : > { %2411 = vmatpush1.bf16.msra.mxu0 %v3327_v9  ;;  %2575 = vmatpush1.bf16.msra.mxu1 %v3330_v11  ;;  %v3420_v9 = vld [vmem:[%s4207_s10 + $0x5e8] ss:$16 sps:$4 sm:$0xff]   ;;  %v3425_v11 = vld [vmem:[%s4207_s10 + $0x604] ss:$16 sps:$4 sm:$0xff]   ;;  %v766_v13 = vpack.c.bf16 %v758_v10, %v758_v10 }
 0x122   : > { %2412 = vmatprep.subr.bf16.mxu0 %v3335_v12  ;;  %2576 = vmatprep.subr.bf16.mxu1 %v3338_v14  ;;  %v3428_v12 = vld [vmem:[%s4207_s10 + $0x60c] ss:$16 sps:$4 sm:$0xff]   ;;  %v3515_v10 = vld [vmem:[%s4207_s10 + $0x7e4] ss:$16 sps:$4 sm:$0xff]  }
 0x123   : > { %2442 = vmatprep.mubr.bf16.mxu0 %v767_v15  ;;  %2606 = vmatprep.mubr.bf16.mxu1 %v767_v15  ;;  %v761_v14 = vld [vmem:[%s4544_s0 + $0x38] sm:$0xff]  ;;  %v3423_v15 = vld [vmem:[%s4207_s10 + $0x600] ss:$16 sps:$4 sm:$0xff]  }
 0x125   : > { %2413 = vmatpush1.bf16.msra.mxu0 %v3333_v16  ;;  %2577 = vmatpush1.bf16.msra.mxu1 %v3336_v17  ;;  %v3426_v16 = vld [vmem:[%s4207_s10 + $0x608] ss:$16 sps:$4 sm:$0xff]   ;;  %v3431_v17 = vld [vmem:[%s4207_s10 + $0x624] ss:$16 sps:$4 sm:$0xff]  }
 0x126   : > { %2414 = vmatprep.subr.bf16.mxu0 %v3341_v18  ;;  %2578 = vmatprep.subr.bf16.mxu1 %v3344_v19  ;;  %v3434_v18 = vld [vmem:[%s4207_s10 + $0x62c] ss:$16 sps:$4 sm:$0xff]   ;;  %v769_v19 = vpack.c.bf16 %v761_v14, %v761_v14  ;;  %v760_v14 = vld [vmem:[%s4544_s0 + $0x30] sm:$0xff] }
 0x129   : > { %2415 = vmatpush1.bf16.msra.mxu0 %v3339_v20  ;;  %2579 = vmatpush1.bf16.msra.mxu1 %v3342_v21  ;;  %v3429_v20 = vld [vmem:[%s4207_s10 + $0x620] ss:$16 sps:$4 sm:$0xff]   ;;  %v3432_v21 = vld [vmem:[%s4207_s10 + $0x628] ss:$16 sps:$4 sm:$0xff]  }
 0x12a   : > { %2416 = vmatprep.subr.bf16.mxu0 %v3347_v22  ;;  %2580 = vmatprep.subr.bf16.mxu1 %v3350_v23  ;;  %v3437_v22 = vld [vmem:[%s4207_s10 + $0x644] ss:$16 sps:$4 sm:$0xff]   ;;  %v3440_v23 = vld [vmem:[%s4207_s10 + $0x64c] ss:$16 sps:$4 sm:$0xff]  }
 0x12d   : > { %2417 = vmatpush1.bf16.msra.mxu0 %v3345_v24  ;;  %2581 = vmatpush1.bf16.msra.mxu1 %v3348_v25  ;;  %v3435_v24 = vld [vmem:[%s4207_s10 + $0x640] ss:$16 sps:$4 sm:$0xff]   ;;  %v3438_v25 = vld [vmem:[%s4207_s10 + $0x648] ss:$16 sps:$4 sm:$0xff]  }
 0x12e   : > { %2418 = vmatprep.subr.bf16.mxu0 %v3353_v26  ;;  %2582 = vmatprep.subr.bf16.mxu1 %v3356_v27  ;;  %v3443_v26 = vld [vmem:[%s4207_s10 + $0x664] ss:$16 sps:$4 sm:$0xff]   ;;  %v3446_v27 = vld [vmem:[%s4207_s10 + $0x66c] ss:$16 sps:$4 sm:$0xff]  }
 0x131   : > { %2419 = vmatpush1.bf16.msra.mxu0 %v3351_v28  ;;  %2583 = vmatpush1.bf16.msra.mxu1 %v3354_v29  ;;  %v3441_v28 = vld [vmem:[%s4207_s10 + $0x660] ss:$16 sps:$4 sm:$0xff]   ;;  %v3444_v29 = vld [vmem:[%s4207_s10 + $0x668] ss:$16 sps:$4 sm:$0xff]  }
 0x132   : > { %2420 = vmatprep.subr.bf16.mxu0 %v3359_v30  ;;  %2584 = vmatprep.subr.bf16.mxu1 %v3362_v31  ;;  %v3449_v30 = vld [vmem:[%s4207_s10 + $0x684] ss:$16 sps:$4 sm:$0xff]   ;;  %v3452_v31 = vld [vmem:[%s4207_s10 + $0x68c] ss:$16 sps:$4 sm:$0xff]  }
 0x135   : > { %2421 = vmatpush1.bf16.msra.mxu0 %v3357_v32  ;;  %2585 = vmatpush1.bf16.msra.mxu1 %v3360_v33  ;;  %v3447_v32 = vld [vmem:[%s4207_s10 + $0x680] ss:$16 sps:$4 sm:$0xff]   ;;  %v3450_v33 = vld [vmem:[%s4207_s10 + $0x688] ss:$16 sps:$4 sm:$0xff]  }
 0x136   : > { %2422 = vmatprep.subr.bf16.mxu0 %v3365_v34  ;;  %2586 = vmatprep.subr.bf16.mxu1 %v3368_v35  ;;  %v3455_v34 = vld [vmem:[%s4207_s10 + $0x6a4] ss:$16 sps:$4 sm:$0xff]   ;;  %v3458_v35 = vld [vmem:[%s4207_s10 + $0x6ac] ss:$16 sps:$4 sm:$0xff]  }
 0x139   : > { %2423 = vmatpush1.bf16.msra.mxu0 %v3363_v36  ;;  %2587 = vmatpush1.bf16.msra.mxu1 %v3366_v37  ;;  %v3453_v36 = vld [vmem:[%s4207_s10 + $0x6a0] ss:$16 sps:$4 sm:$0xff]   ;;  %v3456_v37 = vld [vmem:[%s4207_s10 + $0x6a8] ss:$16 sps:$4 sm:$0xff]  }
 0x13a   : > { %2424 = vmatprep.subr.bf16.mxu0 %v3371_v38  ;;  %2588 = vmatprep.subr.bf16.mxu1 %v3374_v39  ;;  %v3461_v38 = vld [vmem:[%s4207_s10 + $0x6c4] ss:$16 sps:$4 sm:$0xff]   ;;  %v3464_v39 = vld [vmem:[%s4207_s10 + $0x6cc] ss:$16 sps:$4 sm:$0xff]  }
 0x13d   : > { %2425 = vmatpush1.bf16.msra.mxu0 %v3369_v40  ;;  %2589 = vmatpush1.bf16.msra.mxu1 %v3372_v41  ;;  %v3459_v40 = vld [vmem:[%s4207_s10 + $0x6c0] ss:$16 sps:$4 sm:$0xff]   ;;  %v3462_v41 = vld [vmem:[%s4207_s10 + $0x6c8] ss:$16 sps:$4 sm:$0xff]  }
 0x13e   : > { %2426 = vmatprep.subr.bf16.mxu0 %v3377_v42  ;;  %2590 = vmatprep.subr.bf16.mxu1 %v3380_v43  ;;  %v3467_v42 = vld [vmem:[%s4207_s10 + $0x6e4] ss:$16 sps:$4 sm:$0xff]   ;;  %v3470_v43 = vld [vmem:[%s4207_s10 + $0x6ec] ss:$16 sps:$4 sm:$0xff]  }
 0x141   : > { %2427 = vmatpush1.bf16.msra.mxu0 %v3375_v44  ;;  %2591 = vmatpush1.bf16.msra.mxu1 %v3378_v45  ;;  %v3465_v44 = vld [vmem:[%s4207_s10 + $0x6e0] ss:$16 sps:$4 sm:$0xff]   ;;  %v3468_v45 = vld [vmem:[%s4207_s10 + $0x6e8] ss:$16 sps:$4 sm:$0xff]  }
 0x142   : > { %2428 = vmatprep.subr.bf16.mxu0 %v3383_v46  ;;  %2592 = vmatprep.subr.bf16.mxu1 %v3386_v47  ;;  %v3473_v46 = vld [vmem:[%s4207_s10 + $0x704] ss:$16 sps:$4 sm:$0xff]   ;;  %v3476_v47 = vld [vmem:[%s4207_s10 + $0x70c] ss:$16 sps:$4 sm:$0xff]  }
 0x145   : > { %2429 = vmatpush1.bf16.msra.mxu0 %v3381_v48  ;;  %2593 = vmatpush1.bf16.msra.mxu1 %v3384_v49  ;;  %v3471_v48 = vld [vmem:[%s4207_s10 + $0x700] ss:$16 sps:$4 sm:$0xff]   ;;  %v3474_v49 = vld [vmem:[%s4207_s10 + $0x708] ss:$16 sps:$4 sm:$0xff]  }
 0x146   : > { %2430 = vmatprep.subr.bf16.mxu0 %v3389_v50  ;;  %2594 = vmatprep.subr.bf16.mxu1 %v3392_v51  ;;  %v3479_v50 = vld [vmem:[%s4207_s10 + $0x724] ss:$16 sps:$4 sm:$0xff]   ;;  %v3482_v51 = vld [vmem:[%s4207_s10 + $0x72c] ss:$16 sps:$4 sm:$0xff]  }
 0x149   : > { %2431 = vmatpush1.bf16.msra.mxu0 %v3387_v52  ;;  %2595 = vmatpush1.bf16.msra.mxu1 %v3390_v53  ;;  %v3477_v52 = vld [vmem:[%s4207_s10 + $0x720] ss:$16 sps:$4 sm:$0xff]   ;;  %v3480_v53 = vld [vmem:[%s4207_s10 + $0x728] ss:$16 sps:$4 sm:$0xff]  }
 0x14a   : > { %2432 = vmatprep.subr.bf16.mxu0 %v3395_v54  ;;  %2596 = vmatprep.subr.bf16.mxu1 %v3398_v55  ;;  %v3485_v54 = vld [vmem:[%s4207_s10 + $0x744] ss:$16 sps:$4 sm:$0xff]   ;;  %v3488_v55 = vld [vmem:[%s4207_s10 + $0x74c] ss:$16 sps:$4 sm:$0xff]  }
 0x14d   : > { %2433 = vmatpush1.bf16.msra.mxu0 %v3393_v56  ;;  %2597 = vmatpush1.bf16.msra.mxu1 %v3396_v57  ;;  %v3483_v56 = vld [vmem:[%s4207_s10 + $0x740] ss:$16 sps:$4 sm:$0xff]   ;;  %v3486_v57 = vld [vmem:[%s4207_s10 + $0x748] ss:$16 sps:$4 sm:$0xff]  }
 0x14e   : > { %2434 = vmatprep.subr.bf16.mxu0 %v3401_v58  ;;  %2598 = vmatprep.subr.bf16.mxu1 %v3404_v59  ;;  %v3491_v58 = vld [vmem:[%s4207_s10 + $0x764] ss:$16 sps:$4 sm:$0xff]   ;;  %v3494_v59 = vld [vmem:[%s4207_s10 + $0x76c] ss:$16 sps:$4 sm:$0xff]  }
 0x151   : > { %2435 = vmatpush1.bf16.msra.mxu0 %v3399_v60  ;;  %2599 = vmatpush1.bf16.msra.mxu1 %v3402_v61  ;;  %v3489_v60 = vld [vmem:[%s4207_s10 + $0x760] ss:$16 sps:$4 sm:$0xff]   ;;  %v3492_v61 = vld [vmem:[%s4207_s10 + $0x768] ss:$16 sps:$4 sm:$0xff]  }
 0x152   : > { %2436 = vmatprep.subr.bf16.mxu0 %v3407_v62  ;;  %2600 = vmatprep.subr.bf16.mxu1 %v3410_v63  ;;  %v3497_v62 = vld [vmem:[%s4207_s10 + $0x784] ss:$16 sps:$4 sm:$0xff]   ;;  %v3500_v63 = vld [vmem:[%s4207_s10 + $0x78c] ss:$16 sps:$4 sm:$0xff]  }
 0x155   : > { %2437 = vmatpush1.bf16.msra.mxu0 %v3405_v0  ;;  %2601 = vmatpush1.bf16.msra.mxu1 %v3408_v1  ;;  %v3495_v0 = vld [vmem:[%s4207_s10 + $0x780] ss:$16 sps:$4 sm:$0xff]   ;;  %v3498_v1 = vld [vmem:[%s4207_s10 + $0x788] ss:$16 sps:$4 sm:$0xff]  }
 0x156   : > { %2438 = vmatprep.subr.bf16.mxu0 %v3413_v2  ;;  %2602 = vmatprep.subr.bf16.mxu1 %v3416_v3  ;;  %v3503_v2 = vld [vmem:[%s4207_s10 + $0x7a4] ss:$16 sps:$4 sm:$0xff]   ;;  %v3506_v3 = vld [vmem:[%s4207_s10 + $0x7ac] ss:$16 sps:$4 sm:$0xff]  }
 0x159   : > { %2439 = vmatpush1.bf16.msra.mxu0 %v3411_v4  ;;  %2603 = vmatpush1.bf16.msra.mxu1 %v3414_v5  ;;  %v3501_v4 = vld [vmem:[%s4207_s10 + $0x7a0] ss:$16 sps:$4 sm:$0xff]   ;;  %v3504_v5 = vld [vmem:[%s4207_s10 + $0x7a8] ss:$16 sps:$4 sm:$0xff]  }
 0x15a   : > { %2440 = vmatprep.subr.bf16.mxu0 %v3419_v6  ;;  %2604 = vmatprep.subr.bf16.mxu1 %v3422_v7  ;;  %v3509_v6 = vld [vmem:[%s4207_s10 + $0x7c4] ss:$16 sps:$4 sm:$0xff]   ;;  %v3512_v7 = vld [vmem:[%s4207_s10 + $0x7cc] ss:$16 sps:$4 sm:$0xff]  }
 0x15d   : > { %2441 = vmatpush1.bf16.msra.mxu0 %v3417_v8  ;;  %2605 = vmatpush1.bf16.msra.mxu1 %v3420_v9  ;;  %v3507_v8 = vld [vmem:[%s4207_s10 + $0x7c0] ss:$16 sps:$4 sm:$0xff]   ;;  %v3510_v9 = vld [vmem:[%s4207_s10 + $0x7c8] ss:$16 sps:$4 sm:$0xff]  }
 0x15e   : > { %2451 = vmatprep.subr.bf16.mxu0 %v3425_v11  ;;  %2615 = vmatprep.subr.bf16.mxu1 %v3428_v12  ;;  %v3518_v11 = vld [vmem:[%s4207_s10 + $0x7ec] ss:$16 sps:$4 sm:$0xff]   ;;  %v3513_v12 = vld [vmem:[%s4207_s10 + $0x7e0] ss:$16 sps:$4 sm:$0xff]  }
 0x160   : > { %2443 = vmatmul.mubr.bf16.vlgmr.msra.gmra.mrb[0].mxu0 %v766_v13  ;;  %2607 = vmatmul.mubr.bf16.vlgmr.msra.gmra.mrb[0].mxu1 %v766_v13  ;;  %v3516_v13 = vld [vmem:[%s4207_s10 + $0x7e8] ss:$16 sps:$4 sm:$0xff]   ;;  %s751_s10 = scalar_lea.vmem %s4546_s2, %s4558_s9 }
 0x161   : > { %2452 = vmatpush1.bf16.msra.mxu0 %v3423_v15  ;;  %2616 = vmatpush1.bf16.msra.mxu1 %v3426_v16  ;;  %v768_v15 = vpack.c.bf16 %v760_v14, %v760_v14  ;;  %v1028_v16 = vlaneseq }
 0x162   : > { %2453 = vmatprep.subr.bf16.mxu0 %v3431_v17  ;;  %2617 = vmatprep.subr.bf16.mxu1 %v3434_v18 }
 0x163   : > { %2483 = vmatprep.mubr.bf16.mxu0 %v769_v19  ;;  %2647 = vmatprep.mubr.bf16.mxu1 %v769_v19  ;;  %v1029_v17 = vshrl.u32 %v1028_v16, 7 }
 0x165   : > { %2454 = vmatpush1.bf16.msra.mxu0 %v3429_v20  ;;  %2618 = vmatpush1.bf16.msra.mxu1 %v3432_v21  ;;  %v1030_v18 = vsub.s32 0, %v1029_v17  ;;  %v1038_v19 = vsub.s32 2, %v1029_v17  ;;  %v1026_v20 = vld [vmem:[%s751_s10] sm:$0xf]  ;;  %v1034_v21 = vsub.s32 1, %v1029_v17 }
 0x166   : > { %2455 = vmatprep.subr.bf16.mxu0 %v3437_v22  ;;  %2619 = vmatprep.subr.bf16.mxu1 %v3440_v23  ;;  %v1042_v22 = vsub.s32 3, %v1029_v17 }
 0x167   : > { %v1031_v23 = vrot.slane %v1026_v20, %v1030_v18 }
 0x169   : > { %2456 = vmatpush1.bf16.msra.mxu0 %v3435_v24  ;;  %2620 = vmatpush1.bf16.msra.mxu1 %v3438_v25  ;;  %v1039_v24 = vrot.slane %v1026_v20, %v1038_v19  ;;  %v1035_v25 = vrot.slane %v1026_v20, %v1034_v21 }
 0x16a   : > { %2457 = vmatprep.subr.bf16.mxu0 %v3443_v26  ;;  %2621 = vmatprep.subr.bf16.mxu1 %v3446_v27  ;;  %v1043_v26 = vrot.slane %v1026_v20, %v1042_v22 }
 0x16d   : > { %2458 = vmatpush1.bf16.msra.mxu0 %v3441_v28  ;;  %2622 = vmatpush1.bf16.msra.mxu1 %v3444_v29 }
 0x16e   : > { %2459 = vmatprep.subr.bf16.mxu0 %v3449_v30  ;;  %2623 = vmatprep.subr.bf16.mxu1 %v3452_v31 }
 0x171   : > { %2460 = vmatpush1.bf16.msra.mxu0 %v3447_v32  ;;  %2624 = vmatpush1.bf16.msra.mxu1 %v3450_v33 }
 0x172   : > { %2461 = vmatprep.subr.bf16.mxu0 %v3455_v34  ;;  %2625 = vmatprep.subr.bf16.mxu1 %v3458_v35 }
 0x175   : > { %2462 = vmatpush1.bf16.msra.mxu0 %v3453_v36  ;;  %2626 = vmatpush1.bf16.msra.mxu1 %v3456_v37 }
 0x176   : > { %2463 = vmatprep.subr.bf16.mxu0 %v3461_v38  ;;  %2627 = vmatprep.subr.bf16.mxu1 %v3464_v39 }
 0x179   : > { %2464 = vmatpush1.bf16.msra.mxu0 %v3459_v40  ;;  %2628 = vmatpush1.bf16.msra.mxu1 %v3462_v41 }
 0x17a   : > { %2465 = vmatprep.subr.bf16.mxu0 %v3467_v42  ;;  %2629 = vmatprep.subr.bf16.mxu1 %v3470_v43 }
 0x17d   : > { %2466 = vmatpush1.bf16.msra.mxu0 %v3465_v44  ;;  %2630 = vmatpush1.bf16.msra.mxu1 %v3468_v45 }
 0x17e   : > { %2467 = vmatprep.subr.bf16.mxu0 %v3473_v46  ;;  %2631 = vmatprep.subr.bf16.mxu1 %v3476_v47 }
 0x181   : > { %2468 = vmatpush1.bf16.msra.mxu0 %v3471_v48  ;;  %2632 = vmatpush1.bf16.msra.mxu1 %v3474_v49 }
 0x182   : > { %2469 = vmatprep.subr.bf16.mxu0 %v3479_v50  ;;  %2633 = vmatprep.subr.bf16.mxu1 %v3482_v51 }
 0x185   : > { %2470 = vmatpush1.bf16.msra.mxu0 %v3477_v52  ;;  %2634 = vmatpush1.bf16.msra.mxu1 %v3480_v53 }
 0x186   : > { %2471 = vmatprep.subr.bf16.mxu0 %v3485_v54  ;;  %2635 = vmatprep.subr.bf16.mxu1 %v3488_v55 }
 0x189   : > { %2472 = vmatpush1.bf16.msra.mxu0 %v3483_v56  ;;  %2636 = vmatpush1.bf16.msra.mxu1 %v3486_v57 }
 0x18a   : > { %2473 = vmatprep.subr.bf16.mxu0 %v3491_v58  ;;  %2637 = vmatprep.subr.bf16.mxu1 %v3494_v59 }
 0x18d   : > { %2474 = vmatpush1.bf16.msra.mxu0 %v3489_v60  ;;  %2638 = vmatpush1.bf16.msra.mxu1 %v3492_v61 }
 0x18e   : > { %2475 = vmatprep.subr.bf16.mxu0 %v3497_v62  ;;  %2639 = vmatprep.subr.bf16.mxu1 %v3500_v63 }
 0x191   : > { %2476 = vmatpush1.bf16.msra.mxu0 %v3495_v0  ;;  %2640 = vmatpush1.bf16.msra.mxu1 %v3498_v1 }
 0x192   : > { %2477 = vmatprep.subr.bf16.mxu0 %v3503_v2  ;;  %2641 = vmatprep.subr.bf16.mxu1 %v3506_v3 }
 0x195   : > { %2478 = vmatpush1.bf16.msra.mxu0 %v3501_v4  ;;  %2642 = vmatpush1.bf16.msra.mxu1 %v3504_v5 }
 0x196   : > { %2479 = vmatprep.subr.bf16.mxu0 %v3509_v6  ;;  %2643 = vmatprep.subr.bf16.mxu1 %v3512_v7 }
 0x199   : > { %2480 = vmatpush1.bf16.msra.mxu0 %v3507_v8  ;;  %2644 = vmatpush1.bf16.msra.mxu1 %v3510_v9 }
 0x19a   : > { %2481 = vmatprep.subr.bf16.mxu0 %v3515_v10  ;;  %2645 = vmatprep.subr.bf16.mxu1 %v3518_v11 }
 0x19d   : > { %2482 = vmatpush1.bf16.msra.mxu0 %v3513_v12  ;;  %2646 = vmatpush1.bf16.msra.mxu1 %v3516_v13 }
 0x1a0   : > { %2484 = vmatmul.mubr.bf16.vlgmr.msra.gmra.mrb[0].mxu0 %v768_v15  ;;  %2648 = vmatmul.mubr.bf16.vlgmr.msra.gmra.mrb[0].mxu1 %v768_v15 }
 0x273   : > { %v2485_v27 = vpop.f32.mrb[0].mxu0  ;;  %v2649_v28 = vpop.f32.mrb[0].mxu1 }
 0x274   : > { %v3052_v29 = vadd.f32 %v2485_v27, %v1031_v23  ;;  %v3054_v30 = vadd.f32 %v2649_v28, %v1039_v24  ;;  %v2487_v31 = vpop.f32.mrb[1].mxu0  ;;  %v2651_v32 = vpop.f32.mrb[1].mxu1 }
 0x275   : > { %v3053_v33 = vadd.f32 %v2487_v31, %v1035_v25  ;;  %v3055_v34 = vadd.f32 %v2651_v32, %v1043_v26  ;;  %v2489_v35 = vpop.f32.mrb[2].mxu0  ;;  %v2653_v36 = vpop.f32.mrb[2].mxu1 }
 0x276   : > { %2656 = vst [vmem:[%s741_s23] sm:$0xff] %v3052_v29  ;;  %2658 = vst [vmem:[%s741_s23 + $0x10] sm:$0xff] %v3054_v30  ;;  %v2490_v37 = vpop.f32.mrb[3].mxu0  ;;  %v2654_v38 = vpop.f32.mrb[3].mxu1 }
 0x277   : > { %2657 = vst [vmem:[%s741_s23 + $0x8] sm:$0xff] %v3053_v33  ;;  %2659 = vst [vmem:[%s741_s23 + $0x18] sm:$0xff] %v3055_v34 }
 0x278   : > { %3532 = shalt.err (!%p3529_p8)
}
 0x279   : > { %s3533_s6 = scalar_lea.hbm %s4495_s29, 512  ;;  %s3537_s11 = scalar_lea.hbm %s4547_s3, 1024 }
 0x27a   : > { %p3534_p11 = scmp.ne.s32.totalorder %s4495_s29, %s3533_s6  ;;  %p3538_p0 = scmp.lt.u32.totalorder %s4495_s29, %s4547_s3 }
 0x27b   : > { %p3539_p1 = scmp.lt.u32.totalorder %s3537_s11, %s3533_s6  ;;  %p3541_p3 = scmp.lt.u32.totalorder %s3533_s6, %s4495_s29 }
 0x27c   : > { %p3535_p12 = pnand %p3534_p11, %p3659_p5 }
 0x27d   : > { %p3540_p2 = por %p3539_p1, %p3538_p0 }
 0x27e   : > { %p3536_p13 = pneg %p3535_p12 }
 0x27f   : > { %p3542_p4 = por %p3541_p3, %p3540_p2 }
 0x281   : > { %p3543_p6 = pnand %p3542_p4, %p3536_p13 }
 0x283   : > { %3546 = shalt.err (!%p3543_p6)
}
 0x284   : > { %3080 = dma.vmem_to_hbm [thread:$0]  (%p3659_p5), %s4497_s26, 512, %s4495_s29, %s2661_s15  }
 0x285 PF: > { %s2689_s19 = sand.u32 1, %s3577_s12   ;;  %p3083_p7 = pnand %p2781_p10, %p3670_p9 }
 0x286   : > { %s2690_s21 = scalar_lea.sflag [#allocation4], %s2689_s19 }
 0x287   : > { %3572 = dma.done.wait (!%p3083_p7), %s2690_s21, 512  }
 0x288   : > { %3574 = vsyncadd (!%p3083_p7), %s2690_s21, 4294966784  ;;  %s16_s17 = sadd.s32 1, %s3597_s17   ;;  %s4550_s12 = smov %s3581_s13 }
 0x289   : > { %p13_p8 = scmp.ge.s32.totalorder %s16_s17, 4   ;;  %s4551_s13 = smov %s3585_s14 }
 0x28a   : > { %s4552_s14 = smov %s3668_s24  ;;  %s4553_s15 = smov %s3593_s16 }
 0x28b   : > { %s4554_s16 = smov %s4556_s20  ;;  %15 = sbr.rel (!%p13_p8) target bundleno = 4 (0x4), region = 101 }
 0x292   :  { %2695 = vsyncpa [#allocation4], 1 }
 0x293   :  { %2697 = vsyncpa [#allocation4 + $0x1], 1 }

// kernel: projector_forward.4
= control target key start
LH: loop header
LB: loop body
LE: loop exit
PB: predicated region body
PF: predicated region fallthrough
CT: control target
= control target key end

     0   :  { %8 = vsyncpa [#allocation3], 0  ;;  %s8026_s0 = inlined_call_operand.hbm [shape: f32[8,2176], index: 0, kind: input, shape index: {}]   ;;  %s8027_s1 = inlined_call_operand.hbm [shape: bf16[2176,2176], index: 1, kind: input, shape index: {}]   ;;  %s8028_s2 = inlined_call_operand.vmem [shape: f32[1,2176], index: 2, kind: input, shape index: {}]   ;;  %s8029_s3 = inlined_call_operand.vmem [shape: f32[8,2176], index: 3, kind: output, shape index: {}]  }
   0x1   :  { %9 = vsyncpa [#allocation5], 0 }
   0x2   :  { %11 = vsyncpa [#allocation5 + $0x1], 0  ;;  %s6879_s12 = smov 0   ;;  %s6881_s13 = smov 0  }
   0x3   :  { %s6883_s14 = smov 0   ;;  %s6885_s15 = smov 0  }
   0x4   :  { %s6887_s16 = smov 0   ;;  %s6889_s17 = smov 0  }
   0x5 LB: > { %s4939_s18 = sadd.s32 4294967295, %s6786_s17   ;;  %s26_s19 = sadd.s32 1, %s6782_s16  ;;  %s6786_s17 = sphi %s6889_s17, %s17_s17   ;;  %s6782_s16 = sphi %s6887_s16, %s8059_s16   ;;  %s6778_s15 = sphi %s6885_s15, %s8058_s15   ;;  %s6774_s14 = sphi %s6883_s14, %s8057_s14   ;;  %s6770_s13 = sphi %s6881_s13, %s8056_s13   ;;  %s6766_s12 = sphi %s6879_s12, %s8055_s12  }
   0x6   : > { %p27_p0 = scmp.ge.s32.totalorder %s26_s19, 5  ;;  %s62_s20 = sadd.s32 1, %s6774_s14 }
   0x7   : > { %p69_p1 = scmp.ne.s32.totalorder %s6774_s14, %s6770_s13  ;;  %p70_p2 = scmp.eq.s32.totalorder %s6786_s17, 0 }
   0x8   : > { %s8061_s19 = smov (%p27_p0, %s26_s19), 0  ;;  %p75_p4 = scmp.ne.s32.totalorder %s6770_s13, %s6766_s12 }
   0x9   : > { %p6915_p3 = por %p70_p2, %p69_p1  ;;  %s59_s22 = ssub.s32 %s6782_s16, %s8061_s19 }
   0xa   : > { %p6922_p5 = scmp.eq.s32.totalorder %s4939_s18, 0  ;;  %p60_p6 = scmp.eq.s32.totalorder %s59_s22, 0 }
   0xb   : > { %s8034_s21 = scalar_select %p6915_p3, 1, 0 }
   0xc   : > { %s8035_s23 = scalar_select %p6922_p5, 1, 0 }
   0xd   : > { %p127_p7 = scmp.eq.s32.totalorder %s4939_s18, 4  ;;  %p6928_p8 = por %p6922_p5, %p75_p4 }
   0xe   : > { %p4941_p9 = scmp.ge.s32.totalorder %s6786_s17, 1  ;;  %p140_p11 = scmp.lt.s32.totalorder %s6786_s17, 6 }
   0xf   : > { %s8036_s24 = scalar_select %p6928_p8, 1, 0 }
  0x10   : > { %s6934_s25 = scalar_select %p60_p6, %s6774_s14, %s62_s20  }
  0x11   : > { %p6936_p10 = por %p127_p7, %p69_p1  ;;  %p6941_p12 = pnand %p4941_p9, %p140_p11 }
  0x12   : > { %s6852_s28 = smov [#allocation2]   ;;  %s6612_s6 = scalar_lea.hbm %s8026_s0, 2176 }
  0x13   : > { %s8037_s26 = scalar_select %p6936_p10, 1, 0 }
  0x14   : > { %s8038_s27 = scalar_select %p6941_p12, 1, 0 }
  0x15   : > { %s156_s29 = sshll.u32 %s6852_s28, 4  ;;  %p5608_p13 = pneg %p6941_p12  ;;  %s157_s29 = int_to_ptr.vmem [resolvable:$true] %s156_s29 }
  0x16   : > { %p6613_p1 = scmp.ne.s32.totalorder %s8026_s0, %s6612_s6  ;;  %p6619_p7 = scmp.lt.u32.totalorder %s6612_s6, %s8026_s0 }
  0x17   : > { %p6949_p0 = pnand %p5608_p13, %p6922_p5 }
  0x19   : > { %p6614_p2 = pneg %p6949_p0 }
  0x1b   : > { %p6615_p4 = pnand %p6614_p2, %p6613_p1 }
  0x1d   : > { %p6616_p6 = pneg %p6615_p4 }
  0x1f   : > { %p6621_p9 = pnand %p6619_p7, %p6616_p6 }
  0x21   : > { %6624 = shalt.err (!%p6621_p9)
}
  0x22   : > { %s6625_s11 = scalar_lea.vmem %s157_s29, 2176  ;;  %p6633_p8 = scmp.lt.s32.totalorder %s157_s29, %s157_s29 }
  0x23   : > { %p6626_p11 = scmp.ne.s32.totalorder %s157_s29, %s6625_s11  ;;  %p6634_p5 = scmp.lt.s32.totalorder %s6625_s11, %s6625_s11 }
  0x25   : > { %p6628_p13 = pnand %p6626_p11, %p6614_p2  ;;  %p6635_p12 = por %p6634_p5, %p6633_p8 }
  0x27   : > { %p6629_p10 = pneg %p6628_p13 }
  0x29   : > { %p6636_p3 = pnand %p6635_p12, %p6629_p10 }
  0x2b   : > { %6639 = shalt.err (!%p6636_p3)
}
  0x2c   : > { %5611 = dma.hbm_to_vmem [thread:$0]  (!%p6949_p0), %s8026_s0, 2176, %s157_s29, [#allocation3]  }
  0x2d   : > { %p4943_p1 = scmp.ge.s32.totalorder %s6786_s17, 5 }
  0x2e   : > { %p8040_p4 = scmp.ne.s32.totalorder (!%p4943_p1), %s8034_s21, 0 }
  0x2f   : > { %163 = sbr.rel (%p4943_p1) target bundleno = 90 (0x5a), region = 20 }
  0x36   : > { %166 = sbr.rel (!%p8040_p4) target bundleno = 90 (0x5a), region = 24  ;;  %s167_s20 = sand.u32 (%p8040_p4), 1, %s6774_s14  }
  0x37   : > { %s4944_s22 = sshll.u32 (%p8040_p4), %s6782_s16, 2  ;;  %s5601_s28 = smul.u32 (%p8040_p4), 4352, %s167_s20 }
  0x38   : > { %s173_s4 = ssub.s32 (%p8040_p4), 17, %s4944_s22  ;;  %s6980_s5 = scalar_lea.sflag (%p8040_p4), [#allocation5], %s167_s20 }
  0x39   : > { %p174_p5 = scmp.lt.s32.totalorder (%p8040_p4), %s173_s4, 4  ;;  %s171_s6 = scalar_lea.vmem (%p8040_p4), [#allocation4], %s5601_s28 }
  0x3d   : > { %s8063_s4 = smov (!%p174_p5, %s173_s4), 4 }
  0x3e   : > { %s6977_s30 = smul.u32 17408, %s8063_s4 }
  0x40   : > { %s178_s29 = ssub.s32 69632, %s6977_s30 }
  0x41   : > { %179 = vsyncadd %s6980_s5, %s178_s29  ;;  %p4945_p3 = scmp.ne.s32.totalorder %s6977_s30, 0  ;;  %s5527_s21 = sshll.u32 %s6782_s16, 8 }
  0x42   : > { %s6988_s9 = scalar_lea.hbm %s8027_s1, %s5527_s21  ;;  %s4947_s10 = sshll.u32 %s8063_s4, 2 }
  0x43   : > { %s185_s11 = sshll.u32 %s171_s6, 4  ;;  %s6640_s12 = scalar_lea.hbm %s6988_s9, %s6977_s30  ;;  %s6991_s11 = int_to_ptr.vmem [resolvable:$true] %s185_s11 }
  0x44   : > { %p6641_p8 = scmp.ne.s32.totalorder %s6988_s9, %s6640_s12  ;;  %s6644_s22 = scalar_lea.hbm %s8027_s1, 295936 }
  0x45   : > { %p6645_p0 = scmp.lt.u32.totalorder %s6988_s9, %s8027_s1  ;;  %p6646_p2 = scmp.lt.u32.totalorder %s6644_s22, %s6640_s12 }
  0x46   : > { %p6642_p10 = pnand %p6641_p8, %p4945_p3  ;;  %p6648_p7 = scmp.lt.u32.totalorder %s6640_s12, %s6988_s9 }
  0x47   : > { %p6647_p6 = por %p6646_p2, %p6645_p0 }
  0x48   : > { %p6643_p12 = pneg %p6642_p10 }
  0x49   : > { %p6649_p9 = por %p6648_p7, %p6647_p6 }
  0x4b   : > { %p6650_p11 = pnand %p6649_p9, %p6643_p12 }
  0x4d   : > { %6653 = shalt.err (!%p6650_p11)
}
  0x4e   : > { %s6654_s6 = scalar_lea.vmem %s6991_s11, %s6977_s30  ;;  %s6853_s21 = smov [#allocation4]  }
  0x4f   : > { %p6655_p13 = scmp.ne.s32.totalorder %s6991_s11, %s6654_s6  ;;  %s6658_s7 = sshll.u32 %s6853_s21, 4  ;;  %s6659_s7 = int_to_ptr.vmem [resolvable:$false] %s6658_s7 }
  0x50   : > { %s6660_s8 = scalar_lea.vmem %s6659_s7, 139264  ;;  %p6661_p5 = scmp.lt.s32.totalorder %s6991_s11, %s6659_s7 }
  0x51   : > { %p6656_p1 = pnand %p6655_p13, %p4945_p3  ;;  %p6662_p8 = scmp.lt.s32.totalorder %s6660_s8, %s6654_s6 }
  0x53   : > { %p6657_p4 = pneg %p6656_p1  ;;  %p6663_p10 = por %p6662_p8, %p6661_p5 }
  0x55   : > { %p6664_p0 = pnand %p6663_p10, %p6657_p4 }
  0x57   : > { %6667 = shalt.err (!%p6664_p0)
}
  0x58   : > { %s6854_s12 = smov 1088   ;;  %s6855_s18 = smov 256  }
  0x59   : > { %191 = dma.hbm_to_vmem [thread:$0]  (%p4945_p3), %s6988_s9, %s6977_s30, %s6991_s11, %s6980_s5, %s6854_s12, %s6855_s18, %s4947_s10  }
  0x5a PF: > { %p8041_p12 = scmp.ne.s32.totalorder %s8038_s27, 0 }
  0x5b   : > { %p8042_p2 = scmp.ne.s32.totalorder (!%p8041_p12), %s8035_s23, 0 }
  0x5c   : > { %213 = sbr.rel (%p8041_p12) target bundleno = 1033 (0x409), region = 32 }
  0x63   : > { %6757 = dma.done.wait (%p8042_p2), [#allocation3], 2176  }
  0x64   : > { %6759 = vsyncadd (%p8042_p2), [#allocation3], 4294965120  ;;  %s7027_s20 = sand.u32 1, %s6770_s13   ;;  %p8043_p3 = scmp.ne.s32.totalorder %s8036_s24, 0 }
  0x65   : > { %s5602_s22 = smul.u32 4352, %s7027_s20  ;;  %s220_s4 = scalar_lea.sflag [#allocation5], %s7027_s20 }
  0x67   : > { %s7031_s30 = scalar_lea.vmem [#allocation4], %s5602_s22 }
  0x68   : > { %6761 = dma.done.wait (%p8043_p3), %s220_s4, 69632  }
  0x69   : > { %6763 = vsyncadd (%p8043_p3), %s220_s4, 4294897664  ;;  %v5796_v0 = vld [vmem:[%s7031_s30 + $0x4] ss:$16 sps:$4 sm:$0xff]   ;;  %v5798_v1 = vld [vmem:[%s7031_s30 + $0xc] ss:$16 sps:$4 sm:$0xff]   ;;  %s7582_s23 = sshll.u32 %s6778_s15, 2 }
  0x6a   : > { %3597 = vmatprep.subr.bf16.mxu0 %v5796_v0  ;;  %v5800_v2 = vld [vmem:[%s7031_s30] ss:$16 sps:$4 sm:$0xff]   ;;  %v5801_v3 = vld [vmem:[%s7031_s30 + $0x8] ss:$16 sps:$4 sm:$0xff]   ;;  %3966 = vmatprep.subr.bf16.mxu1 %v5798_v1  ;;  %v5802_v4 = vld [vmem:[%s7031_s30 + $0x24] ss:$16 sps:$4 sm:$0xff]  }
  0x6b   : > { %3598 = vmatpush1.bf16.msra.mxu0 %v5800_v2  ;;  %3967 = vmatpush1.bf16.msra.mxu1 %v5801_v3  ;;  %v5804_v5 = vld [vmem:[%s7031_s30 + $0x2c] ss:$16 sps:$4 sm:$0xff]   ;;  %v5806_v6 = vld [vmem:[%s7031_s30 + $0x20] ss:$16 sps:$4 sm:$0xff]   ;;  %v5807_v7 = vld [vmem:[%s7031_s30 + $0x28] ss:$16 sps:$4 sm:$0xff]  }
  0x6c   : > { %3599 = vmatprep.subr.bf16.mxu0 %v5802_v4  ;;  %3968 = vmatprep.subr.bf16.mxu1 %v5804_v5  ;;  %v5808_v8 = vld [vmem:[%s7031_s30 + $0x44] ss:$16 sps:$4 sm:$0xff]   ;;  %v5810_v9 = vld [vmem:[%s7031_s30 + $0x4c] ss:$16 sps:$4 sm:$0xff]   ;;  %v5812_v10 = vld [vmem:[%s7031_s30 + $0x40] ss:$16 sps:$4 sm:$0xff]  }
  0x6d   : > { %v5813_v11 = vld [vmem:[%s7031_s30 + $0x48] ss:$16 sps:$4 sm:$0xff]   ;;  %v5814_v12 = vld [vmem:[%s7031_s30 + $0x64] ss:$16 sps:$4 sm:$0xff]   ;;  %v5816_v13 = vld [vmem:[%s7031_s30 + $0x6c] ss:$16 sps:$4 sm:$0xff]  }
  0x6e   : > { %v5818_v14 = vld [vmem:[%s7031_s30 + $0x60] ss:$16 sps:$4 sm:$0xff]   ;;  %v5819_v15 = vld [vmem:[%s7031_s30 + $0x68] ss:$16 sps:$4 sm:$0xff]   ;;  %v5820_v16 = vld [vmem:[%s7031_s30 + $0x84] ss:$16 sps:$4 sm:$0xff]  }
  0x6f   : > { %3600 = vmatpush1.bf16.msra.mxu0 %v5806_v6  ;;  %3969 = vmatpush1.bf16.msra.mxu1 %v5807_v7  ;;  %v5822_v17 = vld [vmem:[%s7031_s30 + $0x8c] ss:$16 sps:$4 sm:$0xff]   ;;  %v5824_v18 = vld [vmem:[%s7031_s30 + $0x80] ss:$16 sps:$4 sm:$0xff]   ;;  %v5825_v19 = vld [vmem:[%s7031_s30 + $0x88] ss:$16 sps:$4 sm:$0xff]  }
  0x70   : > { %3601 = vmatprep.subr.bf16.mxu0 %v5808_v8  ;;  %3970 = vmatprep.subr.bf16.mxu1 %v5810_v9  ;;  %v5826_v20 = vld [vmem:[%s7031_s30 + $0xa4] ss:$16 sps:$4 sm:$0xff]   ;;  %v5828_v21 = vld [vmem:[%s7031_s30 + $0xac] ss:$16 sps:$4 sm:$0xff]   ;;  %v5830_v22 = vld [vmem:[%s7031_s30 + $0xa0] ss:$16 sps:$4 sm:$0xff]  }
  0x71   : > { %v5831_v23 = vld [vmem:[%s7031_s30 + $0xa8] ss:$16 sps:$4 sm:$0xff]   ;;  %v5832_v24 = vld [vmem:[%s7031_s30 + $0xc4] ss:$16 sps:$4 sm:$0xff]   ;;  %v5834_v25 = vld [vmem:[%s7031_s30 + $0xcc] ss:$16 sps:$4 sm:$0xff]  }
  0x72   : > { %v5836_v26 = vld [vmem:[%s7031_s30 + $0xc0] ss:$16 sps:$4 sm:$0xff]   ;;  %v5837_v27 = vld [vmem:[%s7031_s30 + $0xc8] ss:$16 sps:$4 sm:$0xff]   ;;  %v5838_v28 = vld [vmem:[%s7031_s30 + $0xe4] ss:$16 sps:$4 sm:$0xff]  }
  0x73   : > { %3602 = vmatpush1.bf16.msra.mxu0 %v5812_v10  ;;  %3971 = vmatpush1.bf16.msra.mxu1 %v5813_v11  ;;  %v5840_v29 = vld [vmem:[%s7031_s30 + $0xec] ss:$16 sps:$4 sm:$0xff]   ;;  %v5842_v30 = vld [vmem:[%s7031_s30 + $0xe0] ss:$16 sps:$4 sm:$0xff]   ;;  %v5843_v31 = vld [vmem:[%s7031_s30 + $0xe8] ss:$16 sps:$4 sm:$0xff]  }
  0x74   : > { %3603 = vmatprep.subr.bf16.mxu0 %v5814_v12  ;;  %3972 = vmatprep.subr.bf16.mxu1 %v5816_v13  ;;  %v5844_v32 = vld [vmem:[%s7031_s30 + $0x104] ss:$16 sps:$4 sm:$0xff]   ;;  %v5846_v33 = vld [vmem:[%s7031_s30 + $0x10c] ss:$16 sps:$4 sm:$0xff]   ;;  %v5848_v34 = vld [vmem:[%s7031_s30 + $0x100] ss:$16 sps:$4 sm:$0xff]  }
  0x75   : > { %v5849_v35 = vld [vmem:[%s7031_s30 + $0x108] ss:$16 sps:$4 sm:$0xff]   ;;  %v5850_v36 = vld [vmem:[%s7031_s30 + $0x124] ss:$16 sps:$4 sm:$0xff]   ;;  %v5852_v37 = vld [vmem:[%s7031_s30 + $0x12c] ss:$16 sps:$4 sm:$0xff]  }
  0x76   : > { %v5854_v38 = vld [vmem:[%s7031_s30 + $0x120] ss:$16 sps:$4 sm:$0xff]   ;;  %v5855_v39 = vld [vmem:[%s7031_s30 + $0x128] ss:$16 sps:$4 sm:$0xff]   ;;  %v5856_v40 = vld [vmem:[%s7031_s30 + $0x144] ss:$16 sps:$4 sm:$0xff]  }
  0x77   : > { %3604 = vmatpush1.bf16.msra.mxu0 %v5818_v14  ;;  %3973 = vmatpush1.bf16.msra.mxu1 %v5819_v15  ;;  %v5858_v41 = vld [vmem:[%s7031_s30 + $0x14c] ss:$16 sps:$4 sm:$0xff]   ;;  %v5860_v42 = vld [vmem:[%s7031_s30 + $0x140] ss:$16 sps:$4 sm:$0xff]   ;;  %v5861_v43 = vld [vmem:[%s7031_s30 + $0x148] ss:$16 sps:$4 sm:$0xff]  }
  0x78   : > { %3605 = vmatprep.subr.bf16.mxu0 %v5820_v16  ;;  %3974 = vmatprep.subr.bf16.mxu1 %v5822_v17  ;;  %v5862_v44 = vld [vmem:[%s7031_s30 + $0x164] ss:$16 sps:$4 sm:$0xff]   ;;  %v5864_v45 = vld [vmem:[%s7031_s30 + $0x16c] ss:$16 sps:$4 sm:$0xff]   ;;  %v5866_v47 = vld [vmem:[%s7031_s30 + $0x160] ss:$16 sps:$4 sm:$0xff]  }
  0x79   : > { %v278_v46 = vld [vmem:[#allocation2 + $0x8] sm:$0xff]  ;;  %v5867_v49 = vld [vmem:[%s7031_s30 + $0x168] ss:$16 sps:$4 sm:$0xff]   ;;  %v5870_v51 = vld [vmem:[%s7031_s30 + $0x18c] ss:$16 sps:$4 sm:$0xff]   ;;  %p263_p6 = scmp.lt.s32.totalorder %s7582_s23, 16 }
  0x7a   : > { %v295_v48 = vpack.c.bf16 %v278_v46, %v278_v46  ;;  %v5868_v50 = vld [vmem:[%s7031_s30 + $0x184] ss:$16 sps:$4 sm:$0xff]   ;;  %v5872_v52 = vld [vmem:[%s7031_s30 + $0x180] ss:$16 sps:$4 sm:$0xff]   ;;  %v5873_v53 = vld [vmem:[%s7031_s30 + $0x188] ss:$16 sps:$4 sm:$0xff]  }
  0x7b   : > { %3606 = vmatpush1.bf16.msra.mxu0 %v5824_v18  ;;  %3975 = vmatpush1.bf16.msra.mxu1 %v5825_v19  ;;  %v5874_v54 = vld [vmem:[%s7031_s30 + $0x1a4] ss:$16 sps:$4 sm:$0xff]   ;;  %v5876_v55 = vld [vmem:[%s7031_s30 + $0x1ac] ss:$16 sps:$4 sm:$0xff]   ;;  %v5878_v56 = vld [vmem:[%s7031_s30 + $0x1a0] ss:$16 sps:$4 sm:$0xff]  }
  0x7c   : > { %3607 = vmatprep.subr.bf16.mxu0 %v5826_v20  ;;  %3976 = vmatprep.subr.bf16.mxu1 %v5828_v21  ;;  %v5879_v57 = vld [vmem:[%s7031_s30 + $0x1a8] ss:$16 sps:$4 sm:$0xff]   ;;  %v5880_v58 = vld [vmem:[%s7031_s30 + $0x1c4] ss:$16 sps:$4 sm:$0xff]   ;;  %v5882_v59 = vld [vmem:[%s7031_s30 + $0x1cc] ss:$16 sps:$4 sm:$0xff]  }
  0x7d   : > { %3629 = vmatprep.mubr.bf16.mxu0 %v295_v48  ;;  %3998 = vmatprep.mubr.bf16.mxu1 %v295_v48  ;;  %v5884_v60 = vld [vmem:[%s7031_s30 + $0x1c0] ss:$16 sps:$4 sm:$0xff]   ;;  %v5885_v61 = vld [vmem:[%s7031_s30 + $0x1c8] ss:$16 sps:$4 sm:$0xff]   ;;  %v5886_v62 = vld [vmem:[%s7031_s30 + $0x1e4] ss:$16 sps:$4 sm:$0xff]  }
  0x7e   : > { %v5888_v63 = vld [vmem:[%s7031_s30 + $0x1ec] ss:$16 sps:$4 sm:$0xff]   ;;  %v5890_v0 = vld [vmem:[%s7031_s30 + $0x1e0] ss:$16 sps:$4 sm:$0xff]   ;;  %v5891_v1 = vld [vmem:[%s7031_s30 + $0x1e8] ss:$16 sps:$4 sm:$0xff]  }
  0x7f   : > { %3608 = vmatpush1.bf16.msra.mxu0 %v5830_v22  ;;  %3977 = vmatpush1.bf16.msra.mxu1 %v5831_v23  ;;  %v277_v2 = vld [vmem:[#allocation2] sm:$0xff]  ;;  %v5894_v3 = vld [vmem:[%s7031_s30 + $0x204] ss:$16 sps:$4 sm:$0xff]   ;;  %v5892_v6 = vld [vmem:[%s7031_s30 + $0x200] ss:$16 sps:$4 sm:$0xff]   ;;  %s264_s24 = scalar_select %p263_p6, %s7582_s23, 16 }
  0x80   : > { %3609 = vmatprep.subr.bf16.mxu0 %v5832_v24  ;;  %3978 = vmatprep.subr.bf16.mxu1 %v5834_v25  ;;  %v5897_v4 = vld [vmem:[%s7031_s30 + $0x20c] ss:$16 sps:$4 sm:$0xff]   ;;  %v294_v5 = vpack.c.bf16 %v277_v2, %v277_v2  ;;  %v5895_v7 = vld [vmem:[%s7031_s30 + $0x208] ss:$16 sps:$4 sm:$0xff]   ;;  %v5900_v8 = vld [vmem:[%s7031_s30 + $0x224] ss:$16 sps:$4 sm:$0xff]  }
  0x81   : > { %v5903_v9 = vld [vmem:[%s7031_s30 + $0x22c] ss:$16 sps:$4 sm:$0xff]   ;;  %v5898_v10 = vld [vmem:[%s7031_s30 + $0x220] ss:$16 sps:$4 sm:$0xff]   ;;  %v5901_v11 = vld [vmem:[%s7031_s30 + $0x228] ss:$16 sps:$4 sm:$0xff]   ;;  %s265_s9 = scalar_lea.vmem %s8028_s2, %s264_s24 }
  0x82   : > { %v5906_v12 = vld [vmem:[%s7031_s30 + $0x244] ss:$16 sps:$4 sm:$0xff]   ;;  %v5909_v13 = vld [vmem:[%s7031_s30 + $0x24c] ss:$16 sps:$4 sm:$0xff]   ;;  %v5904_v14 = vld [vmem:[%s7031_s30 + $0x240] ss:$16 sps:$4 sm:$0xff]  }
  0x83   : > { %3610 = vmatpush1.bf16.msra.mxu0 %v5836_v26  ;;  %3979 = vmatpush1.bf16.msra.mxu1 %v5837_v27  ;;  %v5907_v15 = vld [vmem:[%s7031_s30 + $0x248] ss:$16 sps:$4 sm:$0xff]   ;;  %v5912_v16 = vld [vmem:[%s7031_s30 + $0x264] ss:$16 sps:$4 sm:$0xff]   ;;  %v5915_v17 = vld [vmem:[%s7031_s30 + $0x26c] ss:$16 sps:$4 sm:$0xff]  }
  0x84   : > { %3611 = vmatprep.subr.bf16.mxu0 %v5838_v28  ;;  %3980 = vmatprep.subr.bf16.mxu1 %v5840_v29  ;;  %v5910_v18 = vld [vmem:[%s7031_s30 + $0x260] ss:$16 sps:$4 sm:$0xff]   ;;  %v5913_v19 = vld [vmem:[%s7031_s30 + $0x268] ss:$16 sps:$4 sm:$0xff]   ;;  %v5918_v20 = vld [vmem:[%s7031_s30 + $0x284] ss:$16 sps:$4 sm:$0xff]  }
  0x85   : > { %v5921_v21 = vld [vmem:[%s7031_s30 + $0x28c] ss:$16 sps:$4 sm:$0xff]   ;;  %v5916_v22 = vld [vmem:[%s7031_s30 + $0x280] ss:$16 sps:$4 sm:$0xff]   ;;  %v5919_v23 = vld [vmem:[%s7031_s30 + $0x288] ss:$16 sps:$4 sm:$0xff]  }
  0x86   : > { %v5924_v24 = vld [vmem:[%s7031_s30 + $0x2a4] ss:$16 sps:$4 sm:$0xff]   ;;  %v5927_v25 = vld [vmem:[%s7031_s30 + $0x2ac] ss:$16 sps:$4 sm:$0xff]   ;;  %v5922_v26 = vld [vmem:[%s7031_s30 + $0x2a0] ss:$16 sps:$4 sm:$0xff]  }
  0x87   : > { %3612 = vmatpush1.bf16.msra.mxu0 %v5842_v30  ;;  %3981 = vmatpush1.bf16.msra.mxu1 %v5843_v31  ;;  %v5925_v27 = vld [vmem:[%s7031_s30 + $0x2a8] ss:$16 sps:$4 sm:$0xff]   ;;  %v5930_v28 = vld [vmem:[%s7031_s30 + $0x2c4] ss:$16 sps:$4 sm:$0xff]   ;;  %v5933_v29 = vld [vmem:[%s7031_s30 + $0x2cc] ss:$16 sps:$4 sm:$0xff]  }
  0x88   : > { %3613 = vmatprep.subr.bf16.mxu0 %v5844_v32  ;;  %3982 = vmatprep.subr.bf16.mxu1 %v5846_v33  ;;  %v280_v30 = vld [vmem:[#allocation2 + $0x18] sm:$0xff]  ;;  %v5931_v33 = vld [vmem:[%s7031_s30 + $0x2c8] ss:$16 sps:$4 sm:$0xff]   ;;  %s4952_s10 = sshll.u32 %s7027_s20, 5  ;;  %p8044_p7 = scmp.ne.s32.totalorder %s8037_s26, 0 }
  0x89   : > { %v5928_v31 = vld [vmem:[%s7031_s30 + $0x2c0] ss:$16 sps:$4 sm:$0xff]   ;;  %v297_v32 = vpack.c.bf16 %v280_v30, %v280_v30  ;;  %v5954_v46 = vld [vmem:[%s7031_s30 + $0x344] ss:$16 sps:$4 sm:$0xff]   ;;  %s7590_s11 = scalar_lea.vmem [#allocation6], %s4952_s10   ;;  %s4351_s28 = ssub.s32 (%p8044_p7), 17, %s7582_s23 }
  0x8a   : > { %v5952_v48 = vld [vmem:[%s7031_s30 + $0x340] ss:$16 sps:$4 sm:$0xff]   ;;  %v5984_v2 = vld [vmem:[%s7031_s30 + $0x3e4] ss:$16 sps:$4 sm:$0xff]   ;;  %s5528_s29 = sshll.u32 (%p8044_p7), %s6778_s15, 5  ;;  %p4352_p9 = scmp.lt.s32.totalorder (%p8044_p7), %s4351_s28, 4 }
  0x8b   : > { %3614 = vmatpush1.bf16.msra.mxu0 %v5848_v34  ;;  %3983 = vmatpush1.bf16.msra.mxu1 %v5849_v35  ;;  %v5936_v34 = vld [vmem:[%s7031_s30 + $0x2e4] ss:$16 sps:$4 sm:$0xff]   ;;  %v5939_v35 = vld [vmem:[%s7031_s30 + $0x2ec] ss:$16 sps:$4 sm:$0xff]   ;;  %s7603_s7 = scalar_lea.vmem (%p8044_p7), %s8029_s3, %s5528_s29  }
  0x8c   : > { %3615 = vmatprep.subr.bf16.mxu0 %v5850_v36  ;;  %3984 = vmatprep.subr.bf16.mxu1 %v5852_v37  ;;  %v5934_v36 = vld [vmem:[%s7031_s30 + $0x2e0] ss:$16 sps:$4 sm:$0xff]   ;;  %v5937_v37 = vld [vmem:[%s7031_s30 + $0x2e8] ss:$16 sps:$4 sm:$0xff]   ;;  %v6020_v30 = vld [vmem:[%s7031_s30 + $0x4a4] ss:$16 sps:$4 sm:$0xff]  }
  0x8f   : > { %3616 = vmatpush1.bf16.msra.mxu0 %v5854_v38  ;;  %3985 = vmatpush1.bf16.msra.mxu1 %v5855_v39  ;;  %v5942_v38 = vld [vmem:[%s7031_s30 + $0x304] ss:$16 sps:$4 sm:$0xff]   ;;  %v5945_v39 = vld [vmem:[%s7031_s30 + $0x30c] ss:$16 sps:$4 sm:$0xff]  }
  0x90   : > { %3617 = vmatprep.subr.bf16.mxu0 %v5856_v40  ;;  %3986 = vmatprep.subr.bf16.mxu1 %v5858_v41  ;;  %v5940_v40 = vld [vmem:[%s7031_s30 + $0x300] ss:$16 sps:$4 sm:$0xff]   ;;  %v5943_v41 = vld [vmem:[%s7031_s30 + $0x308] ss:$16 sps:$4 sm:$0xff]  }
  0x93   : > { %3618 = vmatpush1.bf16.msra.mxu0 %v5860_v42  ;;  %3987 = vmatpush1.bf16.msra.mxu1 %v5861_v43  ;;  %v5948_v42 = vld [vmem:[%s7031_s30 + $0x324] ss:$16 sps:$4 sm:$0xff]   ;;  %v5951_v43 = vld [vmem:[%s7031_s30 + $0x32c] ss:$16 sps:$4 sm:$0xff]  }
  0x94   : > { %3619 = vmatprep.subr.bf16.mxu0 %v5862_v44  ;;  %3988 = vmatprep.subr.bf16.mxu1 %v5864_v45  ;;  %v5946_v44 = vld [vmem:[%s7031_s30 + $0x320] ss:$16 sps:$4 sm:$0xff]   ;;  %v5949_v45 = vld [vmem:[%s7031_s30 + $0x328] ss:$16 sps:$4 sm:$0xff]  }
  0x97   : > { %3620 = vmatpush1.bf16.msra.mxu0 %v5866_v47  ;;  %3989 = vmatpush1.bf16.msra.mxu1 %v5867_v49  ;;  %v5957_v47 = vld [vmem:[%s7031_s30 + $0x34c] ss:$16 sps:$4 sm:$0xff]   ;;  %v5955_v49 = vld [vmem:[%s7031_s30 + $0x348] ss:$16 sps:$4 sm:$0xff]  }
  0x98   : > { %3621 = vmatprep.subr.bf16.mxu0 %v5868_v50  ;;  %3990 = vmatprep.subr.bf16.mxu1 %v5870_v51  ;;  %v5960_v50 = vld [vmem:[%s7031_s30 + $0x364] ss:$16 sps:$4 sm:$0xff]   ;;  %v5963_v51 = vld [vmem:[%s7031_s30 + $0x36c] ss:$16 sps:$4 sm:$0xff]  }
  0x9b   : > { %3622 = vmatpush1.bf16.msra.mxu0 %v5872_v52  ;;  %3991 = vmatpush1.bf16.msra.mxu1 %v5873_v53  ;;  %v5958_v52 = vld [vmem:[%s7031_s30 + $0x360] ss:$16 sps:$4 sm:$0xff]   ;;  %v5961_v53 = vld [vmem:[%s7031_s30 + $0x368] ss:$16 sps:$4 sm:$0xff]  }
  0x9c   : > { %3623 = vmatprep.subr.bf16.mxu0 %v5874_v54  ;;  %3992 = vmatprep.subr.bf16.mxu1 %v5876_v55  ;;  %v5966_v54 = vld [vmem:[%s7031_s30 + $0x384] ss:$16 sps:$4 sm:$0xff]   ;;  %v5969_v55 = vld [vmem:[%s7031_s30 + $0x38c] ss:$16 sps:$4 sm:$0xff]  }
  0x9f   : > { %3624 = vmatpush1.bf16.msra.mxu0 %v5878_v56  ;;  %3993 = vmatpush1.bf16.msra.mxu1 %v5879_v57  ;;  %v5964_v56 = vld [vmem:[%s7031_s30 + $0x380] ss:$16 sps:$4 sm:$0xff]   ;;  %v5967_v57 = vld [vmem:[%s7031_s30 + $0x388] ss:$16 sps:$4 sm:$0xff]  }
  0xa0   : > { %3625 = vmatprep.subr.bf16.mxu0 %v5880_v58  ;;  %3994 = vmatprep.subr.bf16.mxu1 %v5882_v59  ;;  %v5972_v58 = vld [vmem:[%s7031_s30 + $0x3a4] ss:$16 sps:$4 sm:$0xff]   ;;  %v5975_v59 = vld [vmem:[%s7031_s30 + $0x3ac] ss:$16 sps:$4 sm:$0xff]  }
  0xa3   : > { %3626 = vmatpush1.bf16.msra.mxu0 %v5884_v60  ;;  %3995 = vmatpush1.bf16.msra.mxu1 %v5885_v61  ;;  %v5970_v60 = vld [vmem:[%s7031_s30 + $0x3a0] ss:$16 sps:$4 sm:$0xff]   ;;  %v5973_v61 = vld [vmem:[%s7031_s30 + $0x3a8] ss:$16 sps:$4 sm:$0xff]  }
  0xa4   : > { %3627 = vmatprep.subr.bf16.mxu0 %v5886_v62  ;;  %3996 = vmatprep.subr.bf16.mxu1 %v5888_v63  ;;  %v5978_v62 = vld [vmem:[%s7031_s30 + $0x3c4] ss:$16 sps:$4 sm:$0xff]   ;;  %v5981_v63 = vld [vmem:[%s7031_s30 + $0x3cc] ss:$16 sps:$4 sm:$0xff]  }
  0xa7   : > { %3628 = vmatpush1.bf16.msra.mxu0 %v5890_v0  ;;  %3997 = vmatpush1.bf16.msra.mxu1 %v5891_v1  ;;  %v5976_v0 = vld [vmem:[%s7031_s30 + $0x3c0] ss:$16 sps:$4 sm:$0xff]   ;;  %v5979_v1 = vld [vmem:[%s7031_s30 + $0x3c8] ss:$16 sps:$4 sm:$0xff]  }
  0xa8   : > { %3638 = vmatprep.subr.bf16.mxu0 %v5894_v3  ;;  %4007 = vmatprep.subr.bf16.mxu1 %v5897_v4  ;;  %v5987_v3 = vld [vmem:[%s7031_s30 + $0x3ec] ss:$16 sps:$4 sm:$0xff]   ;;  %v5982_v4 = vld [vmem:[%s7031_s30 + $0x3e0] ss:$16 sps:$4 sm:$0xff]  }
  0xaa   : > { %3630 = vmatmul.mubr.bf16.vlgmr.msra.gmra.mrb[0].mxu0 %v294_v5  ;;  %3999 = vmatmul.mubr.bf16.vlgmr.msra.gmra.mrb[0].mxu1 %v294_v5  ;;  %v5985_v5 = vld [vmem:[%s7031_s30 + $0x3e8] ss:$16 sps:$4 sm:$0xff]  }
  0xab   : > { %3639 = vmatpush1.bf16.msra.mxu0 %v5892_v6  ;;  %4008 = vmatpush1.bf16.msra.mxu1 %v5895_v7  ;;  %v5990_v6 = vld [vmem:[%s7031_s30 + $0x404] ss:$16 sps:$4 sm:$0xff]   ;;  %v279_v7 = vld [vmem:[#allocation2 + $0x10] sm:$0xff] }
  0xac   : > { %3640 = vmatprep.subr.bf16.mxu0 %v5900_v8  ;;  %4009 = vmatprep.subr.bf16.mxu1 %v5903_v9  ;;  %v5993_v8 = vld [vmem:[%s7031_s30 + $0x40c] ss:$16 sps:$4 sm:$0xff]   ;;  %v5988_v9 = vld [vmem:[%s7031_s30 + $0x400] ss:$16 sps:$4 sm:$0xff]  }
  0xad   : > { %3670 = vmatprep.mubr.bf16.mxu0 %v297_v32  ;;  %4039 = vmatprep.mubr.bf16.mxu1 %v297_v32  ;;  %v6018_v32 = vld [vmem:[%s7031_s30 + $0x4a0] ss:$16 sps:$4 sm:$0xff]  }
  0xaf   : > { %3641 = vmatpush1.bf16.msra.mxu0 %v5898_v10  ;;  %4010 = vmatpush1.bf16.msra.mxu1 %v5901_v11  ;;  %v5991_v10 = vld [vmem:[%s7031_s30 + $0x408] ss:$16 sps:$4 sm:$0xff]   ;;  %v296_v11 = vpack.c.bf16 %v279_v7, %v279_v7  ;;  %v6083_v7 = vld [vmem:[%s7031_s30 + $0x5ec] ss:$16 sps:$4 sm:$0xff]  }
  0xb0   : > { %3642 = vmatprep.subr.bf16.mxu0 %v5906_v12  ;;  %4011 = vmatprep.subr.bf16.mxu1 %v5909_v13  ;;  %v5996_v12 = vld [vmem:[%s7031_s30 + $0x424] ss:$16 sps:$4 sm:$0xff]   ;;  %v5999_v13 = vld [vmem:[%s7031_s30 + $0x42c] ss:$16 sps:$4 sm:$0xff]  }
  0xb3   : > { %3643 = vmatpush1.bf16.msra.mxu0 %v5904_v14  ;;  %4012 = vmatpush1.bf16.msra.mxu1 %v5907_v15  ;;  %v282_v14 = vld [vmem:[#allocation2 + $0x28] sm:$0xff] }
  0xb4   : > { %3644 = vmatprep.subr.bf16.mxu0 %v5912_v16  ;;  %4013 = vmatprep.subr.bf16.mxu1 %v5915_v17  ;;  %v299_v15 = vpack.c.bf16 %v282_v14, %v282_v14  ;;  %v5994_v16 = vld [vmem:[%s7031_s30 + $0x420] ss:$16 sps:$4 sm:$0xff]   ;;  %v5997_v17 = vld [vmem:[%s7031_s30 + $0x428] ss:$16 sps:$4 sm:$0xff]  }
  0xb5   : > { %v6087_v14 = vld [vmem:[%s7031_s30 + $0x608] ss:$16 sps:$4 sm:$0xff]  }
  0xb7   : > { %3645 = vmatpush1.bf16.msra.mxu0 %v5910_v18  ;;  %4014 = vmatpush1.bf16.msra.mxu1 %v5913_v19  ;;  %v6002_v18 = vld [vmem:[%s7031_s30 + $0x444] ss:$16 sps:$4 sm:$0xff]   ;;  %v6005_v19 = vld [vmem:[%s7031_s30 + $0x44c] ss:$16 sps:$4 sm:$0xff]  }
  0xb8   : > { %3646 = vmatprep.subr.bf16.mxu0 %v5918_v20  ;;  %4015 = vmatprep.subr.bf16.mxu1 %v5921_v21  ;;  %v6000_v20 = vld [vmem:[%s7031_s30 + $0x440] ss:$16 sps:$4 sm:$0xff]   ;;  %v6003_v21 = vld [vmem:[%s7031_s30 + $0x448] ss:$16 sps:$4 sm:$0xff]  }
  0xbb   : > { %3647 = vmatpush1.bf16.msra.mxu0 %v5916_v22  ;;  %4016 = vmatpush1.bf16.msra.mxu1 %v5919_v23  ;;  %v6008_v22 = vld [vmem:[%s7031_s30 + $0x464] ss:$16 sps:$4 sm:$0xff]   ;;  %v6011_v23 = vld [vmem:[%s7031_s30 + $0x46c] ss:$16 sps:$4 sm:$0xff]  }
  0xbc   : > { %3648 = vmatprep.subr.bf16.mxu0 %v5924_v24  ;;  %4017 = vmatprep.subr.bf16.mxu1 %v5927_v25  ;;  %v6006_v24 = vld [vmem:[%s7031_s30 + $0x460] ss:$16 sps:$4 sm:$0xff]   ;;  %v6009_v25 = vld [vmem:[%s7031_s30 + $0x468] ss:$16 sps:$4 sm:$0xff]  }
  0xbf   : > { %3649 = vmatpush1.bf16.msra.mxu0 %v5922_v26  ;;  %4018 = vmatpush1.bf16.msra.mxu1 %v5925_v27  ;;  %v6014_v26 = vld [vmem:[%s7031_s30 + $0x484] ss:$16 sps:$4 sm:$0xff]   ;;  %v6017_v27 = vld [vmem:[%s7031_s30 + $0x48c] ss:$16 sps:$4 sm:$0xff]  }
  0xc0   : > { %3650 = vmatprep.subr.bf16.mxu0 %v5930_v28  ;;  %4019 = vmatprep.subr.bf16.mxu1 %v5933_v29  ;;  %v6012_v28 = vld [vmem:[%s7031_s30 + $0x480] ss:$16 sps:$4 sm:$0xff]   ;;  %v6015_v29 = vld [vmem:[%s7031_s30 + $0x488] ss:$16 sps:$4 sm:$0xff]  }
  0xc3   : > { %3651 = vmatpush1.bf16.msra.mxu0 %v5928_v31  ;;  %4020 = vmatpush1.bf16.msra.mxu1 %v5931_v33  ;;  %v6023_v31 = vld [vmem:[%s7031_s30 + $0x4ac] ss:$16 sps:$4 sm:$0xff]   ;;  %v6021_v33 = vld [vmem:[%s7031_s30 + $0x4a8] ss:$16 sps:$4 sm:$0xff]  }
  0xc4   : > { %3652 = vmatprep.subr.bf16.mxu0 %v5936_v34  ;;  %4021 = vmatprep.subr.bf16.mxu1 %v5939_v35  ;;  %v6026_v34 = vld [vmem:[%s7031_s30 + $0x4c4] ss:$16 sps:$4 sm:$0xff]   ;;  %v6029_v35 = vld [vmem:[%s7031_s30 + $0x4cc] ss:$16 sps:$4 sm:$0xff]  }
  0xc7   : > { %3653 = vmatpush1.bf16.msra.mxu0 %v5934_v36  ;;  %4022 = vmatpush1.bf16.msra.mxu1 %v5937_v37  ;;  %v6024_v36 = vld [vmem:[%s7031_s30 + $0x4c0] ss:$16 sps:$4 sm:$0xff]   ;;  %v6027_v37 = vld [vmem:[%s7031_s30 + $0x4c8] ss:$16 sps:$4 sm:$0xff]  }
  0xc8   : > { %3654 = vmatprep.subr.bf16.mxu0 %v5942_v38  ;;  %4023 = vmatprep.subr.bf16.mxu1 %v5945_v39  ;;  %v6032_v38 = vld [vmem:[%s7031_s30 + $0x4e4] ss:$16 sps:$4 sm:$0xff]   ;;  %v6035_v39 = vld [vmem:[%s7031_s30 + $0x4ec] ss:$16 sps:$4 sm:$0xff]  }
  0xcb   : > { %3655 = vmatpush1.bf16.msra.mxu0 %v5940_v40  ;;  %4024 = vmatpush1.bf16.msra.mxu1 %v5943_v41  ;;  %v6030_v40 = vld [vmem:[%s7031_s30 + $0x4e0] ss:$16 sps:$4 sm:$0xff]   ;;  %v6033_v41 = vld [vmem:[%s7031_s30 + $0x4e8] ss:$16 sps:$4 sm:$0xff]  }
  0xcc   : > { %3656 = vmatprep.subr.bf16.mxu0 %v5948_v42  ;;  %4025 = vmatprep.subr.bf16.mxu1 %v5951_v43  ;;  %v6038_v42 = vld [vmem:[%s7031_s30 + $0x504] ss:$16 sps:$4 sm:$0xff]   ;;  %v6041_v43 = vld [vmem:[%s7031_s30 + $0x50c] ss:$16 sps:$4 sm:$0xff]  }
  0xcf   : > { %3657 = vmatpush1.bf16.msra.mxu0 %v5946_v44  ;;  %4026 = vmatpush1.bf16.msra.mxu1 %v5949_v45  ;;  %v6036_v44 = vld [vmem:[%s7031_s30 + $0x500] ss:$16 sps:$4 sm:$0xff]   ;;  %v6039_v45 = vld [vmem:[%s7031_s30 + $0x508] ss:$16 sps:$4 sm:$0xff]  }
  0xd0   : > { %3658 = vmatprep.subr.bf16.mxu0 %v5954_v46  ;;  %4027 = vmatprep.subr.bf16.mxu1 %v5957_v47  ;;  %v6044_v46 = vld [vmem:[%s7031_s30 + $0x524] ss:$16 sps:$4 sm:$0xff]   ;;  %v6047_v47 = vld [vmem:[%s7031_s30 + $0x52c] ss:$16 sps:$4 sm:$0xff]  }
  0xd3   : > { %3659 = vmatpush1.bf16.msra.mxu0 %v5952_v48  ;;  %4028 = vmatpush1.bf16.msra.mxu1 %v5955_v49  ;;  %v6042_v48 = vld [vmem:[%s7031_s30 + $0x520] ss:$16 sps:$4 sm:$0xff]   ;;  %v6045_v49 = vld [vmem:[%s7031_s30 + $0x528] ss:$16 sps:$4 sm:$0xff]  }
  0xd4   : > { %3660 = vmatprep.subr.bf16.mxu0 %v5960_v50  ;;  %4029 = vmatprep.subr.bf16.mxu1 %v5963_v51  ;;  %v6050_v50 = vld [vmem:[%s7031_s30 + $0x544] ss:$16 sps:$4 sm:$0xff]   ;;  %v6053_v51 = vld [vmem:[%s7031_s30 + $0x54c] ss:$16 sps:$4 sm:$0xff]  }
  0xd7   : > { %3661 = vmatpush1.bf16.msra.mxu0 %v5958_v52  ;;  %4030 = vmatpush1.bf16.msra.mxu1 %v5961_v53  ;;  %v6048_v52 = vld [vmem:[%s7031_s30 + $0x540] ss:$16 sps:$4 sm:$0xff]   ;;  %v6051_v53 = vld [vmem:[%s7031_s30 + $0x548] ss:$16 sps:$4 sm:$0xff]  }
  0xd8   : > { %3662 = vmatprep.subr.bf16.mxu0 %v5966_v54  ;;  %4031 = vmatprep.subr.bf16.mxu1 %v5969_v55  ;;  %v6056_v54 = vld [vmem:[%s7031_s30 + $0x564] ss:$16 sps:$4 sm:$0xff]   ;;  %v6059_v55 = vld [vmem:[%s7031_s30 + $0x56c] ss:$16 sps:$4 sm:$0xff]  }
  0xdb   : > { %3663 = vmatpush1.bf16.msra.mxu0 %v5964_v56  ;;  %4032 = vmatpush1.bf16.msra.mxu1 %v5967_v57  ;;  %v6054_v56 = vld [vmem:[%s7031_s30 + $0x560] ss:$16 sps:$4 sm:$0xff]   ;;  %v6057_v57 = vld [vmem:[%s7031_s30 + $0x568] ss:$16 sps:$4 sm:$0xff]  }
  0xdc   : > { %3664 = vmatprep.subr.bf16.mxu0 %v5972_v58  ;;  %4033 = vmatprep.subr.bf16.mxu1 %v5975_v59  ;;  %v6062_v58 = vld [vmem:[%s7031_s30 + $0x584] ss:$16 sps:$4 sm:$0xff]   ;;  %v6065_v59 = vld [vmem:[%s7031_s30 + $0x58c] ss:$16 sps:$4 sm:$0xff]  }
  0xdf   : > { %3665 = vmatpush1.bf16.msra.mxu0 %v5970_v60  ;;  %4034 = vmatpush1.bf16.msra.mxu1 %v5973_v61  ;;  %v6060_v60 = vld [vmem:[%s7031_s30 + $0x580] ss:$16 sps:$4 sm:$0xff]   ;;  %v6063_v61 = vld [vmem:[%s7031_s30 + $0x588] ss:$16 sps:$4 sm:$0xff]  }
  0xe0   : > { %3666 = vmatprep.subr.bf16.mxu0 %v5978_v62  ;;  %4035 = vmatprep.subr.bf16.mxu1 %v5981_v63  ;;  %v6068_v62 = vld [vmem:[%s7031_s30 + $0x5a4] ss:$16 sps:$4 sm:$0xff]   ;;  %v6071_v63 = vld [vmem:[%s7031_s30 + $0x5ac] ss:$16 sps:$4 sm:$0xff]  }
  0xe3   : > { %3667 = vmatpush1.bf16.msra.mxu0 %v5976_v0  ;;  %4036 = vmatpush1.bf16.msra.mxu1 %v5979_v1  ;;  %v6066_v0 = vld [vmem:[%s7031_s30 + $0x5a0] ss:$16 sps:$4 sm:$0xff]   ;;  %v6069_v1 = vld [vmem:[%s7031_s30 + $0x5a8] ss:$16 sps:$4 sm:$0xff]  }
  0xe4   : > { %3668 = vmatprep.subr.bf16.mxu0 %v5984_v2  ;;  %4037 = vmatprep.subr.bf16.mxu1 %v5987_v3  ;;  %v6074_v2 = vld [vmem:[%s7031_s30 + $0x5c4] ss:$16 sps:$4 sm:$0xff]   ;;  %v6077_v3 = vld [vmem:[%s7031_s30 + $0x5cc] ss:$16 sps:$4 sm:$0xff]  }
  0xe7   : > { %3669 = vmatpush1.bf16.msra.mxu0 %v5982_v4  ;;  %4038 = vmatpush1.bf16.msra.mxu1 %v5985_v5  ;;  %v6072_v4 = vld [vmem:[%s7031_s30 + $0x5c0] ss:$16 sps:$4 sm:$0xff]   ;;  %v6075_v5 = vld [vmem:[%s7031_s30 + $0x5c8] ss:$16 sps:$4 sm:$0xff]  }
  0xe8   : > { %3679 = vmatprep.subr.bf16.mxu0 %v5990_v6  ;;  %4048 = vmatprep.subr.bf16.mxu1 %v5993_v8  ;;  %v6080_v6 = vld [vmem:[%s7031_s30 + $0x5e4] ss:$16 sps:$4 sm:$0xff]   ;;  %v6078_v8 = vld [vmem:[%s7031_s30 + $0x5e0] ss:$16 sps:$4 sm:$0xff]  }
  0xea   : > { %3671 = vmatmul.mubr.bf16.vlgmr.msra.gmra.mrb[0].mxu0 %v296_v11  ;;  %4040 = vmatmul.mubr.bf16.vlgmr.msra.gmra.mrb[0].mxu1 %v296_v11  ;;  %v281_v11 = vld [vmem:[#allocation2 + $0x20] sm:$0xff] }
  0xeb   : > { %3680 = vmatpush1.bf16.msra.mxu0 %v5988_v9  ;;  %4049 = vmatpush1.bf16.msra.mxu1 %v5991_v10  ;;  %v6081_v9 = vld [vmem:[%s7031_s30 + $0x5e8] ss:$16 sps:$4 sm:$0xff]   ;;  %v6086_v10 = vld [vmem:[%s7031_s30 + $0x604] ss:$16 sps:$4 sm:$0xff]  }
  0xec   : > { %3681 = vmatprep.subr.bf16.mxu0 %v5996_v12  ;;  %4050 = vmatprep.subr.bf16.mxu1 %v5999_v13  ;;  %v6089_v12 = vld [vmem:[%s7031_s30 + $0x60c] ss:$16 sps:$4 sm:$0xff]   ;;  %v6084_v13 = vld [vmem:[%s7031_s30 + $0x600] ss:$16 sps:$4 sm:$0xff]  }
  0xed   : > { %3711 = vmatprep.mubr.bf16.mxu0 %v299_v15  ;;  %4080 = vmatprep.mubr.bf16.mxu1 %v299_v15  ;;  %v298_v15 = vpack.c.bf16 %v281_v11, %v281_v11  ;;  %v6179_v11 = vld [vmem:[%s7031_s30 + $0x7ec] ss:$16 sps:$4 sm:$0xff]  }
  0xef   : > { %3682 = vmatpush1.bf16.msra.mxu0 %v5994_v16  ;;  %4051 = vmatpush1.bf16.msra.mxu1 %v5997_v17  ;;  %v284_v16 = vld [vmem:[#allocation2 + $0x38] sm:$0xff] }
  0xf0   : > { %3683 = vmatprep.subr.bf16.mxu0 %v6002_v18  ;;  %4052 = vmatprep.subr.bf16.mxu1 %v6005_v19  ;;  %v6092_v17 = vld [vmem:[%s7031_s30 + $0x624] ss:$16 sps:$4 sm:$0xff]   ;;  %v6095_v18 = vld [vmem:[%s7031_s30 + $0x62c] ss:$16 sps:$4 sm:$0xff]   ;;  %v301_v19 = vpack.c.bf16 %v284_v16, %v284_v16 }
  0xf1   : > { %v6185_v16 = vld [vmem:[%s7031_s30 + $0x80c] ss:$16 sps:$4 sm:$0xff]  }
  0xf3   : > { %3684 = vmatpush1.bf16.msra.mxu0 %v6000_v20  ;;  %4053 = vmatpush1.bf16.msra.mxu1 %v6003_v21  ;;  %v6090_v20 = vld [vmem:[%s7031_s30 + $0x620] ss:$16 sps:$4 sm:$0xff]   ;;  %v6093_v21 = vld [vmem:[%s7031_s30 + $0x628] ss:$16 sps:$4 sm:$0xff]  }
  0xf4   : > { %3685 = vmatprep.subr.bf16.mxu0 %v6008_v22  ;;  %4054 = vmatprep.subr.bf16.mxu1 %v6011_v23  ;;  %v6098_v22 = vld [vmem:[%s7031_s30 + $0x644] ss:$16 sps:$4 sm:$0xff]   ;;  %v6101_v23 = vld [vmem:[%s7031_s30 + $0x64c] ss:$16 sps:$4 sm:$0xff]  }
  0xf7   : > { %3686 = vmatpush1.bf16.msra.mxu0 %v6006_v24  ;;  %4055 = vmatpush1.bf16.msra.mxu1 %v6009_v25  ;;  %v6096_v24 = vld [vmem:[%s7031_s30 + $0x640] ss:$16 sps:$4 sm:$0xff]   ;;  %v6099_v25 = vld [vmem:[%s7031_s30 + $0x648] ss:$16 sps:$4 sm:$0xff]  }
  0xf8   : > { %3687 = vmatprep.subr.bf16.mxu0 %v6014_v26  ;;  %4056 = vmatprep.subr.bf16.mxu1 %v6017_v27  ;;  %v6104_v26 = vld [vmem:[%s7031_s30 + $0x664] ss:$16 sps:$4 sm:$0xff]   ;;  %v6107_v27 = vld [vmem:[%s7031_s30 + $0x66c] ss:$16 sps:$4 sm:$0xff]  }
  0xfb   : > { %3688 = vmatpush1.bf16.msra.mxu0 %v6012_v28  ;;  %4057 = vmatpush1.bf16.msra.mxu1 %v6015_v29  ;;  %v6102_v28 = vld [vmem:[%s7031_s30 + $0x660] ss:$16 sps:$4 sm:$0xff]   ;;  %v6105_v29 = vld [vmem:[%s7031_s30 + $0x668] ss:$16 sps:$4 sm:$0xff]  }
  0xfc   : > { %3689 = vmatprep.subr.bf16.mxu0 %v6020_v30  ;;  %4058 = vmatprep.subr.bf16.mxu1 %v6023_v31  ;;  %v6110_v30 = vld [vmem:[%s7031_s30 + $0x684] ss:$16 sps:$4 sm:$0xff]   ;;  %v6113_v31 = vld [vmem:[%s7031_s30 + $0x68c] ss:$16 sps:$4 sm:$0xff]  }
  0xff   : > { %3690 = vmatpush1.bf16.msra.mxu0 %v6018_v32  ;;  %4059 = vmatpush1.bf16.msra.mxu1 %v6021_v33  ;;  %v6108_v32 = vld [vmem:[%s7031_s30 + $0x680] ss:$16 sps:$4 sm:$0xff]   ;;  %v6111_v33 = vld [vmem:[%s7031_s30 + $0x688] ss:$16 sps:$4 sm:$0xff]  }
 0x100   : > { %3691 = vmatprep.subr.bf16.mxu0 %v6026_v34  ;;  %4060 = vmatprep.subr.bf16.mxu1 %v6029_v35  ;;  %v6116_v34 = vld [vmem:[%s7031_s30 + $0x6a4] ss:$16 sps:$4 sm:$0xff]   ;;  %v6119_v35 = vld [vmem:[%s7031_s30 + $0x6ac] ss:$16 sps:$4 sm:$0xff]  }
 0x103   : > { %3692 = vmatpush1.bf16.msra.mxu0 %v6024_v36  ;;  %4061 = vmatpush1.bf16.msra.mxu1 %v6027_v37  ;;  %v6114_v36 = vld [vmem:[%s7031_s30 + $0x6a0] ss:$16 sps:$4 sm:$0xff]   ;;  %v6117_v37 = vld [vmem:[%s7031_s30 + $0x6a8] ss:$16 sps:$4 sm:$0xff]  }
 0x104   : > { %3693 = vmatprep.subr.bf16.mxu0 %v6032_v38  ;;  %4062 = vmatprep.subr.bf16.mxu1 %v6035_v39  ;;  %v6122_v38 = vld [vmem:[%s7031_s30 + $0x6c4] ss:$16 sps:$4 sm:$0xff]   ;;  %v6125_v39 = vld [vmem:[%s7031_s30 + $0x6cc] ss:$16 sps:$4 sm:$0xff]  }
 0x107   : > { %3694 = vmatpush1.bf16.msra.mxu0 %v6030_v40  ;;  %4063 = vmatpush1.bf16.msra.mxu1 %v6033_v41  ;;  %v6120_v40 = vld [vmem:[%s7031_s30 + $0x6c0] ss:$16 sps:$4 sm:$0xff]   ;;  %v6123_v41 = vld [vmem:[%s7031_s30 + $0x6c8] ss:$16 sps:$4 sm:$0xff]  }
 0x108   : > { %3695 = vmatprep.subr.bf16.mxu0 %v6038_v42  ;;  %4064 = vmatprep.subr.bf16.mxu1 %v6041_v43  ;;  %v6128_v42 = vld [vmem:[%s7031_s30 + $0x6e4] ss:$16 sps:$4 sm:$0xff]   ;;  %v6131_v43 = vld [vmem:[%s7031_s30 + $0x6ec] ss:$16 sps:$4 sm:$0xff]  }
 0x10b   : > { %3696 = vmatpush1.bf16.msra.mxu0 %v6036_v44  ;;  %4065 = vmatpush1.bf16.msra.mxu1 %v6039_v45  ;;  %v6126_v44 = vld [vmem:[%s7031_s30 + $0x6e0] ss:$16 sps:$4 sm:$0xff]   ;;  %v6129_v45 = vld [vmem:[%s7031_s30 + $0x6e8] ss:$16 sps:$4 sm:$0xff]  }
 0x10c   : > { %3697 = vmatprep.subr.bf16.mxu0 %v6044_v46  ;;  %4066 = vmatprep.subr.bf16.mxu1 %v6047_v47  ;;  %v6134_v46 = vld [vmem:[%s7031_s30 + $0x704] ss:$16 sps:$4 sm:$0xff]   ;;  %v6137_v47 = vld [vmem:[%s7031_s30 + $0x70c] ss:$16 sps:$4 sm:$0xff]  }
 0x10f   : > { %3698 = vmatpush1.bf16.msra.mxu0 %v6042_v48  ;;  %4067 = vmatpush1.bf16.msra.mxu1 %v6045_v49  ;;  %v6132_v48 = vld [vmem:[%s7031_s30 + $0x700] ss:$16 sps:$4 sm:$0xff]   ;;  %v6135_v49 = vld [vmem:[%s7031_s30 + $0x708] ss:$16 sps:$4 sm:$0xff]  }
 0x110   : > { %3699 = vmatprep.subr.bf16.mxu0 %v6050_v50  ;;  %4068 = vmatprep.subr.bf16.mxu1 %v6053_v51  ;;  %v6140_v50 = vld [vmem:[%s7031_s30 + $0x724] ss:$16 sps:$4 sm:$0xff]   ;;  %v6143_v51 = vld [vmem:[%s7031_s30 + $0x72c] ss:$16 sps:$4 sm:$0xff]  }
 0x113   : > { %3700 = vmatpush1.bf16.msra.mxu0 %v6048_v52  ;;  %4069 = vmatpush1.bf16.msra.mxu1 %v6051_v53  ;;  %v6138_v52 = vld [vmem:[%s7031_s30 + $0x720] ss:$16 sps:$4 sm:$0xff]   ;;  %v6141_v53 = vld [vmem:[%s7031_s30 + $0x728] ss:$16 sps:$4 sm:$0xff]  }
 0x114   : > { %3701 = vmatprep.subr.bf16.mxu0 %v6056_v54  ;;  %4070 = vmatprep.subr.bf16.mxu1 %v6059_v55  ;;  %v6146_v54 = vld [vmem:[%s7031_s30 + $0x744] ss:$16 sps:$4 sm:$0xff]   ;;  %v6149_v55 = vld [vmem:[%s7031_s30 + $0x74c] ss:$16 sps:$4 sm:$0xff]  }
 0x117   : > { %3702 = vmatpush1.bf16.msra.mxu0 %v6054_v56  ;;  %4071 = vmatpush1.bf16.msra.mxu1 %v6057_v57  ;;  %v6144_v56 = vld [vmem:[%s7031_s30 + $0x740] ss:$16 sps:$4 sm:$0xff]   ;;  %v6147_v57 = vld [vmem:[%s7031_s30 + $0x748] ss:$16 sps:$4 sm:$0xff]  }
 0x118   : > { %3703 = vmatprep.subr.bf16.mxu0 %v6062_v58  ;;  %4072 = vmatprep.subr.bf16.mxu1 %v6065_v59  ;;  %v6152_v58 = vld [vmem:[%s7031_s30 + $0x764] ss:$16 sps:$4 sm:$0xff]   ;;  %v6155_v59 = vld [vmem:[%s7031_s30 + $0x76c] ss:$16 sps:$4 sm:$0xff]  }
 0x11b   : > { %3704 = vmatpush1.bf16.msra.mxu0 %v6060_v60  ;;  %4073 = vmatpush1.bf16.msra.mxu1 %v6063_v61  ;;  %v6150_v60 = vld [vmem:[%s7031_s30 + $0x760] ss:$16 sps:$4 sm:$0xff]   ;;  %v6153_v61 = vld [vmem:[%s7031_s30 + $0x768] ss:$16 sps:$4 sm:$0xff]  }
 0x11c   : > { %3705 = vmatprep.subr.bf16.mxu0 %v6068_v62  ;;  %4074 = vmatprep.subr.bf16.mxu1 %v6071_v63  ;;  %v6158_v62 = vld [vmem:[%s7031_s30 + $0x784] ss:$16 sps:$4 sm:$0xff]   ;;  %v6161_v63 = vld [vmem:[%s7031_s30 + $0x78c] ss:$16 sps:$4 sm:$0xff]  }
 0x11f   : > { %3706 = vmatpush1.bf16.msra.mxu0 %v6066_v0  ;;  %4075 = vmatpush1.bf16.msra.mxu1 %v6069_v1  ;;  %v6156_v0 = vld [vmem:[%s7031_s30 + $0x780] ss:$16 sps:$4 sm:$0xff]   ;;  %v6159_v1 = vld [vmem:[%s7031_s30 + $0x788] ss:$16 sps:$4 sm:$0xff]  }
 0x120   : > { %3707 = vmatprep.subr.bf16.mxu0 %v6074_v2  ;;  %4076 = vmatprep.subr.bf16.mxu1 %v6077_v3  ;;  %v6164_v2 = vld [vmem:[%s7031_s30 + $0x7a4] ss:$16 sps:$4 sm:$0xff]   ;;  %v6167_v3 = vld [vmem:[%s7031_s30 + $0x7ac] ss:$16 sps:$4 sm:$0xff]  }
 0x123   : > { %3708 = vmatpush1.bf16.msra.mxu0 %v6072_v4  ;;  %4077 = vmatpush1.bf16.msra.mxu1 %v6075_v5  ;;  %v6162_v4 = vld [vmem:[%s7031_s30 + $0x7a0] ss:$16 sps:$4 sm:$0xff]   ;;  %v6165_v5 = vld [vmem:[%s7031_s30 + $0x7a8] ss:$16 sps:$4 sm:$0xff]  }
 0x124   : > { %3709 = vmatprep.subr.bf16.mxu0 %v6080_v6  ;;  %4078 = vmatprep.subr.bf16.mxu1 %v6083_v7  ;;  %v6170_v6 = vld [vmem:[%s7031_s30 + $0x7c4] ss:$16 sps:$4 sm:$0xff]   ;;  %v6173_v7 = vld [vmem:[%s7031_s30 + $0x7cc] ss:$16 sps:$4 sm:$0xff]  }
 0x127   : > { %3710 = vmatpush1.bf16.msra.mxu0 %v6078_v8  ;;  %4079 = vmatpush1.bf16.msra.mxu1 %v6081_v9  ;;  %v6168_v8 = vld [vmem:[%s7031_s30 + $0x7c0] ss:$16 sps:$4 sm:$0xff]   ;;  %v6171_v9 = vld [vmem:[%s7031_s30 + $0x7c8] ss:$16 sps:$4 sm:$0xff]  }
 0x128   : > { %3720 = vmatprep.subr.bf16.mxu0 %v6086_v10  ;;  %4089 = vmatprep.subr.bf16.mxu1 %v6089_v12  ;;  %v6176_v10 = vld [vmem:[%s7031_s30 + $0x7e4] ss:$16 sps:$4 sm:$0xff]   ;;  %v6174_v12 = vld [vmem:[%s7031_s30 + $0x7e0] ss:$16 sps:$4 sm:$0xff]  }
 0x12a   : > { %3712 = vmatmul.mubr.bf16.vlgmr.msra.gmra.mrb[0].mxu0 %v298_v15  ;;  %4081 = vmatmul.mubr.bf16.vlgmr.msra.gmra.mrb[0].mxu1 %v298_v15  ;;  %v6182_v15 = vld [vmem:[%s7031_s30 + $0x804] ss:$16 sps:$4 sm:$0xff]  }
 0x12b   : > { %3721 = vmatpush1.bf16.msra.mxu0 %v6084_v13  ;;  %4090 = vmatpush1.bf16.msra.mxu1 %v6087_v14  ;;  %v6177_v13 = vld [vmem:[%s7031_s30 + $0x7e8] ss:$16 sps:$4 sm:$0xff]  }
 0x12c   : > { %3722 = vmatprep.subr.bf16.mxu0 %v6092_v17  ;;  %4091 = vmatprep.subr.bf16.mxu1 %v6095_v18  ;;  %v283_v14 = vld [vmem:[#allocation2 + $0x30] sm:$0xff]  ;;  %v286_v18 = vld [vmem:[#allocation2 + $0x48] sm:$0xff] }
 0x12d   : > { %3752 = vmatprep.mubr.bf16.mxu0 %v301_v19  ;;  %4121 = vmatprep.mubr.bf16.mxu1 %v301_v19  ;;  %v300_v17 = vpack.c.bf16 %v283_v14, %v283_v14  ;;  %v6180_v19 = vld [vmem:[%s7031_s30 + $0x800] ss:$16 sps:$4 sm:$0xff]   ;;  %v6272_v14 = vld [vmem:[%s7031_s30 + $0x9e4] ss:$16 sps:$4 sm:$0xff]  }
 0x12f   : > { %3723 = vmatpush1.bf16.msra.mxu0 %v6090_v20  ;;  %4092 = vmatpush1.bf16.msra.mxu1 %v6093_v21  ;;  %v6183_v20 = vld [vmem:[%s7031_s30 + $0x808] ss:$16 sps:$4 sm:$0xff]   ;;  %v6188_v21 = vld [vmem:[%s7031_s30 + $0x824] ss:$16 sps:$4 sm:$0xff]  }
 0x130   : > { %3724 = vmatprep.subr.bf16.mxu0 %v6098_v22  ;;  %4093 = vmatprep.subr.bf16.mxu1 %v6101_v23  ;;  %v6191_v22 = vld [vmem:[%s7031_s30 + $0x82c] ss:$16 sps:$4 sm:$0xff]   ;;  %v303_v23 = vpack.c.bf16 %v286_v18, %v286_v18  ;;  %v6278_v18 = vld [vmem:[%s7031_s30 + $0xa04] ss:$16 sps:$4 sm:$0xff]  }
 0x133   : > { %3725 = vmatpush1.bf16.msra.mxu0 %v6096_v24  ;;  %4094 = vmatpush1.bf16.msra.mxu1 %v6099_v25  ;;  %v6186_v24 = vld [vmem:[%s7031_s30 + $0x820] ss:$16 sps:$4 sm:$0xff]   ;;  %v6189_v25 = vld [vmem:[%s7031_s30 + $0x828] ss:$16 sps:$4 sm:$0xff]  }
 0x134   : > { %3726 = vmatprep.subr.bf16.mxu0 %v6104_v26  ;;  %4095 = vmatprep.subr.bf16.mxu1 %v6107_v27  ;;  %v6194_v26 = vld [vmem:[%s7031_s30 + $0x844] ss:$16 sps:$4 sm:$0xff]   ;;  %v6197_v27 = vld [vmem:[%s7031_s30 + $0x84c] ss:$16 sps:$4 sm:$0xff]  }
 0x137   : > { %3727 = vmatpush1.bf16.msra.mxu0 %v6102_v28  ;;  %4096 = vmatpush1.bf16.msra.mxu1 %v6105_v29  ;;  %v6192_v28 = vld [vmem:[%s7031_s30 + $0x840] ss:$16 sps:$4 sm:$0xff]   ;;  %v6195_v29 = vld [vmem:[%s7031_s30 + $0x848] ss:$16 sps:$4 sm:$0xff]  }
 0x138   : > { %3728 = vmatprep.subr.bf16.mxu0 %v6110_v30  ;;  %4097 = vmatprep.subr.bf16.mxu1 %v6113_v31  ;;  %v6200_v30 = vld [vmem:[%s7031_s30 + $0x864] ss:$16 sps:$4 sm:$0xff]   ;;  %v6203_v31 = vld [vmem:[%s7031_s30 + $0x86c] ss:$16 sps:$4 sm:$0xff]  }
 0x13b   : > { %3729 = vmatpush1.bf16.msra.mxu0 %v6108_v32  ;;  %4098 = vmatpush1.bf16.msra.mxu1 %v6111_v33  ;;  %v6198_v32 = vld [vmem:[%s7031_s30 + $0x860] ss:$16 sps:$4 sm:$0xff]   ;;  %v6201_v33 = vld [vmem:[%s7031_s30 + $0x868] ss:$16 sps:$4 sm:$0xff]  }
 0x13c   : > { %3730 = vmatprep.subr.bf16.mxu0 %v6116_v34  ;;  %4099 = vmatprep.subr.bf16.mxu1 %v6119_v35  ;;  %v6206_v34 = vld [vmem:[%s7031_s30 + $0x884] ss:$16 sps:$4 sm:$0xff]   ;;  %v6209_v35 = vld [vmem:[%s7031_s30 + $0x88c] ss:$16 sps:$4 sm:$0xff]  }
 0x13f   : > { %3731 = vmatpush1.bf16.msra.mxu0 %v6114_v36  ;;  %4100 = vmatpush1.bf16.msra.mxu1 %v6117_v37  ;;  %v6204_v36 = vld [vmem:[%s7031_s30 + $0x880] ss:$16 sps:$4 sm:$0xff]   ;;  %v6207_v37 = vld [vmem:[%s7031_s30 + $0x888] ss:$16 sps:$4 sm:$0xff]  }
 0x140   : > { %3732 = vmatprep.subr.bf16.mxu0 %v6122_v38  ;;  %4101 = vmatprep.subr.bf16.mxu1 %v6125_v39  ;;  %v6212_v38 = vld [vmem:[%s7031_s30 + $0x8a4] ss:$16 sps:$4 sm:$0xff]   ;;  %v6215_v39 = vld [vmem:[%s7031_s30 + $0x8ac] ss:$16 sps:$4 sm:$0xff]  }
 0x143   : > { %3733 = vmatpush1.bf16.msra.mxu0 %v6120_v40  ;;  %4102 = vmatpush1.bf16.msra.mxu1 %v6123_v41  ;;  %v6210_v40 = vld [vmem:[%s7031_s30 + $0x8a0] ss:$16 sps:$4 sm:$0xff]   ;;  %v6213_v41 = vld [vmem:[%s7031_s30 + $0x8a8] ss:$16 sps:$4 sm:$0xff]  }
 0x144   : > { %3734 = vmatprep.subr.bf16.mxu0 %v6128_v42  ;;  %4103 = vmatprep.subr.bf16.mxu1 %v6131_v43  ;;  %v6218_v42 = vld [vmem:[%s7031_s30 + $0x8c4] ss:$16 sps:$4 sm:$0xff]   ;;  %v6221_v43 = vld [vmem:[%s7031_s30 + $0x8cc] ss:$16 sps:$4 sm:$0xff]  }
 0x147   : > { %3735 = vmatpush1.bf16.msra.mxu0 %v6126_v44  ;;  %4104 = vmatpush1.bf16.msra.mxu1 %v6129_v45  ;;  %v6216_v44 = vld [vmem:[%s7031_s30 + $0x8c0] ss:$16 sps:$4 sm:$0xff]   ;;  %v6219_v45 = vld [vmem:[%s7031_s30 + $0x8c8] ss:$16 sps:$4 sm:$0xff]  }
 0x148   : > { %3736 = vmatprep.subr.bf16.mxu0 %v6134_v46  ;;  %4105 = vmatprep.subr.bf16.mxu1 %v6137_v47  ;;  %v6224_v46 = vld [vmem:[%s7031_s30 + $0x8e4] ss:$16 sps:$4 sm:$0xff]   ;;  %v6227_v47 = vld [vmem:[%s7031_s30 + $0x8ec] ss:$16 sps:$4 sm:$0xff]  }
 0x14b   : > { %3737 = vmatpush1.bf16.msra.mxu0 %v6132_v48  ;;  %4106 = vmatpush1.bf16.msra.mxu1 %v6135_v49  ;;  %v6222_v48 = vld [vmem:[%s7031_s30 + $0x8e0] ss:$16 sps:$4 sm:$0xff]   ;;  %v6225_v49 = vld [vmem:[%s7031_s30 + $0x8e8] ss:$16 sps:$4 sm:$0xff]  }
 0x14c   : > { %3738 = vmatprep.subr.bf16.mxu0 %v6140_v50  ;;  %4107 = vmatprep.subr.bf16.mxu1 %v6143_v51  ;;  %v6230_v50 = vld [vmem:[%s7031_s30 + $0x904] ss:$16 sps:$4 sm:$0xff]   ;;  %v6233_v51 = vld [vmem:[%s7031_s30 + $0x90c] ss:$16 sps:$4 sm:$0xff]  }
 0x14f   : > { %3739 = vmatpush1.bf16.msra.mxu0 %v6138_v52  ;;  %4108 = vmatpush1.bf16.msra.mxu1 %v6141_v53  ;;  %v6228_v52 = vld [vmem:[%s7031_s30 + $0x900] ss:$16 sps:$4 sm:$0xff]   ;;  %v6231_v53 = vld [vmem:[%s7031_s30 + $0x908] ss:$16 sps:$4 sm:$0xff]  }
 0x150   : > { %3740 = vmatprep.subr.bf16.mxu0 %v6146_v54  ;;  %4109 = vmatprep.subr.bf16.mxu1 %v6149_v55  ;;  %v6236_v54 = vld [vmem:[%s7031_s30 + $0x924] ss:$16 sps:$4 sm:$0xff]   ;;  %v6239_v55 = vld [vmem:[%s7031_s30 + $0x92c] ss:$16 sps:$4 sm:$0xff]  }
 0x153   : > { %3741 = vmatpush1.bf16.msra.mxu0 %v6144_v56  ;;  %4110 = vmatpush1.bf16.msra.mxu1 %v6147_v57  ;;  %v6234_v56 = vld [vmem:[%s7031_s30 + $0x920] ss:$16 sps:$4 sm:$0xff]   ;;  %v6237_v57 = vld [vmem:[%s7031_s30 + $0x928] ss:$16 sps:$4 sm:$0xff]  }
 0x154   : > { %3742 = vmatprep.subr.bf16.mxu0 %v6152_v58  ;;  %4111 = vmatprep.subr.bf16.mxu1 %v6155_v59  ;;  %v6242_v58 = vld [vmem:[%s7031_s30 + $0x944] ss:$16 sps:$4 sm:$0xff]   ;;  %v6245_v59 = vld [vmem:[%s7031_s30 + $0x94c] ss:$16 sps:$4 sm:$0xff]  }
 0x157   : > { %3743 = vmatpush1.bf16.msra.mxu0 %v6150_v60  ;;  %4112 = vmatpush1.bf16.msra.mxu1 %v6153_v61  ;;  %v6240_v60 = vld [vmem:[%s7031_s30 + $0x940] ss:$16 sps:$4 sm:$0xff]   ;;  %v6243_v61 = vld [vmem:[%s7031_s30 + $0x948] ss:$16 sps:$4 sm:$0xff]  }
 0x158   : > { %3744 = vmatprep.subr.bf16.mxu0 %v6158_v62  ;;  %4113 = vmatprep.subr.bf16.mxu1 %v6161_v63  ;;  %v6248_v62 = vld [vmem:[%s7031_s30 + $0x964] ss:$16 sps:$4 sm:$0xff]   ;;  %v6251_v63 = vld [vmem:[%s7031_s30 + $0x96c] ss:$16 sps:$4 sm:$0xff]  }
 0x15b   : > { %3745 = vmatpush1.bf16.msra.mxu0 %v6156_v0  ;;  %4114 = vmatpush1.bf16.msra.mxu1 %v6159_v1  ;;  %v6246_v0 = vld [vmem:[%s7031_s30 + $0x960] ss:$16 sps:$4 sm:$0xff]   ;;  %v6249_v1 = vld [vmem:[%s7031_s30 + $0x968] ss:$16 sps:$4 sm:$0xff]  }
 0x15c   : > { %3746 = vmatprep.subr.bf16.mxu0 %v6164_v2  ;;  %4115 = vmatprep.subr.bf16.mxu1 %v6167_v3  ;;  %v6254_v2 = vld [vmem:[%s7031_s30 + $0x984] ss:$16 sps:$4 sm:$0xff]   ;;  %v6257_v3 = vld [vmem:[%s7031_s30 + $0x98c] ss:$16 sps:$4 sm:$0xff]  }
 0x15f   : > { %3747 = vmatpush1.bf16.msra.mxu0 %v6162_v4  ;;  %4116 = vmatpush1.bf16.msra.mxu1 %v6165_v5  ;;  %v6252_v4 = vld [vmem:[%s7031_s30 + $0x980] ss:$16 sps:$4 sm:$0xff]   ;;  %v6255_v5 = vld [vmem:[%s7031_s30 + $0x988] ss:$16 sps:$4 sm:$0xff]  }
 0x160   : > { %3748 = vmatprep.subr.bf16.mxu0 %v6170_v6  ;;  %4117 = vmatprep.subr.bf16.mxu1 %v6173_v7  ;;  %v6260_v6 = vld [vmem:[%s7031_s30 + $0x9a4] ss:$16 sps:$4 sm:$0xff]   ;;  %v6263_v7 = vld [vmem:[%s7031_s30 + $0x9ac] ss:$16 sps:$4 sm:$0xff]  }
 0x163   : > { %3749 = vmatpush1.bf16.msra.mxu0 %v6168_v8  ;;  %4118 = vmatpush1.bf16.msra.mxu1 %v6171_v9  ;;  %v6258_v8 = vld [vmem:[%s7031_s30 + $0x9a0] ss:$16 sps:$4 sm:$0xff]   ;;  %v6261_v9 = vld [vmem:[%s7031_s30 + $0x9a8] ss:$16 sps:$4 sm:$0xff]  }
 0x164   : > { %3750 = vmatprep.subr.bf16.mxu0 %v6176_v10  ;;  %4119 = vmatprep.subr.bf16.mxu1 %v6179_v11  ;;  %v6266_v10 = vld [vmem:[%s7031_s30 + $0x9c4] ss:$16 sps:$4 sm:$0xff]   ;;  %v6269_v11 = vld [vmem:[%s7031_s30 + $0x9cc] ss:$16 sps:$4 sm:$0xff]  }
 0x167   : > { %3751 = vmatpush1.bf16.msra.mxu0 %v6174_v12  ;;  %4120 = vmatpush1.bf16.msra.mxu1 %v6177_v13  ;;  %v6264_v12 = vld [vmem:[%s7031_s30 + $0x9c0] ss:$16 sps:$4 sm:$0xff]   ;;  %v6267_v13 = vld [vmem:[%s7031_s30 + $0x9c8] ss:$16 sps:$4 sm:$0xff]  }
 0x168   : > { %3761 = vmatprep.subr.bf16.mxu0 %v6182_v15  ;;  %4130 = vmatprep.subr.bf16.mxu1 %v6185_v16  ;;  %v6275_v15 = vld [vmem:[%s7031_s30 + $0x9ec] ss:$16 sps:$4 sm:$0xff]   ;;  %v6270_v16 = vld [vmem:[%s7031_s30 + $0x9e0] ss:$16 sps:$4 sm:$0xff]  }
 0x16a   : > { %3753 = vmatmul.mubr.bf16.vlgmr.msra.gmra.mrb[0].mxu0 %v300_v17  ;;  %4122 = vmatmul.mubr.bf16.vlgmr.msra.gmra.mrb[0].mxu1 %v300_v17  ;;  %v6273_v17 = vld [vmem:[%s7031_s30 + $0x9e8] ss:$16 sps:$4 sm:$0xff]  }
 0x16b   : > { %3762 = vmatpush1.bf16.msra.mxu0 %v6180_v19  ;;  %4131 = vmatpush1.bf16.msra.mxu1 %v6183_v20  ;;  %v285_v19 = vld [vmem:[#allocation2 + $0x40] sm:$0xff] }
 0x16c   : > { %3763 = vmatprep.subr.bf16.mxu0 %v6188_v21  ;;  %4132 = vmatprep.subr.bf16.mxu1 %v6191_v22  ;;  %v6281_v20 = vld [vmem:[%s7031_s30 + $0xa0c] ss:$16 sps:$4 sm:$0xff]   ;;  %v288_v21 = vld [vmem:[#allocation2 + $0x58] sm:$0xff]  ;;  %v302_v22 = vpack.c.bf16 %v285_v19, %v285_v19 }
 0x16d   : > { %3793 = vmatprep.mubr.bf16.mxu0 %v303_v23  ;;  %4162 = vmatprep.mubr.bf16.mxu1 %v303_v23  ;;  %v6276_v23 = vld [vmem:[%s7031_s30 + $0xa00] ss:$16 sps:$4 sm:$0xff]   ;;  %v6371_v19 = vld [vmem:[%s7031_s30 + $0xbec] ss:$16 sps:$4 sm:$0xff]  }
 0x16f   : > { %3764 = vmatpush1.bf16.msra.mxu0 %v6186_v24  ;;  %4133 = vmatpush1.bf16.msra.mxu1 %v6189_v25  ;;  %v6279_v24 = vld [vmem:[%s7031_s30 + $0xa08] ss:$16 sps:$4 sm:$0xff]   ;;  %v6284_v25 = vld [vmem:[%s7031_s30 + $0xa24] ss:$16 sps:$4 sm:$0xff]  }
 0x170   : > { %3765 = vmatprep.subr.bf16.mxu0 %v6194_v26  ;;  %4134 = vmatprep.subr.bf16.mxu1 %v6197_v27  ;;  %v6287_v26 = vld [vmem:[%s7031_s30 + $0xa2c] ss:$16 sps:$4 sm:$0xff]   ;;  %v305_v27 = vpack.c.bf16 %v288_v21, %v288_v21  ;;  %v6369_v21 = vld [vmem:[%s7031_s30 + $0xbe8] ss:$16 sps:$4 sm:$0xff]  }
 0x173   : > { %3766 = vmatpush1.bf16.msra.mxu0 %v6192_v28  ;;  %4135 = vmatpush1.bf16.msra.mxu1 %v6195_v29  ;;  %v6282_v28 = vld [vmem:[%s7031_s30 + $0xa20] ss:$16 sps:$4 sm:$0xff]   ;;  %v6285_v29 = vld [vmem:[%s7031_s30 + $0xa28] ss:$16 sps:$4 sm:$0xff]  }
 0x174   : > { %3767 = vmatprep.subr.bf16.mxu0 %v6200_v30  ;;  %4136 = vmatprep.subr.bf16.mxu1 %v6203_v31  ;;  %v6290_v30 = vld [vmem:[%s7031_s30 + $0xa44] ss:$16 sps:$4 sm:$0xff]   ;;  %v6293_v31 = vld [vmem:[%s7031_s30 + $0xa4c] ss:$16 sps:$4 sm:$0xff]  }
 0x177   : > { %3768 = vmatpush1.bf16.msra.mxu0 %v6198_v32  ;;  %4137 = vmatpush1.bf16.msra.mxu1 %v6201_v33  ;;  %v6288_v32 = vld [vmem:[%s7031_s30 + $0xa40] ss:$16 sps:$4 sm:$0xff]   ;;  %v6291_v33 = vld [vmem:[%s7031_s30 + $0xa48] ss:$16 sps:$4 sm:$0xff]  }
 0x178   : > { %3769 = vmatprep.subr.bf16.mxu0 %v6206_v34  ;;  %4138 = vmatprep.subr.bf16.mxu1 %v6209_v35  ;;  %v6296_v34 = vld [vmem:[%s7031_s30 + $0xa64] ss:$16 sps:$4 sm:$0xff]   ;;  %v6299_v35 = vld [vmem:[%s7031_s30 + $0xa6c] ss:$16 sps:$4 sm:$0xff]  }
 0x17b   : > { %3770 = vmatpush1.bf16.msra.mxu0 %v6204_v36  ;;  %4139 = vmatpush1.bf16.msra.mxu1 %v6207_v37  ;;  %v6294_v36 = vld [vmem:[%s7031_s30 + $0xa60] ss:$16 sps:$4 sm:$0xff]   ;;  %v6297_v37 = vld [vmem:[%s7031_s30 + $0xa68] ss:$16 sps:$4 sm:$0xff]  }
 0x17c   : > { %3771 = vmatprep.subr.bf16.mxu0 %v6212_v38  ;;  %4140 = vmatprep.subr.bf16.mxu1 %v6215_v39  ;;  %v6302_v38 = vld [vmem:[%s7031_s30 + $0xa84] ss:$16 sps:$4 sm:$0xff]   ;;  %v6305_v39 = vld [vmem:[%s7031_s30 + $0xa8c] ss:$16 sps:$4 sm:$0xff]  }
 0x17f   : > { %3772 = vmatpush1.bf16.msra.mxu0 %v6210_v40  ;;  %4141 = vmatpush1.bf16.msra.mxu1 %v6213_v41  ;;  %v6300_v40 = vld [vmem:[%s7031_s30 + $0xa80] ss:$16 sps:$4 sm:$0xff]   ;;  %v6303_v41 = vld [vmem:[%s7031_s30 + $0xa88] ss:$16 sps:$4 sm:$0xff]  }
 0x180   : > { %3773 = vmatprep.subr.bf16.mxu0 %v6218_v42  ;;  %4142 = vmatprep.subr.bf16.mxu1 %v6221_v43  ;;  %v6308_v42 = vld [vmem:[%s7031_s30 + $0xaa4] ss:$16 sps:$4 sm:$0xff]   ;;  %v6311_v43 = vld [vmem:[%s7031_s30 + $0xaac] ss:$16 sps:$4 sm:$0xff]  }
 0x183   : > { %3774 = vmatpush1.bf16.msra.mxu0 %v6216_v44  ;;  %4143 = vmatpush1.bf16.msra.mxu1 %v6219_v45  ;;  %v6306_v44 = vld [vmem:[%s7031_s30 + $0xaa0] ss:$16 sps:$4 sm:$0xff]   ;;  %v6309_v45 = vld [vmem:[%s7031_s30 + $0xaa8] ss:$16 sps:$4 sm:$0xff]  }
 0x184   : > { %3775 = vmatprep.subr.bf16.mxu0 %v6224_v46  ;;  %4144 = vmatprep.subr.bf16.mxu1 %v6227_v47  ;;  %v6314_v46 = vld [vmem:[%s7031_s30 + $0xac4] ss:$16 sps:$4 sm:$0xff]   ;;  %v6317_v47 = vld [vmem:[%s7031_s30 + $0xacc] ss:$16 sps:$4 sm:$0xff]  }
 0x187   : > { %3776 = vmatpush1.bf16.msra.mxu0 %v6222_v48  ;;  %4145 = vmatpush1.bf16.msra.mxu1 %v6225_v49  ;;  %v6312_v48 = vld [vmem:[%s7031_s30 + $0xac0] ss:$16 sps:$4 sm:$0xff]   ;;  %v6315_v49 = vld [vmem:[%s7031_s30 + $0xac8] ss:$16 sps:$4 sm:$0xff]  }
 0x188   : > { %3777 = vmatprep.subr.bf16.mxu0 %v6230_v50  ;;  %4146 = vmatprep.subr.bf16.mxu1 %v6233_v51  ;;  %v6320_v50 = vld [vmem:[%s7031_s30 + $0xae4] ss:$16 sps:$4 sm:$0xff]   ;;  %v6323_v51 = vld [vmem:[%s7031_s30 + $0xaec] ss:$16 sps:$4 sm:$0xff]  }
 0x18b   : > { %3778 = vmatpush1.bf16.msra.mxu0 %v6228_v52  ;;  %4147 = vmatpush1.bf16.msra.mxu1 %v6231_v53  ;;  %v6318_v52 = vld [vmem:[%s7031_s30 + $0xae0] ss:$16 sps:$4 sm:$0xff]   ;;  %v6321_v53 = vld [vmem:[%s7031_s30 + $0xae8] ss:$16 sps:$4 sm:$0xff]  }
 0x18c   : > { %3779 = vmatprep.subr.bf16.mxu0 %v6236_v54  ;;  %4148 = vmatprep.subr.bf16.mxu1 %v6239_v55  ;;  %v6326_v54 = vld [vmem:[%s7031_s30 + $0xb04] ss:$16 sps:$4 sm:$0xff]   ;;  %v6329_v55 = vld [vmem:[%s7031_s30 + $0xb0c] ss:$16 sps:$4 sm:$0xff]  }
 0x18f   : > { %3780 = vmatpush1.bf16.msra.mxu0 %v6234_v56  ;;  %4149 = vmatpush1.bf16.msra.mxu1 %v6237_v57  ;;  %v6324_v56 = vld [vmem:[%s7031_s30 + $0xb00] ss:$16 sps:$4 sm:$0xff]   ;;  %v6327_v57 = vld [vmem:[%s7031_s30 + $0xb08] ss:$16 sps:$4 sm:$0xff]  }
 0x190   : > { %3781 = vmatprep.subr.bf16.mxu0 %v6242_v58  ;;  %4150 = vmatprep.subr.bf16.mxu1 %v6245_v59  ;;  %v6332_v58 = vld [vmem:[%s7031_s30 + $0xb24] ss:$16 sps:$4 sm:$0xff]   ;;  %v6335_v59 = vld [vmem:[%s7031_s30 + $0xb2c] ss:$16 sps:$4 sm:$0xff]  }
 0x193   : > { %3782 = vmatpush1.bf16.msra.mxu0 %v6240_v60  ;;  %4151 = vmatpush1.bf16.msra.mxu1 %v6243_v61  ;;  %v6330_v60 = vld [vmem:[%s7031_s30 + $0xb20] ss:$16 sps:$4 sm:$0xff]   ;;  %v6333_v61 = vld [vmem:[%s7031_s30 + $0xb28] ss:$16 sps:$4 sm:$0xff]  }
 0x194   : > { %3783 = vmatprep.subr.bf16.mxu0 %v6248_v62  ;;  %4152 = vmatprep.subr.bf16.mxu1 %v6251_v63  ;;  %v6338_v62 = vld [vmem:[%s7031_s30 + $0xb44] ss:$16 sps:$4 sm:$0xff]   ;;  %v6341_v63 = vld [vmem:[%s7031_s30 + $0xb4c] ss:$16 sps:$4 sm:$0xff]  }
 0x197   : > { %3784 = vmatpush1.bf16.msra.mxu0 %v6246_v0  ;;  %4153 = vmatpush1.bf16.msra.mxu1 %v6249_v1  ;;  %v6336_v0 = vld [vmem:[%s7031_s30 + $0xb40] ss:$16 sps:$4 sm:$0xff]   ;;  %v6339_v1 = vld [vmem:[%s7031_s30 + $0xb48] ss:$16 sps:$4 sm:$0xff]  }
 0x198   : > { %3785 = vmatprep.subr.bf16.mxu0 %v6254_v2  ;;  %4154 = vmatprep.subr.bf16.mxu1 %v6257_v3  ;;  %v6344_v2 = vld [vmem:[%s7031_s30 + $0xb64] ss:$16 sps:$4 sm:$0xff]   ;;  %v6347_v3 = vld [vmem:[%s7031_s30 + $0xb6c] ss:$16 sps:$4 sm:$0xff]  }
 0x19b   : > { %3786 = vmatpush1.bf16.msra.mxu0 %v6252_v4  ;;  %4155 = vmatpush1.bf16.msra.mxu1 %v6255_v5  ;;  %v6342_v4 = vld [vmem:[%s7031_s30 + $0xb60] ss:$16 sps:$4 sm:$0xff]   ;;  %v6345_v5 = vld [vmem:[%s7031_s30 + $0xb68] ss:$16 sps:$4 sm:$0xff]  }
 0x19c   : > { %3787 = vmatprep.subr.bf16.mxu0 %v6260_v6  ;;  %4156 = vmatprep.subr.bf16.mxu1 %v6263_v7  ;;  %v6350_v6 = vld [vmem:[%s7031_s30 + $0xb84] ss:$16 sps:$4 sm:$0xff]   ;;  %v6353_v7 = vld [vmem:[%s7031_s30 + $0xb8c] ss:$16 sps:$4 sm:$0xff]  }
 0x19f   : > { %3788 = vmatpush1.bf16.msra.mxu0 %v6258_v8  ;;  %4157 = vmatpush1.bf16.msra.mxu1 %v6261_v9  ;;  %v6348_v8 = vld [vmem:[%s7031_s30 + $0xb80] ss:$16 sps:$4 sm:$0xff]   ;;  %v6351_v9 = vld [vmem:[%s7031_s30 + $0xb88] ss:$16 sps:$4 sm:$0xff]  }
 0x1a0   : > { %3789 = vmatprep.subr.bf16.mxu0 %v6266_v10  ;;  %4158 = vmatprep.subr.bf16.mxu1 %v6269_v11  ;;  %v6356_v10 = vld [vmem:[%s7031_s30 + $0xba4] ss:$16 sps:$4 sm:$0xff]   ;;  %v6359_v11 = vld [vmem:[%s7031_s30 + $0xbac] ss:$16 sps:$4 sm:$0xff]  }
 0x1a3   : > { %3790 = vmatpush1.bf16.msra.mxu0 %v6264_v12  ;;  %4159 = vmatpush1.bf16.msra.mxu1 %v6267_v13  ;;  %v6354_v12 = vld [vmem:[%s7031_s30 + $0xba0] ss:$16 sps:$4 sm:$0xff]   ;;  %v6357_v13 = vld [vmem:[%s7031_s30 + $0xba8] ss:$16 sps:$4 sm:$0xff]  }
 0x1a4   : > { %3791 = vmatprep.subr.bf16.mxu0 %v6272_v14  ;;  %4160 = vmatprep.subr.bf16.mxu1 %v6275_v15  ;;  %v6362_v14 = vld [vmem:[%s7031_s30 + $0xbc4] ss:$16 sps:$4 sm:$0xff]   ;;  %v6365_v15 = vld [vmem:[%s7031_s30 + $0xbcc] ss:$16 sps:$4 sm:$0xff]  }
 0x1a7   : > { %3792 = vmatpush1.bf16.msra.mxu0 %v6270_v16  ;;  %4161 = vmatpush1.bf16.msra.mxu1 %v6273_v17  ;;  %v6360_v16 = vld [vmem:[%s7031_s30 + $0xbc0] ss:$16 sps:$4 sm:$0xff]   ;;  %v6363_v17 = vld [vmem:[%s7031_s30 + $0xbc8] ss:$16 sps:$4 sm:$0xff]  }
 0x1a8   : > { %3802 = vmatprep.subr.bf16.mxu0 %v6278_v18  ;;  %4171 = vmatprep.subr.bf16.mxu1 %v6281_v20  ;;  %v6368_v18 = vld [vmem:[%s7031_s30 + $0xbe4] ss:$16 sps:$4 sm:$0xff]   ;;  %v6366_v20 = vld [vmem:[%s7031_s30 + $0xbe0] ss:$16 sps:$4 sm:$0xff]  }
 0x1aa   : > { %3794 = vmatmul.mubr.bf16.vlgmr.msra.gmra.mrb[0].mxu0 %v302_v22  ;;  %4163 = vmatmul.mubr.bf16.vlgmr.msra.gmra.mrb[0].mxu1 %v302_v22  ;;  %v287_v22 = vld [vmem:[#allocation2 + $0x50] sm:$0xff] }
 0x1ab   : > { %3803 = vmatpush1.bf16.msra.mxu0 %v6276_v23  ;;  %4172 = vmatpush1.bf16.msra.mxu1 %v6279_v24  ;;  %v6374_v23 = vld [vmem:[%s7031_s30 + $0xc04] ss:$16 sps:$4 sm:$0xff]   ;;  %v6377_v24 = vld [vmem:[%s7031_s30 + $0xc0c] ss:$16 sps:$4 sm:$0xff]  }
 0x1ac   : > { %3804 = vmatprep.subr.bf16.mxu0 %v6284_v25  ;;  %4173 = vmatprep.subr.bf16.mxu1 %v6287_v26  ;;  %v304_v25 = vpack.c.bf16 %v287_v22, %v287_v22  ;;  %v290_v26 = vld [vmem:[#allocation2 + $0x68] sm:$0xff] }
 0x1ad   : > { %3834 = vmatprep.mubr.bf16.mxu0 %v305_v27  ;;  %4203 = vmatprep.mubr.bf16.mxu1 %v305_v27  ;;  %v6372_v27 = vld [vmem:[%s7031_s30 + $0xc00] ss:$16 sps:$4 sm:$0xff]   ;;  %v6464_v22 = vld [vmem:[%s7031_s30 + $0xde4] ss:$16 sps:$4 sm:$0xff]  }
 0x1af   : > { %3805 = vmatpush1.bf16.msra.mxu0 %v6282_v28  ;;  %4174 = vmatpush1.bf16.msra.mxu1 %v6285_v29  ;;  %v6375_v28 = vld [vmem:[%s7031_s30 + $0xc08] ss:$16 sps:$4 sm:$0xff]   ;;  %v6380_v29 = vld [vmem:[%s7031_s30 + $0xc24] ss:$16 sps:$4 sm:$0xff]  }
 0x1b0   : > { %3806 = vmatprep.subr.bf16.mxu0 %v6290_v30  ;;  %4175 = vmatprep.subr.bf16.mxu1 %v6293_v31  ;;  %v6383_v30 = vld [vmem:[%s7031_s30 + $0xc2c] ss:$16 sps:$4 sm:$0xff]   ;;  %v307_v31 = vpack.c.bf16 %v290_v26, %v290_v26 }
 0x1b1   : > { %v289_v26 = vld [vmem:[#allocation2 + $0x60] sm:$0xff] }
 0x1b3   : > { %3807 = vmatpush1.bf16.msra.mxu0 %v6288_v32  ;;  %4176 = vmatpush1.bf16.msra.mxu1 %v6291_v33  ;;  %v6378_v32 = vld [vmem:[%s7031_s30 + $0xc20] ss:$16 sps:$4 sm:$0xff]   ;;  %v6381_v33 = vld [vmem:[%s7031_s30 + $0xc28] ss:$16 sps:$4 sm:$0xff]  }
 0x1b4   : > { %3808 = vmatprep.subr.bf16.mxu0 %v6296_v34  ;;  %4177 = vmatprep.subr.bf16.mxu1 %v6299_v35  ;;  %v6386_v34 = vld [vmem:[%s7031_s30 + $0xc44] ss:$16 sps:$4 sm:$0xff]   ;;  %v6389_v35 = vld [vmem:[%s7031_s30 + $0xc4c] ss:$16 sps:$4 sm:$0xff]  }
 0x1b7   : > { %3809 = vmatpush1.bf16.msra.mxu0 %v6294_v36  ;;  %4178 = vmatpush1.bf16.msra.mxu1 %v6297_v37  ;;  %v6384_v36 = vld [vmem:[%s7031_s30 + $0xc40] ss:$16 sps:$4 sm:$0xff]   ;;  %v6387_v37 = vld [vmem:[%s7031_s30 + $0xc48] ss:$16 sps:$4 sm:$0xff]  }
 0x1b8   : > { %3810 = vmatprep.subr.bf16.mxu0 %v6302_v38  ;;  %4179 = vmatprep.subr.bf16.mxu1 %v6305_v39  ;;  %v6392_v38 = vld [vmem:[%s7031_s30 + $0xc64] ss:$16 sps:$4 sm:$0xff]   ;;  %v6395_v39 = vld [vmem:[%s7031_s30 + $0xc6c] ss:$16 sps:$4 sm:$0xff]  }
 0x1bb   : > { %3811 = vmatpush1.bf16.msra.mxu0 %v6300_v40  ;;  %4180 = vmatpush1.bf16.msra.mxu1 %v6303_v41  ;;  %v6390_v40 = vld [vmem:[%s7031_s30 + $0xc60] ss:$16 sps:$4 sm:$0xff]   ;;  %v6393_v41 = vld [vmem:[%s7031_s30 + $0xc68] ss:$16 sps:$4 sm:$0xff]  }
 0x1bc   : > { %3812 = vmatprep.subr.bf16.mxu0 %v6308_v42  ;;  %4181 = vmatprep.subr.bf16.mxu1 %v6311_v43  ;;  %v6398_v42 = vld [vmem:[%s7031_s30 + $0xc84] ss:$16 sps:$4 sm:$0xff]   ;;  %v6401_v43 = vld [vmem:[%s7031_s30 + $0xc8c] ss:$16 sps:$4 sm:$0xff]  }
 0x1bf   : > { %3813 = vmatpush1.bf16.msra.mxu0 %v6306_v44  ;;  %4182 = vmatpush1.bf16.msra.mxu1 %v6309_v45  ;;  %v6396_v44 = vld [vmem:[%s7031_s30 + $0xc80] ss:$16 sps:$4 sm:$0xff]   ;;  %v6399_v45 = vld [vmem:[%s7031_s30 + $0xc88] ss:$16 sps:$4 sm:$0xff]  }
 0x1c0   : > { %3814 = vmatprep.subr.bf16.mxu0 %v6314_v46  ;;  %4183 = vmatprep.subr.bf16.mxu1 %v6317_v47  ;;  %v6404_v46 = vld [vmem:[%s7031_s30 + $0xca4] ss:$16 sps:$4 sm:$0xff]   ;;  %v6407_v47 = vld [vmem:[%s7031_s30 + $0xcac] ss:$16 sps:$4 sm:$0xff]  }
 0x1c3   : > { %3815 = vmatpush1.bf16.msra.mxu0 %v6312_v48  ;;  %4184 = vmatpush1.bf16.msra.mxu1 %v6315_v49  ;;  %v6402_v48 = vld [vmem:[%s7031_s30 + $0xca0] ss:$16 sps:$4 sm:$0xff]   ;;  %v6405_v49 = vld [vmem:[%s7031_s30 + $0xca8] ss:$16 sps:$4 sm:$0xff]  }
 0x1c4   : > { %3816 = vmatprep.subr.bf16.mxu0 %v6320_v50  ;;  %4185 = vmatprep.subr.bf16.mxu1 %v6323_v51  ;;  %v6410_v50 = vld [vmem:[%s7031_s30 + $0xcc4] ss:$16 sps:$4 sm:$0xff]   ;;  %v6413_v51 = vld [vmem:[%s7031_s30 + $0xccc] ss:$16 sps:$4 sm:$0xff]  }
 0x1c7   : > { %3817 = vmatpush1.bf16.msra.mxu0 %v6318_v52  ;;  %4186 = vmatpush1.bf16.msra.mxu1 %v6321_v53  ;;  %v6408_v52 = vld [vmem:[%s7031_s30 + $0xcc0] ss:$16 sps:$4 sm:$0xff]   ;;  %v6411_v53 = vld [vmem:[%s7031_s30 + $0xcc8] ss:$16 sps:$4 sm:$0xff]  }
 0x1c8   : > { %3818 = vmatprep.subr.bf16.mxu0 %v6326_v54  ;;  %4187 = vmatprep.subr.bf16.mxu1 %v6329_v55  ;;  %v6416_v54 = vld [vmem:[%s7031_s30 + $0xce4] ss:$16 sps:$4 sm:$0xff]   ;;  %v6419_v55 = vld [vmem:[%s7031_s30 + $0xcec] ss:$16 sps:$4 sm:$0xff]  }
 0x1cb   : > { %3819 = vmatpush1.bf16.msra.mxu0 %v6324_v56  ;;  %4188 = vmatpush1.bf16.msra.mxu1 %v6327_v57  ;;  %v6414_v56 = vld [vmem:[%s7031_s30 + $0xce0] ss:$16 sps:$4 sm:$0xff]   ;;  %v6417_v57 = vld [vmem:[%s7031_s30 + $0xce8] ss:$16 sps:$4 sm:$0xff]  }
 0x1cc   : > { %3820 = vmatprep.subr.bf16.mxu0 %v6332_v58  ;;  %4189 = vmatprep.subr.bf16.mxu1 %v6335_v59  ;;  %v6422_v58 = vld [vmem:[%s7031_s30 + $0xd04] ss:$16 sps:$4 sm:$0xff]   ;;  %v6425_v59 = vld [vmem:[%s7031_s30 + $0xd0c] ss:$16 sps:$4 sm:$0xff]  }
 0x1cf   : > { %3821 = vmatpush1.bf16.msra.mxu0 %v6330_v60  ;;  %4190 = vmatpush1.bf16.msra.mxu1 %v6333_v61  ;;  %v6420_v60 = vld [vmem:[%s7031_s30 + $0xd00] ss:$16 sps:$4 sm:$0xff]   ;;  %v6423_v61 = vld [vmem:[%s7031_s30 + $0xd08] ss:$16 sps:$4 sm:$0xff]  }
 0x1d0   : > { %3822 = vmatprep.subr.bf16.mxu0 %v6338_v62  ;;  %4191 = vmatprep.subr.bf16.mxu1 %v6341_v63  ;;  %v6428_v62 = vld [vmem:[%s7031_s30 + $0xd24] ss:$16 sps:$4 sm:$0xff]   ;;  %v6431_v63 = vld [vmem:[%s7031_s30 + $0xd2c] ss:$16 sps:$4 sm:$0xff]  }
 0x1d3   : > { %3823 = vmatpush1.bf16.msra.mxu0 %v6336_v0  ;;  %4192 = vmatpush1.bf16.msra.mxu1 %v6339_v1  ;;  %v6426_v0 = vld [vmem:[%s7031_s30 + $0xd20] ss:$16 sps:$4 sm:$0xff]   ;;  %v6429_v1 = vld [vmem:[%s7031_s30 + $0xd28] ss:$16 sps:$4 sm:$0xff]  }
 0x1d4   : > { %3824 = vmatprep.subr.bf16.mxu0 %v6344_v2  ;;  %4193 = vmatprep.subr.bf16.mxu1 %v6347_v3  ;;  %v6434_v2 = vld [vmem:[%s7031_s30 + $0xd44] ss:$16 sps:$4 sm:$0xff]   ;;  %v6437_v3 = vld [vmem:[%s7031_s30 + $0xd4c] ss:$16 sps:$4 sm:$0xff]  }
 0x1d7   : > { %3825 = vmatpush1.bf16.msra.mxu0 %v6342_v4  ;;  %4194 = vmatpush1.bf16.msra.mxu1 %v6345_v5  ;;  %v6432_v4 = vld [vmem:[%s7031_s30 + $0xd40] ss:$16 sps:$4 sm:$0xff]   ;;  %v6435_v5 = vld [vmem:[%s7031_s30 + $0xd48] ss:$16 sps:$4 sm:$0xff]  }
 0x1d8   : > { %3826 = vmatprep.subr.bf16.mxu0 %v6350_v6  ;;  %4195 = vmatprep.subr.bf16.mxu1 %v6353_v7  ;;  %v6440_v6 = vld [vmem:[%s7031_s30 + $0xd64] ss:$16 sps:$4 sm:$0xff]   ;;  %v6443_v7 = vld [vmem:[%s7031_s30 + $0xd6c] ss:$16 sps:$4 sm:$0xff]  }
 0x1db   : > { %3827 = vmatpush1.bf16.msra.mxu0 %v6348_v8  ;;  %4196 = vmatpush1.bf16.msra.mxu1 %v6351_v9  ;;  %v6438_v8 = vld [vmem:[%s7031_s30 + $0xd60] ss:$16 sps:$4 sm:$0xff]   ;;  %v6441_v9 = vld [vmem:[%s7031_s30 + $0xd68] ss:$16 sps:$4 sm:$0xff]  }
 0x1dc   : > { %3828 = vmatprep.subr.bf16.mxu0 %v6356_v10  ;;  %4197 = vmatprep.subr.bf16.mxu1 %v6359_v11  ;;  %v6446_v10 = vld [vmem:[%s7031_s30 + $0xd84] ss:$16 sps:$4 sm:$0xff]   ;;  %v6449_v11 = vld [vmem:[%s7031_s30 + $0xd8c] ss:$16 sps:$4 sm:$0xff]  }
 0x1df   : > { %3829 = vmatpush1.bf16.msra.mxu0 %v6354_v12  ;;  %4198 = vmatpush1.bf16.msra.mxu1 %v6357_v13  ;;  %v6444_v12 = vld [vmem:[%s7031_s30 + $0xd80] ss:$16 sps:$4 sm:$0xff]   ;;  %v6447_v13 = vld [vmem:[%s7031_s30 + $0xd88] ss:$16 sps:$4 sm:$0xff]  }
 0x1e0   : > { %3830 = vmatprep.subr.bf16.mxu0 %v6362_v14  ;;  %4199 = vmatprep.subr.bf16.mxu1 %v6365_v15  ;;  %v6452_v14 = vld [vmem:[%s7031_s30 + $0xda4] ss:$16 sps:$4 sm:$0xff]   ;;  %v6455_v15 = vld [vmem:[%s7031_s30 + $0xdac] ss:$16 sps:$4 sm:$0xff]  }
 0x1e3   : > { %3831 = vmatpush1.bf16.msra.mxu0 %v6360_v16  ;;  %4200 = vmatpush1.bf16.msra.mxu1 %v6363_v17  ;;  %v6450_v16 = vld [vmem:[%s7031_s30 + $0xda0] ss:$16 sps:$4 sm:$0xff]   ;;  %v6453_v17 = vld [vmem:[%s7031_s30 + $0xda8] ss:$16 sps:$4 sm:$0xff]  }
 0x1e4   : > { %3832 = vmatprep.subr.bf16.mxu0 %v6368_v18  ;;  %4201 = vmatprep.subr.bf16.mxu1 %v6371_v19  ;;  %v6458_v18 = vld [vmem:[%s7031_s30 + $0xdc4] ss:$16 sps:$4 sm:$0xff]   ;;  %v6461_v19 = vld [vmem:[%s7031_s30 + $0xdcc] ss:$16 sps:$4 sm:$0xff]  }
 0x1e7   : > { %3833 = vmatpush1.bf16.msra.mxu0 %v6366_v20  ;;  %4202 = vmatpush1.bf16.msra.mxu1 %v6369_v21  ;;  %v6456_v20 = vld [vmem:[%s7031_s30 + $0xdc0] ss:$16 sps:$4 sm:$0xff]   ;;  %v6459_v21 = vld [vmem:[%s7031_s30 + $0xdc8] ss:$16 sps:$4 sm:$0xff]  }
 0x1e8   : > { %3843 = vmatprep.subr.bf16.mxu0 %v6374_v23  ;;  %4212 = vmatprep.subr.bf16.mxu1 %v6377_v24  ;;  %v6467_v23 = vld [vmem:[%s7031_s30 + $0xdec] ss:$16 sps:$4 sm:$0xff]   ;;  %v6462_v24 = vld [vmem:[%s7031_s30 + $0xde0] ss:$16 sps:$4 sm:$0xff]  }
 0x1ea   : > { %3835 = vmatmul.mubr.bf16.vlgmr.msra.gmra.mrb[0].mxu0 %v304_v25  ;;  %4204 = vmatmul.mubr.bf16.vlgmr.msra.gmra.mrb[0].mxu1 %v304_v25  ;;  %v6465_v25 = vld [vmem:[%s7031_s30 + $0xde8] ss:$16 sps:$4 sm:$0xff]  }
 0x1eb   : > { %3844 = vmatpush1.bf16.msra.mxu0 %v6372_v27  ;;  %4213 = vmatpush1.bf16.msra.mxu1 %v6375_v28  ;;  %v6470_v27 = vld [vmem:[%s7031_s30 + $0xe04] ss:$16 sps:$4 sm:$0xff]   ;;  %v6473_v28 = vld [vmem:[%s7031_s30 + $0xe0c] ss:$16 sps:$4 sm:$0xff]  }
 0x1ec   : > { %3845 = vmatprep.subr.bf16.mxu0 %v6380_v29  ;;  %4214 = vmatprep.subr.bf16.mxu1 %v6383_v30  ;;  %v306_v29 = vpack.c.bf16 %v289_v26, %v289_v26  ;;  %v292_v30 = vld [vmem:[#allocation2 + $0x78] sm:$0xff] }
 0x1ed   : > { %3875 = vmatprep.mubr.bf16.mxu0 %v307_v31  ;;  %4244 = vmatprep.mubr.bf16.mxu1 %v307_v31  ;;  %v6468_v31 = vld [vmem:[%s7031_s30 + $0xe00] ss:$16 sps:$4 sm:$0xff]   ;;  %v6560_v26 = vld [vmem:[%s7031_s30 + $0xfe4] ss:$16 sps:$4 sm:$0xff]  }
 0x1ef   : > { %3846 = vmatpush1.bf16.msra.mxu0 %v6378_v32  ;;  %4215 = vmatpush1.bf16.msra.mxu1 %v6381_v33  ;;  %v6471_v32 = vld [vmem:[%s7031_s30 + $0xe08] ss:$16 sps:$4 sm:$0xff]   ;;  %v6476_v33 = vld [vmem:[%s7031_s30 + $0xe24] ss:$16 sps:$4 sm:$0xff]  }
 0x1f0   : > { %3847 = vmatprep.subr.bf16.mxu0 %v6386_v34  ;;  %4216 = vmatprep.subr.bf16.mxu1 %v6389_v35  ;;  %v6479_v34 = vld [vmem:[%s7031_s30 + $0xe2c] ss:$16 sps:$4 sm:$0xff]   ;;  %v309_v35 = vpack.c.bf16 %v292_v30, %v292_v30 }
 0x1f1   : > { %v291_v30 = vld [vmem:[#allocation2 + $0x70] sm:$0xff] }
 0x1f3   : > { %3848 = vmatpush1.bf16.msra.mxu0 %v6384_v36  ;;  %4217 = vmatpush1.bf16.msra.mxu1 %v6387_v37  ;;  %v6474_v36 = vld [vmem:[%s7031_s30 + $0xe20] ss:$16 sps:$4 sm:$0xff]   ;;  %v6477_v37 = vld [vmem:[%s7031_s30 + $0xe28] ss:$16 sps:$4 sm:$0xff]  }
 0x1f4   : > { %3849 = vmatprep.subr.bf16.mxu0 %v6392_v38  ;;  %4218 = vmatprep.subr.bf16.mxu1 %v6395_v39  ;;  %v6482_v38 = vld [vmem:[%s7031_s30 + $0xe44] ss:$16 sps:$4 sm:$0xff]   ;;  %v6485_v39 = vld [vmem:[%s7031_s30 + $0xe4c] ss:$16 sps:$4 sm:$0xff]  }
 0x1f7   : > { %3850 = vmatpush1.bf16.msra.mxu0 %v6390_v40  ;;  %4219 = vmatpush1.bf16.msra.mxu1 %v6393_v41  ;;  %v6480_v40 = vld [vmem:[%s7031_s30 + $0xe40] ss:$16 sps:$4 sm:$0xff]   ;;  %v6483_v41 = vld [vmem:[%s7031_s30 + $0xe48] ss:$16 sps:$4 sm:$0xff]  }
 0x1f8   : > { %3851 = vmatprep.subr.bf16.mxu0 %v6398_v42  ;;  %4220 = vmatprep.subr.bf16.mxu1 %v6401_v43  ;;  %v6488_v42 = vld [vmem:[%s7031_s30 + $0xe64] ss:$16 sps:$4 sm:$0xff]   ;;  %v6491_v43 = vld [vmem:[%s7031_s30 + $0xe6c] ss:$16 sps:$4 sm:$0xff]  }
 0x1fb   : > { %3852 = vmatpush1.bf16.msra.mxu0 %v6396_v44  ;;  %4221 = vmatpush1.bf16.msra.mxu1 %v6399_v45  ;;  %v6486_v44 = vld [vmem:[%s7031_s30 + $0xe60] ss:$16 sps:$4 sm:$0xff]   ;;  %v6489_v45 = vld [vmem:[%s7031_s30 + $0xe68] ss:$16 sps:$4 sm:$0xff]  }
 0x1fc   : > { %3853 = vmatprep.subr.bf16.mxu0 %v6404_v46  ;;  %4222 = vmatprep.subr.bf16.mxu1 %v6407_v47  ;;  %v6494_v46 = vld [vmem:[%s7031_s30 + $0xe84] ss:$16 sps:$4 sm:$0xff]   ;;  %v6497_v47 = vld [vmem:[%s7031_s30 + $0xe8c] ss:$16 sps:$4 sm:$0xff]  }
 0x1ff   : > { %3854 = vmatpush1.bf16.msra.mxu0 %v6402_v48  ;;  %4223 = vmatpush1.bf16.msra.mxu1 %v6405_v49  ;;  %v6492_v48 = vld [vmem:[%s7031_s30 + $0xe80] ss:$16 sps:$4 sm:$0xff]   ;;  %v6495_v49 = vld [vmem:[%s7031_s30 + $0xe88] ss:$16 sps:$4 sm:$0xff]  }
 0x200   : > { %3855 = vmatprep.subr.bf16.mxu0 %v6410_v50  ;;  %4224 = vmatprep.subr.bf16.mxu1 %v6413_v51  ;;  %v6500_v50 = vld [vmem:[%s7031_s30 + $0xea4] ss:$16 sps:$4 sm:$0xff]   ;;  %v6503_v51 = vld [vmem:[%s7031_s30 + $0xeac] ss:$16 sps:$4 sm:$0xff]  }
 0x203   : > { %3856 = vmatpush1.bf16.msra.mxu0 %v6408_v52  ;;  %4225 = vmatpush1.bf16.msra.mxu1 %v6411_v53  ;;  %v6498_v52 = vld [vmem:[%s7031_s30 + $0xea0] ss:$16 sps:$4 sm:$0xff]   ;;  %v6501_v53 = vld [vmem:[%s7031_s30 + $0xea8] ss:$16 sps:$4 sm:$0xff]  }
 0x204   : > { %3857 = vmatprep.subr.bf16.mxu0 %v6416_v54  ;;  %4226 = vmatprep.subr.bf16.mxu1 %v6419_v55  ;;  %v6506_v54 = vld [vmem:[%s7031_s30 + $0xec4] ss:$16 sps:$4 sm:$0xff]   ;;  %v6509_v55 = vld [vmem:[%s7031_s30 + $0xecc] ss:$16 sps:$4 sm:$0xff]  }
 0x207   : > { %3858 = vmatpush1.bf16.msra.mxu0 %v6414_v56  ;;  %4227 = vmatpush1.bf16.msra.mxu1 %v6417_v57  ;;  %v6504_v56 = vld [vmem:[%s7031_s30 + $0xec0] ss:$16 sps:$4 sm:$0xff]   ;;  %v6507_v57 = vld [vmem:[%s7031_s30 + $0xec8] ss:$16 sps:$4 sm:$0xff]  }
 0x208   : > { %3859 = vmatprep.subr.bf16.mxu0 %v6422_v58  ;;  %4228 = vmatprep.subr.bf16.mxu1 %v6425_v59  ;;  %v6512_v58 = vld [vmem:[%s7031_s30 + $0xee4] ss:$16 sps:$4 sm:$0xff]   ;;  %v6515_v59 = vld [vmem:[%s7031_s30 + $0xeec] ss:$16 sps:$4 sm:$0xff]  }
 0x20b   : > { %3860 = vmatpush1.bf16.msra.mxu0 %v6420_v60  ;;  %4229 = vmatpush1.bf16.msra.mxu1 %v6423_v61  ;;  %v6510_v60 = vld [vmem:[%s7031_s30 + $0xee0] ss:$16 sps:$4 sm:$0xff]   ;;  %v6513_v61 = vld [vmem:[%s7031_s30 + $0xee8] ss:$16 sps:$4 sm:$0xff]  }
 0x20c   : > { %3861 = vmatprep.subr.bf16.mxu0 %v6428_v62  ;;  %4230 = vmatprep.subr.bf16.mxu1 %v6431_v63  ;;  %v6518_v62 = vld [vmem:[%s7031_s30 + $0xf04] ss:$16 sps:$4 sm:$0xff]   ;;  %v6521_v63 = vld [vmem:[%s7031_s30 + $0xf0c] ss:$16 sps:$4 sm:$0xff]  }
 0x20f   : > { %3862 = vmatpush1.bf16.msra.mxu0 %v6426_v0  ;;  %4231 = vmatpush1.bf16.msra.mxu1 %v6429_v1  ;;  %v6516_v0 = vld [vmem:[%s7031_s30 + $0xf00] ss:$16 sps:$4 sm:$0xff]   ;;  %v6519_v1 = vld [vmem:[%s7031_s30 + $0xf08] ss:$16 sps:$4 sm:$0xff]  }
 0x210   : > { %3863 = vmatprep.subr.bf16.mxu0 %v6434_v2  ;;  %4232 = vmatprep.subr.bf16.mxu1 %v6437_v3  ;;  %v6524_v2 = vld [vmem:[%s7031_s30 + $0xf24] ss:$16 sps:$4 sm:$0xff]   ;;  %v6527_v3 = vld [vmem:[%s7031_s30 + $0xf2c] ss:$16 sps:$4 sm:$0xff]  }
 0x213   : > { %3864 = vmatpush1.bf16.msra.mxu0 %v6432_v4  ;;  %4233 = vmatpush1.bf16.msra.mxu1 %v6435_v5  ;;  %v6522_v4 = vld [vmem:[%s7031_s30 + $0xf20] ss:$16 sps:$4 sm:$0xff]   ;;  %v6525_v5 = vld [vmem:[%s7031_s30 + $0xf28] ss:$16 sps:$4 sm:$0xff]  }
 0x214   : > { %3865 = vmatprep.subr.bf16.mxu0 %v6440_v6  ;;  %4234 = vmatprep.subr.bf16.mxu1 %v6443_v7  ;;  %v6530_v6 = vld [vmem:[%s7031_s30 + $0xf44] ss:$16 sps:$4 sm:$0xff]   ;;  %v6533_v7 = vld [vmem:[%s7031_s30 + $0xf4c] ss:$16 sps:$4 sm:$0xff]  }
 0x217   : > { %3866 = vmatpush1.bf16.msra.mxu0 %v6438_v8  ;;  %4235 = vmatpush1.bf16.msra.mxu1 %v6441_v9  ;;  %v6528_v8 = vld [vmem:[%s7031_s30 + $0xf40] ss:$16 sps:$4 sm:$0xff]   ;;  %v6531_v9 = vld [vmem:[%s7031_s30 + $0xf48] ss:$16 sps:$4 sm:$0xff]  }
 0x218   : > { %3867 = vmatprep.subr.bf16.mxu0 %v6446_v10  ;;  %4236 = vmatprep.subr.bf16.mxu1 %v6449_v11  ;;  %v6536_v10 = vld [vmem:[%s7031_s30 + $0xf64] ss:$16 sps:$4 sm:$0xff]   ;;  %v6539_v11 = vld [vmem:[%s7031_s30 + $0xf6c] ss:$16 sps:$4 sm:$0xff]  }
 0x21b   : > { %3868 = vmatpush1.bf16.msra.mxu0 %v6444_v12  ;;  %4237 = vmatpush1.bf16.msra.mxu1 %v6447_v13  ;;  %v6534_v12 = vld [vmem:[%s7031_s30 + $0xf60] ss:$16 sps:$4 sm:$0xff]   ;;  %v6537_v13 = vld [vmem:[%s7031_s30 + $0xf68] ss:$16 sps:$4 sm:$0xff]  }
 0x21c   : > { %3869 = vmatprep.subr.bf16.mxu0 %v6452_v14  ;;  %4238 = vmatprep.subr.bf16.mxu1 %v6455_v15  ;;  %v6542_v14 = vld [vmem:[%s7031_s30 + $0xf84] ss:$16 sps:$4 sm:$0xff]   ;;  %v6545_v15 = vld [vmem:[%s7031_s30 + $0xf8c] ss:$16 sps:$4 sm:$0xff]  }
 0x21f   : > { %3870 = vmatpush1.bf16.msra.mxu0 %v6450_v16  ;;  %4239 = vmatpush1.bf16.msra.mxu1 %v6453_v17  ;;  %v6540_v16 = vld [vmem:[%s7031_s30 + $0xf80] ss:$16 sps:$4 sm:$0xff]   ;;  %v6543_v17 = vld [vmem:[%s7031_s30 + $0xf88] ss:$16 sps:$4 sm:$0xff]  }
 0x220   : > { %3871 = vmatprep.subr.bf16.mxu0 %v6458_v18  ;;  %4240 = vmatprep.subr.bf16.mxu1 %v6461_v19  ;;  %v6548_v18 = vld [vmem:[%s7031_s30 + $0xfa4] ss:$16 sps:$4 sm:$0xff]   ;;  %v6551_v19 = vld [vmem:[%s7031_s30 + $0xfac] ss:$16 sps:$4 sm:$0xff]  }
 0x223   : > { %3872 = vmatpush1.bf16.msra.mxu0 %v6456_v20  ;;  %4241 = vmatpush1.bf16.msra.mxu1 %v6459_v21  ;;  %v6546_v20 = vld [vmem:[%s7031_s30 + $0xfa0] ss:$16 sps:$4 sm:$0xff]   ;;  %v6549_v21 = vld [vmem:[%s7031_s30 + $0xfa8] ss:$16 sps:$4 sm:$0xff]  }
 0x224   : > { %3873 = vmatprep.subr.bf16.mxu0 %v6464_v22  ;;  %4242 = vmatprep.subr.bf16.mxu1 %v6467_v23  ;;  %v6554_v22 = vld [vmem:[%s7031_s30 + $0xfc4] ss:$16 sps:$4 sm:$0xff]   ;;  %v6557_v23 = vld [vmem:[%s7031_s30 + $0xfcc] ss:$16 sps:$4 sm:$0xff]  }
 0x227   : > { %3874 = vmatpush1.bf16.msra.mxu0 %v6462_v24  ;;  %4243 = vmatpush1.bf16.msra.mxu1 %v6465_v25  ;;  %v6552_v24 = vld [vmem:[%s7031_s30 + $0xfc0] ss:$16 sps:$4 sm:$0xff]   ;;  %v6555_v25 = vld [vmem:[%s7031_s30 + $0xfc8] ss:$16 sps:$4 sm:$0xff]  }
 0x228   : > { %3884 = vmatprep.subr.bf16.mxu0 %v6470_v27  ;;  %4253 = vmatprep.subr.bf16.mxu1 %v6473_v28  ;;  %v6563_v27 = vld [vmem:[%s7031_s30 + $0xfec] ss:$16 sps:$4 sm:$0xff]   ;;  %v6558_v28 = vld [vmem:[%s7031_s30 + $0xfe0] ss:$16 sps:$4 sm:$0xff]  }
 0x22a   : > { %3876 = vmatmul.mubr.bf16.vlgmr.msra.gmra.mrb[0].mxu0 %v306_v29  ;;  %4245 = vmatmul.mubr.bf16.vlgmr.msra.gmra.mrb[0].mxu1 %v306_v29  ;;  %v6561_v29 = vld [vmem:[%s7031_s30 + $0xfe8] ss:$16 sps:$4 sm:$0xff]  }
 0x22b   : > { %3885 = vmatpush1.bf16.msra.mxu0 %v6468_v31  ;;  %4254 = vmatpush1.bf16.msra.mxu1 %v6471_v32  ;;  %v6566_v31 = vld [vmem:[%s7031_s30 + $0x1004] ss:$16 sps:$4 sm:$0xff]   ;;  %v6569_v32 = vld [vmem:[%s7031_s30 + $0x100c] ss:$16 sps:$4 sm:$0xff]  }
 0x22c   : > { %3886 = vmatprep.subr.bf16.mxu0 %v6476_v33  ;;  %4255 = vmatprep.subr.bf16.mxu1 %v6479_v34  ;;  %v308_v33 = vpack.c.bf16 %v291_v30, %v291_v30  ;;  %v6564_v34 = vld [vmem:[%s7031_s30 + $0x1000] ss:$16 sps:$4 sm:$0xff]  }
 0x22d   : > { %3916 = vmatprep.mubr.bf16.mxu0 %v309_v35  ;;  %4285 = vmatprep.mubr.bf16.mxu1 %v309_v35  ;;  %v6567_v35 = vld [vmem:[%s7031_s30 + $0x1008] ss:$16 sps:$4 sm:$0xff]  }
 0x22f   : > { %3887 = vmatpush1.bf16.msra.mxu0 %v6474_v36  ;;  %4256 = vmatpush1.bf16.msra.mxu1 %v6477_v37  ;;  %v6572_v36 = vld [vmem:[%s7031_s30 + $0x1024] ss:$16 sps:$4 sm:$0xff]   ;;  %v6575_v37 = vld [vmem:[%s7031_s30 + $0x102c] ss:$16 sps:$4 sm:$0xff]  }
 0x230   : > { %3888 = vmatprep.subr.bf16.mxu0 %v6482_v38  ;;  %4257 = vmatprep.subr.bf16.mxu1 %v6485_v39  ;;  %v6570_v38 = vld [vmem:[%s7031_s30 + $0x1020] ss:$16 sps:$4 sm:$0xff]   ;;  %v6573_v39 = vld [vmem:[%s7031_s30 + $0x1028] ss:$16 sps:$4 sm:$0xff]  }
 0x233   : > { %3889 = vmatpush1.bf16.msra.mxu0 %v6480_v40  ;;  %4258 = vmatpush1.bf16.msra.mxu1 %v6483_v41  ;;  %v6578_v40 = vld [vmem:[%s7031_s30 + $0x1044] ss:$16 sps:$4 sm:$0xff]   ;;  %v6581_v41 = vld [vmem:[%s7031_s30 + $0x104c] ss:$16 sps:$4 sm:$0xff]  }
 0x234   : > { %3890 = vmatprep.subr.bf16.mxu0 %v6488_v42  ;;  %4259 = vmatprep.subr.bf16.mxu1 %v6491_v43  ;;  %v6856_v42 = vmov 0   ;;  %v6576_v43 = vld [vmem:[%s7031_s30 + $0x1040] ss:$16 sps:$4 sm:$0xff]  }
 0x237   : > { %3891 = vmatpush1.bf16.msra.mxu0 %v6486_v44  ;;  %4260 = vmatpush1.bf16.msra.mxu1 %v6489_v45  ;;  %v6579_v44 = vld [vmem:[%s7031_s30 + $0x1048] ss:$16 sps:$4 sm:$0xff]   ;;  %v6584_v45 = vld [vmem:[%s7031_s30 + $0x1064] ss:$16 sps:$4 sm:$0xff]  }
 0x238   : > { %3892 = vmatprep.subr.bf16.mxu0 %v6494_v46  ;;  %4261 = vmatprep.subr.bf16.mxu1 %v6497_v47  ;;  %v6587_v46 = vld [vmem:[%s7031_s30 + $0x106c] ss:$16 sps:$4 sm:$0xff]   ;;  %v6582_v47 = vld [vmem:[%s7031_s30 + $0x1060] ss:$16 sps:$4 sm:$0xff]  }
 0x23b   : > { %3893 = vmatpush1.bf16.msra.mxu0 %v6492_v48  ;;  %4262 = vmatpush1.bf16.msra.mxu1 %v6495_v49  ;;  %v6585_v48 = vld [vmem:[%s7031_s30 + $0x1068] ss:$16 sps:$4 sm:$0xff]   ;;  %v6590_v49 = vld [vmem:[%s7031_s30 + $0x1084] ss:$16 sps:$4 sm:$0xff]  }
 0x23c   : > { %3894 = vmatprep.subr.bf16.mxu0 %v6500_v50  ;;  %4263 = vmatprep.subr.bf16.mxu1 %v6503_v51  ;;  %v6593_v50 = vld [vmem:[%s7031_s30 + $0x108c] ss:$16 sps:$4 sm:$0xff]   ;;  %v6588_v51 = vld [vmem:[%s7031_s30 + $0x1080] ss:$16 sps:$4 sm:$0xff]  }
 0x23f   : > { %3895 = vmatpush1.bf16.msra.mxu0 %v6498_v52  ;;  %4264 = vmatpush1.bf16.msra.mxu1 %v6501_v53  ;;  %v6591_v52 = vld [vmem:[%s7031_s30 + $0x1088] ss:$16 sps:$4 sm:$0xff]   ;;  %v6596_v53 = vld [vmem:[%s7031_s30 + $0x10a4] ss:$16 sps:$4 sm:$0xff]  }
 0x240   : > { %3896 = vmatprep.subr.bf16.mxu0 %v6506_v54  ;;  %4265 = vmatprep.subr.bf16.mxu1 %v6509_v55  ;;  %v6599_v54 = vld [vmem:[%s7031_s30 + $0x10ac] ss:$16 sps:$4 sm:$0xff]   ;;  %v6594_v55 = vld [vmem:[%s7031_s30 + $0x10a0] ss:$16 sps:$4 sm:$0xff]  }
 0x243   : > { %3897 = vmatpush1.bf16.msra.mxu0 %v6504_v56  ;;  %4266 = vmatpush1.bf16.msra.mxu1 %v6507_v57  ;;  %v6597_v56 = vld [vmem:[%s7031_s30 + $0x10a8] ss:$16 sps:$4 sm:$0xff]   ;;  %v6602_v57 = vld [vmem:[%s7031_s30 + $0x10c4] ss:$16 sps:$4 sm:$0xff]  }
 0x244   : > { %3898 = vmatprep.subr.bf16.mxu0 %v6512_v58  ;;  %4267 = vmatprep.subr.bf16.mxu1 %v6515_v59  ;;  %v6605_v58 = vld [vmem:[%s7031_s30 + $0x10cc] ss:$16 sps:$4 sm:$0xff]   ;;  %v6600_v59 = vld [vmem:[%s7031_s30 + $0x10c0] ss:$16 sps:$4 sm:$0xff]  }
 0x247   : > { %3899 = vmatpush1.bf16.msra.mxu0 %v6510_v60  ;;  %4268 = vmatpush1.bf16.msra.mxu1 %v6513_v61  ;;  %v6603_v60 = vld [vmem:[%s7031_s30 + $0x10c8] ss:$16 sps:$4 sm:$0xff]   ;;  %v6608_v61 = vld [vmem:[%s7031_s30 + $0x10e4] ss:$16 sps:$4 sm:$0xff]  }
 0x248   : > { %3900 = vmatprep.subr.bf16.mxu0 %v6518_v62  ;;  %4269 = vmatprep.subr.bf16.mxu1 %v6521_v63  ;;  %v6611_v62 = vld [vmem:[%s7031_s30 + $0x10ec] ss:$16 sps:$4 sm:$0xff]   ;;  %v6606_v63 = vld [vmem:[%s7031_s30 + $0x10e0] ss:$16 sps:$4 sm:$0xff]  }
 0x24b   : > { %3901 = vmatpush1.bf16.msra.mxu0 %v6516_v0  ;;  %4270 = vmatpush1.bf16.msra.mxu1 %v6519_v1  ;;  %v6609_v0 = vld [vmem:[%s7031_s30 + $0x10e8] ss:$16 sps:$4 sm:$0xff]  }
 0x24c   : > { %3902 = vmatprep.subr.bf16.mxu0 %v6524_v2  ;;  %4271 = vmatprep.subr.bf16.mxu1 %v6527_v3  ;;  %v293_v1 = vld [vmem:[#allocation2 + $0x80] sm:$0xff]  ;;  %v857_v3 = vlaneseq }
 0x24d   : > { %v310_v2 = vpack.c.bf16 %v293_v1, %v293_v1 }
 0x24f   : > { %3903 = vmatpush1.bf16.msra.mxu0 %v6522_v4  ;;  %4272 = vmatpush1.bf16.msra.mxu1 %v6525_v5  ;;  %v858_v4 = vshrl.u32 %v857_v3, 7 }
 0x250   : > { %3904 = vmatprep.subr.bf16.mxu0 %v6530_v6  ;;  %4273 = vmatprep.subr.bf16.mxu1 %v6533_v7  ;;  %v855_v7 = vld [vmem:[%s265_s9] sm:$0xf] }
 0x251   : > { %v859_v5 = vsub.s32 0, %v858_v4  ;;  %v867_v6 = vsub.s32 2, %v858_v4 }
 0x253   : > { %3905 = vmatpush1.bf16.msra.mxu0 %v6528_v8  ;;  %4274 = vmatpush1.bf16.msra.mxu1 %v6531_v9  ;;  %v863_v8 = vsub.s32 1, %v858_v4  ;;  %v871_v9 = vsub.s32 3, %v858_v4 }
 0x254   : > { %3906 = vmatprep.subr.bf16.mxu0 %v6536_v10  ;;  %4275 = vmatprep.subr.bf16.mxu1 %v6539_v11  ;;  %v860_v10 = vrot.slane %v855_v7, %v859_v5  ;;  %v868_v11 = vrot.slane %v855_v7, %v867_v6 }
 0x257   : > { %3907 = vmatpush1.bf16.msra.mxu0 %v6534_v12  ;;  %4276 = vmatpush1.bf16.msra.mxu1 %v6537_v13  ;;  %v864_v12 = vrot.slane %v855_v7, %v863_v8  ;;  %v872_v13 = vrot.slane %v855_v7, %v871_v9 }
 0x258   : > { %3908 = vmatprep.subr.bf16.mxu0 %v6542_v14  ;;  %4277 = vmatprep.subr.bf16.mxu1 %v6545_v15 }
 0x25b   : > { %3909 = vmatpush1.bf16.msra.mxu0 %v6540_v16  ;;  %4278 = vmatpush1.bf16.msra.mxu1 %v6543_v17 }
 0x25c   : > { %3910 = vmatprep.subr.bf16.mxu0 %v6548_v18  ;;  %4279 = vmatprep.subr.bf16.mxu1 %v6551_v19 }
 0x25f   : > { %3911 = vmatpush1.bf16.msra.mxu0 %v6546_v20  ;;  %4280 = vmatpush1.bf16.msra.mxu1 %v6549_v21 }
 0x260   : > { %3912 = vmatprep.subr.bf16.mxu0 %v6554_v22  ;;  %4281 = vmatprep.subr.bf16.mxu1 %v6557_v23 }
 0x263   : > { %3913 = vmatpush1.bf16.msra.mxu0 %v6552_v24  ;;  %4282 = vmatpush1.bf16.msra.mxu1 %v6555_v25 }
 0x264   : > { %3914 = vmatprep.subr.bf16.mxu0 %v6560_v26  ;;  %4283 = vmatprep.subr.bf16.mxu1 %v6563_v27 }
 0x267   : > { %3915 = vmatpush1.bf16.msra.mxu0 %v6558_v28  ;;  %4284 = vmatpush1.bf16.msra.mxu1 %v6561_v29 }
 0x268   : > { %3925 = vmatprep.subr.bf16.mxu0 %v6566_v31  ;;  %4294 = vmatprep.subr.bf16.mxu1 %v6569_v32 }
 0x26a   : > { %3917 = vmatmul.mubr.bf16.vlgmr.msra.gmra.mrb[0].mxu0 %v308_v33  ;;  %4286 = vmatmul.mubr.bf16.vlgmr.msra.gmra.mrb[0].mxu1 %v308_v33 }
 0x26b   : > { %3926 = vmatpush1.bf16.msra.mxu0 %v6564_v34  ;;  %4295 = vmatpush1.bf16.msra.mxu1 %v6567_v35 }
 0x26c   : > { %3927 = vmatprep.subr.bf16.mxu0 %v6572_v36  ;;  %4296 = vmatprep.subr.bf16.mxu1 %v6575_v37 }
 0x26d   : > { %3957 = vmatprep.mubr.bf16.mxu0 %v6856_v42  ;;  %4326 = vmatprep.mubr.bf16.mxu1 %v6856_v42 }
 0x26f   : > { %3928 = vmatpush1.bf16.msra.mxu0 %v6570_v38  ;;  %4297 = vmatpush1.bf16.msra.mxu1 %v6573_v39 }
 0x270   : > { %3929 = vmatprep.subr.bf16.mxu0 %v6578_v40  ;;  %4298 = vmatprep.subr.bf16.mxu1 %v6581_v41 }
 0x273   : > { %3930 = vmatpush1.bf16.msra.mxu0 %v6576_v43  ;;  %4299 = vmatpush1.bf16.msra.mxu1 %v6579_v44 }
 0x274   : > { %3931 = vmatprep.subr.bf16.mxu0 %v6584_v45  ;;  %4300 = vmatprep.subr.bf16.mxu1 %v6587_v46 }
 0x277   : > { %3932 = vmatpush1.bf16.msra.mxu0 %v6582_v47  ;;  %4301 = vmatpush1.bf16.msra.mxu1 %v6585_v48 }
 0x278   : > { %3933 = vmatprep.subr.bf16.mxu0 %v6590_v49  ;;  %4302 = vmatprep.subr.bf16.mxu1 %v6593_v50 }
 0x27b   : > { %3934 = vmatpush1.bf16.msra.mxu0 %v6588_v51  ;;  %4303 = vmatpush1.bf16.msra.mxu1 %v6591_v52 }
 0x27c   : > { %3935 = vmatprep.subr.bf16.mxu0 %v6596_v53  ;;  %4304 = vmatprep.subr.bf16.mxu1 %v6599_v54 }
 0x27f   : > { %3936 = vmatpush1.bf16.msra.mxu0 %v6594_v55  ;;  %4305 = vmatpush1.bf16.msra.mxu1 %v6597_v56 }
 0x280   : > { %3937 = vmatprep.subr.bf16.mxu0 %v6602_v57  ;;  %4306 = vmatprep.subr.bf16.mxu1 %v6605_v58 }
 0x283   : > { %3938 = vmatpush1.bf16.msra.mxu0 %v6600_v59  ;;  %4307 = vmatpush1.bf16.msra.mxu1 %v6603_v60 }
 0x284   : > { %3939 = vmatprep.subr.bf16.mxu0 %v6608_v61  ;;  %4308 = vmatprep.subr.bf16.mxu1 %v6611_v62 }
 0x287   : > { %3940 = vmatpush1.bf16.msra.mxu0 %v6606_v63  ;;  %4309 = vmatpush1.bf16.msra.mxu1 %v6609_v0 }
 0x28a   : > { %3958 = vmatmul.mubr.bf16.vlgmr.msra.gmra.mrb[0].mxu0 %v310_v2  ;;  %4327 = vmatmul.mubr.bf16.vlgmr.msra.gmra.mrb[0].mxu1 %v310_v2 }
 0x35d   : > { %v3959_v14 = vpop.f32.mrb[0].mxu0  ;;  %v4328_v15 = vpop.f32.mrb[0].mxu1  ;;  %4349 = sbr.rel (!%p8044_p7) target bundleno = 1033 (0x409), region = 44 }
 0x35e   : > { %v5533_v16 = vadd.f32 %v3959_v14, %v860_v10  ;;  %v5535_v17 = vadd.f32 %v4328_v15, %v868_v11  ;;  %v3961_v18 = vpop.f32.mrb[1].mxu0  ;;  %v4330_v19 = vpop.f32.mrb[1].mxu1 }
 0x35f   : > { %v5534_v20 = vadd.f32 %v3961_v18, %v864_v12  ;;  %v5536_v21 = vadd.f32 %v4330_v19, %v872_v13  ;;  %v3963_v22 = vpop.f32.mrb[2].mxu0  ;;  %v4332_v23 = vpop.f32.mrb[2].mxu1 }
 0x360   : > { %v4335_v24 = vmax.f32 %v5533_v16, 0.0  ;;  %v4337_v25 = vmax.f32 %v5535_v17, 0.0  ;;  %v3964_v26 = vpop.f32.mrb[3].mxu0  ;;  %v4333_v27 = vpop.f32.mrb[3].mxu1 }
 0x361   : > { %v4336_v28 = vmax.f32 %v5534_v20, 0.0  ;;  %v4338_v29 = vmax.f32 %v5536_v21, 0.0 }
 0x362   : > { %4339 = vst [vmem:[%s7590_s11] sm:$0xff] %v4335_v24  ;;  %4341 = vst [vmem:[%s7590_s11 + $0x10] sm:$0xff] %v4337_v25 }
 0x363   : > { %4340 = vst [vmem:[%s7590_s11 + $0x8] sm:$0xff] %v4336_v28  ;;  %4342 = vst [vmem:[%s7590_s11 + $0x18] sm:$0xff] %v4338_v29 }
 0x364   : > { %s8065_s28 = smov (!%p4352_p9, %s4351_s28), 4 }
 0x365   : > { %s5500_s8 = sshll.u32 %s8065_s28, 7  ;;  %s7605_s12 = sshll.u32 %s8065_s28, 3 }
 0x366   : > { %p5504_p11 = scmp.eq.s32.totalorder %s5500_s8, 0 }
 0x367   : > { %p4364_p13 = scmp.lt.u32.totalorder (!%p5504_p11), %s7605_s12, 8 }
 0x368   : > { %4363 = sbr.rel (%p5504_p11) target bundleno = 1033 (0x409), region = 48 }
 0x36f   : > { %4367 = sbr.rel (%p4364_p13) target bundleno = 1024 (0x400), region = 52  ;;  %s7609_s26 = sand.u32 (!%p4364_p13), 7, %s7605_s12  }
 0x370   : > { %p4383_p1 = scmp.eq.s32.totalorder (!%p4364_p13), %s7609_s26, 0  ;;  %p5505_p4 = scmp.ne.s32.totalorder (!%p4364_p13), %s7609_s26, 0 }
 0x376   : > { %4386 = sbr.rel (%p5505_p4) target bundleno = 953 (0x3b9), region = 67  ;;  %s4387_s15 = sshrl.u32 (!%p5505_p4), %s7605_s12, 3 }
 0x377   : > { %s7616_s18 = sshrl.u32 (!%p5505_p4), %s4387_s15, 6 }
 0x378   : > { %p5506_p5 = scmp.le.s32.totalorder (!%p5505_p4), %s7616_s18, 0 }
 0x37d   : > { %4841 = sbr.rel (%p5506_p5) target bundleno = 933 (0x3a5), region = 159  ;;  %s8045_s20 = smov (!%p5506_p5), %s7603_s7 }
 0x37e   : > { %s8046_s22 = smov (!%p5506_p5), %s7590_s11  ;;  %s7625_s4 = smov (!%p5506_p5), 0  }
 0x37f   : > { %s7627_s30 = smov (!%p5506_p5), 0  }
 0x384 LB: >> { %v4400_v30 = vld [vmem:[%s6794_s22] sm:$0xff]  ;;  %v4402_v31 = vld [vmem:[%s6794_s22 + $0x8] sm:$0xff]  ;;  %v4404_v32 = vld [vmem:[%s6794_s22 + $0x10] sm:$0xff]  ;;  %s4528_s23 = sadd.s32 1, %s6798_s4  ;;  %s4394_s30 = sadd.s32 1, %s6802_s30   ;;  %s6802_s30 = sphi %s7627_s30, %s4394_s30   ;;  %s6798_s4 = sphi %s7625_s4, %s8049_s4   ;;  %s6794_s22 = sphi %s8046_s22, %s8048_s22   ;;  %s6790_s20 = sphi %s8045_s20, %s8047_s20  }
 0x385   : >> { %4401 = vst [vmem:[%s6790_s20] sm:$0xff] %v4400_v30  ;;  %4403 = vst [vmem:[%s6790_s20 + $0x8] sm:$0xff] %v4402_v31  ;;  %v4406_v33 = vld [vmem:[%s6794_s22 + $0x18] sm:$0xff]  ;;  %v4408_v34 = vld [vmem:[%s6794_s22 + $0x20] sm:$0xff]  ;;  %p4529_p8 = scmp.ge.s32.totalorder %s4528_s23, %s7616_s18  ;;  %p4393_p10 = scmp.ge.s32.totalorder %s4394_s30, %s7616_s18 }
 0x386   : >> { %4405 = vst [vmem:[%s6790_s20 + $0x10] sm:$0xff] %v4404_v32  ;;  %v4410_v35 = vld [vmem:[%s6794_s22 + $0x28] sm:$0xff]  ;;  %4407 = vst [vmem:[%s6790_s20 + $0x18] sm:$0xff] %v4406_v33  ;;  %v4412_v36 = vld [vmem:[%s6794_s22 + $0x30] sm:$0xff] }
 0x387   : >> { %4409 = vst [vmem:[%s6790_s20 + $0x20] sm:$0xff] %v4408_v34  ;;  %4411 = vst [vmem:[%s6790_s20 + $0x28] sm:$0xff] %v4410_v35  ;;  %v4414_v37 = vld [vmem:[%s6794_s22 + $0x38] sm:$0xff]  ;;  %v4416_v38 = vld [vmem:[%s6794_s22 + $0x40] sm:$0xff]  ;;  %s8067_s23 = smov (%p4529_p8, %s4528_s23), 0 }
 0x388   : >> { %4413 = vst [vmem:[%s6790_s20 + $0x30] sm:$0xff] %v4412_v36  ;;  %4415 = vst [vmem:[%s6790_s20 + $0x38] sm:$0xff] %v4414_v37  ;;  %v4418_v39 = vld [vmem:[%s6794_s22 + $0x48] sm:$0xff]  ;;  %v4420_v40 = vld [vmem:[%s6794_s22 + $0x50] sm:$0xff]  ;;  %s5507_s24 = sshll.u32 %s8067_s23, 9  ;;  %s8049_s4 = smov %s8067_s23 }
 0x389   : >> { %4417 = vst [vmem:[%s6790_s20 + $0x40] sm:$0xff] %v4416_v38  ;;  %v4422_v41 = vld [vmem:[%s6794_s22 + $0x58] sm:$0xff]  ;;  %4419 = vst [vmem:[%s6790_s20 + $0x48] sm:$0xff] %v4418_v39  ;;  %v4424_v42 = vld [vmem:[%s6794_s22 + $0x60] sm:$0xff]  ;;  %s7683_s27 = scalar_lea.vmem %s7590_s11, %s5507_s24 [#allocation6]   ;;  %s7686_s5 = scalar_lea.vmem %s7603_s7, %s5507_s24  }
 0x38a   : >> { %4421 = vst [vmem:[%s6790_s20 + $0x50] sm:$0xff] %v4420_v40  ;;  %4423 = vst [vmem:[%s6790_s20 + $0x58] sm:$0xff] %v4422_v41  ;;  %v4426_v43 = vld [vmem:[%s6794_s22 + $0x68] sm:$0xff]  ;;  %v4428_v44 = vld [vmem:[%s6794_s22 + $0x70] sm:$0xff] }
 0x38b   : >> { %4425 = vst [vmem:[%s6790_s20 + $0x60] sm:$0xff] %v4424_v42  ;;  %4427 = vst [vmem:[%s6790_s20 + $0x68] sm:$0xff] %v4426_v43  ;;  %v4430_v45 = vld [vmem:[%s6794_s22 + $0x78] sm:$0xff]  ;;  %v4432_v46 = vld [vmem:[%s6794_s22 + $0x80] sm:$0xff] }
 0x38c   : >> { %4429 = vst [vmem:[%s6790_s20 + $0x70] sm:$0xff] %v4428_v44  ;;  %v4434_v47 = vld [vmem:[%s6794_s22 + $0x88] sm:$0xff]  ;;  %4431 = vst [vmem:[%s6790_s20 + $0x78] sm:$0xff] %v4430_v45  ;;  %v4436_v48 = vld [vmem:[%s6794_s22 + $0x90] sm:$0xff] }
 0x38d   : >> { %4433 = vst [vmem:[%s6790_s20 + $0x80] sm:$0xff] %v4432_v46  ;;  %4435 = vst [vmem:[%s6790_s20 + $0x88] sm:$0xff] %v4434_v47  ;;  %v4438_v49 = vld [vmem:[%s6794_s22 + $0x98] sm:$0xff]  ;;  %v4440_v50 = vld [vmem:[%s6794_s22 + $0xa0] sm:$0xff] }
 0x38e   : >> { %4437 = vst [vmem:[%s6790_s20 + $0x90] sm:$0xff] %v4436_v48  ;;  %4439 = vst [vmem:[%s6790_s20 + $0x98] sm:$0xff] %v4438_v49  ;;  %v4442_v51 = vld [vmem:[%s6794_s22 + $0xa8] sm:$0xff]  ;;  %v4444_v52 = vld [vmem:[%s6794_s22 + $0xb0] sm:$0xff] }
 0x38f   : >> { %4441 = vst [vmem:[%s6790_s20 + $0xa0] sm:$0xff] %v4440_v50  ;;  %v4446_v53 = vld [vmem:[%s6794_s22 + $0xb8] sm:$0xff]  ;;  %4443 = vst [vmem:[%s6790_s20 + $0xa8] sm:$0xff] %v4442_v51  ;;  %v4448_v54 = vld [vmem:[%s6794_s22 + $0xc0] sm:$0xff] }
 0x390   : >> { %4445 = vst [vmem:[%s6790_s20 + $0xb0] sm:$0xff] %v4444_v52  ;;  %4447 = vst [vmem:[%s6790_s20 + $0xb8] sm:$0xff] %v4446_v53  ;;  %v4450_v55 = vld [vmem:[%s6794_s22 + $0xc8] sm:$0xff]  ;;  %v4452_v56 = vld [vmem:[%s6794_s22 + $0xd0] sm:$0xff] }
 0x391   : >> { %4449 = vst [vmem:[%s6790_s20 + $0xc0] sm:$0xff] %v4448_v54  ;;  %4451 = vst [vmem:[%s6790_s20 + $0xc8] sm:$0xff] %v4450_v55  ;;  %v4454_v57 = vld [vmem:[%s6794_s22 + $0xd8] sm:$0xff]  ;;  %v4456_v58 = vld [vmem:[%s6794_s22 + $0xe0] sm:$0xff] }
 0x392   : >> { %4453 = vst [vmem:[%s6790_s20 + $0xd0] sm:$0xff] %v4452_v56  ;;  %v4458_v59 = vld [vmem:[%s6794_s22 + $0xe8] sm:$0xff]  ;;  %4455 = vst [vmem:[%s6790_s20 + $0xd8] sm:$0xff] %v4454_v57  ;;  %v4460_v60 = vld [vmem:[%s6794_s22 + $0xf0] sm:$0xff] }
 0x393   : >> { %4457 = vst [vmem:[%s6790_s20 + $0xe0] sm:$0xff] %v4456_v58  ;;  %4459 = vst [vmem:[%s6790_s20 + $0xe8] sm:$0xff] %v4458_v59  ;;  %v4462_v61 = vld [vmem:[%s6794_s22 + $0xf8] sm:$0xff]  ;;  %v4464_v62 = vld [vmem:[%s6794_s22 + $0x100] sm:$0xff] }
 0x394   : >> { %4461 = vst [vmem:[%s6790_s20 + $0xf0] sm:$0xff] %v4460_v60  ;;  %4463 = vst [vmem:[%s6790_s20 + $0xf8] sm:$0xff] %v4462_v61  ;;  %v4466_v63 = vld [vmem:[%s6794_s22 + $0x108] sm:$0xff]  ;;  %v4468_v0 = vld [vmem:[%s6794_s22 + $0x110] sm:$0xff] }
 0x395   : >> { %4465 = vst [vmem:[%s6790_s20 + $0x100] sm:$0xff] %v4464_v62  ;;  %v4470_v1 = vld [vmem:[%s6794_s22 + $0x118] sm:$0xff]  ;;  %4467 = vst [vmem:[%s6790_s20 + $0x108] sm:$0xff] %v4466_v63  ;;  %v4472_v2 = vld [vmem:[%s6794_s22 + $0x120] sm:$0xff] }
 0x396   : >> { %4469 = vst [vmem:[%s6790_s20 + $0x110] sm:$0xff] %v4468_v0  ;;  %4471 = vst [vmem:[%s6790_s20 + $0x118] sm:$0xff] %v4470_v1  ;;  %v4474_v3 = vld [vmem:[%s6794_s22 + $0x128] sm:$0xff]  ;;  %v4476_v4 = vld [vmem:[%s6794_s22 + $0x130] sm:$0xff] }
 0x397   : >> { %4473 = vst [vmem:[%s6790_s20 + $0x120] sm:$0xff] %v4472_v2  ;;  %4475 = vst [vmem:[%s6790_s20 + $0x128] sm:$0xff] %v4474_v3  ;;  %v4478_v5 = vld [vmem:[%s6794_s22 + $0x138] sm:$0xff]  ;;  %v4480_v6 = vld [vmem:[%s6794_s22 + $0x140] sm:$0xff] }
 0x398   : >> { %4477 = vst [vmem:[%s6790_s20 + $0x130] sm:$0xff] %v4476_v4  ;;  %v4482_v7 = vld [vmem:[%s6794_s22 + $0x148] sm:$0xff]  ;;  %4479 = vst [vmem:[%s6790_s20 + $0x138] sm:$0xff] %v4478_v5  ;;  %v4484_v8 = vld [vmem:[%s6794_s22 + $0x150] sm:$0xff] }
 0x399   : >> { %4481 = vst [vmem:[%s6790_s20 + $0x140] sm:$0xff] %v4480_v6  ;;  %4483 = vst [vmem:[%s6790_s20 + $0x148] sm:$0xff] %v4482_v7  ;;  %v4486_v9 = vld [vmem:[%s6794_s22 + $0x158] sm:$0xff]  ;;  %v4488_v10 = vld [vmem:[%s6794_s22 + $0x160] sm:$0xff] }
 0x39a   : >> { %4485 = vst [vmem:[%s6790_s20 + $0x150] sm:$0xff] %v4484_v8  ;;  %4487 = vst [vmem:[%s6790_s20 + $0x158] sm:$0xff] %v4486_v9  ;;  %v4490_v11 = vld [vmem:[%s6794_s22 + $0x168] sm:$0xff]  ;;  %v4492_v12 = vld [vmem:[%s6794_s22 + $0x170] sm:$0xff] }
 0x39b   : >> { %4489 = vst [vmem:[%s6790_s20 + $0x160] sm:$0xff] %v4488_v10  ;;  %v4494_v13 = vld [vmem:[%s6794_s22 + $0x178] sm:$0xff]  ;;  %4491 = vst [vmem:[%s6790_s20 + $0x168] sm:$0xff] %v4490_v11  ;;  %v4496_v14 = vld [vmem:[%s6794_s22 + $0x180] sm:$0xff] }
 0x39c   : >> { %4493 = vst [vmem:[%s6790_s20 + $0x170] sm:$0xff] %v4492_v12  ;;  %4495 = vst [vmem:[%s6790_s20 + $0x178] sm:$0xff] %v4494_v13  ;;  %v4498_v15 = vld [vmem:[%s6794_s22 + $0x188] sm:$0xff]  ;;  %v4500_v16 = vld [vmem:[%s6794_s22 + $0x190] sm:$0xff] }
 0x39d   : >> { %4497 = vst [vmem:[%s6790_s20 + $0x180] sm:$0xff] %v4496_v14  ;;  %4499 = vst [vmem:[%s6790_s20 + $0x188] sm:$0xff] %v4498_v15  ;;  %v4502_v17 = vld [vmem:[%s6794_s22 + $0x198] sm:$0xff]  ;;  %v4504_v18 = vld [vmem:[%s6794_s22 + $0x1a0] sm:$0xff] }
 0x39e   : >> { %4501 = vst [vmem:[%s6790_s20 + $0x190] sm:$0xff] %v4500_v16  ;;  %v4506_v19 = vld [vmem:[%s6794_s22 + $0x1a8] sm:$0xff]  ;;  %4503 = vst [vmem:[%s6790_s20 + $0x198] sm:$0xff] %v4502_v17  ;;  %v4508_v20 = vld [vmem:[%s6794_s22 + $0x1b0] sm:$0xff]  ;;  %4396 = sbr.rel (!%p4393_p10) target bundleno = 900 (0x384), region = 165 }
 0x39f   : >> { %4505 = vst [vmem:[%s6790_s20 + $0x1a0] sm:$0xff] %v4504_v18  ;;  %4507 = vst [vmem:[%s6790_s20 + $0x1a8] sm:$0xff] %v4506_v19  ;;  %v4510_v21 = vld [vmem:[%s6794_s22 + $0x1b8] sm:$0xff]  ;;  %v4512_v22 = vld [vmem:[%s6794_s22 + $0x1c0] sm:$0xff] }
 0x3a0   : >> { %4509 = vst [vmem:[%s6790_s20 + $0x1b0] sm:$0xff] %v4508_v20  ;;  %4511 = vst [vmem:[%s6790_s20 + $0x1b8] sm:$0xff] %v4510_v21  ;;  %v4514_v23 = vld [vmem:[%s6794_s22 + $0x1c8] sm:$0xff]  ;;  %v4516_v24 = vld [vmem:[%s6794_s22 + $0x1d0] sm:$0xff] }
 0x3a1   : >> { %4513 = vst [vmem:[%s6790_s20 + $0x1c0] sm:$0xff] %v4512_v22  ;;  %v4518_v25 = vld [vmem:[%s6794_s22 + $0x1d8] sm:$0xff]  ;;  %4515 = vst [vmem:[%s6790_s20 + $0x1c8] sm:$0xff] %v4514_v23  ;;  %v4520_v26 = vld [vmem:[%s6794_s22 + $0x1e0] sm:$0xff] }
 0x3a2   : >> { %4517 = vst [vmem:[%s6790_s20 + $0x1d0] sm:$0xff] %v4516_v24  ;;  %4519 = vst [vmem:[%s6790_s20 + $0x1d8] sm:$0xff] %v4518_v25  ;;  %v4522_v27 = vld [vmem:[%s6794_s22 + $0x1e8] sm:$0xff]  ;;  %v4524_v28 = vld [vmem:[%s6794_s22 + $0x1f0] sm:$0xff] }
 0x3a3   : >> { %4521 = vst [vmem:[%s6790_s20 + $0x1e0] sm:$0xff] %v4520_v26  ;;  %4523 = vst [vmem:[%s6790_s20 + $0x1e8] sm:$0xff] %v4522_v27  ;;  %v4526_v29 = vld [vmem:[%s6794_s22 + $0x1f8] sm:$0xff]  ;;  %s8048_s22 = smov %s7683_s27 }
 0x3a4   : >> { %4525 = vst [vmem:[%s6790_s20 + $0x1f0] sm:$0xff] %v4524_v28  ;;  %4527 = vst [vmem:[%s6790_s20 + $0x1f8] sm:$0xff] %v4526_v29  ;;  %s8047_s20 = smov %s7686_s5 }
 0x3a5 PF: > { %s7792_s9 = sand.u32 63, %s4387_s15   ;;  %s5529_s10 = sshll.u32 %s7616_s18, 13 }
 0x3a6   : > { %s4539_s28 = sshra.s32 %s5529_s10, 4  ;;  %p5512_p0 = scmp.le.s32.totalorder %s7792_s9, 0 }
 0x3a7   : > { %s4540_s29 = scalar_lea.vmem %s7590_s11, %s4539_s28 [#allocation6]   ;;  %s4543_s6 = scalar_lea.vmem %s7603_s7, %s4539_s28  }
 0x3a8   : > { %4855 = sbr.rel (%p5512_p0) target bundleno = 953 (0x3b9), region = 170  ;;  %s6804_s21 = smov (!%p5512_p0), %s4543_s6  }
 0x3a9   : > { %s6808_s8 = smov (!%p5512_p0), %s4540_s29   ;;  %s6812_s23 = smov (!%p5512_p0), 0  }
 0x3aa   : > { %s6816_s30 = smov (!%p5512_p0), 0  }
 0x3af LB: >> { %v4555_v30 = vld [vmem:[%s6810_s8] sm:$0xff]  ;;  %s4557_s15 = sadd.s32 1, %s6814_s23  ;;  %s4549_s30 = sadd.s32 1, %s6818_s30   ;;  %s6818_s30 = sphi %s6816_s30, %s4549_s30   ;;  %s6814_s23 = sphi %s6812_s23, %s6813_s23   ;;  %s6810_s8 = sphi %s6808_s8, %s4562_s8   ;;  %s6806_s21 = sphi %s6804_s21, %s4563_s21  }
 0x3b0   : >> { %4556 = vst [vmem:[%s6806_s21] sm:$0xff] %v4555_v30  ;;  %p4558_p12 = scmp.ge.s32.totalorder %s4557_s15, %s7792_s9  ;;  %p4548_p2 = scmp.ge.s32.totalorder %s4549_s30, %s7792_s9 }
 0x3b2   : >> { %s8069_s15 = smov (%p4558_p12, %s4557_s15), 0  ;;  %4551 = sbr.rel (!%p4548_p2) target bundleno = 943 (0x3af), region = 176 }
 0x3b3   : >> { %s5513_s18 = sshll.u32 %s8069_s15, 3  ;;  %s6813_s23 = smov %s8069_s15  }
 0x3b4   : >> { %s4562_s8 = scalar_lea.vmem %s4540_s29, %s5513_s18 [#allocation6]   ;;  %s4563_s21 = scalar_lea.vmem %s4543_s6, %s5513_s18  }
 0x3b9 PF: > { %4566 = sbr.rel (%p4383_p1) target bundleno = 1024 (0x400), region = 85  ;;  %s7804_s20 = ssub.s32 (!%p4383_p1), %s7605_s12, %s7609_s26 }
 0x3ba   : > { %s4572_s22 = sshrl.u32 (!%p4383_p1), %s7605_s12, 3  ;;  %s4569_s4 = scalar_lea.vmem (!%p4383_p1), %s7590_s11, %s7804_s20 [#allocation6] }
 0x3bb   : > { %s4571_s24 = scalar_lea.vmem (!%p4383_p1), %s7603_s7, %s7804_s20  ;;  %s7813_s27 = sshrl.u32 (!%p4383_p1), %s4572_s22, 6 }
 0x3bc   : > { %p5515_p3 = scmp.le.s32.totalorder (!%p4383_p1), %s7813_s27, 0 }
 0x3c0   : > { %4869 = sbr.rel (%p5515_p3) target bundleno = 1000 (0x3e8), region = 181  ;;  %s8050_s5 = smov (!%p5515_p3), %s7603_s7 }
 0x3c1   : > { %s8051_s9 = smov (!%p5515_p3), %s7590_s11  ;;  %s7822_s10 = smov (!%p5515_p3), 0  }
 0x3c2   : > { %s7824_s28 = smov (!%p5515_p3), 0  }
 0x3c7 LB: >> { %v4585_v31 = vld [vmem:[%s6826_s9] sm:$0xff]  ;;  %v4587_v32 = vld [vmem:[%s6826_s9 + $0x8] sm:$0xff]  ;;  %v4589_v33 = vld [vmem:[%s6826_s9 + $0x10] sm:$0xff]  ;;  %s4713_s29 = sadd.s32 1, %s6830_s10  ;;  %s4579_s28 = sadd.s32 1, %s6834_s28   ;;  %s6834_s28 = sphi %s7824_s28, %s4579_s28   ;;  %s6830_s10 = sphi %s7822_s10, %s8054_s10   ;;  %s6826_s9 = sphi %s8051_s9, %s8053_s9   ;;  %s6822_s5 = sphi %s8050_s5, %s8052_s5  }
 0x3c8   : >> { %4586 = vst [vmem:[%s6822_s5] sm:$0xff] %v4585_v31  ;;  %4588 = vst [vmem:[%s6822_s5 + $0x8] sm:$0xff] %v4587_v32  ;;  %v4591_v34 = vld [vmem:[%s6826_s9 + $0x18] sm:$0xff]  ;;  %v4593_v35 = vld [vmem:[%s6826_s9 + $0x20] sm:$0xff]  ;;  %p4714_p6 = scmp.ge.s32.totalorder %s4713_s29, %s7813_s27  ;;  %p4578_p7 = scmp.ge.s32.totalorder %s4579_s28, %s7813_s27 }
 0x3c9   : >> { %4590 = vst [vmem:[%s6822_s5 + $0x10] sm:$0xff] %v4589_v33  ;;  %v4595_v36 = vld [vmem:[%s6826_s9 + $0x28] sm:$0xff]  ;;  %4592 = vst [vmem:[%s6822_s5 + $0x18] sm:$0xff] %v4591_v34  ;;  %v4597_v37 = vld [vmem:[%s6826_s9 + $0x30] sm:$0xff] }
 0x3ca   : >> { %4594 = vst [vmem:[%s6822_s5 + $0x20] sm:$0xff] %v4593_v35  ;;  %4596 = vst [vmem:[%s6822_s5 + $0x28] sm:$0xff] %v4595_v36  ;;  %v4599_v38 = vld [vmem:[%s6826_s9 + $0x38] sm:$0xff]  ;;  %v4601_v39 = vld [vmem:[%s6826_s9 + $0x40] sm:$0xff]  ;;  %s8071_s29 = smov (%p4714_p6, %s4713_s29), 0 }
 0x3cb   : >> { %4598 = vst [vmem:[%s6822_s5 + $0x30] sm:$0xff] %v4597_v37  ;;  %4600 = vst [vmem:[%s6822_s5 + $0x38] sm:$0xff] %v4599_v38  ;;  %v4603_v40 = vld [vmem:[%s6826_s9 + $0x48] sm:$0xff]  ;;  %v4605_v41 = vld [vmem:[%s6826_s9 + $0x50] sm:$0xff]  ;;  %s5516_s6 = sshll.u32 %s8071_s29, 9  ;;  %s8054_s10 = smov %s8071_s29 }
 0x3cc   : >> { %4602 = vst [vmem:[%s6822_s5 + $0x40] sm:$0xff] %v4601_v39  ;;  %v4607_v42 = vld [vmem:[%s6826_s9 + $0x58] sm:$0xff]  ;;  %4604 = vst [vmem:[%s6822_s5 + $0x48] sm:$0xff] %v4603_v40  ;;  %v4609_v43 = vld [vmem:[%s6826_s9 + $0x60] sm:$0xff]  ;;  %s7880_s21 = scalar_lea.vmem %s7590_s11, %s5516_s6 [#allocation6]   ;;  %s7883_s8 = scalar_lea.vmem %s7603_s7, %s5516_s6  }
 0x3cd   : >> { %4606 = vst [vmem:[%s6822_s5 + $0x50] sm:$0xff] %v4605_v41  ;;  %4608 = vst [vmem:[%s6822_s5 + $0x58] sm:$0xff] %v4607_v42  ;;  %v4611_v44 = vld [vmem:[%s6826_s9 + $0x68] sm:$0xff]  ;;  %v4613_v45 = vld [vmem:[%s6826_s9 + $0x70] sm:$0xff] }
 0x3ce   : >> { %4610 = vst [vmem:[%s6822_s5 + $0x60] sm:$0xff] %v4609_v43  ;;  %4612 = vst [vmem:[%s6822_s5 + $0x68] sm:$0xff] %v4611_v44  ;;  %v4615_v46 = vld [vmem:[%s6826_s9 + $0x78] sm:$0xff]  ;;  %v4617_v47 = vld [vmem:[%s6826_s9 + $0x80] sm:$0xff] }
 0x3cf   : >> { %4614 = vst [vmem:[%s6822_s5 + $0x70] sm:$0xff] %v4613_v45  ;;  %v4619_v48 = vld [vmem:[%s6826_s9 + $0x88] sm:$0xff]  ;;  %4616 = vst [vmem:[%s6822_s5 + $0x78] sm:$0xff] %v4615_v46  ;;  %v4621_v49 = vld [vmem:[%s6826_s9 + $0x90] sm:$0xff] }
 0x3d0   : >> { %4618 = vst [vmem:[%s6822_s5 + $0x80] sm:$0xff] %v4617_v47  ;;  %4620 = vst [vmem:[%s6822_s5 + $0x88] sm:$0xff] %v4619_v48  ;;  %v4623_v50 = vld [vmem:[%s6826_s9 + $0x98] sm:$0xff]  ;;  %v4625_v51 = vld [vmem:[%s6826_s9 + $0xa0] sm:$0xff] }
 0x3d1   : >> { %4622 = vst [vmem:[%s6822_s5 + $0x90] sm:$0xff] %v4621_v49  ;;  %4624 = vst [vmem:[%s6822_s5 + $0x98] sm:$0xff] %v4623_v50  ;;  %v4627_v52 = vld [vmem:[%s6826_s9 + $0xa8] sm:$0xff]  ;;  %v4629_v53 = vld [vmem:[%s6826_s9 + $0xb0] sm:$0xff] }
 0x3d2   : >> { %4626 = vst [vmem:[%s6822_s5 + $0xa0] sm:$0xff] %v4625_v51  ;;  %v4631_v54 = vld [vmem:[%s6826_s9 + $0xb8] sm:$0xff]  ;;  %4628 = vst [vmem:[%s6822_s5 + $0xa8] sm:$0xff] %v4627_v52  ;;  %v4633_v55 = vld [vmem:[%s6826_s9 + $0xc0] sm:$0xff] }
 0x3d3   : >> { %4630 = vst [vmem:[%s6822_s5 + $0xb0] sm:$0xff] %v4629_v53  ;;  %4632 = vst [vmem:[%s6822_s5 + $0xb8] sm:$0xff] %v4631_v54  ;;  %v4635_v56 = vld [vmem:[%s6826_s9 + $0xc8] sm:$0xff]  ;;  %v4637_v57 = vld [vmem:[%s6826_s9 + $0xd0] sm:$0xff] }
 0x3d4   : >> { %4634 = vst [vmem:[%s6822_s5 + $0xc0] sm:$0xff] %v4633_v55  ;;  %4636 = vst [vmem:[%s6822_s5 + $0xc8] sm:$0xff] %v4635_v56  ;;  %v4639_v58 = vld [vmem:[%s6826_s9 + $0xd8] sm:$0xff]  ;;  %v4641_v59 = vld [vmem:[%s6826_s9 + $0xe0] sm:$0xff] }
 0x3d5   : >> { %4638 = vst [vmem:[%s6822_s5 + $0xd0] sm:$0xff] %v4637_v57  ;;  %v4643_v60 = vld [vmem:[%s6826_s9 + $0xe8] sm:$0xff]  ;;  %4640 = vst [vmem:[%s6822_s5 + $0xd8] sm:$0xff] %v4639_v58  ;;  %v4645_v61 = vld [vmem:[%s6826_s9 + $0xf0] sm:$0xff] }
 0x3d6   : >> { %4642 = vst [vmem:[%s6822_s5 + $0xe0] sm:$0xff] %v4641_v59  ;;  %4644 = vst [vmem:[%s6822_s5 + $0xe8] sm:$0xff] %v4643_v60  ;;  %v4647_v62 = vld [vmem:[%s6826_s9 + $0xf8] sm:$0xff]  ;;  %v4649_v63 = vld [vmem:[%s6826_s9 + $0x100] sm:$0xff] }
 0x3d7   : >> { %4646 = vst [vmem:[%s6822_s5 + $0xf0] sm:$0xff] %v4645_v61  ;;  %4648 = vst [vmem:[%s6822_s5 + $0xf8] sm:$0xff] %v4647_v62  ;;  %v4651_v0 = vld [vmem:[%s6826_s9 + $0x108] sm:$0xff]  ;;  %v4653_v1 = vld [vmem:[%s6826_s9 + $0x110] sm:$0xff] }
 0x3d8   : >> { %4650 = vst [vmem:[%s6822_s5 + $0x100] sm:$0xff] %v4649_v63  ;;  %v4655_v2 = vld [vmem:[%s6826_s9 + $0x118] sm:$0xff]  ;;  %4652 = vst [vmem:[%s6822_s5 + $0x108] sm:$0xff] %v4651_v0  ;;  %v4657_v3 = vld [vmem:[%s6826_s9 + $0x120] sm:$0xff] }
 0x3d9   : >> { %4654 = vst [vmem:[%s6822_s5 + $0x110] sm:$0xff] %v4653_v1  ;;  %4656 = vst [vmem:[%s6822_s5 + $0x118] sm:$0xff] %v4655_v2  ;;  %v4659_v4 = vld [vmem:[%s6826_s9 + $0x128] sm:$0xff]  ;;  %v4661_v5 = vld [vmem:[%s6826_s9 + $0x130] sm:$0xff] }
 0x3da   : >> { %4658 = vst [vmem:[%s6822_s5 + $0x120] sm:$0xff] %v4657_v3  ;;  %4660 = vst [vmem:[%s6822_s5 + $0x128] sm:$0xff] %v4659_v4  ;;  %v4663_v6 = vld [vmem:[%s6826_s9 + $0x138] sm:$0xff]  ;;  %v4665_v7 = vld [vmem:[%s6826_s9 + $0x140] sm:$0xff] }
 0x3db   : >> { %4662 = vst [vmem:[%s6822_s5 + $0x130] sm:$0xff] %v4661_v5  ;;  %v4667_v8 = vld [vmem:[%s6826_s9 + $0x148] sm:$0xff]  ;;  %4664 = vst [vmem:[%s6822_s5 + $0x138] sm:$0xff] %v4663_v6  ;;  %v4669_v9 = vld [vmem:[%s6826_s9 + $0x150] sm:$0xff] }
 0x3dc   : >> { %4666 = vst [vmem:[%s6822_s5 + $0x140] sm:$0xff] %v4665_v7  ;;  %4668 = vst [vmem:[%s6822_s5 + $0x148] sm:$0xff] %v4667_v8  ;;  %v4671_v10 = vld [vmem:[%s6826_s9 + $0x158] sm:$0xff]  ;;  %v4673_v11 = vld [vmem:[%s6826_s9 + $0x160] sm:$0xff] }
 0x3dd   : >> { %4670 = vst [vmem:[%s6822_s5 + $0x150] sm:$0xff] %v4669_v9  ;;  %4672 = vst [vmem:[%s6822_s5 + $0x158] sm:$0xff] %v4671_v10  ;;  %v4675_v12 = vld [vmem:[%s6826_s9 + $0x168] sm:$0xff]  ;;  %v4677_v13 = vld [vmem:[%s6826_s9 + $0x170] sm:$0xff] }
 0x3de   : >> { %4674 = vst [vmem:[%s6822_s5 + $0x160] sm:$0xff] %v4673_v11  ;;  %v4679_v14 = vld [vmem:[%s6826_s9 + $0x178] sm:$0xff]  ;;  %4676 = vst [vmem:[%s6822_s5 + $0x168] sm:$0xff] %v4675_v12  ;;  %v4681_v15 = vld [vmem:[%s6826_s9 + $0x180] sm:$0xff] }
 0x3df   : >> { %4678 = vst [vmem:[%s6822_s5 + $0x170] sm:$0xff] %v4677_v13  ;;  %4680 = vst [vmem:[%s6822_s5 + $0x178] sm:$0xff] %v4679_v14  ;;  %v4683_v16 = vld [vmem:[%s6826_s9 + $0x188] sm:$0xff]  ;;  %v4685_v17 = vld [vmem:[%s6826_s9 + $0x190] sm:$0xff] }
 0x3e0   : >> { %4682 = vst [vmem:[%s6822_s5 + $0x180] sm:$0xff] %v4681_v15  ;;  %4684 = vst [vmem:[%s6822_s5 + $0x188] sm:$0xff] %v4683_v16  ;;  %v4687_v18 = vld [vmem:[%s6826_s9 + $0x198] sm:$0xff]  ;;  %v4689_v19 = vld [vmem:[%s6826_s9 + $0x1a0] sm:$0xff] }
 0x3e1   : >> { %4686 = vst [vmem:[%s6822_s5 + $0x190] sm:$0xff] %v4685_v17  ;;  %v4691_v20 = vld [vmem:[%s6826_s9 + $0x1a8] sm:$0xff]  ;;  %4688 = vst [vmem:[%s6822_s5 + $0x198] sm:$0xff] %v4687_v18  ;;  %v4693_v21 = vld [vmem:[%s6826_s9 + $0x1b0] sm:$0xff]  ;;  %4581 = sbr.rel (!%p4578_p7) target bundleno = 967 (0x3c7), region = 187 }
 0x3e2   : >> { %4690 = vst [vmem:[%s6822_s5 + $0x1a0] sm:$0xff] %v4689_v19  ;;  %4692 = vst [vmem:[%s6822_s5 + $0x1a8] sm:$0xff] %v4691_v20  ;;  %v4695_v22 = vld [vmem:[%s6826_s9 + $0x1b8] sm:$0xff]  ;;  %v4697_v23 = vld [vmem:[%s6826_s9 + $0x1c0] sm:$0xff] }
 0x3e3   : >> { %4694 = vst [vmem:[%s6822_s5 + $0x1b0] sm:$0xff] %v4693_v21  ;;  %4696 = vst [vmem:[%s6822_s5 + $0x1b8] sm:$0xff] %v4695_v22  ;;  %v4699_v24 = vld [vmem:[%s6826_s9 + $0x1c8] sm:$0xff]  ;;  %v4701_v25 = vld [vmem:[%s6826_s9 + $0x1d0] sm:$0xff] }
 0x3e4   : >> { %4698 = vst [vmem:[%s6822_s5 + $0x1c0] sm:$0xff] %v4697_v23  ;;  %v4703_v26 = vld [vmem:[%s6826_s9 + $0x1d8] sm:$0xff]  ;;  %4700 = vst [vmem:[%s6822_s5 + $0x1c8] sm:$0xff] %v4699_v24  ;;  %v4705_v27 = vld [vmem:[%s6826_s9 + $0x1e0] sm:$0xff] }
 0x3e5   : >> { %4702 = vst [vmem:[%s6822_s5 + $0x1d0] sm:$0xff] %v4701_v25  ;;  %4704 = vst [vmem:[%s6822_s5 + $0x1d8] sm:$0xff] %v4703_v26  ;;  %v4707_v28 = vld [vmem:[%s6826_s9 + $0x1e8] sm:$0xff]  ;;  %v4709_v29 = vld [vmem:[%s6826_s9 + $0x1f0] sm:$0xff] }
 0x3e6   : >> { %4706 = vst [vmem:[%s6822_s5 + $0x1e0] sm:$0xff] %v4705_v27  ;;  %4708 = vst [vmem:[%s6822_s5 + $0x1e8] sm:$0xff] %v4707_v28  ;;  %v4711_v30 = vld [vmem:[%s6826_s9 + $0x1f8] sm:$0xff]  ;;  %s8053_s9 = smov %s7880_s21 }
 0x3e7   : >> { %4710 = vst [vmem:[%s6822_s5 + $0x1f0] sm:$0xff] %v4709_v29  ;;  %4712 = vst [vmem:[%s6822_s5 + $0x1f8] sm:$0xff] %v4711_v30  ;;  %s8052_s5 = smov %s7883_s8 }
 0x3e8 PF: > { %s7989_s23 = sand.u32 63, %s4572_s22   ;;  %s5531_s30 = sshll.u32 %s7813_s27, 13 }
 0x3e9   : > { %s4724_s15 = sshra.s32 %s5531_s30, 4  ;;  %p5521_p9 = scmp.le.s32.totalorder %s7989_s23, 0 }
 0x3ea   : > { %s4725_s18 = scalar_lea.vmem %s7590_s11, %s4724_s15 [#allocation6]   ;;  %s4728_s6 = scalar_lea.vmem %s7603_s7, %s4724_s15  }
 0x3eb   : > { %4883 = sbr.rel (%p5521_p9) target bundleno = 1020 (0x3fc), region = 192  ;;  %s6836_s21 = smov (!%p5521_p9), %s4728_s6  }
 0x3ec   : > { %s6840_s29 = smov (!%p5521_p9), %s4725_s18   ;;  %s6844_s8 = smov (!%p5521_p9), 0  }
 0x3ed   : > { %s6848_s28 = smov (!%p5521_p9), 0  }
 0x3f2 LB: >> { %v4740_v31 = vld [vmem:[%s6842_s29] sm:$0xff]  ;;  %s4742_s22 = sadd.s32 1, %s6846_s8  ;;  %s4734_s28 = sadd.s32 1, %s6850_s28   ;;  %s6850_s28 = sphi %s6848_s28, %s4734_s28   ;;  %s6846_s8 = sphi %s6844_s8, %s6845_s8   ;;  %s6842_s29 = sphi %s6840_s29, %s4747_s29   ;;  %s6838_s21 = sphi %s6836_s21, %s4748_s21  }
 0x3f3   : >> { %4741 = vst [vmem:[%s6838_s21] sm:$0xff] %v4740_v31  ;;  %p4743_p11 = scmp.ge.s32.totalorder %s4742_s22, %s7989_s23  ;;  %p4733_p13 = scmp.ge.s32.totalorder %s4734_s28, %s7989_s23 }
 0x3f5   : >> { %s8073_s22 = smov (%p4743_p11, %s4742_s22), 0  ;;  %4736 = sbr.rel (!%p4733_p13) target bundleno = 1010 (0x3f2), region = 198 }
 0x3f6   : >> { %s5522_s27 = sshll.u32 %s8073_s22, 3  ;;  %s6845_s8 = smov %s8073_s22  }
 0x3f7   : >> { %s4747_s29 = scalar_lea.vmem %s4725_s18, %s5522_s27 [#allocation6]   ;;  %s4748_s21 = scalar_lea.vmem %s4728_s6, %s5522_s27  }
 0x3fc PF: > { %s6857_s5 = smov 0  }
 0x3fd   : > { %s4749_s9 = sshllo.u32 %s6857_s5, %s7609_s26 }
 0x3fe   : > { %v4758_v32 = vld [vmem:[%s4569_s4] sm:%s4749_s9] }
 0x3ff   : > { %4759 = vst [vmem:[%s4571_s24] sm:%s4749_s9] %v4758_v32 }
 0x400 PF: > { %p5524_p1 = scmp.ge.u32.totalorder %s7605_s12, 8 }
 0x401   : > { %s6858_s10 = smov (!%p5524_p1), 0  }
 0x402   : > { %4370 = sbr.rel (%p5524_p1) target bundleno = 1033 (0x409), region = 56  ;;  %s4371_s23 = sshllo.u32 (!%p5524_p1), %s6858_s10, %s7605_s12 }
 0x403   : > { %v4380_v33 = vld [vmem:[%s7590_s11] sm:%s4371_s23] (!%p5524_p1) }
 0x404   : > { %4381 = vst [vmem:[%s7603_s7] sm:%s4371_s23] (!%p5524_p1), %v4380_v33 }
 0x409 PF: > { %s17_s17 = sadd.s32 1, %s6786_s17   ;;  %s8055_s12 = smov %s6770_s13 }
 0x40a   : > { %p14_p4 = scmp.ge.s32.totalorder %s17_s17, 7   ;;  %s8056_s13 = smov %s6774_s14 }
 0x40b   : > { %s8057_s14 = smov %s6934_s25  ;;  %s8058_s15 = smov %s6782_s16 }
 0x40c   : > { %s8059_s16 = smov %s8061_s19  ;;  %16 = sbr.rel (!%p14_p4) target bundleno = 5 (0x5), region = 209 }
 0x413   :  { %4773 = vsyncpa [#allocation3], 1 }
 0x414   :  { %4775 = vsyncpa [#allocation3 + $0x1], 1 }
 0x415   :  { %4776 = vsyncpa [#allocation5], 1 }
 0x416   :  { %4778 = vsyncpa [#allocation5 + $0x1], 1 }

// kernel: projector_forward.5
= control target key start
LH: loop header
LB: loop body
LE: loop exit
PB: predicated region body
PF: predicated region fallthrough
CT: control target
= control target key end

     0   :  { %s7064_s12 = smov 0   ;;  %s7066_s13 = smov 0   ;;  %s8821_s0 = inlined_call_operand.vmem [shape: f32[8,2176], index: 0, kind: input, shape index: {}]   ;;  %s8822_s1 = inlined_call_operand.vmem [shape: bf16[2176,1024], index: 1, kind: input, shape index: {}]   ;;  %s8823_s2 = inlined_call_operand.vmem [shape: f32[1,1024], index: 2, kind: input, shape index: {}]   ;;  %s8824_s3 = inlined_call_operand.vmem [shape: f32[8,1024], index: 3, kind: output, shape index: {}]  }
   0x1   :  { %s7068_s14 = smov 0   ;;  %s7070_s15 = smov 0  }
   0x2   :  { %s7072_s16 = smov 0  }
   0x3 LB: > { %s22_s17 = sadd.s32 1, %s7037_s15  ;;  %p65_p1 = scmp.ne.s32.totalorder %s7029_s13, %s7025_s12  ;;  %s7041_s16 = sphi %s7072_s16, %s13_s16   ;;  %s7037_s15 = sphi %s7070_s15, %s8828_s15   ;;  %s7033_s14 = sphi %s7068_s14, %s8827_s14   ;;  %s7029_s13 = sphi %s7066_s13, %s8826_s13   ;;  %s7025_s12 = sphi %s7064_s12, %s8825_s12  }
   0x4   : > { %p23_p0 = scmp.ge.s32.totalorder %s22_s17, 2  ;;  %p66_p2 = scmp.eq.s32.totalorder %s7041_s16, 0 }
   0x5   : > { %s58_s19 = sadd.s32 1, %s7029_s13  ;;  %p5522_p5 = scmp.ge.s32.totalorder %s7041_s16, 2 }
   0x6   : > { %s8830_s17 = smov (%p23_p0, %s22_s17), 0  ;;  %p67_p3 = por %p66_p2, %p65_p1 }
   0x7   : > { %s55_s18 = ssub.s32 %s7037_s15, %s8830_s17  ;;  %153 = sbr.rel (%p5522_p5) target bundleno = 290 (0x122), region = 20 }
   0x8   : > { %p56_p4 = scmp.eq.s32.totalorder %s55_s18, 0 }
   0xa   : > { %s7099_s20 = scalar_select %p56_p4, %s7029_s13, %s58_s19  }
   0xe   : > { %156 = sbr.rel (!%p67_p3) target bundleno = 290 (0x122), region = 24  ;;  %s158_s21 = sand.u32 (%p67_p3), 1, %s7029_s13  }
   0xf   : > { %s6075_s22 = sshll.u32 (%p67_p3), %s7037_s15, 4  ;;  %s6144_s23 = smul.u32 (%p67_p3), 4352, %s158_s21 }
  0x10   : > { %s7107_s26 = scalar_lea.vmem (%p67_p3), %s8822_s1, %s6075_s22 }
  0x11   : > { %v176_v0 = vld [vmem:[%s7107_s26] sm:$0xff] (%p67_p3)  ;;  %v178_v1 = vld [vmem:[%s7107_s26 + $0x8] sm:$0xff] (%p67_p3)  ;;  %s7115_s27 = scalar_lea.vmem (%p67_p3), [#allocation2], %s6144_s23 }
  0x12   : > { %v180_v2 = vld [vmem:[%s7107_s26 + $0x20] sm:$0xff] (%p67_p3)  ;;  %v182_v3 = vld [vmem:[%s7107_s26 + $0x28] sm:$0xff] (%p67_p3)  ;;  %177 = vst [vmem:[%s7115_s27] sm:$0xff] (%p67_p3), %v176_v0  ;;  %179 = vst [vmem:[%s7115_s27 + $0x8] sm:$0xff] (%p67_p3), %v178_v1 }
  0x13   : > { %v184_v4 = vld [vmem:[%s7107_s26 + $0x40] sm:$0xff] (%p67_p3)  ;;  %v186_v5 = vld [vmem:[%s7107_s26 + $0x48] sm:$0xff] (%p67_p3)  ;;  %181 = vst [vmem:[%s7115_s27 + $0x10] sm:$0xff] (%p67_p3), %v180_v2  ;;  %183 = vst [vmem:[%s7115_s27 + $0x18] sm:$0xff] (%p67_p3), %v182_v3 }
  0x14   : > { %185 = vst [vmem:[%s7115_s27 + $0x20] sm:$0xff] (%p67_p3), %v184_v4  ;;  %187 = vst [vmem:[%s7115_s27 + $0x28] sm:$0xff] (%p67_p3), %v186_v5  ;;  %v188_v6 = vld [vmem:[%s7107_s26 + $0x60] sm:$0xff] (%p67_p3)  ;;  %v190_v7 = vld [vmem:[%s7107_s26 + $0x68] sm:$0xff] (%p67_p3) }
  0x15   : > { %v192_v8 = vld [vmem:[%s7107_s26 + $0x80] sm:$0xff]  ;;  %189 = vst [vmem:[%s7115_s27 + $0x30] sm:$0xff] %v188_v6  ;;  %191 = vst [vmem:[%s7115_s27 + $0x38] sm:$0xff] %v190_v7  ;;  %v194_v9 = vld [vmem:[%s7107_s26 + $0x88] sm:$0xff] }
  0x16   : > { %193 = vst [vmem:[%s7115_s27 + $0x40] sm:$0xff] %v192_v8  ;;  %v196_v10 = vld [vmem:[%s7107_s26 + $0xa0] sm:$0xff]  ;;  %v198_v11 = vld [vmem:[%s7107_s26 + $0xa8] sm:$0xff]  ;;  %195 = vst [vmem:[%s7115_s27 + $0x48] sm:$0xff] %v194_v9 }
  0x17   : > { %197 = vst [vmem:[%s7115_s27 + $0x50] sm:$0xff] %v196_v10  ;;  %199 = vst [vmem:[%s7115_s27 + $0x58] sm:$0xff] %v198_v11  ;;  %v200_v12 = vld [vmem:[%s7107_s26 + $0xc0] sm:$0xff]  ;;  %v202_v13 = vld [vmem:[%s7107_s26 + $0xc8] sm:$0xff] }
  0x18   : > { %v204_v14 = vld [vmem:[%s7107_s26 + $0xe0] sm:$0xff]  ;;  %201 = vst [vmem:[%s7115_s27 + $0x60] sm:$0xff] %v200_v12  ;;  %203 = vst [vmem:[%s7115_s27 + $0x68] sm:$0xff] %v202_v13  ;;  %v206_v15 = vld [vmem:[%s7107_s26 + $0xe8] sm:$0xff] }
  0x19   : > { %205 = vst [vmem:[%s7115_s27 + $0x70] sm:$0xff] %v204_v14  ;;  %v208_v16 = vld [vmem:[%s7107_s26 + $0x100] sm:$0xff]  ;;  %v210_v17 = vld [vmem:[%s7107_s26 + $0x108] sm:$0xff]  ;;  %207 = vst [vmem:[%s7115_s27 + $0x78] sm:$0xff] %v206_v15 }
  0x1a   : > { %209 = vst [vmem:[%s7115_s27 + $0x80] sm:$0xff] %v208_v16  ;;  %211 = vst [vmem:[%s7115_s27 + $0x88] sm:$0xff] %v210_v17  ;;  %v212_v18 = vld [vmem:[%s7107_s26 + $0x120] sm:$0xff]  ;;  %v214_v19 = vld [vmem:[%s7107_s26 + $0x128] sm:$0xff] }
  0x1b   : > { %v216_v20 = vld [vmem:[%s7107_s26 + $0x140] sm:$0xff]  ;;  %213 = vst [vmem:[%s7115_s27 + $0x90] sm:$0xff] %v212_v18  ;;  %215 = vst [vmem:[%s7115_s27 + $0x98] sm:$0xff] %v214_v19  ;;  %v218_v21 = vld [vmem:[%s7107_s26 + $0x148] sm:$0xff] }
  0x1c   : > { %217 = vst [vmem:[%s7115_s27 + $0xa0] sm:$0xff] %v216_v20  ;;  %v220_v22 = vld [vmem:[%s7107_s26 + $0x160] sm:$0xff]  ;;  %v222_v23 = vld [vmem:[%s7107_s26 + $0x168] sm:$0xff]  ;;  %219 = vst [vmem:[%s7115_s27 + $0xa8] sm:$0xff] %v218_v21 }
  0x1d   : > { %221 = vst [vmem:[%s7115_s27 + $0xb0] sm:$0xff] %v220_v22  ;;  %223 = vst [vmem:[%s7115_s27 + $0xb8] sm:$0xff] %v222_v23  ;;  %v224_v24 = vld [vmem:[%s7107_s26 + $0x180] sm:$0xff]  ;;  %v226_v25 = vld [vmem:[%s7107_s26 + $0x188] sm:$0xff] }
  0x1e   : > { %v228_v26 = vld [vmem:[%s7107_s26 + $0x1a0] sm:$0xff]  ;;  %225 = vst [vmem:[%s7115_s27 + $0xc0] sm:$0xff] %v224_v24  ;;  %227 = vst [vmem:[%s7115_s27 + $0xc8] sm:$0xff] %v226_v25  ;;  %v230_v27 = vld [vmem:[%s7107_s26 + $0x1a8] sm:$0xff] }
  0x1f   : > { %229 = vst [vmem:[%s7115_s27 + $0xd0] sm:$0xff] %v228_v26  ;;  %v232_v28 = vld [vmem:[%s7107_s26 + $0x1c0] sm:$0xff]  ;;  %v234_v29 = vld [vmem:[%s7107_s26 + $0x1c8] sm:$0xff]  ;;  %231 = vst [vmem:[%s7115_s27 + $0xd8] sm:$0xff] %v230_v27 }
  0x20   : > { %233 = vst [vmem:[%s7115_s27 + $0xe0] sm:$0xff] %v232_v28  ;;  %235 = vst [vmem:[%s7115_s27 + $0xe8] sm:$0xff] %v234_v29  ;;  %v236_v30 = vld [vmem:[%s7107_s26 + $0x1e0] sm:$0xff]  ;;  %v238_v31 = vld [vmem:[%s7107_s26 + $0x1e8] sm:$0xff] }
  0x21   : > { %v240_v32 = vld [vmem:[%s7107_s26 + $0x200] sm:$0xff]  ;;  %237 = vst [vmem:[%s7115_s27 + $0xf0] sm:$0xff] %v236_v30  ;;  %239 = vst [vmem:[%s7115_s27 + $0xf8] sm:$0xff] %v238_v31  ;;  %v242_v33 = vld [vmem:[%s7107_s26 + $0x208] sm:$0xff] }
  0x22   : > { %241 = vst [vmem:[%s7115_s27 + $0x100] sm:$0xff] %v240_v32  ;;  %v244_v34 = vld [vmem:[%s7107_s26 + $0x220] sm:$0xff]  ;;  %v246_v35 = vld [vmem:[%s7107_s26 + $0x228] sm:$0xff]  ;;  %243 = vst [vmem:[%s7115_s27 + $0x108] sm:$0xff] %v242_v33 }
  0x23   : > { %245 = vst [vmem:[%s7115_s27 + $0x110] sm:$0xff] %v244_v34  ;;  %247 = vst [vmem:[%s7115_s27 + $0x118] sm:$0xff] %v246_v35  ;;  %v248_v36 = vld [vmem:[%s7107_s26 + $0x240] sm:$0xff]  ;;  %v250_v37 = vld [vmem:[%s7107_s26 + $0x248] sm:$0xff] }
  0x24   : > { %v252_v38 = vld [vmem:[%s7107_s26 + $0x260] sm:$0xff]  ;;  %249 = vst [vmem:[%s7115_s27 + $0x120] sm:$0xff] %v248_v36  ;;  %251 = vst [vmem:[%s7115_s27 + $0x128] sm:$0xff] %v250_v37  ;;  %v254_v39 = vld [vmem:[%s7107_s26 + $0x268] sm:$0xff] }
  0x25   : > { %253 = vst [vmem:[%s7115_s27 + $0x130] sm:$0xff] %v252_v38  ;;  %v256_v40 = vld [vmem:[%s7107_s26 + $0x280] sm:$0xff]  ;;  %v258_v41 = vld [vmem:[%s7107_s26 + $0x288] sm:$0xff]  ;;  %255 = vst [vmem:[%s7115_s27 + $0x138] sm:$0xff] %v254_v39 }
  0x26   : > { %257 = vst [vmem:[%s7115_s27 + $0x140] sm:$0xff] %v256_v40  ;;  %259 = vst [vmem:[%s7115_s27 + $0x148] sm:$0xff] %v258_v41  ;;  %v260_v42 = vld [vmem:[%s7107_s26 + $0x2a0] sm:$0xff]  ;;  %v262_v43 = vld [vmem:[%s7107_s26 + $0x2a8] sm:$0xff] }
  0x27   : > { %v264_v44 = vld [vmem:[%s7107_s26 + $0x2c0] sm:$0xff]  ;;  %261 = vst [vmem:[%s7115_s27 + $0x150] sm:$0xff] %v260_v42  ;;  %263 = vst [vmem:[%s7115_s27 + $0x158] sm:$0xff] %v262_v43  ;;  %v266_v45 = vld [vmem:[%s7107_s26 + $0x2c8] sm:$0xff] }
  0x28   : > { %265 = vst [vmem:[%s7115_s27 + $0x160] sm:$0xff] %v264_v44  ;;  %v268_v46 = vld [vmem:[%s7107_s26 + $0x2e0] sm:$0xff]  ;;  %v270_v47 = vld [vmem:[%s7107_s26 + $0x2e8] sm:$0xff]  ;;  %267 = vst [vmem:[%s7115_s27 + $0x168] sm:$0xff] %v266_v45 }
  0x29   : > { %269 = vst [vmem:[%s7115_s27 + $0x170] sm:$0xff] %v268_v46  ;;  %271 = vst [vmem:[%s7115_s27 + $0x178] sm:$0xff] %v270_v47  ;;  %v272_v48 = vld [vmem:[%s7107_s26 + $0x300] sm:$0xff]  ;;  %v274_v49 = vld [vmem:[%s7107_s26 + $0x308] sm:$0xff] }
  0x2a   : > { %v276_v50 = vld [vmem:[%s7107_s26 + $0x320] sm:$0xff]  ;;  %273 = vst [vmem:[%s7115_s27 + $0x180] sm:$0xff] %v272_v48  ;;  %275 = vst [vmem:[%s7115_s27 + $0x188] sm:$0xff] %v274_v49  ;;  %v278_v51 = vld [vmem:[%s7107_s26 + $0x328] sm:$0xff] }
  0x2b   : > { %277 = vst [vmem:[%s7115_s27 + $0x190] sm:$0xff] %v276_v50  ;;  %v280_v52 = vld [vmem:[%s7107_s26 + $0x340] sm:$0xff]  ;;  %v282_v53 = vld [vmem:[%s7107_s26 + $0x348] sm:$0xff]  ;;  %279 = vst [vmem:[%s7115_s27 + $0x198] sm:$0xff] %v278_v51 }
  0x2c   : > { %281 = vst [vmem:[%s7115_s27 + $0x1a0] sm:$0xff] %v280_v52  ;;  %283 = vst [vmem:[%s7115_s27 + $0x1a8] sm:$0xff] %v282_v53  ;;  %v284_v54 = vld [vmem:[%s7107_s26 + $0x360] sm:$0xff]  ;;  %v286_v55 = vld [vmem:[%s7107_s26 + $0x368] sm:$0xff] }
  0x2d   : > { %v288_v56 = vld [vmem:[%s7107_s26 + $0x380] sm:$0xff]  ;;  %285 = vst [vmem:[%s7115_s27 + $0x1b0] sm:$0xff] %v284_v54  ;;  %287 = vst [vmem:[%s7115_s27 + $0x1b8] sm:$0xff] %v286_v55  ;;  %v290_v57 = vld [vmem:[%s7107_s26 + $0x388] sm:$0xff] }
  0x2e   : > { %289 = vst [vmem:[%s7115_s27 + $0x1c0] sm:$0xff] %v288_v56  ;;  %v292_v58 = vld [vmem:[%s7107_s26 + $0x3a0] sm:$0xff]  ;;  %v294_v59 = vld [vmem:[%s7107_s26 + $0x3a8] sm:$0xff]  ;;  %291 = vst [vmem:[%s7115_s27 + $0x1c8] sm:$0xff] %v290_v57 }
  0x2f   : > { %293 = vst [vmem:[%s7115_s27 + $0x1d0] sm:$0xff] %v292_v58  ;;  %295 = vst [vmem:[%s7115_s27 + $0x1d8] sm:$0xff] %v294_v59  ;;  %v296_v60 = vld [vmem:[%s7107_s26 + $0x3c0] sm:$0xff]  ;;  %v298_v61 = vld [vmem:[%s7107_s26 + $0x3c8] sm:$0xff] }
  0x30   : > { %v300_v62 = vld [vmem:[%s7107_s26 + $0x3e0] sm:$0xff]  ;;  %297 = vst [vmem:[%s7115_s27 + $0x1e0] sm:$0xff] %v296_v60  ;;  %299 = vst [vmem:[%s7115_s27 + $0x1e8] sm:$0xff] %v298_v61  ;;  %v302_v63 = vld [vmem:[%s7107_s26 + $0x3e8] sm:$0xff] }
  0x31   : > { %301 = vst [vmem:[%s7115_s27 + $0x1f0] sm:$0xff] %v300_v62  ;;  %v304_v0 = vld [vmem:[%s7107_s26 + $0x400] sm:$0xff]  ;;  %v306_v1 = vld [vmem:[%s7107_s26 + $0x408] sm:$0xff]  ;;  %303 = vst [vmem:[%s7115_s27 + $0x1f8] sm:$0xff] %v302_v63 }
  0x32   : > { %305 = vst [vmem:[%s7115_s27 + $0x200] sm:$0xff] %v304_v0  ;;  %307 = vst [vmem:[%s7115_s27 + $0x208] sm:$0xff] %v306_v1  ;;  %v308_v2 = vld [vmem:[%s7107_s26 + $0x420] sm:$0xff]  ;;  %v310_v3 = vld [vmem:[%s7107_s26 + $0x428] sm:$0xff] }
  0x33   : > { %v312_v4 = vld [vmem:[%s7107_s26 + $0x440] sm:$0xff]  ;;  %309 = vst [vmem:[%s7115_s27 + $0x210] sm:$0xff] %v308_v2  ;;  %311 = vst [vmem:[%s7115_s27 + $0x218] sm:$0xff] %v310_v3  ;;  %v314_v5 = vld [vmem:[%s7107_s26 + $0x448] sm:$0xff] }
  0x34   : > { %313 = vst [vmem:[%s7115_s27 + $0x220] sm:$0xff] %v312_v4  ;;  %v316_v6 = vld [vmem:[%s7107_s26 + $0x460] sm:$0xff]  ;;  %v318_v7 = vld [vmem:[%s7107_s26 + $0x468] sm:$0xff]  ;;  %315 = vst [vmem:[%s7115_s27 + $0x228] sm:$0xff] %v314_v5 }
  0x35   : > { %317 = vst [vmem:[%s7115_s27 + $0x230] sm:$0xff] %v316_v6  ;;  %319 = vst [vmem:[%s7115_s27 + $0x238] sm:$0xff] %v318_v7  ;;  %v320_v8 = vld [vmem:[%s7107_s26 + $0x480] sm:$0xff]  ;;  %v322_v9 = vld [vmem:[%s7107_s26 + $0x488] sm:$0xff] }
  0x36   : > { %v324_v10 = vld [vmem:[%s7107_s26 + $0x4a0] sm:$0xff]  ;;  %321 = vst [vmem:[%s7115_s27 + $0x240] sm:$0xff] %v320_v8  ;;  %323 = vst [vmem:[%s7115_s27 + $0x248] sm:$0xff] %v322_v9  ;;  %v326_v11 = vld [vmem:[%s7107_s26 + $0x4a8] sm:$0xff] }
  0x37   : > { %325 = vst [vmem:[%s7115_s27 + $0x250] sm:$0xff] %v324_v10  ;;  %v328_v12 = vld [vmem:[%s7107_s26 + $0x4c0] sm:$0xff]  ;;  %v330_v13 = vld [vmem:[%s7107_s26 + $0x4c8] sm:$0xff]  ;;  %327 = vst [vmem:[%s7115_s27 + $0x258] sm:$0xff] %v326_v11 }
  0x38   : > { %329 = vst [vmem:[%s7115_s27 + $0x260] sm:$0xff] %v328_v12  ;;  %331 = vst [vmem:[%s7115_s27 + $0x268] sm:$0xff] %v330_v13  ;;  %v332_v14 = vld [vmem:[%s7107_s26 + $0x4e0] sm:$0xff]  ;;  %v334_v15 = vld [vmem:[%s7107_s26 + $0x4e8] sm:$0xff] }
  0x39   : > { %v336_v16 = vld [vmem:[%s7107_s26 + $0x500] sm:$0xff]  ;;  %333 = vst [vmem:[%s7115_s27 + $0x270] sm:$0xff] %v332_v14  ;;  %335 = vst [vmem:[%s7115_s27 + $0x278] sm:$0xff] %v334_v15  ;;  %v338_v17 = vld [vmem:[%s7107_s26 + $0x508] sm:$0xff] }
  0x3a   : > { %337 = vst [vmem:[%s7115_s27 + $0x280] sm:$0xff] %v336_v16  ;;  %v340_v18 = vld [vmem:[%s7107_s26 + $0x520] sm:$0xff]  ;;  %v342_v19 = vld [vmem:[%s7107_s26 + $0x528] sm:$0xff]  ;;  %339 = vst [vmem:[%s7115_s27 + $0x288] sm:$0xff] %v338_v17 }
  0x3b   : > { %341 = vst [vmem:[%s7115_s27 + $0x290] sm:$0xff] %v340_v18  ;;  %343 = vst [vmem:[%s7115_s27 + $0x298] sm:$0xff] %v342_v19  ;;  %v344_v20 = vld [vmem:[%s7107_s26 + $0x540] sm:$0xff]  ;;  %v346_v21 = vld [vmem:[%s7107_s26 + $0x548] sm:$0xff] }
  0x3c   : > { %v348_v22 = vld [vmem:[%s7107_s26 + $0x560] sm:$0xff]  ;;  %345 = vst [vmem:[%s7115_s27 + $0x2a0] sm:$0xff] %v344_v20  ;;  %347 = vst [vmem:[%s7115_s27 + $0x2a8] sm:$0xff] %v346_v21  ;;  %v350_v23 = vld [vmem:[%s7107_s26 + $0x568] sm:$0xff] }
  0x3d   : > { %349 = vst [vmem:[%s7115_s27 + $0x2b0] sm:$0xff] %v348_v22  ;;  %v352_v24 = vld [vmem:[%s7107_s26 + $0x580] sm:$0xff]  ;;  %v354_v25 = vld [vmem:[%s7107_s26 + $0x588] sm:$0xff]  ;;  %351 = vst [vmem:[%s7115_s27 + $0x2b8] sm:$0xff] %v350_v23 }
  0x3e   : > { %353 = vst [vmem:[%s7115_s27 + $0x2c0] sm:$0xff] %v352_v24  ;;  %355 = vst [vmem:[%s7115_s27 + $0x2c8] sm:$0xff] %v354_v25  ;;  %v356_v26 = vld [vmem:[%s7107_s26 + $0x5a0] sm:$0xff]  ;;  %v358_v27 = vld [vmem:[%s7107_s26 + $0x5a8] sm:$0xff] }
  0x3f   : > { %v360_v28 = vld [vmem:[%s7107_s26 + $0x5c0] sm:$0xff]  ;;  %357 = vst [vmem:[%s7115_s27 + $0x2d0] sm:$0xff] %v356_v26  ;;  %359 = vst [vmem:[%s7115_s27 + $0x2d8] sm:$0xff] %v358_v27  ;;  %v362_v29 = vld [vmem:[%s7107_s26 + $0x5c8] sm:$0xff] }
  0x40   : > { %361 = vst [vmem:[%s7115_s27 + $0x2e0] sm:$0xff] %v360_v28  ;;  %v364_v30 = vld [vmem:[%s7107_s26 + $0x5e0] sm:$0xff]  ;;  %v366_v31 = vld [vmem:[%s7107_s26 + $0x5e8] sm:$0xff]  ;;  %363 = vst [vmem:[%s7115_s27 + $0x2e8] sm:$0xff] %v362_v29 }
  0x41   : > { %365 = vst [vmem:[%s7115_s27 + $0x2f0] sm:$0xff] %v364_v30  ;;  %367 = vst [vmem:[%s7115_s27 + $0x2f8] sm:$0xff] %v366_v31  ;;  %v368_v32 = vld [vmem:[%s7107_s26 + $0x600] sm:$0xff]  ;;  %v370_v33 = vld [vmem:[%s7107_s26 + $0x608] sm:$0xff] }
  0x42   : > { %v372_v34 = vld [vmem:[%s7107_s26 + $0x620] sm:$0xff]  ;;  %369 = vst [vmem:[%s7115_s27 + $0x300] sm:$0xff] %v368_v32  ;;  %371 = vst [vmem:[%s7115_s27 + $0x308] sm:$0xff] %v370_v33  ;;  %v374_v35 = vld [vmem:[%s7107_s26 + $0x628] sm:$0xff] }
  0x43   : > { %373 = vst [vmem:[%s7115_s27 + $0x310] sm:$0xff] %v372_v34  ;;  %v376_v36 = vld [vmem:[%s7107_s26 + $0x640] sm:$0xff]  ;;  %v378_v37 = vld [vmem:[%s7107_s26 + $0x648] sm:$0xff]  ;;  %375 = vst [vmem:[%s7115_s27 + $0x318] sm:$0xff] %v374_v35 }
  0x44   : > { %377 = vst [vmem:[%s7115_s27 + $0x320] sm:$0xff] %v376_v36  ;;  %379 = vst [vmem:[%s7115_s27 + $0x328] sm:$0xff] %v378_v37  ;;  %v380_v38 = vld [vmem:[%s7107_s26 + $0x660] sm:$0xff]  ;;  %v382_v39 = vld [vmem:[%s7107_s26 + $0x668] sm:$0xff] }
  0x45   : > { %v384_v40 = vld [vmem:[%s7107_s26 + $0x680] sm:$0xff]  ;;  %381 = vst [vmem:[%s7115_s27 + $0x330] sm:$0xff] %v380_v38  ;;  %383 = vst [vmem:[%s7115_s27 + $0x338] sm:$0xff] %v382_v39  ;;  %v386_v41 = vld [vmem:[%s7107_s26 + $0x688] sm:$0xff] }
  0x46   : > { %385 = vst [vmem:[%s7115_s27 + $0x340] sm:$0xff] %v384_v40  ;;  %v388_v42 = vld [vmem:[%s7107_s26 + $0x6a0] sm:$0xff]  ;;  %v390_v43 = vld [vmem:[%s7107_s26 + $0x6a8] sm:$0xff]  ;;  %387 = vst [vmem:[%s7115_s27 + $0x348] sm:$0xff] %v386_v41 }
  0x47   : > { %389 = vst [vmem:[%s7115_s27 + $0x350] sm:$0xff] %v388_v42  ;;  %391 = vst [vmem:[%s7115_s27 + $0x358] sm:$0xff] %v390_v43  ;;  %v392_v44 = vld [vmem:[%s7107_s26 + $0x6c0] sm:$0xff]  ;;  %v394_v45 = vld [vmem:[%s7107_s26 + $0x6c8] sm:$0xff] }
  0x48   : > { %v396_v46 = vld [vmem:[%s7107_s26 + $0x6e0] sm:$0xff]  ;;  %393 = vst [vmem:[%s7115_s27 + $0x360] sm:$0xff] %v392_v44  ;;  %395 = vst [vmem:[%s7115_s27 + $0x368] sm:$0xff] %v394_v45  ;;  %v398_v47 = vld [vmem:[%s7107_s26 + $0x6e8] sm:$0xff] }
  0x49   : > { %397 = vst [vmem:[%s7115_s27 + $0x370] sm:$0xff] %v396_v46  ;;  %v400_v48 = vld [vmem:[%s7107_s26 + $0x700] sm:$0xff]  ;;  %v402_v49 = vld [vmem:[%s7107_s26 + $0x708] sm:$0xff]  ;;  %399 = vst [vmem:[%s7115_s27 + $0x378] sm:$0xff] %v398_v47 }
  0x4a   : > { %401 = vst [vmem:[%s7115_s27 + $0x380] sm:$0xff] %v400_v48  ;;  %403 = vst [vmem:[%s7115_s27 + $0x388] sm:$0xff] %v402_v49  ;;  %v404_v50 = vld [vmem:[%s7107_s26 + $0x720] sm:$0xff]  ;;  %v406_v51 = vld [vmem:[%s7107_s26 + $0x728] sm:$0xff] }
  0x4b   : > { %v408_v52 = vld [vmem:[%s7107_s26 + $0x740] sm:$0xff]  ;;  %405 = vst [vmem:[%s7115_s27 + $0x390] sm:$0xff] %v404_v50  ;;  %407 = vst [vmem:[%s7115_s27 + $0x398] sm:$0xff] %v406_v51  ;;  %v410_v53 = vld [vmem:[%s7107_s26 + $0x748] sm:$0xff] }
  0x4c   : > { %409 = vst [vmem:[%s7115_s27 + $0x3a0] sm:$0xff] %v408_v52  ;;  %v412_v54 = vld [vmem:[%s7107_s26 + $0x760] sm:$0xff]  ;;  %v414_v55 = vld [vmem:[%s7107_s26 + $0x768] sm:$0xff]  ;;  %411 = vst [vmem:[%s7115_s27 + $0x3a8] sm:$0xff] %v410_v53 }
  0x4d   : > { %413 = vst [vmem:[%s7115_s27 + $0x3b0] sm:$0xff] %v412_v54  ;;  %415 = vst [vmem:[%s7115_s27 + $0x3b8] sm:$0xff] %v414_v55  ;;  %v416_v56 = vld [vmem:[%s7107_s26 + $0x780] sm:$0xff]  ;;  %v418_v57 = vld [vmem:[%s7107_s26 + $0x788] sm:$0xff] }
  0x4e   : > { %v420_v58 = vld [vmem:[%s7107_s26 + $0x7a0] sm:$0xff]  ;;  %417 = vst [vmem:[%s7115_s27 + $0x3c0] sm:$0xff] %v416_v56  ;;  %419 = vst [vmem:[%s7115_s27 + $0x3c8] sm:$0xff] %v418_v57  ;;  %v422_v59 = vld [vmem:[%s7107_s26 + $0x7a8] sm:$0xff] }
  0x4f   : > { %421 = vst [vmem:[%s7115_s27 + $0x3d0] sm:$0xff] %v420_v58  ;;  %v424_v60 = vld [vmem:[%s7107_s26 + $0x7c0] sm:$0xff]  ;;  %v426_v61 = vld [vmem:[%s7107_s26 + $0x7c8] sm:$0xff]  ;;  %423 = vst [vmem:[%s7115_s27 + $0x3d8] sm:$0xff] %v422_v59 }
  0x50   : > { %425 = vst [vmem:[%s7115_s27 + $0x3e0] sm:$0xff] %v424_v60  ;;  %427 = vst [vmem:[%s7115_s27 + $0x3e8] sm:$0xff] %v426_v61  ;;  %v428_v62 = vld [vmem:[%s7107_s26 + $0x7e0] sm:$0xff]  ;;  %v430_v63 = vld [vmem:[%s7107_s26 + $0x7e8] sm:$0xff] }
  0x51   : > { %v432_v0 = vld [vmem:[%s7107_s26 + $0x800] sm:$0xff]  ;;  %429 = vst [vmem:[%s7115_s27 + $0x3f0] sm:$0xff] %v428_v62  ;;  %431 = vst [vmem:[%s7115_s27 + $0x3f8] sm:$0xff] %v430_v63  ;;  %v434_v1 = vld [vmem:[%s7107_s26 + $0x808] sm:$0xff] }
  0x52   : > { %433 = vst [vmem:[%s7115_s27 + $0x400] sm:$0xff] %v432_v0  ;;  %v436_v2 = vld [vmem:[%s7107_s26 + $0x820] sm:$0xff]  ;;  %v438_v3 = vld [vmem:[%s7107_s26 + $0x828] sm:$0xff]  ;;  %435 = vst [vmem:[%s7115_s27 + $0x408] sm:$0xff] %v434_v1 }
  0x53   : > { %437 = vst [vmem:[%s7115_s27 + $0x410] sm:$0xff] %v436_v2  ;;  %439 = vst [vmem:[%s7115_s27 + $0x418] sm:$0xff] %v438_v3  ;;  %v440_v4 = vld [vmem:[%s7107_s26 + $0x840] sm:$0xff]  ;;  %v442_v5 = vld [vmem:[%s7107_s26 + $0x848] sm:$0xff] }
  0x54   : > { %v444_v6 = vld [vmem:[%s7107_s26 + $0x860] sm:$0xff]  ;;  %441 = vst [vmem:[%s7115_s27 + $0x420] sm:$0xff] %v440_v4  ;;  %443 = vst [vmem:[%s7115_s27 + $0x428] sm:$0xff] %v442_v5  ;;  %v446_v7 = vld [vmem:[%s7107_s26 + $0x868] sm:$0xff] }
  0x55   : > { %445 = vst [vmem:[%s7115_s27 + $0x430] sm:$0xff] %v444_v6  ;;  %v448_v8 = vld [vmem:[%s7107_s26 + $0x880] sm:$0xff]  ;;  %v450_v9 = vld [vmem:[%s7107_s26 + $0x888] sm:$0xff]  ;;  %447 = vst [vmem:[%s7115_s27 + $0x438] sm:$0xff] %v446_v7 }
  0x56   : > { %449 = vst [vmem:[%s7115_s27 + $0x440] sm:$0xff] %v448_v8  ;;  %451 = vst [vmem:[%s7115_s27 + $0x448] sm:$0xff] %v450_v9  ;;  %v452_v10 = vld [vmem:[%s7107_s26 + $0x8a0] sm:$0xff]  ;;  %v454_v11 = vld [vmem:[%s7107_s26 + $0x8a8] sm:$0xff] }
  0x57   : > { %v456_v12 = vld [vmem:[%s7107_s26 + $0x8c0] sm:$0xff]  ;;  %453 = vst [vmem:[%s7115_s27 + $0x450] sm:$0xff] %v452_v10  ;;  %455 = vst [vmem:[%s7115_s27 + $0x458] sm:$0xff] %v454_v11  ;;  %v458_v13 = vld [vmem:[%s7107_s26 + $0x8c8] sm:$0xff] }
  0x58   : > { %457 = vst [vmem:[%s7115_s27 + $0x460] sm:$0xff] %v456_v12  ;;  %v460_v14 = vld [vmem:[%s7107_s26 + $0x8e0] sm:$0xff]  ;;  %v462_v15 = vld [vmem:[%s7107_s26 + $0x8e8] sm:$0xff]  ;;  %459 = vst [vmem:[%s7115_s27 + $0x468] sm:$0xff] %v458_v13 }
  0x59   : > { %461 = vst [vmem:[%s7115_s27 + $0x470] sm:$0xff] %v460_v14  ;;  %463 = vst [vmem:[%s7115_s27 + $0x478] sm:$0xff] %v462_v15  ;;  %v464_v16 = vld [vmem:[%s7107_s26 + $0x900] sm:$0xff]  ;;  %v466_v17 = vld [vmem:[%s7107_s26 + $0x908] sm:$0xff] }
  0x5a   : > { %v468_v18 = vld [vmem:[%s7107_s26 + $0x920] sm:$0xff]  ;;  %465 = vst [vmem:[%s7115_s27 + $0x480] sm:$0xff] %v464_v16  ;;  %467 = vst [vmem:[%s7115_s27 + $0x488] sm:$0xff] %v466_v17  ;;  %v470_v19 = vld [vmem:[%s7107_s26 + $0x928] sm:$0xff] }
  0x5b   : > { %469 = vst [vmem:[%s7115_s27 + $0x490] sm:$0xff] %v468_v18  ;;  %v472_v20 = vld [vmem:[%s7107_s26 + $0x940] sm:$0xff]  ;;  %v474_v21 = vld [vmem:[%s7107_s26 + $0x948] sm:$0xff]  ;;  %471 = vst [vmem:[%s7115_s27 + $0x498] sm:$0xff] %v470_v19 }
  0x5c   : > { %473 = vst [vmem:[%s7115_s27 + $0x4a0] sm:$0xff] %v472_v20  ;;  %475 = vst [vmem:[%s7115_s27 + $0x4a8] sm:$0xff] %v474_v21  ;;  %v476_v22 = vld [vmem:[%s7107_s26 + $0x960] sm:$0xff]  ;;  %v478_v23 = vld [vmem:[%s7107_s26 + $0x968] sm:$0xff] }
  0x5d   : > { %v480_v24 = vld [vmem:[%s7107_s26 + $0x980] sm:$0xff]  ;;  %477 = vst [vmem:[%s7115_s27 + $0x4b0] sm:$0xff] %v476_v22  ;;  %479 = vst [vmem:[%s7115_s27 + $0x4b8] sm:$0xff] %v478_v23  ;;  %v482_v25 = vld [vmem:[%s7107_s26 + $0x988] sm:$0xff] }
  0x5e   : > { %481 = vst [vmem:[%s7115_s27 + $0x4c0] sm:$0xff] %v480_v24  ;;  %v484_v26 = vld [vmem:[%s7107_s26 + $0x9a0] sm:$0xff]  ;;  %v486_v27 = vld [vmem:[%s7107_s26 + $0x9a8] sm:$0xff]  ;;  %483 = vst [vmem:[%s7115_s27 + $0x4c8] sm:$0xff] %v482_v25 }
  0x5f   : > { %485 = vst [vmem:[%s7115_s27 + $0x4d0] sm:$0xff] %v484_v26  ;;  %487 = vst [vmem:[%s7115_s27 + $0x4d8] sm:$0xff] %v486_v27  ;;  %v488_v28 = vld [vmem:[%s7107_s26 + $0x9c0] sm:$0xff]  ;;  %v490_v29 = vld [vmem:[%s7107_s26 + $0x9c8] sm:$0xff] }
  0x60   : > { %v492_v30 = vld [vmem:[%s7107_s26 + $0x9e0] sm:$0xff]  ;;  %489 = vst [vmem:[%s7115_s27 + $0x4e0] sm:$0xff] %v488_v28  ;;  %491 = vst [vmem:[%s7115_s27 + $0x4e8] sm:$0xff] %v490_v29  ;;  %v494_v31 = vld [vmem:[%s7107_s26 + $0x9e8] sm:$0xff] }
  0x61   : > { %493 = vst [vmem:[%s7115_s27 + $0x4f0] sm:$0xff] %v492_v30  ;;  %v496_v32 = vld [vmem:[%s7107_s26 + $0xa00] sm:$0xff]  ;;  %v498_v33 = vld [vmem:[%s7107_s26 + $0xa08] sm:$0xff]  ;;  %495 = vst [vmem:[%s7115_s27 + $0x4f8] sm:$0xff] %v494_v31 }
  0x62   : > { %497 = vst [vmem:[%s7115_s27 + $0x500] sm:$0xff] %v496_v32  ;;  %499 = vst [vmem:[%s7115_s27 + $0x508] sm:$0xff] %v498_v33  ;;  %v500_v34 = vld [vmem:[%s7107_s26 + $0xa20] sm:$0xff]  ;;  %v502_v35 = vld [vmem:[%s7107_s26 + $0xa28] sm:$0xff] }
  0x63   : > { %v504_v36 = vld [vmem:[%s7107_s26 + $0xa40] sm:$0xff]  ;;  %501 = vst [vmem:[%s7115_s27 + $0x510] sm:$0xff] %v500_v34  ;;  %503 = vst [vmem:[%s7115_s27 + $0x518] sm:$0xff] %v502_v35  ;;  %v506_v37 = vld [vmem:[%s7107_s26 + $0xa48] sm:$0xff] }
  0x64   : > { %505 = vst [vmem:[%s7115_s27 + $0x520] sm:$0xff] %v504_v36  ;;  %v508_v38 = vld [vmem:[%s7107_s26 + $0xa60] sm:$0xff]  ;;  %v510_v39 = vld [vmem:[%s7107_s26 + $0xa68] sm:$0xff]  ;;  %507 = vst [vmem:[%s7115_s27 + $0x528] sm:$0xff] %v506_v37 }
  0x65   : > { %509 = vst [vmem:[%s7115_s27 + $0x530] sm:$0xff] %v508_v38  ;;  %511 = vst [vmem:[%s7115_s27 + $0x538] sm:$0xff] %v510_v39  ;;  %v512_v40 = vld [vmem:[%s7107_s26 + $0xa80] sm:$0xff]  ;;  %v514_v41 = vld [vmem:[%s7107_s26 + $0xa88] sm:$0xff] }
  0x66   : > { %v516_v42 = vld [vmem:[%s7107_s26 + $0xaa0] sm:$0xff]  ;;  %513 = vst [vmem:[%s7115_s27 + $0x540] sm:$0xff] %v512_v40  ;;  %515 = vst [vmem:[%s7115_s27 + $0x548] sm:$0xff] %v514_v41  ;;  %v518_v43 = vld [vmem:[%s7107_s26 + $0xaa8] sm:$0xff] }
  0x67   : > { %517 = vst [vmem:[%s7115_s27 + $0x550] sm:$0xff] %v516_v42  ;;  %v520_v44 = vld [vmem:[%s7107_s26 + $0xac0] sm:$0xff]  ;;  %v522_v45 = vld [vmem:[%s7107_s26 + $0xac8] sm:$0xff]  ;;  %519 = vst [vmem:[%s7115_s27 + $0x558] sm:$0xff] %v518_v43 }
  0x68   : > { %521 = vst [vmem:[%s7115_s27 + $0x560] sm:$0xff] %v520_v44  ;;  %523 = vst [vmem:[%s7115_s27 + $0x568] sm:$0xff] %v522_v45  ;;  %v524_v46 = vld [vmem:[%s7107_s26 + $0xae0] sm:$0xff]  ;;  %v526_v47 = vld [vmem:[%s7107_s26 + $0xae8] sm:$0xff] }
  0x69   : > { %v528_v48 = vld [vmem:[%s7107_s26 + $0xb00] sm:$0xff]  ;;  %525 = vst [vmem:[%s7115_s27 + $0x570] sm:$0xff] %v524_v46  ;;  %527 = vst [vmem:[%s7115_s27 + $0x578] sm:$0xff] %v526_v47  ;;  %v530_v49 = vld [vmem:[%s7107_s26 + $0xb08] sm:$0xff] }
  0x6a   : > { %529 = vst [vmem:[%s7115_s27 + $0x580] sm:$0xff] %v528_v48  ;;  %v532_v50 = vld [vmem:[%s7107_s26 + $0xb20] sm:$0xff]  ;;  %v534_v51 = vld [vmem:[%s7107_s26 + $0xb28] sm:$0xff]  ;;  %531 = vst [vmem:[%s7115_s27 + $0x588] sm:$0xff] %v530_v49 }
  0x6b   : > { %533 = vst [vmem:[%s7115_s27 + $0x590] sm:$0xff] %v532_v50  ;;  %535 = vst [vmem:[%s7115_s27 + $0x598] sm:$0xff] %v534_v51  ;;  %v536_v52 = vld [vmem:[%s7107_s26 + $0xb40] sm:$0xff]  ;;  %v538_v53 = vld [vmem:[%s7107_s26 + $0xb48] sm:$0xff] }
  0x6c   : > { %v540_v54 = vld [vmem:[%s7107_s26 + $0xb60] sm:$0xff]  ;;  %537 = vst [vmem:[%s7115_s27 + $0x5a0] sm:$0xff] %v536_v52  ;;  %539 = vst [vmem:[%s7115_s27 + $0x5a8] sm:$0xff] %v538_v53  ;;  %v542_v55 = vld [vmem:[%s7107_s26 + $0xb68] sm:$0xff] }
  0x6d   : > { %541 = vst [vmem:[%s7115_s27 + $0x5b0] sm:$0xff] %v540_v54  ;;  %v544_v56 = vld [vmem:[%s7107_s26 + $0xb80] sm:$0xff]  ;;  %v546_v57 = vld [vmem:[%s7107_s26 + $0xb88] sm:$0xff]  ;;  %543 = vst [vmem:[%s7115_s27 + $0x5b8] sm:$0xff] %v542_v55 }
  0x6e   : > { %545 = vst [vmem:[%s7115_s27 + $0x5c0] sm:$0xff] %v544_v56  ;;  %547 = vst [vmem:[%s7115_s27 + $0x5c8] sm:$0xff] %v546_v57  ;;  %v548_v58 = vld [vmem:[%s7107_s26 + $0xba0] sm:$0xff]  ;;  %v550_v59 = vld [vmem:[%s7107_s26 + $0xba8] sm:$0xff] }
  0x6f   : > { %v552_v60 = vld [vmem:[%s7107_s26 + $0xbc0] sm:$0xff]  ;;  %549 = vst [vmem:[%s7115_s27 + $0x5d0] sm:$0xff] %v548_v58  ;;  %551 = vst [vmem:[%s7115_s27 + $0x5d8] sm:$0xff] %v550_v59  ;;  %v554_v61 = vld [vmem:[%s7107_s26 + $0xbc8] sm:$0xff] }
  0x70   : > { %553 = vst [vmem:[%s7115_s27 + $0x5e0] sm:$0xff] %v552_v60  ;;  %v556_v62 = vld [vmem:[%s7107_s26 + $0xbe0] sm:$0xff]  ;;  %v558_v63 = vld [vmem:[%s7107_s26 + $0xbe8] sm:$0xff]  ;;  %555 = vst [vmem:[%s7115_s27 + $0x5e8] sm:$0xff] %v554_v61 }
  0x71   : > { %557 = vst [vmem:[%s7115_s27 + $0x5f0] sm:$0xff] %v556_v62  ;;  %559 = vst [vmem:[%s7115_s27 + $0x5f8] sm:$0xff] %v558_v63  ;;  %v560_v0 = vld [vmem:[%s7107_s26 + $0xc00] sm:$0xff]  ;;  %v562_v1 = vld [vmem:[%s7107_s26 + $0xc08] sm:$0xff] }
  0x72   : > { %v564_v2 = vld [vmem:[%s7107_s26 + $0xc20] sm:$0xff]  ;;  %561 = vst [vmem:[%s7115_s27 + $0x600] sm:$0xff] %v560_v0  ;;  %563 = vst [vmem:[%s7115_s27 + $0x608] sm:$0xff] %v562_v1  ;;  %v566_v3 = vld [vmem:[%s7107_s26 + $0xc28] sm:$0xff] }
  0x73   : > { %565 = vst [vmem:[%s7115_s27 + $0x610] sm:$0xff] %v564_v2  ;;  %v568_v4 = vld [vmem:[%s7107_s26 + $0xc40] sm:$0xff]  ;;  %v570_v5 = vld [vmem:[%s7107_s26 + $0xc48] sm:$0xff]  ;;  %567 = vst [vmem:[%s7115_s27 + $0x618] sm:$0xff] %v566_v3 }
  0x74   : > { %569 = vst [vmem:[%s7115_s27 + $0x620] sm:$0xff] %v568_v4  ;;  %571 = vst [vmem:[%s7115_s27 + $0x628] sm:$0xff] %v570_v5  ;;  %v572_v6 = vld [vmem:[%s7107_s26 + $0xc60] sm:$0xff]  ;;  %v574_v7 = vld [vmem:[%s7107_s26 + $0xc68] sm:$0xff] }
  0x75   : > { %v576_v8 = vld [vmem:[%s7107_s26 + $0xc80] sm:$0xff]  ;;  %573 = vst [vmem:[%s7115_s27 + $0x630] sm:$0xff] %v572_v6  ;;  %575 = vst [vmem:[%s7115_s27 + $0x638] sm:$0xff] %v574_v7  ;;  %v578_v9 = vld [vmem:[%s7107_s26 + $0xc88] sm:$0xff] }
  0x76   : > { %577 = vst [vmem:[%s7115_s27 + $0x640] sm:$0xff] %v576_v8  ;;  %v580_v10 = vld [vmem:[%s7107_s26 + $0xca0] sm:$0xff]  ;;  %v582_v11 = vld [vmem:[%s7107_s26 + $0xca8] sm:$0xff]  ;;  %579 = vst [vmem:[%s7115_s27 + $0x648] sm:$0xff] %v578_v9 }
  0x77   : > { %581 = vst [vmem:[%s7115_s27 + $0x650] sm:$0xff] %v580_v10  ;;  %583 = vst [vmem:[%s7115_s27 + $0x658] sm:$0xff] %v582_v11  ;;  %v584_v12 = vld [vmem:[%s7107_s26 + $0xcc0] sm:$0xff]  ;;  %v586_v13 = vld [vmem:[%s7107_s26 + $0xcc8] sm:$0xff] }
  0x78   : > { %v588_v14 = vld [vmem:[%s7107_s26 + $0xce0] sm:$0xff]  ;;  %585 = vst [vmem:[%s7115_s27 + $0x660] sm:$0xff] %v584_v12  ;;  %587 = vst [vmem:[%s7115_s27 + $0x668] sm:$0xff] %v586_v13  ;;  %v590_v15 = vld [vmem:[%s7107_s26 + $0xce8] sm:$0xff] }
  0x79   : > { %589 = vst [vmem:[%s7115_s27 + $0x670] sm:$0xff] %v588_v14  ;;  %v592_v16 = vld [vmem:[%s7107_s26 + $0xd00] sm:$0xff]  ;;  %v594_v17 = vld [vmem:[%s7107_s26 + $0xd08] sm:$0xff]  ;;  %591 = vst [vmem:[%s7115_s27 + $0x678] sm:$0xff] %v590_v15 }
  0x7a   : > { %593 = vst [vmem:[%s7115_s27 + $0x680] sm:$0xff] %v592_v16  ;;  %595 = vst [vmem:[%s7115_s27 + $0x688] sm:$0xff] %v594_v17  ;;  %v596_v18 = vld [vmem:[%s7107_s26 + $0xd20] sm:$0xff]  ;;  %v598_v19 = vld [vmem:[%s7107_s26 + $0xd28] sm:$0xff] }
  0x7b   : > { %v600_v20 = vld [vmem:[%s7107_s26 + $0xd40] sm:$0xff]  ;;  %597 = vst [vmem:[%s7115_s27 + $0x690] sm:$0xff] %v596_v18  ;;  %599 = vst [vmem:[%s7115_s27 + $0x698] sm:$0xff] %v598_v19  ;;  %v602_v21 = vld [vmem:[%s7107_s26 + $0xd48] sm:$0xff] }
  0x7c   : > { %601 = vst [vmem:[%s7115_s27 + $0x6a0] sm:$0xff] %v600_v20  ;;  %v604_v22 = vld [vmem:[%s7107_s26 + $0xd60] sm:$0xff]  ;;  %v606_v23 = vld [vmem:[%s7107_s26 + $0xd68] sm:$0xff]  ;;  %603 = vst [vmem:[%s7115_s27 + $0x6a8] sm:$0xff] %v602_v21 }
  0x7d   : > { %605 = vst [vmem:[%s7115_s27 + $0x6b0] sm:$0xff] %v604_v22  ;;  %607 = vst [vmem:[%s7115_s27 + $0x6b8] sm:$0xff] %v606_v23  ;;  %v608_v24 = vld [vmem:[%s7107_s26 + $0xd80] sm:$0xff]  ;;  %v610_v25 = vld [vmem:[%s7107_s26 + $0xd88] sm:$0xff] }
  0x7e   : > { %v612_v26 = vld [vmem:[%s7107_s26 + $0xda0] sm:$0xff]  ;;  %609 = vst [vmem:[%s7115_s27 + $0x6c0] sm:$0xff] %v608_v24  ;;  %611 = vst [vmem:[%s7115_s27 + $0x6c8] sm:$0xff] %v610_v25  ;;  %v614_v27 = vld [vmem:[%s7107_s26 + $0xda8] sm:$0xff] }
  0x7f   : > { %613 = vst [vmem:[%s7115_s27 + $0x6d0] sm:$0xff] %v612_v26  ;;  %v616_v28 = vld [vmem:[%s7107_s26 + $0xdc0] sm:$0xff]  ;;  %v618_v29 = vld [vmem:[%s7107_s26 + $0xdc8] sm:$0xff]  ;;  %615 = vst [vmem:[%s7115_s27 + $0x6d8] sm:$0xff] %v614_v27 }
  0x80   : > { %617 = vst [vmem:[%s7115_s27 + $0x6e0] sm:$0xff] %v616_v28  ;;  %619 = vst [vmem:[%s7115_s27 + $0x6e8] sm:$0xff] %v618_v29  ;;  %v620_v30 = vld [vmem:[%s7107_s26 + $0xde0] sm:$0xff]  ;;  %v622_v31 = vld [vmem:[%s7107_s26 + $0xde8] sm:$0xff] }
  0x81   : > { %v624_v32 = vld [vmem:[%s7107_s26 + $0xe00] sm:$0xff]  ;;  %621 = vst [vmem:[%s7115_s27 + $0x6f0] sm:$0xff] %v620_v30  ;;  %623 = vst [vmem:[%s7115_s27 + $0x6f8] sm:$0xff] %v622_v31  ;;  %v626_v33 = vld [vmem:[%s7107_s26 + $0xe08] sm:$0xff] }
  0x82   : > { %625 = vst [vmem:[%s7115_s27 + $0x700] sm:$0xff] %v624_v32  ;;  %v628_v34 = vld [vmem:[%s7107_s26 + $0xe20] sm:$0xff]  ;;  %v630_v35 = vld [vmem:[%s7107_s26 + $0xe28] sm:$0xff]  ;;  %627 = vst [vmem:[%s7115_s27 + $0x708] sm:$0xff] %v626_v33 }
  0x83   : > { %629 = vst [vmem:[%s7115_s27 + $0x710] sm:$0xff] %v628_v34  ;;  %631 = vst [vmem:[%s7115_s27 + $0x718] sm:$0xff] %v630_v35  ;;  %v632_v36 = vld [vmem:[%s7107_s26 + $0xe40] sm:$0xff]  ;;  %v634_v37 = vld [vmem:[%s7107_s26 + $0xe48] sm:$0xff] }
  0x84   : > { %v636_v38 = vld [vmem:[%s7107_s26 + $0xe60] sm:$0xff]  ;;  %633 = vst [vmem:[%s7115_s27 + $0x720] sm:$0xff] %v632_v36  ;;  %635 = vst [vmem:[%s7115_s27 + $0x728] sm:$0xff] %v634_v37  ;;  %v638_v39 = vld [vmem:[%s7107_s26 + $0xe68] sm:$0xff] }
  0x85   : > { %637 = vst [vmem:[%s7115_s27 + $0x730] sm:$0xff] %v636_v38  ;;  %v640_v40 = vld [vmem:[%s7107_s26 + $0xe80] sm:$0xff]  ;;  %v642_v41 = vld [vmem:[%s7107_s26 + $0xe88] sm:$0xff]  ;;  %639 = vst [vmem:[%s7115_s27 + $0x738] sm:$0xff] %v638_v39 }
  0x86   : > { %641 = vst [vmem:[%s7115_s27 + $0x740] sm:$0xff] %v640_v40  ;;  %643 = vst [vmem:[%s7115_s27 + $0x748] sm:$0xff] %v642_v41  ;;  %v644_v42 = vld [vmem:[%s7107_s26 + $0xea0] sm:$0xff]  ;;  %v646_v43 = vld [vmem:[%s7107_s26 + $0xea8] sm:$0xff] }
  0x87   : > { %v648_v44 = vld [vmem:[%s7107_s26 + $0xec0] sm:$0xff]  ;;  %645 = vst [vmem:[%s7115_s27 + $0x750] sm:$0xff] %v644_v42  ;;  %647 = vst [vmem:[%s7115_s27 + $0x758] sm:$0xff] %v646_v43  ;;  %v650_v45 = vld [vmem:[%s7107_s26 + $0xec8] sm:$0xff] }
  0x88   : > { %649 = vst [vmem:[%s7115_s27 + $0x760] sm:$0xff] %v648_v44  ;;  %v652_v46 = vld [vmem:[%s7107_s26 + $0xee0] sm:$0xff]  ;;  %v654_v47 = vld [vmem:[%s7107_s26 + $0xee8] sm:$0xff]  ;;  %651 = vst [vmem:[%s7115_s27 + $0x768] sm:$0xff] %v650_v45 }
  0x89   : > { %653 = vst [vmem:[%s7115_s27 + $0x770] sm:$0xff] %v652_v46  ;;  %655 = vst [vmem:[%s7115_s27 + $0x778] sm:$0xff] %v654_v47  ;;  %v656_v48 = vld [vmem:[%s7107_s26 + $0xf00] sm:$0xff]  ;;  %v658_v49 = vld [vmem:[%s7107_s26 + $0xf08] sm:$0xff] }
  0x8a   : > { %v660_v50 = vld [vmem:[%s7107_s26 + $0xf20] sm:$0xff]  ;;  %657 = vst [vmem:[%s7115_s27 + $0x780] sm:$0xff] %v656_v48  ;;  %659 = vst [vmem:[%s7115_s27 + $0x788] sm:$0xff] %v658_v49  ;;  %v662_v51 = vld [vmem:[%s7107_s26 + $0xf28] sm:$0xff] }
  0x8b   : > { %661 = vst [vmem:[%s7115_s27 + $0x790] sm:$0xff] %v660_v50  ;;  %v664_v52 = vld [vmem:[%s7107_s26 + $0xf40] sm:$0xff]  ;;  %v666_v53 = vld [vmem:[%s7107_s26 + $0xf48] sm:$0xff]  ;;  %663 = vst [vmem:[%s7115_s27 + $0x798] sm:$0xff] %v662_v51 }
  0x8c   : > { %665 = vst [vmem:[%s7115_s27 + $0x7a0] sm:$0xff] %v664_v52  ;;  %667 = vst [vmem:[%s7115_s27 + $0x7a8] sm:$0xff] %v666_v53  ;;  %v668_v54 = vld [vmem:[%s7107_s26 + $0xf60] sm:$0xff]  ;;  %v670_v55 = vld [vmem:[%s7107_s26 + $0xf68] sm:$0xff] }
  0x8d   : > { %v672_v56 = vld [vmem:[%s7107_s26 + $0xf80] sm:$0xff]  ;;  %669 = vst [vmem:[%s7115_s27 + $0x7b0] sm:$0xff] %v668_v54  ;;  %671 = vst [vmem:[%s7115_s27 + $0x7b8] sm:$0xff] %v670_v55  ;;  %v674_v57 = vld [vmem:[%s7107_s26 + $0xf88] sm:$0xff] }
  0x8e   : > { %673 = vst [vmem:[%s7115_s27 + $0x7c0] sm:$0xff] %v672_v56  ;;  %v676_v58 = vld [vmem:[%s7107_s26 + $0xfa0] sm:$0xff]  ;;  %v678_v59 = vld [vmem:[%s7107_s26 + $0xfa8] sm:$0xff]  ;;  %675 = vst [vmem:[%s7115_s27 + $0x7c8] sm:$0xff] %v674_v57 }
  0x8f   : > { %677 = vst [vmem:[%s7115_s27 + $0x7d0] sm:$0xff] %v676_v58  ;;  %679 = vst [vmem:[%s7115_s27 + $0x7d8] sm:$0xff] %v678_v59  ;;  %v680_v60 = vld [vmem:[%s7107_s26 + $0xfc0] sm:$0xff]  ;;  %v682_v61 = vld [vmem:[%s7107_s26 + $0xfc8] sm:$0xff] }
  0x90   : > { %v684_v62 = vld [vmem:[%s7107_s26 + $0xfe0] sm:$0xff]  ;;  %681 = vst [vmem:[%s7115_s27 + $0x7e0] sm:$0xff] %v680_v60  ;;  %683 = vst [vmem:[%s7115_s27 + $0x7e8] sm:$0xff] %v682_v61  ;;  %v686_v63 = vld [vmem:[%s7107_s26 + $0xfe8] sm:$0xff] }
  0x91   : > { %685 = vst [vmem:[%s7115_s27 + $0x7f0] sm:$0xff] %v684_v62  ;;  %v688_v0 = vld [vmem:[%s7107_s26 + $0x1000] sm:$0xff]  ;;  %v690_v1 = vld [vmem:[%s7107_s26 + $0x1008] sm:$0xff]  ;;  %687 = vst [vmem:[%s7115_s27 + $0x7f8] sm:$0xff] %v686_v63 }
  0x92   : > { %689 = vst [vmem:[%s7115_s27 + $0x800] sm:$0xff] %v688_v0  ;;  %691 = vst [vmem:[%s7115_s27 + $0x808] sm:$0xff] %v690_v1  ;;  %v692_v2 = vld [vmem:[%s7107_s26 + $0x1020] sm:$0xff]  ;;  %v694_v3 = vld [vmem:[%s7107_s26 + $0x1028] sm:$0xff] }
  0x93   : > { %v696_v4 = vld [vmem:[%s7107_s26 + $0x1040] sm:$0xff]  ;;  %693 = vst [vmem:[%s7115_s27 + $0x810] sm:$0xff] %v692_v2  ;;  %695 = vst [vmem:[%s7115_s27 + $0x818] sm:$0xff] %v694_v3  ;;  %v698_v5 = vld [vmem:[%s7107_s26 + $0x1048] sm:$0xff] }
  0x94   : > { %697 = vst [vmem:[%s7115_s27 + $0x820] sm:$0xff] %v696_v4  ;;  %v700_v6 = vld [vmem:[%s7107_s26 + $0x1060] sm:$0xff]  ;;  %v702_v7 = vld [vmem:[%s7107_s26 + $0x1068] sm:$0xff]  ;;  %699 = vst [vmem:[%s7115_s27 + $0x828] sm:$0xff] %v698_v5 }
  0x95   : > { %701 = vst [vmem:[%s7115_s27 + $0x830] sm:$0xff] %v700_v6  ;;  %703 = vst [vmem:[%s7115_s27 + $0x838] sm:$0xff] %v702_v7  ;;  %v704_v8 = vld [vmem:[%s7107_s26 + $0x1080] sm:$0xff]  ;;  %v706_v9 = vld [vmem:[%s7107_s26 + $0x1088] sm:$0xff] }
  0x96   : > { %v708_v10 = vld [vmem:[%s7107_s26 + $0x10a0] sm:$0xff]  ;;  %705 = vst [vmem:[%s7115_s27 + $0x840] sm:$0xff] %v704_v8  ;;  %707 = vst [vmem:[%s7115_s27 + $0x848] sm:$0xff] %v706_v9  ;;  %v710_v11 = vld [vmem:[%s7107_s26 + $0x10a8] sm:$0xff] }
  0x97   : > { %709 = vst [vmem:[%s7115_s27 + $0x850] sm:$0xff] %v708_v10  ;;  %v712_v12 = vld [vmem:[%s7107_s26 + $0x10c0] sm:$0xff]  ;;  %v714_v13 = vld [vmem:[%s7107_s26 + $0x10c8] sm:$0xff]  ;;  %711 = vst [vmem:[%s7115_s27 + $0x858] sm:$0xff] %v710_v11 }
  0x98   : > { %713 = vst [vmem:[%s7115_s27 + $0x860] sm:$0xff] %v712_v12  ;;  %715 = vst [vmem:[%s7115_s27 + $0x868] sm:$0xff] %v714_v13  ;;  %v716_v14 = vld [vmem:[%s7107_s26 + $0x10e0] sm:$0xff]  ;;  %v718_v15 = vld [vmem:[%s7107_s26 + $0x10e8] sm:$0xff] }
  0x99   : > { %v720_v16 = vld [vmem:[%s7107_s26 + $0x1100] sm:$0xff]  ;;  %717 = vst [vmem:[%s7115_s27 + $0x870] sm:$0xff] %v716_v14  ;;  %719 = vst [vmem:[%s7115_s27 + $0x878] sm:$0xff] %v718_v15  ;;  %v722_v17 = vld [vmem:[%s7107_s26 + $0x1108] sm:$0xff] }
  0x9a   : > { %721 = vst [vmem:[%s7115_s27 + $0x880] sm:$0xff] %v720_v16  ;;  %v724_v18 = vld [vmem:[%s7107_s26 + $0x1120] sm:$0xff]  ;;  %v726_v19 = vld [vmem:[%s7107_s26 + $0x1128] sm:$0xff]  ;;  %723 = vst [vmem:[%s7115_s27 + $0x888] sm:$0xff] %v722_v17 }
  0x9b   : > { %725 = vst [vmem:[%s7115_s27 + $0x890] sm:$0xff] %v724_v18  ;;  %727 = vst [vmem:[%s7115_s27 + $0x898] sm:$0xff] %v726_v19  ;;  %v728_v20 = vld [vmem:[%s7107_s26 + $0x1140] sm:$0xff]  ;;  %v730_v21 = vld [vmem:[%s7107_s26 + $0x1148] sm:$0xff] }
  0x9c   : > { %v732_v22 = vld [vmem:[%s7107_s26 + $0x1160] sm:$0xff]  ;;  %729 = vst [vmem:[%s7115_s27 + $0x8a0] sm:$0xff] %v728_v20  ;;  %731 = vst [vmem:[%s7115_s27 + $0x8a8] sm:$0xff] %v730_v21  ;;  %v734_v23 = vld [vmem:[%s7107_s26 + $0x1168] sm:$0xff] }
  0x9d   : > { %733 = vst [vmem:[%s7115_s27 + $0x8b0] sm:$0xff] %v732_v22  ;;  %v736_v24 = vld [vmem:[%s7107_s26 + $0x1180] sm:$0xff]  ;;  %v738_v25 = vld [vmem:[%s7107_s26 + $0x1188] sm:$0xff]  ;;  %735 = vst [vmem:[%s7115_s27 + $0x8b8] sm:$0xff] %v734_v23 }
  0x9e   : > { %737 = vst [vmem:[%s7115_s27 + $0x8c0] sm:$0xff] %v736_v24  ;;  %739 = vst [vmem:[%s7115_s27 + $0x8c8] sm:$0xff] %v738_v25  ;;  %v740_v26 = vld [vmem:[%s7107_s26 + $0x11a0] sm:$0xff]  ;;  %v742_v27 = vld [vmem:[%s7107_s26 + $0x11a8] sm:$0xff] }
  0x9f   : > { %v744_v28 = vld [vmem:[%s7107_s26 + $0x11c0] sm:$0xff]  ;;  %741 = vst [vmem:[%s7115_s27 + $0x8d0] sm:$0xff] %v740_v26  ;;  %743 = vst [vmem:[%s7115_s27 + $0x8d8] sm:$0xff] %v742_v27  ;;  %v746_v29 = vld [vmem:[%s7107_s26 + $0x11c8] sm:$0xff] }
  0xa0   : > { %745 = vst [vmem:[%s7115_s27 + $0x8e0] sm:$0xff] %v744_v28  ;;  %v748_v30 = vld [vmem:[%s7107_s26 + $0x11e0] sm:$0xff]  ;;  %v750_v31 = vld [vmem:[%s7107_s26 + $0x11e8] sm:$0xff]  ;;  %747 = vst [vmem:[%s7115_s27 + $0x8e8] sm:$0xff] %v746_v29 }
  0xa1   : > { %749 = vst [vmem:[%s7115_s27 + $0x8f0] sm:$0xff] %v748_v30  ;;  %751 = vst [vmem:[%s7115_s27 + $0x8f8] sm:$0xff] %v750_v31  ;;  %v752_v32 = vld [vmem:[%s7107_s26 + $0x1200] sm:$0xff]  ;;  %v754_v33 = vld [vmem:[%s7107_s26 + $0x1208] sm:$0xff] }
  0xa2   : > { %v756_v34 = vld [vmem:[%s7107_s26 + $0x1220] sm:$0xff]  ;;  %753 = vst [vmem:[%s7115_s27 + $0x900] sm:$0xff] %v752_v32  ;;  %755 = vst [vmem:[%s7115_s27 + $0x908] sm:$0xff] %v754_v33  ;;  %v758_v35 = vld [vmem:[%s7107_s26 + $0x1228] sm:$0xff] }
  0xa3   : > { %757 = vst [vmem:[%s7115_s27 + $0x910] sm:$0xff] %v756_v34  ;;  %v760_v36 = vld [vmem:[%s7107_s26 + $0x1240] sm:$0xff]  ;;  %v762_v37 = vld [vmem:[%s7107_s26 + $0x1248] sm:$0xff]  ;;  %759 = vst [vmem:[%s7115_s27 + $0x918] sm:$0xff] %v758_v35 }
  0xa4   : > { %761 = vst [vmem:[%s7115_s27 + $0x920] sm:$0xff] %v760_v36  ;;  %763 = vst [vmem:[%s7115_s27 + $0x928] sm:$0xff] %v762_v37  ;;  %v764_v38 = vld [vmem:[%s7107_s26 + $0x1260] sm:$0xff]  ;;  %v766_v39 = vld [vmem:[%s7107_s26 + $0x1268] sm:$0xff] }
  0xa5   : > { %v768_v40 = vld [vmem:[%s7107_s26 + $0x1280] sm:$0xff]  ;;  %765 = vst [vmem:[%s7115_s27 + $0x930] sm:$0xff] %v764_v38  ;;  %767 = vst [vmem:[%s7115_s27 + $0x938] sm:$0xff] %v766_v39  ;;  %v770_v41 = vld [vmem:[%s7107_s26 + $0x1288] sm:$0xff] }
  0xa6   : > { %769 = vst [vmem:[%s7115_s27 + $0x940] sm:$0xff] %v768_v40  ;;  %v772_v42 = vld [vmem:[%s7107_s26 + $0x12a0] sm:$0xff]  ;;  %v774_v43 = vld [vmem:[%s7107_s26 + $0x12a8] sm:$0xff]  ;;  %771 = vst [vmem:[%s7115_s27 + $0x948] sm:$0xff] %v770_v41 }
  0xa7   : > { %773 = vst [vmem:[%s7115_s27 + $0x950] sm:$0xff] %v772_v42  ;;  %775 = vst [vmem:[%s7115_s27 + $0x958] sm:$0xff] %v774_v43  ;;  %v776_v44 = vld [vmem:[%s7107_s26 + $0x12c0] sm:$0xff]  ;;  %v778_v45 = vld [vmem:[%s7107_s26 + $0x12c8] sm:$0xff] }
  0xa8   : > { %v780_v46 = vld [vmem:[%s7107_s26 + $0x12e0] sm:$0xff]  ;;  %777 = vst [vmem:[%s7115_s27 + $0x960] sm:$0xff] %v776_v44  ;;  %779 = vst [vmem:[%s7115_s27 + $0x968] sm:$0xff] %v778_v45  ;;  %v782_v47 = vld [vmem:[%s7107_s26 + $0x12e8] sm:$0xff] }
  0xa9   : > { %781 = vst [vmem:[%s7115_s27 + $0x970] sm:$0xff] %v780_v46  ;;  %v784_v48 = vld [vmem:[%s7107_s26 + $0x1300] sm:$0xff]  ;;  %v786_v49 = vld [vmem:[%s7107_s26 + $0x1308] sm:$0xff]  ;;  %783 = vst [vmem:[%s7115_s27 + $0x978] sm:$0xff] %v782_v47 }
  0xaa   : > { %785 = vst [vmem:[%s7115_s27 + $0x980] sm:$0xff] %v784_v48  ;;  %787 = vst [vmem:[%s7115_s27 + $0x988] sm:$0xff] %v786_v49  ;;  %v788_v50 = vld [vmem:[%s7107_s26 + $0x1320] sm:$0xff]  ;;  %v790_v51 = vld [vmem:[%s7107_s26 + $0x1328] sm:$0xff] }
  0xab   : > { %v792_v52 = vld [vmem:[%s7107_s26 + $0x1340] sm:$0xff]  ;;  %789 = vst [vmem:[%s7115_s27 + $0x990] sm:$0xff] %v788_v50  ;;  %791 = vst [vmem:[%s7115_s27 + $0x998] sm:$0xff] %v790_v51  ;;  %v794_v53 = vld [vmem:[%s7107_s26 + $0x1348] sm:$0xff] }
  0xac   : > { %793 = vst [vmem:[%s7115_s27 + $0x9a0] sm:$0xff] %v792_v52  ;;  %v796_v54 = vld [vmem:[%s7107_s26 + $0x1360] sm:$0xff]  ;;  %v798_v55 = vld [vmem:[%s7107_s26 + $0x1368] sm:$0xff]  ;;  %795 = vst [vmem:[%s7115_s27 + $0x9a8] sm:$0xff] %v794_v53 }
  0xad   : > { %797 = vst [vmem:[%s7115_s27 + $0x9b0] sm:$0xff] %v796_v54  ;;  %799 = vst [vmem:[%s7115_s27 + $0x9b8] sm:$0xff] %v798_v55  ;;  %v800_v56 = vld [vmem:[%s7107_s26 + $0x1380] sm:$0xff]  ;;  %v802_v57 = vld [vmem:[%s7107_s26 + $0x1388] sm:$0xff] }
  0xae   : > { %v804_v58 = vld [vmem:[%s7107_s26 + $0x13a0] sm:$0xff]  ;;  %801 = vst [vmem:[%s7115_s27 + $0x9c0] sm:$0xff] %v800_v56  ;;  %803 = vst [vmem:[%s7115_s27 + $0x9c8] sm:$0xff] %v802_v57  ;;  %v806_v59 = vld [vmem:[%s7107_s26 + $0x13a8] sm:$0xff] }
  0xaf   : > { %805 = vst [vmem:[%s7115_s27 + $0x9d0] sm:$0xff] %v804_v58  ;;  %v808_v60 = vld [vmem:[%s7107_s26 + $0x13c0] sm:$0xff]  ;;  %v810_v61 = vld [vmem:[%s7107_s26 + $0x13c8] sm:$0xff]  ;;  %807 = vst [vmem:[%s7115_s27 + $0x9d8] sm:$0xff] %v806_v59 }
  0xb0   : > { %809 = vst [vmem:[%s7115_s27 + $0x9e0] sm:$0xff] %v808_v60  ;;  %811 = vst [vmem:[%s7115_s27 + $0x9e8] sm:$0xff] %v810_v61  ;;  %v812_v62 = vld [vmem:[%s7107_s26 + $0x13e0] sm:$0xff]  ;;  %v814_v63 = vld [vmem:[%s7107_s26 + $0x13e8] sm:$0xff] }
  0xb1   : > { %v816_v0 = vld [vmem:[%s7107_s26 + $0x1400] sm:$0xff]  ;;  %813 = vst [vmem:[%s7115_s27 + $0x9f0] sm:$0xff] %v812_v62  ;;  %815 = vst [vmem:[%s7115_s27 + $0x9f8] sm:$0xff] %v814_v63  ;;  %v818_v1 = vld [vmem:[%s7107_s26 + $0x1408] sm:$0xff] }
  0xb2   : > { %817 = vst [vmem:[%s7115_s27 + $0xa00] sm:$0xff] %v816_v0  ;;  %v820_v2 = vld [vmem:[%s7107_s26 + $0x1420] sm:$0xff]  ;;  %v822_v3 = vld [vmem:[%s7107_s26 + $0x1428] sm:$0xff]  ;;  %819 = vst [vmem:[%s7115_s27 + $0xa08] sm:$0xff] %v818_v1 }
  0xb3   : > { %821 = vst [vmem:[%s7115_s27 + $0xa10] sm:$0xff] %v820_v2  ;;  %823 = vst [vmem:[%s7115_s27 + $0xa18] sm:$0xff] %v822_v3  ;;  %v824_v4 = vld [vmem:[%s7107_s26 + $0x1440] sm:$0xff]  ;;  %v826_v5 = vld [vmem:[%s7107_s26 + $0x1448] sm:$0xff] }
  0xb4   : > { %v828_v6 = vld [vmem:[%s7107_s26 + $0x1460] sm:$0xff]  ;;  %825 = vst [vmem:[%s7115_s27 + $0xa20] sm:$0xff] %v824_v4  ;;  %827 = vst [vmem:[%s7115_s27 + $0xa28] sm:$0xff] %v826_v5  ;;  %v830_v7 = vld [vmem:[%s7107_s26 + $0x1468] sm:$0xff] }
  0xb5   : > { %829 = vst [vmem:[%s7115_s27 + $0xa30] sm:$0xff] %v828_v6  ;;  %v832_v8 = vld [vmem:[%s7107_s26 + $0x1480] sm:$0xff]  ;;  %v834_v9 = vld [vmem:[%s7107_s26 + $0x1488] sm:$0xff]  ;;  %831 = vst [vmem:[%s7115_s27 + $0xa38] sm:$0xff] %v830_v7 }
  0xb6   : > { %833 = vst [vmem:[%s7115_s27 + $0xa40] sm:$0xff] %v832_v8  ;;  %835 = vst [vmem:[%s7115_s27 + $0xa48] sm:$0xff] %v834_v9  ;;  %v836_v10 = vld [vmem:[%s7107_s26 + $0x14a0] sm:$0xff]  ;;  %v838_v11 = vld [vmem:[%s7107_s26 + $0x14a8] sm:$0xff] }
  0xb7   : > { %v840_v12 = vld [vmem:[%s7107_s26 + $0x14c0] sm:$0xff]  ;;  %837 = vst [vmem:[%s7115_s27 + $0xa50] sm:$0xff] %v836_v10  ;;  %839 = vst [vmem:[%s7115_s27 + $0xa58] sm:$0xff] %v838_v11  ;;  %v842_v13 = vld [vmem:[%s7107_s26 + $0x14c8] sm:$0xff] }
  0xb8   : > { %841 = vst [vmem:[%s7115_s27 + $0xa60] sm:$0xff] %v840_v12  ;;  %v844_v14 = vld [vmem:[%s7107_s26 + $0x14e0] sm:$0xff]  ;;  %v846_v15 = vld [vmem:[%s7107_s26 + $0x14e8] sm:$0xff]  ;;  %843 = vst [vmem:[%s7115_s27 + $0xa68] sm:$0xff] %v842_v13 }
  0xb9   : > { %845 = vst [vmem:[%s7115_s27 + $0xa70] sm:$0xff] %v844_v14  ;;  %847 = vst [vmem:[%s7115_s27 + $0xa78] sm:$0xff] %v846_v15  ;;  %v848_v16 = vld [vmem:[%s7107_s26 + $0x1500] sm:$0xff]  ;;  %v850_v17 = vld [vmem:[%s7107_s26 + $0x1508] sm:$0xff] }
  0xba   : > { %v852_v18 = vld [vmem:[%s7107_s26 + $0x1520] sm:$0xff]  ;;  %849 = vst [vmem:[%s7115_s27 + $0xa80] sm:$0xff] %v848_v16  ;;  %851 = vst [vmem:[%s7115_s27 + $0xa88] sm:$0xff] %v850_v17  ;;  %v854_v19 = vld [vmem:[%s7107_s26 + $0x1528] sm:$0xff] }
  0xbb   : > { %853 = vst [vmem:[%s7115_s27 + $0xa90] sm:$0xff] %v852_v18  ;;  %v856_v20 = vld [vmem:[%s7107_s26 + $0x1540] sm:$0xff]  ;;  %v858_v21 = vld [vmem:[%s7107_s26 + $0x1548] sm:$0xff]  ;;  %855 = vst [vmem:[%s7115_s27 + $0xa98] sm:$0xff] %v854_v19 }
  0xbc   : > { %857 = vst [vmem:[%s7115_s27 + $0xaa0] sm:$0xff] %v856_v20  ;;  %859 = vst [vmem:[%s7115_s27 + $0xaa8] sm:$0xff] %v858_v21  ;;  %v860_v22 = vld [vmem:[%s7107_s26 + $0x1560] sm:$0xff]  ;;  %v862_v23 = vld [vmem:[%s7107_s26 + $0x1568] sm:$0xff] }
  0xbd   : > { %v864_v24 = vld [vmem:[%s7107_s26 + $0x1580] sm:$0xff]  ;;  %861 = vst [vmem:[%s7115_s27 + $0xab0] sm:$0xff] %v860_v22  ;;  %863 = vst [vmem:[%s7115_s27 + $0xab8] sm:$0xff] %v862_v23  ;;  %v866_v25 = vld [vmem:[%s7107_s26 + $0x1588] sm:$0xff] }
  0xbe   : > { %865 = vst [vmem:[%s7115_s27 + $0xac0] sm:$0xff] %v864_v24  ;;  %v868_v26 = vld [vmem:[%s7107_s26 + $0x15a0] sm:$0xff]  ;;  %v870_v27 = vld [vmem:[%s7107_s26 + $0x15a8] sm:$0xff]  ;;  %867 = vst [vmem:[%s7115_s27 + $0xac8] sm:$0xff] %v866_v25 }
  0xbf   : > { %869 = vst [vmem:[%s7115_s27 + $0xad0] sm:$0xff] %v868_v26  ;;  %871 = vst [vmem:[%s7115_s27 + $0xad8] sm:$0xff] %v870_v27  ;;  %v872_v28 = vld [vmem:[%s7107_s26 + $0x15c0] sm:$0xff]  ;;  %v874_v29 = vld [vmem:[%s7107_s26 + $0x15c8] sm:$0xff] }
  0xc0   : > { %v876_v30 = vld [vmem:[%s7107_s26 + $0x15e0] sm:$0xff]  ;;  %873 = vst [vmem:[%s7115_s27 + $0xae0] sm:$0xff] %v872_v28  ;;  %875 = vst [vmem:[%s7115_s27 + $0xae8] sm:$0xff] %v874_v29  ;;  %v878_v31 = vld [vmem:[%s7107_s26 + $0x15e8] sm:$0xff] }
  0xc1   : > { %877 = vst [vmem:[%s7115_s27 + $0xaf0] sm:$0xff] %v876_v30  ;;  %v880_v32 = vld [vmem:[%s7107_s26 + $0x1600] sm:$0xff]  ;;  %v882_v33 = vld [vmem:[%s7107_s26 + $0x1608] sm:$0xff]  ;;  %879 = vst [vmem:[%s7115_s27 + $0xaf8] sm:$0xff] %v878_v31 }
  0xc2   : > { %881 = vst [vmem:[%s7115_s27 + $0xb00] sm:$0xff] %v880_v32  ;;  %883 = vst [vmem:[%s7115_s27 + $0xb08] sm:$0xff] %v882_v33  ;;  %v884_v34 = vld [vmem:[%s7107_s26 + $0x1620] sm:$0xff]  ;;  %v886_v35 = vld [vmem:[%s7107_s26 + $0x1628] sm:$0xff] }
  0xc3   : > { %v888_v36 = vld [vmem:[%s7107_s26 + $0x1640] sm:$0xff]  ;;  %885 = vst [vmem:[%s7115_s27 + $0xb10] sm:$0xff] %v884_v34  ;;  %887 = vst [vmem:[%s7115_s27 + $0xb18] sm:$0xff] %v886_v35  ;;  %v890_v37 = vld [vmem:[%s7107_s26 + $0x1648] sm:$0xff] }
  0xc4   : > { %889 = vst [vmem:[%s7115_s27 + $0xb20] sm:$0xff] %v888_v36  ;;  %v892_v38 = vld [vmem:[%s7107_s26 + $0x1660] sm:$0xff]  ;;  %v894_v39 = vld [vmem:[%s7107_s26 + $0x1668] sm:$0xff]  ;;  %891 = vst [vmem:[%s7115_s27 + $0xb28] sm:$0xff] %v890_v37 }
  0xc5   : > { %893 = vst [vmem:[%s7115_s27 + $0xb30] sm:$0xff] %v892_v38  ;;  %895 = vst [vmem:[%s7115_s27 + $0xb38] sm:$0xff] %v894_v39  ;;  %v896_v40 = vld [vmem:[%s7107_s26 + $0x1680] sm:$0xff]  ;;  %v898_v41 = vld [vmem:[%s7107_s26 + $0x1688] sm:$0xff] }
  0xc6   : > { %v900_v42 = vld [vmem:[%s7107_s26 + $0x16a0] sm:$0xff]  ;;  %897 = vst [vmem:[%s7115_s27 + $0xb40] sm:$0xff] %v896_v40  ;;  %899 = vst [vmem:[%s7115_s27 + $0xb48] sm:$0xff] %v898_v41  ;;  %v902_v43 = vld [vmem:[%s7107_s26 + $0x16a8] sm:$0xff] }
  0xc7   : > { %901 = vst [vmem:[%s7115_s27 + $0xb50] sm:$0xff] %v900_v42  ;;  %v904_v44 = vld [vmem:[%s7107_s26 + $0x16c0] sm:$0xff]  ;;  %v906_v45 = vld [vmem:[%s7107_s26 + $0x16c8] sm:$0xff]  ;;  %903 = vst [vmem:[%s7115_s27 + $0xb58] sm:$0xff] %v902_v43 }
  0xc8   : > { %905 = vst [vmem:[%s7115_s27 + $0xb60] sm:$0xff] %v904_v44  ;;  %907 = vst [vmem:[%s7115_s27 + $0xb68] sm:$0xff] %v906_v45  ;;  %v908_v46 = vld [vmem:[%s7107_s26 + $0x16e0] sm:$0xff]  ;;  %v910_v47 = vld [vmem:[%s7107_s26 + $0x16e8] sm:$0xff] }
  0xc9   : > { %v912_v48 = vld [vmem:[%s7107_s26 + $0x1700] sm:$0xff]  ;;  %909 = vst [vmem:[%s7115_s27 + $0xb70] sm:$0xff] %v908_v46  ;;  %911 = vst [vmem:[%s7115_s27 + $0xb78] sm:$0xff] %v910_v47  ;;  %v914_v49 = vld [vmem:[%s7107_s26 + $0x1708] sm:$0xff] }
  0xca   : > { %913 = vst [vmem:[%s7115_s27 + $0xb80] sm:$0xff] %v912_v48  ;;  %v916_v50 = vld [vmem:[%s7107_s26 + $0x1720] sm:$0xff]  ;;  %v918_v51 = vld [vmem:[%s7107_s26 + $0x1728] sm:$0xff]  ;;  %915 = vst [vmem:[%s7115_s27 + $0xb88] sm:$0xff] %v914_v49 }
  0xcb   : > { %917 = vst [vmem:[%s7115_s27 + $0xb90] sm:$0xff] %v916_v50  ;;  %919 = vst [vmem:[%s7115_s27 + $0xb98] sm:$0xff] %v918_v51  ;;  %v920_v52 = vld [vmem:[%s7107_s26 + $0x1740] sm:$0xff]  ;;  %v922_v53 = vld [vmem:[%s7107_s26 + $0x1748] sm:$0xff] }
  0xcc   : > { %v924_v54 = vld [vmem:[%s7107_s26 + $0x1760] sm:$0xff]  ;;  %921 = vst [vmem:[%s7115_s27 + $0xba0] sm:$0xff] %v920_v52  ;;  %923 = vst [vmem:[%s7115_s27 + $0xba8] sm:$0xff] %v922_v53  ;;  %v926_v55 = vld [vmem:[%s7107_s26 + $0x1768] sm:$0xff] }
  0xcd   : > { %925 = vst [vmem:[%s7115_s27 + $0xbb0] sm:$0xff] %v924_v54  ;;  %v928_v56 = vld [vmem:[%s7107_s26 + $0x1780] sm:$0xff]  ;;  %v930_v57 = vld [vmem:[%s7107_s26 + $0x1788] sm:$0xff]  ;;  %927 = vst [vmem:[%s7115_s27 + $0xbb8] sm:$0xff] %v926_v55 }
  0xce   : > { %929 = vst [vmem:[%s7115_s27 + $0xbc0] sm:$0xff] %v928_v56  ;;  %931 = vst [vmem:[%s7115_s27 + $0xbc8] sm:$0xff] %v930_v57  ;;  %v932_v58 = vld [vmem:[%s7107_s26 + $0x17a0] sm:$0xff]  ;;  %v934_v59 = vld [vmem:[%s7107_s26 + $0x17a8] sm:$0xff] }
  0xcf   : > { %v936_v60 = vld [vmem:[%s7107_s26 + $0x17c0] sm:$0xff]  ;;  %933 = vst [vmem:[%s7115_s27 + $0xbd0] sm:$0xff] %v932_v58  ;;  %935 = vst [vmem:[%s7115_s27 + $0xbd8] sm:$0xff] %v934_v59  ;;  %v938_v61 = vld [vmem:[%s7107_s26 + $0x17c8] sm:$0xff] }
  0xd0   : > { %937 = vst [vmem:[%s7115_s27 + $0xbe0] sm:$0xff] %v936_v60  ;;  %v940_v62 = vld [vmem:[%s7107_s26 + $0x17e0] sm:$0xff]  ;;  %v942_v63 = vld [vmem:[%s7107_s26 + $0x17e8] sm:$0xff]  ;;  %939 = vst [vmem:[%s7115_s27 + $0xbe8] sm:$0xff] %v938_v61 }
  0xd1   : > { %941 = vst [vmem:[%s7115_s27 + $0xbf0] sm:$0xff] %v940_v62  ;;  %943 = vst [vmem:[%s7115_s27 + $0xbf8] sm:$0xff] %v942_v63  ;;  %v944_v0 = vld [vmem:[%s7107_s26 + $0x1800] sm:$0xff]  ;;  %v946_v1 = vld [vmem:[%s7107_s26 + $0x1808] sm:$0xff] }
  0xd2   : > { %v948_v2 = vld [vmem:[%s7107_s26 + $0x1820] sm:$0xff]  ;;  %945 = vst [vmem:[%s7115_s27 + $0xc00] sm:$0xff] %v944_v0  ;;  %947 = vst [vmem:[%s7115_s27 + $0xc08] sm:$0xff] %v946_v1  ;;  %v950_v3 = vld [vmem:[%s7107_s26 + $0x1828] sm:$0xff] }
  0xd3   : > { %949 = vst [vmem:[%s7115_s27 + $0xc10] sm:$0xff] %v948_v2  ;;  %v952_v4 = vld [vmem:[%s7107_s26 + $0x1840] sm:$0xff]  ;;  %v954_v5 = vld [vmem:[%s7107_s26 + $0x1848] sm:$0xff]  ;;  %951 = vst [vmem:[%s7115_s27 + $0xc18] sm:$0xff] %v950_v3 }
  0xd4   : > { %953 = vst [vmem:[%s7115_s27 + $0xc20] sm:$0xff] %v952_v4  ;;  %955 = vst [vmem:[%s7115_s27 + $0xc28] sm:$0xff] %v954_v5  ;;  %v956_v6 = vld [vmem:[%s7107_s26 + $0x1860] sm:$0xff]  ;;  %v958_v7 = vld [vmem:[%s7107_s26 + $0x1868] sm:$0xff] }
  0xd5   : > { %v960_v8 = vld [vmem:[%s7107_s26 + $0x1880] sm:$0xff]  ;;  %957 = vst [vmem:[%s7115_s27 + $0xc30] sm:$0xff] %v956_v6  ;;  %959 = vst [vmem:[%s7115_s27 + $0xc38] sm:$0xff] %v958_v7  ;;  %v962_v9 = vld [vmem:[%s7107_s26 + $0x1888] sm:$0xff] }
  0xd6   : > { %961 = vst [vmem:[%s7115_s27 + $0xc40] sm:$0xff] %v960_v8  ;;  %v964_v10 = vld [vmem:[%s7107_s26 + $0x18a0] sm:$0xff]  ;;  %v966_v11 = vld [vmem:[%s7107_s26 + $0x18a8] sm:$0xff]  ;;  %963 = vst [vmem:[%s7115_s27 + $0xc48] sm:$0xff] %v962_v9 }
  0xd7   : > { %965 = vst [vmem:[%s7115_s27 + $0xc50] sm:$0xff] %v964_v10  ;;  %967 = vst [vmem:[%s7115_s27 + $0xc58] sm:$0xff] %v966_v11  ;;  %v968_v12 = vld [vmem:[%s7107_s26 + $0x18c0] sm:$0xff]  ;;  %v970_v13 = vld [vmem:[%s7107_s26 + $0x18c8] sm:$0xff] }
  0xd8   : > { %v972_v14 = vld [vmem:[%s7107_s26 + $0x18e0] sm:$0xff]  ;;  %969 = vst [vmem:[%s7115_s27 + $0xc60] sm:$0xff] %v968_v12  ;;  %971 = vst [vmem:[%s7115_s27 + $0xc68] sm:$0xff] %v970_v13  ;;  %v974_v15 = vld [vmem:[%s7107_s26 + $0x18e8] sm:$0xff] }
  0xd9   : > { %973 = vst [vmem:[%s7115_s27 + $0xc70] sm:$0xff] %v972_v14  ;;  %v976_v16 = vld [vmem:[%s7107_s26 + $0x1900] sm:$0xff]  ;;  %v978_v17 = vld [vmem:[%s7107_s26 + $0x1908] sm:$0xff]  ;;  %975 = vst [vmem:[%s7115_s27 + $0xc78] sm:$0xff] %v974_v15 }
  0xda   : > { %977 = vst [vmem:[%s7115_s27 + $0xc80] sm:$0xff] %v976_v16  ;;  %979 = vst [vmem:[%s7115_s27 + $0xc88] sm:$0xff] %v978_v17  ;;  %v980_v18 = vld [vmem:[%s7107_s26 + $0x1920] sm:$0xff]  ;;  %v982_v19 = vld [vmem:[%s7107_s26 + $0x1928] sm:$0xff] }
  0xdb   : > { %v984_v20 = vld [vmem:[%s7107_s26 + $0x1940] sm:$0xff]  ;;  %981 = vst [vmem:[%s7115_s27 + $0xc90] sm:$0xff] %v980_v18  ;;  %983 = vst [vmem:[%s7115_s27 + $0xc98] sm:$0xff] %v982_v19  ;;  %v986_v21 = vld [vmem:[%s7107_s26 + $0x1948] sm:$0xff] }
  0xdc   : > { %985 = vst [vmem:[%s7115_s27 + $0xca0] sm:$0xff] %v984_v20  ;;  %v988_v22 = vld [vmem:[%s7107_s26 + $0x1960] sm:$0xff]  ;;  %v990_v23 = vld [vmem:[%s7107_s26 + $0x1968] sm:$0xff]  ;;  %987 = vst [vmem:[%s7115_s27 + $0xca8] sm:$0xff] %v986_v21 }
  0xdd   : > { %989 = vst [vmem:[%s7115_s27 + $0xcb0] sm:$0xff] %v988_v22  ;;  %991 = vst [vmem:[%s7115_s27 + $0xcb8] sm:$0xff] %v990_v23  ;;  %v992_v24 = vld [vmem:[%s7107_s26 + $0x1980] sm:$0xff]  ;;  %v994_v25 = vld [vmem:[%s7107_s26 + $0x1988] sm:$0xff] }
  0xde   : > { %v996_v26 = vld [vmem:[%s7107_s26 + $0x19a0] sm:$0xff]  ;;  %993 = vst [vmem:[%s7115_s27 + $0xcc0] sm:$0xff] %v992_v24  ;;  %995 = vst [vmem:[%s7115_s27 + $0xcc8] sm:$0xff] %v994_v25  ;;  %v998_v27 = vld [vmem:[%s7107_s26 + $0x19a8] sm:$0xff] }
  0xdf   : > { %997 = vst [vmem:[%s7115_s27 + $0xcd0] sm:$0xff] %v996_v26  ;;  %v1000_v28 = vld [vmem:[%s7107_s26 + $0x19c0] sm:$0xff]  ;;  %v1002_v29 = vld [vmem:[%s7107_s26 + $0x19c8] sm:$0xff]  ;;  %999 = vst [vmem:[%s7115_s27 + $0xcd8] sm:$0xff] %v998_v27 }
  0xe0   : > { %1001 = vst [vmem:[%s7115_s27 + $0xce0] sm:$0xff] %v1000_v28  ;;  %1003 = vst [vmem:[%s7115_s27 + $0xce8] sm:$0xff] %v1002_v29  ;;  %v1004_v30 = vld [vmem:[%s7107_s26 + $0x19e0] sm:$0xff]  ;;  %v1006_v31 = vld [vmem:[%s7107_s26 + $0x19e8] sm:$0xff] }
  0xe1   : > { %v1008_v32 = vld [vmem:[%s7107_s26 + $0x1a00] sm:$0xff]  ;;  %1005 = vst [vmem:[%s7115_s27 + $0xcf0] sm:$0xff] %v1004_v30  ;;  %1007 = vst [vmem:[%s7115_s27 + $0xcf8] sm:$0xff] %v1006_v31  ;;  %v1010_v33 = vld [vmem:[%s7107_s26 + $0x1a08] sm:$0xff] }
  0xe2   : > { %1009 = vst [vmem:[%s7115_s27 + $0xd00] sm:$0xff] %v1008_v32  ;;  %v1012_v34 = vld [vmem:[%s7107_s26 + $0x1a20] sm:$0xff]  ;;  %v1014_v35 = vld [vmem:[%s7107_s26 + $0x1a28] sm:$0xff]  ;;  %1011 = vst [vmem:[%s7115_s27 + $0xd08] sm:$0xff] %v1010_v33 }
  0xe3   : > { %1013 = vst [vmem:[%s7115_s27 + $0xd10] sm:$0xff] %v1012_v34  ;;  %1015 = vst [vmem:[%s7115_s27 + $0xd18] sm:$0xff] %v1014_v35  ;;  %v1016_v36 = vld [vmem:[%s7107_s26 + $0x1a40] sm:$0xff]  ;;  %v1018_v37 = vld [vmem:[%s7107_s26 + $0x1a48] sm:$0xff] }
  0xe4   : > { %v1020_v38 = vld [vmem:[%s7107_s26 + $0x1a60] sm:$0xff]  ;;  %1017 = vst [vmem:[%s7115_s27 + $0xd20] sm:$0xff] %v1016_v36  ;;  %1019 = vst [vmem:[%s7115_s27 + $0xd28] sm:$0xff] %v1018_v37  ;;  %v1022_v39 = vld [vmem:[%s7107_s26 + $0x1a68] sm:$0xff] }
  0xe5   : > { %1021 = vst [vmem:[%s7115_s27 + $0xd30] sm:$0xff] %v1020_v38  ;;  %v1024_v40 = vld [vmem:[%s7107_s26 + $0x1a80] sm:$0xff]  ;;  %v1026_v41 = vld [vmem:[%s7107_s26 + $0x1a88] sm:$0xff]  ;;  %1023 = vst [vmem:[%s7115_s27 + $0xd38] sm:$0xff] %v1022_v39 }
  0xe6   : > { %1025 = vst [vmem:[%s7115_s27 + $0xd40] sm:$0xff] %v1024_v40  ;;  %1027 = vst [vmem:[%s7115_s27 + $0xd48] sm:$0xff] %v1026_v41  ;;  %v1028_v42 = vld [vmem:[%s7107_s26 + $0x1aa0] sm:$0xff]  ;;  %v1030_v43 = vld [vmem:[%s7107_s26 + $0x1aa8] sm:$0xff] }
  0xe7   : > { %v1032_v44 = vld [vmem:[%s7107_s26 + $0x1ac0] sm:$0xff]  ;;  %1029 = vst [vmem:[%s7115_s27 + $0xd50] sm:$0xff] %v1028_v42  ;;  %1031 = vst [vmem:[%s7115_s27 + $0xd58] sm:$0xff] %v1030_v43  ;;  %v1034_v45 = vld [vmem:[%s7107_s26 + $0x1ac8] sm:$0xff] }
  0xe8   : > { %1033 = vst [vmem:[%s7115_s27 + $0xd60] sm:$0xff] %v1032_v44  ;;  %v1036_v46 = vld [vmem:[%s7107_s26 + $0x1ae0] sm:$0xff]  ;;  %v1038_v47 = vld [vmem:[%s7107_s26 + $0x1ae8] sm:$0xff]  ;;  %1035 = vst [vmem:[%s7115_s27 + $0xd68] sm:$0xff] %v1034_v45 }
  0xe9   : > { %1037 = vst [vmem:[%s7115_s27 + $0xd70] sm:$0xff] %v1036_v46  ;;  %1039 = vst [vmem:[%s7115_s27 + $0xd78] sm:$0xff] %v1038_v47  ;;  %v1040_v48 = vld [vmem:[%s7107_s26 + $0x1b00] sm:$0xff]  ;;  %v1042_v49 = vld [vmem:[%s7107_s26 + $0x1b08] sm:$0xff] }
  0xea   : > { %v1044_v50 = vld [vmem:[%s7107_s26 + $0x1b20] sm:$0xff]  ;;  %1041 = vst [vmem:[%s7115_s27 + $0xd80] sm:$0xff] %v1040_v48  ;;  %1043 = vst [vmem:[%s7115_s27 + $0xd88] sm:$0xff] %v1042_v49  ;;  %v1046_v51 = vld [vmem:[%s7107_s26 + $0x1b28] sm:$0xff] }
  0xeb   : > { %1045 = vst [vmem:[%s7115_s27 + $0xd90] sm:$0xff] %v1044_v50  ;;  %v1048_v52 = vld [vmem:[%s7107_s26 + $0x1b40] sm:$0xff]  ;;  %v1050_v53 = vld [vmem:[%s7107_s26 + $0x1b48] sm:$0xff]  ;;  %1047 = vst [vmem:[%s7115_s27 + $0xd98] sm:$0xff] %v1046_v51 }
  0xec   : > { %1049 = vst [vmem:[%s7115_s27 + $0xda0] sm:$0xff] %v1048_v52  ;;  %1051 = vst [vmem:[%s7115_s27 + $0xda8] sm:$0xff] %v1050_v53  ;;  %v1052_v54 = vld [vmem:[%s7107_s26 + $0x1b60] sm:$0xff]  ;;  %v1054_v55 = vld [vmem:[%s7107_s26 + $0x1b68] sm:$0xff] }
  0xed   : > { %v1056_v56 = vld [vmem:[%s7107_s26 + $0x1b80] sm:$0xff]  ;;  %1053 = vst [vmem:[%s7115_s27 + $0xdb0] sm:$0xff] %v1052_v54  ;;  %1055 = vst [vmem:[%s7115_s27 + $0xdb8] sm:$0xff] %v1054_v55  ;;  %v1058_v57 = vld [vmem:[%s7107_s26 + $0x1b88] sm:$0xff] }
  0xee   : > { %1057 = vst [vmem:[%s7115_s27 + $0xdc0] sm:$0xff] %v1056_v56  ;;  %v1060_v58 = vld [vmem:[%s7107_s26 + $0x1ba0] sm:$0xff]  ;;  %v1062_v59 = vld [vmem:[%s7107_s26 + $0x1ba8] sm:$0xff]  ;;  %1059 = vst [vmem:[%s7115_s27 + $0xdc8] sm:$0xff] %v1058_v57 }
  0xef   : > { %1061 = vst [vmem:[%s7115_s27 + $0xdd0] sm:$0xff] %v1060_v58  ;;  %1063 = vst [vmem:[%s7115_s27 + $0xdd8] sm:$0xff] %v1062_v59  ;;  %v1064_v60 = vld [vmem:[%s7107_s26 + $0x1bc0] sm:$0xff]  ;;  %v1066_v61 = vld [vmem:[%s7107_s26 + $0x1bc8] sm:$0xff] }
  0xf0   : > { %v1068_v62 = vld [vmem:[%s7107_s26 + $0x1be0] sm:$0xff]  ;;  %1065 = vst [vmem:[%s7115_s27 + $0xde0] sm:$0xff] %v1064_v60  ;;  %1067 = vst [vmem:[%s7115_s27 + $0xde8] sm:$0xff] %v1066_v61  ;;  %v1070_v63 = vld [vmem:[%s7107_s26 + $0x1be8] sm:$0xff] }
  0xf1   : > { %1069 = vst [vmem:[%s7115_s27 + $0xdf0] sm:$0xff] %v1068_v62  ;;  %v1072_v0 = vld [vmem:[%s7107_s26 + $0x1c00] sm:$0xff]  ;;  %v1074_v1 = vld [vmem:[%s7107_s26 + $0x1c08] sm:$0xff]  ;;  %1071 = vst [vmem:[%s7115_s27 + $0xdf8] sm:$0xff] %v1070_v63 }
  0xf2   : > { %1073 = vst [vmem:[%s7115_s27 + $0xe00] sm:$0xff] %v1072_v0  ;;  %1075 = vst [vmem:[%s7115_s27 + $0xe08] sm:$0xff] %v1074_v1  ;;  %v1076_v2 = vld [vmem:[%s7107_s26 + $0x1c20] sm:$0xff]  ;;  %v1078_v3 = vld [vmem:[%s7107_s26 + $0x1c28] sm:$0xff] }
  0xf3   : > { %v1080_v4 = vld [vmem:[%s7107_s26 + $0x1c40] sm:$0xff]  ;;  %1077 = vst [vmem:[%s7115_s27 + $0xe10] sm:$0xff] %v1076_v2  ;;  %1079 = vst [vmem:[%s7115_s27 + $0xe18] sm:$0xff] %v1078_v3  ;;  %v1082_v5 = vld [vmem:[%s7107_s26 + $0x1c48] sm:$0xff] }
  0xf4   : > { %1081 = vst [vmem:[%s7115_s27 + $0xe20] sm:$0xff] %v1080_v4  ;;  %v1084_v6 = vld [vmem:[%s7107_s26 + $0x1c60] sm:$0xff]  ;;  %v1086_v7 = vld [vmem:[%s7107_s26 + $0x1c68] sm:$0xff]  ;;  %1083 = vst [vmem:[%s7115_s27 + $0xe28] sm:$0xff] %v1082_v5 }
  0xf5   : > { %1085 = vst [vmem:[%s7115_s27 + $0xe30] sm:$0xff] %v1084_v6  ;;  %1087 = vst [vmem:[%s7115_s27 + $0xe38] sm:$0xff] %v1086_v7  ;;  %v1088_v8 = vld [vmem:[%s7107_s26 + $0x1c80] sm:$0xff]  ;;  %v1090_v9 = vld [vmem:[%s7107_s26 + $0x1c88] sm:$0xff] }
  0xf6   : > { %v1092_v10 = vld [vmem:[%s7107_s26 + $0x1ca0] sm:$0xff]  ;;  %1089 = vst [vmem:[%s7115_s27 + $0xe40] sm:$0xff] %v1088_v8  ;;  %1091 = vst [vmem:[%s7115_s27 + $0xe48] sm:$0xff] %v1090_v9  ;;  %v1094_v11 = vld [vmem:[%s7107_s26 + $0x1ca8] sm:$0xff] }
  0xf7   : > { %1093 = vst [vmem:[%s7115_s27 + $0xe50] sm:$0xff] %v1092_v10  ;;  %v1096_v12 = vld [vmem:[%s7107_s26 + $0x1cc0] sm:$0xff]  ;;  %v1098_v13 = vld [vmem:[%s7107_s26 + $0x1cc8] sm:$0xff]  ;;  %1095 = vst [vmem:[%s7115_s27 + $0xe58] sm:$0xff] %v1094_v11 }
  0xf8   : > { %1097 = vst [vmem:[%s7115_s27 + $0xe60] sm:$0xff] %v1096_v12  ;;  %1099 = vst [vmem:[%s7115_s27 + $0xe68] sm:$0xff] %v1098_v13  ;;  %v1100_v14 = vld [vmem:[%s7107_s26 + $0x1ce0] sm:$0xff]  ;;  %v1102_v15 = vld [vmem:[%s7107_s26 + $0x1ce8] sm:$0xff] }
  0xf9   : > { %v1104_v16 = vld [vmem:[%s7107_s26 + $0x1d00] sm:$0xff]  ;;  %1101 = vst [vmem:[%s7115_s27 + $0xe70] sm:$0xff] %v1100_v14  ;;  %1103 = vst [vmem:[%s7115_s27 + $0xe78] sm:$0xff] %v1102_v15  ;;  %v1106_v17 = vld [vmem:[%s7107_s26 + $0x1d08] sm:$0xff] }
  0xfa   : > { %1105 = vst [vmem:[%s7115_s27 + $0xe80] sm:$0xff] %v1104_v16  ;;  %v1108_v18 = vld [vmem:[%s7107_s26 + $0x1d20] sm:$0xff]  ;;  %v1110_v19 = vld [vmem:[%s7107_s26 + $0x1d28] sm:$0xff]  ;;  %1107 = vst [vmem:[%s7115_s27 + $0xe88] sm:$0xff] %v1106_v17 }
  0xfb   : > { %1109 = vst [vmem:[%s7115_s27 + $0xe90] sm:$0xff] %v1108_v18  ;;  %1111 = vst [vmem:[%s7115_s27 + $0xe98] sm:$0xff] %v1110_v19  ;;  %v1112_v20 = vld [vmem:[%s7107_s26 + $0x1d40] sm:$0xff]  ;;  %v1114_v21 = vld [vmem:[%s7107_s26 + $0x1d48] sm:$0xff] }
  0xfc   : > { %v1116_v22 = vld [vmem:[%s7107_s26 + $0x1d60] sm:$0xff]  ;;  %1113 = vst [vmem:[%s7115_s27 + $0xea0] sm:$0xff] %v1112_v20  ;;  %1115 = vst [vmem:[%s7115_s27 + $0xea8] sm:$0xff] %v1114_v21  ;;  %v1118_v23 = vld [vmem:[%s7107_s26 + $0x1d68] sm:$0xff] }
  0xfd   : > { %1117 = vst [vmem:[%s7115_s27 + $0xeb0] sm:$0xff] %v1116_v22  ;;  %v1120_v24 = vld [vmem:[%s7107_s26 + $0x1d80] sm:$0xff]  ;;  %v1122_v25 = vld [vmem:[%s7107_s26 + $0x1d88] sm:$0xff]  ;;  %1119 = vst [vmem:[%s7115_s27 + $0xeb8] sm:$0xff] %v1118_v23 }
  0xfe   : > { %1121 = vst [vmem:[%s7115_s27 + $0xec0] sm:$0xff] %v1120_v24  ;;  %1123 = vst [vmem:[%s7115_s27 + $0xec8] sm:$0xff] %v1122_v25  ;;  %v1124_v26 = vld [vmem:[%s7107_s26 + $0x1da0] sm:$0xff]  ;;  %v1126_v27 = vld [vmem:[%s7107_s26 + $0x1da8] sm:$0xff] }
  0xff   : > { %v1128_v28 = vld [vmem:[%s7107_s26 + $0x1dc0] sm:$0xff]  ;;  %1125 = vst [vmem:[%s7115_s27 + $0xed0] sm:$0xff] %v1124_v26  ;;  %1127 = vst [vmem:[%s7115_s27 + $0xed8] sm:$0xff] %v1126_v27  ;;  %v1130_v29 = vld [vmem:[%s7107_s26 + $0x1dc8] sm:$0xff] }
 0x100   : > { %1129 = vst [vmem:[%s7115_s27 + $0xee0] sm:$0xff] %v1128_v28  ;;  %v1132_v30 = vld [vmem:[%s7107_s26 + $0x1de0] sm:$0xff]  ;;  %v1134_v31 = vld [vmem:[%s7107_s26 + $0x1de8] sm:$0xff]  ;;  %1131 = vst [vmem:[%s7115_s27 + $0xee8] sm:$0xff] %v1130_v29 }
 0x101   : > { %1133 = vst [vmem:[%s7115_s27 + $0xef0] sm:$0xff] %v1132_v30  ;;  %1135 = vst [vmem:[%s7115_s27 + $0xef8] sm:$0xff] %v1134_v31  ;;  %v1136_v32 = vld [vmem:[%s7107_s26 + $0x1e00] sm:$0xff]  ;;  %v1138_v33 = vld [vmem:[%s7107_s26 + $0x1e08] sm:$0xff] }
 0x102   : > { %v1140_v34 = vld [vmem:[%s7107_s26 + $0x1e20] sm:$0xff]  ;;  %1137 = vst [vmem:[%s7115_s27 + $0xf00] sm:$0xff] %v1136_v32  ;;  %1139 = vst [vmem:[%s7115_s27 + $0xf08] sm:$0xff] %v1138_v33  ;;  %v1142_v35 = vld [vmem:[%s7107_s26 + $0x1e28] sm:$0xff] }
 0x103   : > { %1141 = vst [vmem:[%s7115_s27 + $0xf10] sm:$0xff] %v1140_v34  ;;  %v1144_v36 = vld [vmem:[%s7107_s26 + $0x1e40] sm:$0xff]  ;;  %v1146_v37 = vld [vmem:[%s7107_s26 + $0x1e48] sm:$0xff]  ;;  %1143 = vst [vmem:[%s7115_s27 + $0xf18] sm:$0xff] %v1142_v35 }
 0x104   : > { %1145 = vst [vmem:[%s7115_s27 + $0xf20] sm:$0xff] %v1144_v36  ;;  %1147 = vst [vmem:[%s7115_s27 + $0xf28] sm:$0xff] %v1146_v37  ;;  %v1148_v38 = vld [vmem:[%s7107_s26 + $0x1e60] sm:$0xff]  ;;  %v1150_v39 = vld [vmem:[%s7107_s26 + $0x1e68] sm:$0xff] }
 0x105   : > { %v1152_v40 = vld [vmem:[%s7107_s26 + $0x1e80] sm:$0xff]  ;;  %1149 = vst [vmem:[%s7115_s27 + $0xf30] sm:$0xff] %v1148_v38  ;;  %1151 = vst [vmem:[%s7115_s27 + $0xf38] sm:$0xff] %v1150_v39  ;;  %v1154_v41 = vld [vmem:[%s7107_s26 + $0x1e88] sm:$0xff] }
 0x106   : > { %1153 = vst [vmem:[%s7115_s27 + $0xf40] sm:$0xff] %v1152_v40  ;;  %v1156_v42 = vld [vmem:[%s7107_s26 + $0x1ea0] sm:$0xff]  ;;  %v1158_v43 = vld [vmem:[%s7107_s26 + $0x1ea8] sm:$0xff]  ;;  %1155 = vst [vmem:[%s7115_s27 + $0xf48] sm:$0xff] %v1154_v41 }
 0x107   : > { %1157 = vst [vmem:[%s7115_s27 + $0xf50] sm:$0xff] %v1156_v42  ;;  %1159 = vst [vmem:[%s7115_s27 + $0xf58] sm:$0xff] %v1158_v43  ;;  %v1160_v44 = vld [vmem:[%s7107_s26 + $0x1ec0] sm:$0xff]  ;;  %v1162_v45 = vld [vmem:[%s7107_s26 + $0x1ec8] sm:$0xff] }
 0x108   : > { %v1164_v46 = vld [vmem:[%s7107_s26 + $0x1ee0] sm:$0xff]  ;;  %1161 = vst [vmem:[%s7115_s27 + $0xf60] sm:$0xff] %v1160_v44  ;;  %1163 = vst [vmem:[%s7115_s27 + $0xf68] sm:$0xff] %v1162_v45  ;;  %v1166_v47 = vld [vmem:[%s7107_s26 + $0x1ee8] sm:$0xff] }
 0x109   : > { %1165 = vst [vmem:[%s7115_s27 + $0xf70] sm:$0xff] %v1164_v46  ;;  %v1168_v48 = vld [vmem:[%s7107_s26 + $0x1f00] sm:$0xff]  ;;  %v1170_v49 = vld [vmem:[%s7107_s26 + $0x1f08] sm:$0xff]  ;;  %1167 = vst [vmem:[%s7115_s27 + $0xf78] sm:$0xff] %v1166_v47 }
 0x10a   : > { %1169 = vst [vmem:[%s7115_s27 + $0xf80] sm:$0xff] %v1168_v48  ;;  %1171 = vst [vmem:[%s7115_s27 + $0xf88] sm:$0xff] %v1170_v49  ;;  %v1172_v50 = vld [vmem:[%s7107_s26 + $0x1f20] sm:$0xff]  ;;  %v1174_v51 = vld [vmem:[%s7107_s26 + $0x1f28] sm:$0xff] }
 0x10b   : > { %v1176_v52 = vld [vmem:[%s7107_s26 + $0x1f40] sm:$0xff]  ;;  %1173 = vst [vmem:[%s7115_s27 + $0xf90] sm:$0xff] %v1172_v50  ;;  %1175 = vst [vmem:[%s7115_s27 + $0xf98] sm:$0xff] %v1174_v51  ;;  %v1178_v53 = vld [vmem:[%s7107_s26 + $0x1f48] sm:$0xff] }
 0x10c   : > { %1177 = vst [vmem:[%s7115_s27 + $0xfa0] sm:$0xff] %v1176_v52  ;;  %v1180_v54 = vld [vmem:[%s7107_s26 + $0x1f60] sm:$0xff]  ;;  %v1182_v55 = vld [vmem:[%s7107_s26 + $0x1f68] sm:$0xff]  ;;  %1179 = vst [vmem:[%s7115_s27 + $0xfa8] sm:$0xff] %v1178_v53 }
 0x10d   : > { %1181 = vst [vmem:[%s7115_s27 + $0xfb0] sm:$0xff] %v1180_v54  ;;  %1183 = vst [vmem:[%s7115_s27 + $0xfb8] sm:$0xff] %v1182_v55  ;;  %v1184_v56 = vld [vmem:[%s7107_s26 + $0x1f80] sm:$0xff]  ;;  %v1186_v57 = vld [vmem:[%s7107_s26 + $0x1f88] sm:$0xff] }
 0x10e   : > { %v1188_v58 = vld [vmem:[%s7107_s26 + $0x1fa0] sm:$0xff]  ;;  %1185 = vst [vmem:[%s7115_s27 + $0xfc0] sm:$0xff] %v1184_v56  ;;  %1187 = vst [vmem:[%s7115_s27 + $0xfc8] sm:$0xff] %v1186_v57  ;;  %v1190_v59 = vld [vmem:[%s7107_s26 + $0x1fa8] sm:$0xff] }
 0x10f   : > { %1189 = vst [vmem:[%s7115_s27 + $0xfd0] sm:$0xff] %v1188_v58  ;;  %v1192_v60 = vld [vmem:[%s7107_s26 + $0x1fc0] sm:$0xff]  ;;  %v1194_v61 = vld [vmem:[%s7107_s26 + $0x1fc8] sm:$0xff]  ;;  %1191 = vst [vmem:[%s7115_s27 + $0xfd8] sm:$0xff] %v1190_v59 }
 0x110   : > { %1193 = vst [vmem:[%s7115_s27 + $0xfe0] sm:$0xff] %v1192_v60  ;;  %1195 = vst [vmem:[%s7115_s27 + $0xfe8] sm:$0xff] %v1194_v61  ;;  %v1196_v62 = vld [vmem:[%s7107_s26 + $0x1fe0] sm:$0xff]  ;;  %v1198_v63 = vld [vmem:[%s7107_s26 + $0x1fe8] sm:$0xff] }
 0x111   : > { %v1200_v0 = vld [vmem:[%s7107_s26 + $0x2000] sm:$0xff]  ;;  %1197 = vst [vmem:[%s7115_s27 + $0xff0] sm:$0xff] %v1196_v62  ;;  %1199 = vst [vmem:[%s7115_s27 + $0xff8] sm:$0xff] %v1198_v63  ;;  %v1202_v1 = vld [vmem:[%s7107_s26 + $0x2008] sm:$0xff] }
 0x112   : > { %1201 = vst [vmem:[%s7115_s27 + $0x1000] sm:$0xff] %v1200_v0  ;;  %v1204_v2 = vld [vmem:[%s7107_s26 + $0x2020] sm:$0xff]  ;;  %v1206_v3 = vld [vmem:[%s7107_s26 + $0x2028] sm:$0xff]  ;;  %1203 = vst [vmem:[%s7115_s27 + $0x1008] sm:$0xff] %v1202_v1 }
 0x113   : > { %1205 = vst [vmem:[%s7115_s27 + $0x1010] sm:$0xff] %v1204_v2  ;;  %1207 = vst [vmem:[%s7115_s27 + $0x1018] sm:$0xff] %v1206_v3  ;;  %v1208_v4 = vld [vmem:[%s7107_s26 + $0x2040] sm:$0xff]  ;;  %v1210_v5 = vld [vmem:[%s7107_s26 + $0x2048] sm:$0xff] }
 0x114   : > { %v1212_v6 = vld [vmem:[%s7107_s26 + $0x2060] sm:$0xff]  ;;  %1209 = vst [vmem:[%s7115_s27 + $0x1020] sm:$0xff] %v1208_v4  ;;  %1211 = vst [vmem:[%s7115_s27 + $0x1028] sm:$0xff] %v1210_v5  ;;  %v1214_v7 = vld [vmem:[%s7107_s26 + $0x2068] sm:$0xff] }
 0x115   : > { %1213 = vst [vmem:[%s7115_s27 + $0x1030] sm:$0xff] %v1212_v6  ;;  %v1216_v8 = vld [vmem:[%s7107_s26 + $0x2080] sm:$0xff]  ;;  %v1218_v9 = vld [vmem:[%s7107_s26 + $0x2088] sm:$0xff]  ;;  %1215 = vst [vmem:[%s7115_s27 + $0x1038] sm:$0xff] %v1214_v7 }
 0x116   : > { %1217 = vst [vmem:[%s7115_s27 + $0x1040] sm:$0xff] %v1216_v8  ;;  %1219 = vst [vmem:[%s7115_s27 + $0x1048] sm:$0xff] %v1218_v9  ;;  %v1220_v10 = vld [vmem:[%s7107_s26 + $0x20a0] sm:$0xff]  ;;  %v1222_v11 = vld [vmem:[%s7107_s26 + $0x20a8] sm:$0xff] }
 0x117   : > { %v1224_v12 = vld [vmem:[%s7107_s26 + $0x20c0] sm:$0xff]  ;;  %1221 = vst [vmem:[%s7115_s27 + $0x1050] sm:$0xff] %v1220_v10  ;;  %1223 = vst [vmem:[%s7115_s27 + $0x1058] sm:$0xff] %v1222_v11  ;;  %v1226_v13 = vld [vmem:[%s7107_s26 + $0x20c8] sm:$0xff] }
 0x118   : > { %1225 = vst [vmem:[%s7115_s27 + $0x1060] sm:$0xff] %v1224_v12  ;;  %v1228_v14 = vld [vmem:[%s7107_s26 + $0x20e0] sm:$0xff]  ;;  %v1230_v15 = vld [vmem:[%s7107_s26 + $0x20e8] sm:$0xff]  ;;  %1227 = vst [vmem:[%s7115_s27 + $0x1068] sm:$0xff] %v1226_v13 }
 0x119   : > { %1229 = vst [vmem:[%s7115_s27 + $0x1070] sm:$0xff] %v1228_v14  ;;  %1231 = vst [vmem:[%s7115_s27 + $0x1078] sm:$0xff] %v1230_v15  ;;  %v1232_v16 = vld [vmem:[%s7107_s26 + $0x2100] sm:$0xff]  ;;  %v1234_v17 = vld [vmem:[%s7107_s26 + $0x2108] sm:$0xff] }
 0x11a   : > { %v1236_v18 = vld [vmem:[%s7107_s26 + $0x2120] sm:$0xff]  ;;  %1233 = vst [vmem:[%s7115_s27 + $0x1080] sm:$0xff] %v1232_v16  ;;  %1235 = vst [vmem:[%s7115_s27 + $0x1088] sm:$0xff] %v1234_v17  ;;  %v1238_v19 = vld [vmem:[%s7107_s26 + $0x2128] sm:$0xff] }
 0x11b   : > { %1237 = vst [vmem:[%s7115_s27 + $0x1090] sm:$0xff] %v1236_v18  ;;  %v1240_v20 = vld [vmem:[%s7107_s26 + $0x2140] sm:$0xff]  ;;  %v1242_v21 = vld [vmem:[%s7107_s26 + $0x2148] sm:$0xff]  ;;  %1239 = vst [vmem:[%s7115_s27 + $0x1098] sm:$0xff] %v1238_v19 }
 0x11c   : > { %1241 = vst [vmem:[%s7115_s27 + $0x10a0] sm:$0xff] %v1240_v20  ;;  %1243 = vst [vmem:[%s7115_s27 + $0x10a8] sm:$0xff] %v1242_v21  ;;  %v1244_v22 = vld [vmem:[%s7107_s26 + $0x2160] sm:$0xff]  ;;  %v1246_v23 = vld [vmem:[%s7107_s26 + $0x2168] sm:$0xff] }
 0x11d   : > { %v1248_v24 = vld [vmem:[%s7107_s26 + $0x2180] sm:$0xff]  ;;  %1245 = vst [vmem:[%s7115_s27 + $0x10b0] sm:$0xff] %v1244_v22  ;;  %1247 = vst [vmem:[%s7115_s27 + $0x10b8] sm:$0xff] %v1246_v23  ;;  %v1250_v25 = vld [vmem:[%s7107_s26 + $0x2188] sm:$0xff] }
 0x11e   : > { %1249 = vst [vmem:[%s7115_s27 + $0x10c0] sm:$0xff] %v1248_v24  ;;  %v1252_v26 = vld [vmem:[%s7107_s26 + $0x21a0] sm:$0xff]  ;;  %v1254_v27 = vld [vmem:[%s7107_s26 + $0x21a8] sm:$0xff]  ;;  %1251 = vst [vmem:[%s7115_s27 + $0x10c8] sm:$0xff] %v1250_v25 }
 0x11f   : > { %1253 = vst [vmem:[%s7115_s27 + $0x10d0] sm:$0xff] %v1252_v26  ;;  %1255 = vst [vmem:[%s7115_s27 + $0x10d8] sm:$0xff] %v1254_v27  ;;  %v1256_v28 = vld [vmem:[%s7107_s26 + $0x21c0] sm:$0xff]  ;;  %v1258_v29 = vld [vmem:[%s7107_s26 + $0x21c8] sm:$0xff] }
 0x120   : > { %v1260_v30 = vld [vmem:[%s7107_s26 + $0x21e0] sm:$0xff]  ;;  %1257 = vst [vmem:[%s7115_s27 + $0x10e0] sm:$0xff] %v1256_v28  ;;  %1259 = vst [vmem:[%s7115_s27 + $0x10e8] sm:$0xff] %v1258_v29  ;;  %v1262_v31 = vld [vmem:[%s7107_s26 + $0x21e8] sm:$0xff] }
 0x121   : > { %1261 = vst [vmem:[%s7115_s27 + $0x10f0] sm:$0xff] %v1260_v30  ;;  %1263 = vst [vmem:[%s7115_s27 + $0x10f8] sm:$0xff] %v1262_v31 }
 0x122 PF: > { %p5525_p6 = scmp.ge.s32.totalorder %s7041_s16, 1  ;;  %p1276_p7 = scmp.lt.s32.totalorder %s7041_s16, 3 }
 0x124   : > { %p1277_p8 = pnand %p5525_p6, %p1276_p7 }
 0x125   : > { %s1283_s28 = sand.u32 (!%p1277_p8), 1, %s7025_s12   ;;  %v1342_v32 = vld [vmem:[%s8821_s0 + $0x8] sm:$0xff] (!%p1277_p8)  ;;  %s5526_s24 = sshll.u32 (!%p1277_p8), %s7033_s14, 2 }
 0x126   : > { %1280 = sbr.rel (%p1277_p8) target bundleno = 1061 (0x425), region = 51  ;;  %v1359_v33 = vpack.c.bf16 (!%p1277_p8), %v1342_v32, %v1342_v32  ;;  %v1341_v32 = vld [vmem:[%s8821_s0] sm:$0xff] (!%p1277_p8)  ;;  %p1326_p9 = scmp.lt.s32.totalorder (!%p1277_p8), %s5526_s24, 7 }
 0x127   : > { %s6145_s4 = smul.u32 (!%p1277_p8), 4352, %s1283_s28 }
 0x128   : > { %4693 = vmatprep.mubr.bf16.mxu0 (!%p1277_p8), %v1359_v33  ;;  %5062 = vmatprep.mubr.bf16.mxu1 (!%p1277_p8), %v1359_v33 }
 0x129   : > { %s8205_s5 = scalar_lea.vmem (!%p1277_p8), [#allocation2], %s6145_s4 }
 0x12a   : > { %v6187_v34 = vld [vmem:[%s8205_s5 + $0x4] ss:$16 sps:$4 sm:$0xff] (!%p1277_p8)   ;;  %v6189_v35 = vld [vmem:[%s8205_s5 + $0xc] ss:$16 sps:$4 sm:$0xff] (!%p1277_p8)   ;;  %v6191_v36 = vld [vmem:[%s8205_s5] ss:$16 sps:$4 sm:$0xff] (!%p1277_p8)  }
 0x12b   : > { %4661 = vmatprep.subr.bf16.mxu0 (!%p1277_p8), %v6187_v34  ;;  %v6192_v37 = vld [vmem:[%s8205_s5 + $0x8] ss:$16 sps:$4 sm:$0xff] (!%p1277_p8)   ;;  %5030 = vmatprep.subr.bf16.mxu1 (!%p1277_p8), %v6189_v35  ;;  %v6193_v38 = vld [vmem:[%s8205_s5 + $0x24] ss:$16 sps:$4 sm:$0xff] (!%p1277_p8)   ;;  %v6195_v39 = vld [vmem:[%s8205_s5 + $0x2c] ss:$16 sps:$4 sm:$0xff] (!%p1277_p8)  }
 0x12c   : > { %4662 = vmatpush1.bf16.msra.mxu0 (!%p1277_p8), %v6191_v36  ;;  %5031 = vmatpush1.bf16.msra.mxu1 (!%p1277_p8), %v6192_v37  ;;  %v6197_v40 = vld [vmem:[%s8205_s5 + $0x20] ss:$16 sps:$4 sm:$0xff] (!%p1277_p8)   ;;  %v6198_v41 = vld [vmem:[%s8205_s5 + $0x28] ss:$16 sps:$4 sm:$0xff] (!%p1277_p8)   ;;  %v6199_v42 = vld [vmem:[%s8205_s5 + $0x44] ss:$16 sps:$4 sm:$0xff] (!%p1277_p8)  }
 0x12d   : > { %4663 = vmatprep.subr.bf16.mxu0 %v6193_v38  ;;  %5032 = vmatprep.subr.bf16.mxu1 %v6195_v39  ;;  %v6201_v43 = vld [vmem:[%s8205_s5 + $0x4c] ss:$16 sps:$4 sm:$0xff]   ;;  %v6203_v44 = vld [vmem:[%s8205_s5 + $0x40] ss:$16 sps:$4 sm:$0xff]   ;;  %v6204_v45 = vld [vmem:[%s8205_s5 + $0x48] ss:$16 sps:$4 sm:$0xff]   ;;  %v1358_v39 = vpack.c.bf16 %v1341_v32, %v1341_v32 }
 0x12e   : > { %v6205_v46 = vld [vmem:[%s8205_s5 + $0x64] ss:$16 sps:$4 sm:$0xff]   ;;  %v6207_v47 = vld [vmem:[%s8205_s5 + $0x6c] ss:$16 sps:$4 sm:$0xff]   ;;  %v6209_v48 = vld [vmem:[%s8205_s5 + $0x60] ss:$16 sps:$4 sm:$0xff]  }
 0x12f   : > { %v6210_v49 = vld [vmem:[%s8205_s5 + $0x68] ss:$16 sps:$4 sm:$0xff]   ;;  %v6211_v50 = vld [vmem:[%s8205_s5 + $0x84] ss:$16 sps:$4 sm:$0xff]   ;;  %v6213_v51 = vld [vmem:[%s8205_s5 + $0x8c] ss:$16 sps:$4 sm:$0xff]  }
 0x130   : > { %4664 = vmatpush1.bf16.msra.mxu0 %v6197_v40  ;;  %5033 = vmatpush1.bf16.msra.mxu1 %v6198_v41  ;;  %v6215_v52 = vld [vmem:[%s8205_s5 + $0x80] ss:$16 sps:$4 sm:$0xff]   ;;  %v6216_v53 = vld [vmem:[%s8205_s5 + $0x88] ss:$16 sps:$4 sm:$0xff]   ;;  %v6217_v54 = vld [vmem:[%s8205_s5 + $0xa4] ss:$16 sps:$4 sm:$0xff]  }
 0x131   : > { %4665 = vmatprep.subr.bf16.mxu0 %v6199_v42  ;;  %5034 = vmatprep.subr.bf16.mxu1 %v6201_v43  ;;  %v6219_v55 = vld [vmem:[%s8205_s5 + $0xac] ss:$16 sps:$4 sm:$0xff]   ;;  %v6221_v56 = vld [vmem:[%s8205_s5 + $0xa0] ss:$16 sps:$4 sm:$0xff]   ;;  %v6222_v57 = vld [vmem:[%s8205_s5 + $0xa8] ss:$16 sps:$4 sm:$0xff]  }
 0x132   : > { %v6223_v58 = vld [vmem:[%s8205_s5 + $0xc4] ss:$16 sps:$4 sm:$0xff]   ;;  %v6225_v59 = vld [vmem:[%s8205_s5 + $0xcc] ss:$16 sps:$4 sm:$0xff]   ;;  %v6227_v60 = vld [vmem:[%s8205_s5 + $0xc0] ss:$16 sps:$4 sm:$0xff]  }
 0x133   : > { %v6228_v61 = vld [vmem:[%s8205_s5 + $0xc8] ss:$16 sps:$4 sm:$0xff]   ;;  %v6229_v62 = vld [vmem:[%s8205_s5 + $0xe4] ss:$16 sps:$4 sm:$0xff]   ;;  %v6231_v63 = vld [vmem:[%s8205_s5 + $0xec] ss:$16 sps:$4 sm:$0xff]  }
 0x134   : > { %4666 = vmatpush1.bf16.msra.mxu0 %v6203_v44  ;;  %5035 = vmatpush1.bf16.msra.mxu1 %v6204_v45  ;;  %v6233_v0 = vld [vmem:[%s8205_s5 + $0xe0] ss:$16 sps:$4 sm:$0xff]   ;;  %v6234_v1 = vld [vmem:[%s8205_s5 + $0xe8] ss:$16 sps:$4 sm:$0xff]   ;;  %v6235_v2 = vld [vmem:[%s8205_s5 + $0x104] ss:$16 sps:$4 sm:$0xff]  }
 0x135   : > { %4667 = vmatprep.subr.bf16.mxu0 %v6205_v46  ;;  %5036 = vmatprep.subr.bf16.mxu1 %v6207_v47  ;;  %v6237_v3 = vld [vmem:[%s8205_s5 + $0x10c] ss:$16 sps:$4 sm:$0xff]   ;;  %v6239_v4 = vld [vmem:[%s8205_s5 + $0x100] ss:$16 sps:$4 sm:$0xff]   ;;  %v6240_v5 = vld [vmem:[%s8205_s5 + $0x108] ss:$16 sps:$4 sm:$0xff]  }
 0x136   : > { %v6241_v6 = vld [vmem:[%s8205_s5 + $0x124] ss:$16 sps:$4 sm:$0xff]   ;;  %v6243_v7 = vld [vmem:[%s8205_s5 + $0x12c] ss:$16 sps:$4 sm:$0xff]   ;;  %v6245_v8 = vld [vmem:[%s8205_s5 + $0x120] ss:$16 sps:$4 sm:$0xff]  }
 0x137   : > { %v6246_v9 = vld [vmem:[%s8205_s5 + $0x128] ss:$16 sps:$4 sm:$0xff]   ;;  %v6247_v10 = vld [vmem:[%s8205_s5 + $0x144] ss:$16 sps:$4 sm:$0xff]   ;;  %v6249_v11 = vld [vmem:[%s8205_s5 + $0x14c] ss:$16 sps:$4 sm:$0xff]  }
 0x138   : > { %4668 = vmatpush1.bf16.msra.mxu0 %v6209_v48  ;;  %5037 = vmatpush1.bf16.msra.mxu1 %v6210_v49  ;;  %v6251_v12 = vld [vmem:[%s8205_s5 + $0x140] ss:$16 sps:$4 sm:$0xff]   ;;  %v6252_v13 = vld [vmem:[%s8205_s5 + $0x148] ss:$16 sps:$4 sm:$0xff]   ;;  %v6253_v14 = vld [vmem:[%s8205_s5 + $0x164] ss:$16 sps:$4 sm:$0xff]  }
 0x139   : > { %4669 = vmatprep.subr.bf16.mxu0 %v6211_v50  ;;  %5038 = vmatprep.subr.bf16.mxu1 %v6213_v51  ;;  %v6255_v15 = vld [vmem:[%s8205_s5 + $0x16c] ss:$16 sps:$4 sm:$0xff]   ;;  %v6257_v16 = vld [vmem:[%s8205_s5 + $0x160] ss:$16 sps:$4 sm:$0xff]   ;;  %v6258_v17 = vld [vmem:[%s8205_s5 + $0x168] ss:$16 sps:$4 sm:$0xff]  }
 0x13a   : > { %v6259_v18 = vld [vmem:[%s8205_s5 + $0x184] ss:$16 sps:$4 sm:$0xff]   ;;  %v6261_v19 = vld [vmem:[%s8205_s5 + $0x18c] ss:$16 sps:$4 sm:$0xff]   ;;  %v6263_v20 = vld [vmem:[%s8205_s5 + $0x180] ss:$16 sps:$4 sm:$0xff]  }
 0x13b   : > { %v6264_v21 = vld [vmem:[%s8205_s5 + $0x188] ss:$16 sps:$4 sm:$0xff]   ;;  %v6265_v22 = vld [vmem:[%s8205_s5 + $0x1a4] ss:$16 sps:$4 sm:$0xff]   ;;  %v6267_v23 = vld [vmem:[%s8205_s5 + $0x1ac] ss:$16 sps:$4 sm:$0xff]  }
 0x13c   : > { %4670 = vmatpush1.bf16.msra.mxu0 %v6215_v52  ;;  %5039 = vmatpush1.bf16.msra.mxu1 %v6216_v53  ;;  %v6269_v24 = vld [vmem:[%s8205_s5 + $0x1a0] ss:$16 sps:$4 sm:$0xff]   ;;  %v6270_v25 = vld [vmem:[%s8205_s5 + $0x1a8] ss:$16 sps:$4 sm:$0xff]   ;;  %v6271_v26 = vld [vmem:[%s8205_s5 + $0x1c4] ss:$16 sps:$4 sm:$0xff]  }
 0x13d   : > { %4671 = vmatprep.subr.bf16.mxu0 %v6217_v54  ;;  %5040 = vmatprep.subr.bf16.mxu1 %v6219_v55  ;;  %v6273_v27 = vld [vmem:[%s8205_s5 + $0x1cc] ss:$16 sps:$4 sm:$0xff]   ;;  %v6275_v28 = vld [vmem:[%s8205_s5 + $0x1c0] ss:$16 sps:$4 sm:$0xff]   ;;  %v6276_v29 = vld [vmem:[%s8205_s5 + $0x1c8] ss:$16 sps:$4 sm:$0xff]  }
 0x13e   : > { %v6277_v30 = vld [vmem:[%s8205_s5 + $0x1e4] ss:$16 sps:$4 sm:$0xff]   ;;  %v6279_v31 = vld [vmem:[%s8205_s5 + $0x1ec] ss:$16 sps:$4 sm:$0xff]   ;;  %v6281_v33 = vld [vmem:[%s8205_s5 + $0x1e0] ss:$16 sps:$4 sm:$0xff]  }
 0x13f   : > { %v6282_v34 = vld [vmem:[%s8205_s5 + $0x1e8] ss:$16 sps:$4 sm:$0xff]   ;;  %v6285_v35 = vld [vmem:[%s8205_s5 + $0x204] ss:$16 sps:$4 sm:$0xff]   ;;  %v6288_v36 = vld [vmem:[%s8205_s5 + $0x20c] ss:$16 sps:$4 sm:$0xff]  }
 0x140   : > { %4672 = vmatpush1.bf16.msra.mxu0 %v6221_v56  ;;  %5041 = vmatpush1.bf16.msra.mxu1 %v6222_v57  ;;  %v6283_v37 = vld [vmem:[%s8205_s5 + $0x200] ss:$16 sps:$4 sm:$0xff]   ;;  %v6286_v38 = vld [vmem:[%s8205_s5 + $0x208] ss:$16 sps:$4 sm:$0xff]   ;;  %v6291_v40 = vld [vmem:[%s8205_s5 + $0x224] ss:$16 sps:$4 sm:$0xff]  }
 0x141   : > { %4673 = vmatprep.subr.bf16.mxu0 %v6223_v58  ;;  %5042 = vmatprep.subr.bf16.mxu1 %v6225_v59  ;;  %v6294_v41 = vld [vmem:[%s8205_s5 + $0x22c] ss:$16 sps:$4 sm:$0xff]   ;;  %v6289_v42 = vld [vmem:[%s8205_s5 + $0x220] ss:$16 sps:$4 sm:$0xff]   ;;  %v6292_v43 = vld [vmem:[%s8205_s5 + $0x228] ss:$16 sps:$4 sm:$0xff]  }
 0x142   : > { %v6297_v44 = vld [vmem:[%s8205_s5 + $0x244] ss:$16 sps:$4 sm:$0xff]   ;;  %v6300_v45 = vld [vmem:[%s8205_s5 + $0x24c] ss:$16 sps:$4 sm:$0xff]   ;;  %v6295_v46 = vld [vmem:[%s8205_s5 + $0x240] ss:$16 sps:$4 sm:$0xff]  }
 0x143   : > { %v6298_v47 = vld [vmem:[%s8205_s5 + $0x248] ss:$16 sps:$4 sm:$0xff]   ;;  %v6303_v48 = vld [vmem:[%s8205_s5 + $0x264] ss:$16 sps:$4 sm:$0xff]   ;;  %v6306_v49 = vld [vmem:[%s8205_s5 + $0x26c] ss:$16 sps:$4 sm:$0xff]  }
 0x144   : > { %4674 = vmatpush1.bf16.msra.mxu0 %v6227_v60  ;;  %5043 = vmatpush1.bf16.msra.mxu1 %v6228_v61  ;;  %v6301_v50 = vld [vmem:[%s8205_s5 + $0x260] ss:$16 sps:$4 sm:$0xff]   ;;  %v6304_v51 = vld [vmem:[%s8205_s5 + $0x268] ss:$16 sps:$4 sm:$0xff]   ;;  %v6309_v52 = vld [vmem:[%s8205_s5 + $0x284] ss:$16 sps:$4 sm:$0xff]  }
 0x145   : > { %4675 = vmatprep.subr.bf16.mxu0 %v6229_v62  ;;  %5044 = vmatprep.subr.bf16.mxu1 %v6231_v63  ;;  %v6312_v53 = vld [vmem:[%s8205_s5 + $0x28c] ss:$16 sps:$4 sm:$0xff]   ;;  %v6307_v54 = vld [vmem:[%s8205_s5 + $0x280] ss:$16 sps:$4 sm:$0xff]   ;;  %v6310_v55 = vld [vmem:[%s8205_s5 + $0x288] ss:$16 sps:$4 sm:$0xff]  }
 0x146   : > { %v6315_v56 = vld [vmem:[%s8205_s5 + $0x2a4] ss:$16 sps:$4 sm:$0xff]   ;;  %v6318_v57 = vld [vmem:[%s8205_s5 + $0x2ac] ss:$16 sps:$4 sm:$0xff]   ;;  %v6313_v58 = vld [vmem:[%s8205_s5 + $0x2a0] ss:$16 sps:$4 sm:$0xff]  }
 0x147   : > { %v6316_v59 = vld [vmem:[%s8205_s5 + $0x2a8] ss:$16 sps:$4 sm:$0xff]   ;;  %v6321_v60 = vld [vmem:[%s8205_s5 + $0x2c4] ss:$16 sps:$4 sm:$0xff]   ;;  %v6324_v61 = vld [vmem:[%s8205_s5 + $0x2cc] ss:$16 sps:$4 sm:$0xff]  }
 0x148   : > { %4676 = vmatpush1.bf16.msra.mxu0 %v6233_v0  ;;  %5045 = vmatpush1.bf16.msra.mxu1 %v6234_v1  ;;  %v1344_v62 = vld [vmem:[%s8821_s0 + $0x18] sm:$0xff]  ;;  %v6319_v0 = vld [vmem:[%s8205_s5 + $0x2c0] ss:$16 sps:$4 sm:$0xff]   ;;  %s8832_s24 = smov (!%p1326_p9, %s5526_s24), 7 }
 0x149   : > { %4677 = vmatprep.subr.bf16.mxu0 %v6235_v2  ;;  %5046 = vmatprep.subr.bf16.mxu1 %v6237_v3  ;;  %v1361_v63 = vpack.c.bf16 %v1344_v62, %v1344_v62  ;;  %v6322_v1 = vld [vmem:[%s8205_s5 + $0x2c8] ss:$16 sps:$4 sm:$0xff]   ;;  %v6327_v2 = vld [vmem:[%s8205_s5 + $0x2e4] ss:$16 sps:$4 sm:$0xff]   ;;  %v6330_v3 = vld [vmem:[%s8205_s5 + $0x2ec] ss:$16 sps:$4 sm:$0xff]  }
 0x14a   : > { %v6367_v32 = vld [vmem:[%s8205_s5 + $0x3c0] ss:$16 sps:$4 sm:$0xff]   ;;  %v6411_v62 = vld [vmem:[%s8205_s5 + $0x4a4] ss:$16 sps:$4 sm:$0xff]   ;;  %s5528_s27 = sshll.u32 %s8832_s24, 3 }
 0x14b   : > { %s1338_s29 = scalar_lea.vmem %s8824_s3, %s5528_s27 }
 0x14c   : > { %4678 = vmatpush1.bf16.msra.mxu0 %v6239_v4  ;;  %5047 = vmatpush1.bf16.msra.mxu1 %v6240_v5  ;;  %v6325_v4 = vld [vmem:[%s8205_s5 + $0x2e0] ss:$16 sps:$4 sm:$0xff]   ;;  %v6328_v5 = vld [vmem:[%s8205_s5 + $0x2e8] ss:$16 sps:$4 sm:$0xff]  }
 0x14d   : > { %4679 = vmatprep.subr.bf16.mxu0 %v6241_v6  ;;  %5048 = vmatprep.subr.bf16.mxu1 %v6243_v7  ;;  %v6333_v6 = vld [vmem:[%s8205_s5 + $0x304] ss:$16 sps:$4 sm:$0xff]   ;;  %v6336_v7 = vld [vmem:[%s8205_s5 + $0x30c] ss:$16 sps:$4 sm:$0xff]  }
 0x150   : > { %4680 = vmatpush1.bf16.msra.mxu0 %v6245_v8  ;;  %5049 = vmatpush1.bf16.msra.mxu1 %v6246_v9  ;;  %v6331_v8 = vld [vmem:[%s8205_s5 + $0x300] ss:$16 sps:$4 sm:$0xff]   ;;  %v6334_v9 = vld [vmem:[%s8205_s5 + $0x308] ss:$16 sps:$4 sm:$0xff]  }
 0x151   : > { %4681 = vmatprep.subr.bf16.mxu0 %v6247_v10  ;;  %5050 = vmatprep.subr.bf16.mxu1 %v6249_v11  ;;  %v6339_v10 = vld [vmem:[%s8205_s5 + $0x324] ss:$16 sps:$4 sm:$0xff]   ;;  %v6342_v11 = vld [vmem:[%s8205_s5 + $0x32c] ss:$16 sps:$4 sm:$0xff]  }
 0x154   : > { %4682 = vmatpush1.bf16.msra.mxu0 %v6251_v12  ;;  %5051 = vmatpush1.bf16.msra.mxu1 %v6252_v13  ;;  %v6337_v12 = vld [vmem:[%s8205_s5 + $0x320] ss:$16 sps:$4 sm:$0xff]   ;;  %v6340_v13 = vld [vmem:[%s8205_s5 + $0x328] ss:$16 sps:$4 sm:$0xff]  }
 0x155   : > { %4683 = vmatprep.subr.bf16.mxu0 %v6253_v14  ;;  %5052 = vmatprep.subr.bf16.mxu1 %v6255_v15  ;;  %v6345_v14 = vld [vmem:[%s8205_s5 + $0x344] ss:$16 sps:$4 sm:$0xff]   ;;  %v6348_v15 = vld [vmem:[%s8205_s5 + $0x34c] ss:$16 sps:$4 sm:$0xff]  }
 0x158   : > { %4684 = vmatpush1.bf16.msra.mxu0 %v6257_v16  ;;  %5053 = vmatpush1.bf16.msra.mxu1 %v6258_v17  ;;  %v6343_v16 = vld [vmem:[%s8205_s5 + $0x340] ss:$16 sps:$4 sm:$0xff]   ;;  %v6346_v17 = vld [vmem:[%s8205_s5 + $0x348] ss:$16 sps:$4 sm:$0xff]  }
 0x159   : > { %4685 = vmatprep.subr.bf16.mxu0 %v6259_v18  ;;  %5054 = vmatprep.subr.bf16.mxu1 %v6261_v19  ;;  %v6351_v18 = vld [vmem:[%s8205_s5 + $0x364] ss:$16 sps:$4 sm:$0xff]   ;;  %v6354_v19 = vld [vmem:[%s8205_s5 + $0x36c] ss:$16 sps:$4 sm:$0xff]  }
 0x15c   : > { %4686 = vmatpush1.bf16.msra.mxu0 %v6263_v20  ;;  %5055 = vmatpush1.bf16.msra.mxu1 %v6264_v21  ;;  %v6349_v20 = vld [vmem:[%s8205_s5 + $0x360] ss:$16 sps:$4 sm:$0xff]   ;;  %v6352_v21 = vld [vmem:[%s8205_s5 + $0x368] ss:$16 sps:$4 sm:$0xff]  }
 0x15d   : > { %4687 = vmatprep.subr.bf16.mxu0 %v6265_v22  ;;  %5056 = vmatprep.subr.bf16.mxu1 %v6267_v23  ;;  %v6357_v22 = vld [vmem:[%s8205_s5 + $0x384] ss:$16 sps:$4 sm:$0xff]   ;;  %v6360_v23 = vld [vmem:[%s8205_s5 + $0x38c] ss:$16 sps:$4 sm:$0xff]  }
 0x160   : > { %4688 = vmatpush1.bf16.msra.mxu0 %v6269_v24  ;;  %5057 = vmatpush1.bf16.msra.mxu1 %v6270_v25  ;;  %v6355_v24 = vld [vmem:[%s8205_s5 + $0x380] ss:$16 sps:$4 sm:$0xff]   ;;  %v6358_v25 = vld [vmem:[%s8205_s5 + $0x388] ss:$16 sps:$4 sm:$0xff]  }
 0x161   : > { %4689 = vmatprep.subr.bf16.mxu0 %v6271_v26  ;;  %5058 = vmatprep.subr.bf16.mxu1 %v6273_v27  ;;  %v6363_v26 = vld [vmem:[%s8205_s5 + $0x3a4] ss:$16 sps:$4 sm:$0xff]   ;;  %v6366_v27 = vld [vmem:[%s8205_s5 + $0x3ac] ss:$16 sps:$4 sm:$0xff]  }
 0x164   : > { %4690 = vmatpush1.bf16.msra.mxu0 %v6275_v28  ;;  %5059 = vmatpush1.bf16.msra.mxu1 %v6276_v29  ;;  %v6361_v28 = vld [vmem:[%s8205_s5 + $0x3a0] ss:$16 sps:$4 sm:$0xff]   ;;  %v6364_v29 = vld [vmem:[%s8205_s5 + $0x3a8] ss:$16 sps:$4 sm:$0xff]  }
 0x165   : > { %4691 = vmatprep.subr.bf16.mxu0 %v6277_v30  ;;  %5060 = vmatprep.subr.bf16.mxu1 %v6279_v31  ;;  %v6369_v30 = vld [vmem:[%s8205_s5 + $0x3c4] ss:$16 sps:$4 sm:$0xff]   ;;  %v6372_v31 = vld [vmem:[%s8205_s5 + $0x3cc] ss:$16 sps:$4 sm:$0xff]  }
 0x168   : > { %4692 = vmatpush1.bf16.msra.mxu0 %v6281_v33  ;;  %5061 = vmatpush1.bf16.msra.mxu1 %v6282_v34  ;;  %v6370_v33 = vld [vmem:[%s8205_s5 + $0x3c8] ss:$16 sps:$4 sm:$0xff]   ;;  %v6375_v34 = vld [vmem:[%s8205_s5 + $0x3e4] ss:$16 sps:$4 sm:$0xff]  }
 0x169   : > { %4702 = vmatprep.subr.bf16.mxu0 %v6285_v35  ;;  %5071 = vmatprep.subr.bf16.mxu1 %v6288_v36  ;;  %v6378_v35 = vld [vmem:[%s8205_s5 + $0x3ec] ss:$16 sps:$4 sm:$0xff]   ;;  %v6373_v36 = vld [vmem:[%s8205_s5 + $0x3e0] ss:$16 sps:$4 sm:$0xff]  }
 0x16b   : > { %4694 = vmatmul.mubr.bf16.vlgmr.msra.gmra.mrb[0].mxu0 %v1358_v39  ;;  %5063 = vmatmul.mubr.bf16.vlgmr.msra.gmra.mrb[0].mxu1 %v1358_v39  ;;  %v6381_v39 = vld [vmem:[%s8205_s5 + $0x404] ss:$16 sps:$4 sm:$0xff]  }
 0x16c   : > { %4703 = vmatpush1.bf16.msra.mxu0 %v6283_v37  ;;  %5072 = vmatpush1.bf16.msra.mxu1 %v6286_v38  ;;  %v6376_v37 = vld [vmem:[%s8205_s5 + $0x3e8] ss:$16 sps:$4 sm:$0xff]   ;;  %v1343_v38 = vld [vmem:[%s8821_s0 + $0x10] sm:$0xff] }
 0x16d   : > { %4704 = vmatprep.subr.bf16.mxu0 %v6291_v40  ;;  %5073 = vmatprep.subr.bf16.mxu1 %v6294_v41  ;;  %v6384_v40 = vld [vmem:[%s8205_s5 + $0x40c] ss:$16 sps:$4 sm:$0xff]   ;;  %v6379_v41 = vld [vmem:[%s8205_s5 + $0x400] ss:$16 sps:$4 sm:$0xff]  }
 0x16e   : > { %4734 = vmatprep.mubr.bf16.mxu0 %v1361_v63  ;;  %5103 = vmatprep.mubr.bf16.mxu1 %v1361_v63  ;;  %v6414_v63 = vld [vmem:[%s8205_s5 + $0x4ac] ss:$16 sps:$4 sm:$0xff]  }
 0x170   : > { %4705 = vmatpush1.bf16.msra.mxu0 %v6289_v42  ;;  %5074 = vmatpush1.bf16.msra.mxu1 %v6292_v43  ;;  %v1360_v42 = vpack.c.bf16 %v1343_v38, %v1343_v38  ;;  %v6382_v43 = vld [vmem:[%s8205_s5 + $0x408] ss:$16 sps:$4 sm:$0xff]   ;;  %v6471_v38 = vld [vmem:[%s8205_s5 + $0x5e4] ss:$16 sps:$4 sm:$0xff]  }
 0x171   : > { %4706 = vmatprep.subr.bf16.mxu0 %v6297_v44  ;;  %5075 = vmatprep.subr.bf16.mxu1 %v6300_v45  ;;  %v6387_v44 = vld [vmem:[%s8205_s5 + $0x424] ss:$16 sps:$4 sm:$0xff]   ;;  %v1346_v45 = vld [vmem:[%s8821_s0 + $0x28] sm:$0xff] }
 0x174   : > { %4707 = vmatpush1.bf16.msra.mxu0 %v6295_v46  ;;  %5076 = vmatpush1.bf16.msra.mxu1 %v6298_v47  ;;  %v6390_v46 = vld [vmem:[%s8205_s5 + $0x42c] ss:$16 sps:$4 sm:$0xff]   ;;  %v1363_v47 = vpack.c.bf16 %v1346_v45, %v1346_v45 }
 0x175   : > { %4708 = vmatprep.subr.bf16.mxu0 %v6303_v48  ;;  %5077 = vmatprep.subr.bf16.mxu1 %v6306_v49  ;;  %v6385_v48 = vld [vmem:[%s8205_s5 + $0x420] ss:$16 sps:$4 sm:$0xff]   ;;  %v6388_v49 = vld [vmem:[%s8205_s5 + $0x428] ss:$16 sps:$4 sm:$0xff]  }
 0x178   : > { %4709 = vmatpush1.bf16.msra.mxu0 %v6301_v50  ;;  %5078 = vmatpush1.bf16.msra.mxu1 %v6304_v51  ;;  %v6393_v50 = vld [vmem:[%s8205_s5 + $0x444] ss:$16 sps:$4 sm:$0xff]   ;;  %v6396_v51 = vld [vmem:[%s8205_s5 + $0x44c] ss:$16 sps:$4 sm:$0xff]  }
 0x179   : > { %4710 = vmatprep.subr.bf16.mxu0 %v6309_v52  ;;  %5079 = vmatprep.subr.bf16.mxu1 %v6312_v53  ;;  %v6391_v52 = vld [vmem:[%s8205_s5 + $0x440] ss:$16 sps:$4 sm:$0xff]   ;;  %v6394_v53 = vld [vmem:[%s8205_s5 + $0x448] ss:$16 sps:$4 sm:$0xff]  }
 0x17c   : > { %4711 = vmatpush1.bf16.msra.mxu0 %v6307_v54  ;;  %5080 = vmatpush1.bf16.msra.mxu1 %v6310_v55  ;;  %v6399_v54 = vld [vmem:[%s8205_s5 + $0x464] ss:$16 sps:$4 sm:$0xff]   ;;  %v6402_v55 = vld [vmem:[%s8205_s5 + $0x46c] ss:$16 sps:$4 sm:$0xff]  }
 0x17d   : > { %4712 = vmatprep.subr.bf16.mxu0 %v6315_v56  ;;  %5081 = vmatprep.subr.bf16.mxu1 %v6318_v57  ;;  %v6397_v56 = vld [vmem:[%s8205_s5 + $0x460] ss:$16 sps:$4 sm:$0xff]   ;;  %v6400_v57 = vld [vmem:[%s8205_s5 + $0x468] ss:$16 sps:$4 sm:$0xff]  }
 0x180   : > { %4713 = vmatpush1.bf16.msra.mxu0 %v6313_v58  ;;  %5082 = vmatpush1.bf16.msra.mxu1 %v6316_v59  ;;  %v6405_v58 = vld [vmem:[%s8205_s5 + $0x484] ss:$16 sps:$4 sm:$0xff]   ;;  %v6408_v59 = vld [vmem:[%s8205_s5 + $0x48c] ss:$16 sps:$4 sm:$0xff]  }
 0x181   : > { %4714 = vmatprep.subr.bf16.mxu0 %v6321_v60  ;;  %5083 = vmatprep.subr.bf16.mxu1 %v6324_v61  ;;  %v6403_v60 = vld [vmem:[%s8205_s5 + $0x480] ss:$16 sps:$4 sm:$0xff]   ;;  %v6406_v61 = vld [vmem:[%s8205_s5 + $0x488] ss:$16 sps:$4 sm:$0xff]  }
 0x184   : > { %4715 = vmatpush1.bf16.msra.mxu0 %v6319_v0  ;;  %5084 = vmatpush1.bf16.msra.mxu1 %v6322_v1  ;;  %v6409_v0 = vld [vmem:[%s8205_s5 + $0x4a0] ss:$16 sps:$4 sm:$0xff]   ;;  %v6412_v1 = vld [vmem:[%s8205_s5 + $0x4a8] ss:$16 sps:$4 sm:$0xff]  }
 0x185   : > { %4716 = vmatprep.subr.bf16.mxu0 %v6327_v2  ;;  %5085 = vmatprep.subr.bf16.mxu1 %v6330_v3  ;;  %v6417_v2 = vld [vmem:[%s8205_s5 + $0x4c4] ss:$16 sps:$4 sm:$0xff]   ;;  %v6420_v3 = vld [vmem:[%s8205_s5 + $0x4cc] ss:$16 sps:$4 sm:$0xff]  }
 0x188   : > { %4717 = vmatpush1.bf16.msra.mxu0 %v6325_v4  ;;  %5086 = vmatpush1.bf16.msra.mxu1 %v6328_v5  ;;  %v6415_v4 = vld [vmem:[%s8205_s5 + $0x4c0] ss:$16 sps:$4 sm:$0xff]   ;;  %v6418_v5 = vld [vmem:[%s8205_s5 + $0x4c8] ss:$16 sps:$4 sm:$0xff]  }
 0x189   : > { %4718 = vmatprep.subr.bf16.mxu0 %v6333_v6  ;;  %5087 = vmatprep.subr.bf16.mxu1 %v6336_v7  ;;  %v6423_v6 = vld [vmem:[%s8205_s5 + $0x4e4] ss:$16 sps:$4 sm:$0xff]   ;;  %v6426_v7 = vld [vmem:[%s8205_s5 + $0x4ec] ss:$16 sps:$4 sm:$0xff]  }
 0x18c   : > { %4719 = vmatpush1.bf16.msra.mxu0 %v6331_v8  ;;  %5088 = vmatpush1.bf16.msra.mxu1 %v6334_v9  ;;  %v6421_v8 = vld [vmem:[%s8205_s5 + $0x4e0] ss:$16 sps:$4 sm:$0xff]   ;;  %v6424_v9 = vld [vmem:[%s8205_s5 + $0x4e8] ss:$16 sps:$4 sm:$0xff]  }
 0x18d   : > { %4720 = vmatprep.subr.bf16.mxu0 %v6339_v10  ;;  %5089 = vmatprep.subr.bf16.mxu1 %v6342_v11  ;;  %v6429_v10 = vld [vmem:[%s8205_s5 + $0x504] ss:$16 sps:$4 sm:$0xff]   ;;  %v6432_v11 = vld [vmem:[%s8205_s5 + $0x50c] ss:$16 sps:$4 sm:$0xff]  }
 0x190   : > { %4721 = vmatpush1.bf16.msra.mxu0 %v6337_v12  ;;  %5090 = vmatpush1.bf16.msra.mxu1 %v6340_v13  ;;  %v6427_v12 = vld [vmem:[%s8205_s5 + $0x500] ss:$16 sps:$4 sm:$0xff]   ;;  %v6430_v13 = vld [vmem:[%s8205_s5 + $0x508] ss:$16 sps:$4 sm:$0xff]  }
 0x191   : > { %4722 = vmatprep.subr.bf16.mxu0 %v6345_v14  ;;  %5091 = vmatprep.subr.bf16.mxu1 %v6348_v15  ;;  %v6435_v14 = vld [vmem:[%s8205_s5 + $0x524] ss:$16 sps:$4 sm:$0xff]   ;;  %v6438_v15 = vld [vmem:[%s8205_s5 + $0x52c] ss:$16 sps:$4 sm:$0xff]  }
 0x194   : > { %4723 = vmatpush1.bf16.msra.mxu0 %v6343_v16  ;;  %5092 = vmatpush1.bf16.msra.mxu1 %v6346_v17  ;;  %v6433_v16 = vld [vmem:[%s8205_s5 + $0x520] ss:$16 sps:$4 sm:$0xff]   ;;  %v6436_v17 = vld [vmem:[%s8205_s5 + $0x528] ss:$16 sps:$4 sm:$0xff]  }
 0x195   : > { %4724 = vmatprep.subr.bf16.mxu0 %v6351_v18  ;;  %5093 = vmatprep.subr.bf16.mxu1 %v6354_v19  ;;  %v6441_v18 = vld [vmem:[%s8205_s5 + $0x544] ss:$16 sps:$4 sm:$0xff]   ;;  %v6444_v19 = vld [vmem:[%s8205_s5 + $0x54c] ss:$16 sps:$4 sm:$0xff]  }
 0x198   : > { %4725 = vmatpush1.bf16.msra.mxu0 %v6349_v20  ;;  %5094 = vmatpush1.bf16.msra.mxu1 %v6352_v21  ;;  %v6439_v20 = vld [vmem:[%s8205_s5 + $0x540] ss:$16 sps:$4 sm:$0xff]   ;;  %v6442_v21 = vld [vmem:[%s8205_s5 + $0x548] ss:$16 sps:$4 sm:$0xff]  }
 0x199   : > { %4726 = vmatprep.subr.bf16.mxu0 %v6357_v22  ;;  %5095 = vmatprep.subr.bf16.mxu1 %v6360_v23  ;;  %v6447_v22 = vld [vmem:[%s8205_s5 + $0x564] ss:$16 sps:$4 sm:$0xff]   ;;  %v6450_v23 = vld [vmem:[%s8205_s5 + $0x56c] ss:$16 sps:$4 sm:$0xff]  }
 0x19c   : > { %4727 = vmatpush1.bf16.msra.mxu0 %v6355_v24  ;;  %5096 = vmatpush1.bf16.msra.mxu1 %v6358_v25  ;;  %v6445_v24 = vld [vmem:[%s8205_s5 + $0x560] ss:$16 sps:$4 sm:$0xff]   ;;  %v6448_v25 = vld [vmem:[%s8205_s5 + $0x568] ss:$16 sps:$4 sm:$0xff]  }
 0x19d   : > { %4728 = vmatprep.subr.bf16.mxu0 %v6363_v26  ;;  %5097 = vmatprep.subr.bf16.mxu1 %v6366_v27  ;;  %v6453_v26 = vld [vmem:[%s8205_s5 + $0x584] ss:$16 sps:$4 sm:$0xff]   ;;  %v6456_v27 = vld [vmem:[%s8205_s5 + $0x58c] ss:$16 sps:$4 sm:$0xff]  }
 0x1a0   : > { %4729 = vmatpush1.bf16.msra.mxu0 %v6361_v28  ;;  %5098 = vmatpush1.bf16.msra.mxu1 %v6364_v29  ;;  %v6451_v28 = vld [vmem:[%s8205_s5 + $0x580] ss:$16 sps:$4 sm:$0xff]   ;;  %v6454_v29 = vld [vmem:[%s8205_s5 + $0x588] ss:$16 sps:$4 sm:$0xff]  }
 0x1a1   : > { %4730 = vmatprep.subr.bf16.mxu0 %v6369_v30  ;;  %5099 = vmatprep.subr.bf16.mxu1 %v6372_v31  ;;  %v6459_v30 = vld [vmem:[%s8205_s5 + $0x5a4] ss:$16 sps:$4 sm:$0xff]   ;;  %v6462_v31 = vld [vmem:[%s8205_s5 + $0x5ac] ss:$16 sps:$4 sm:$0xff]  }
 0x1a4   : > { %4731 = vmatpush1.bf16.msra.mxu0 %v6367_v32  ;;  %5100 = vmatpush1.bf16.msra.mxu1 %v6370_v33  ;;  %v6457_v32 = vld [vmem:[%s8205_s5 + $0x5a0] ss:$16 sps:$4 sm:$0xff]   ;;  %v6460_v33 = vld [vmem:[%s8205_s5 + $0x5a8] ss:$16 sps:$4 sm:$0xff]  }
 0x1a5   : > { %4732 = vmatprep.subr.bf16.mxu0 %v6375_v34  ;;  %5101 = vmatprep.subr.bf16.mxu1 %v6378_v35  ;;  %v6465_v34 = vld [vmem:[%s8205_s5 + $0x5c4] ss:$16 sps:$4 sm:$0xff]   ;;  %v6468_v35 = vld [vmem:[%s8205_s5 + $0x5cc] ss:$16 sps:$4 sm:$0xff]  }
 0x1a8   : > { %4733 = vmatpush1.bf16.msra.mxu0 %v6373_v36  ;;  %5102 = vmatpush1.bf16.msra.mxu1 %v6376_v37  ;;  %v6463_v36 = vld [vmem:[%s8205_s5 + $0x5c0] ss:$16 sps:$4 sm:$0xff]   ;;  %v6466_v37 = vld [vmem:[%s8205_s5 + $0x5c8] ss:$16 sps:$4 sm:$0xff]  }
 0x1a9   : > { %4743 = vmatprep.subr.bf16.mxu0 %v6381_v39  ;;  %5112 = vmatprep.subr.bf16.mxu1 %v6384_v40  ;;  %v6474_v39 = vld [vmem:[%s8205_s5 + $0x5ec] ss:$16 sps:$4 sm:$0xff]   ;;  %v6469_v40 = vld [vmem:[%s8205_s5 + $0x5e0] ss:$16 sps:$4 sm:$0xff]  }
 0x1ab   : > { %4735 = vmatmul.mubr.bf16.vlgmr.msra.gmra.mrb[0].mxu0 %v1360_v42  ;;  %5104 = vmatmul.mubr.bf16.vlgmr.msra.gmra.mrb[0].mxu1 %v1360_v42  ;;  %v1345_v42 = vld [vmem:[%s8821_s0 + $0x20] sm:$0xff] }
 0x1ac   : > { %4744 = vmatpush1.bf16.msra.mxu0 %v6379_v41  ;;  %5113 = vmatpush1.bf16.msra.mxu1 %v6382_v43  ;;  %v6472_v41 = vld [vmem:[%s8205_s5 + $0x5e8] ss:$16 sps:$4 sm:$0xff]   ;;  %v6477_v43 = vld [vmem:[%s8205_s5 + $0x604] ss:$16 sps:$4 sm:$0xff]   ;;  %v1362_v45 = vpack.c.bf16 %v1345_v42, %v1345_v42 }
 0x1ad   : > { %4745 = vmatprep.subr.bf16.mxu0 %v6387_v44  ;;  %5114 = vmatprep.subr.bf16.mxu1 %v6390_v46  ;;  %v6480_v44 = vld [vmem:[%s8205_s5 + $0x60c] ss:$16 sps:$4 sm:$0xff]   ;;  %v6567_v42 = vld [vmem:[%s8205_s5 + $0x7e4] ss:$16 sps:$4 sm:$0xff]  }
 0x1ae   : > { %4775 = vmatprep.mubr.bf16.mxu0 %v1363_v47  ;;  %5144 = vmatprep.mubr.bf16.mxu1 %v1363_v47  ;;  %v1348_v46 = vld [vmem:[%s8821_s0 + $0x38] sm:$0xff]  ;;  %v6475_v47 = vld [vmem:[%s8205_s5 + $0x600] ss:$16 sps:$4 sm:$0xff]  }
 0x1b0   : > { %4746 = vmatpush1.bf16.msra.mxu0 %v6385_v48  ;;  %5115 = vmatpush1.bf16.msra.mxu1 %v6388_v49  ;;  %v6478_v48 = vld [vmem:[%s8205_s5 + $0x608] ss:$16 sps:$4 sm:$0xff]   ;;  %v6483_v49 = vld [vmem:[%s8205_s5 + $0x624] ss:$16 sps:$4 sm:$0xff]  }
 0x1b1   : > { %4747 = vmatprep.subr.bf16.mxu0 %v6393_v50  ;;  %5116 = vmatprep.subr.bf16.mxu1 %v6396_v51  ;;  %v6486_v50 = vld [vmem:[%s8205_s5 + $0x62c] ss:$16 sps:$4 sm:$0xff]   ;;  %v1365_v51 = vpack.c.bf16 %v1348_v46, %v1348_v46  ;;  %v6573_v46 = vld [vmem:[%s8205_s5 + $0x804] ss:$16 sps:$4 sm:$0xff]  }
 0x1b4   : > { %4748 = vmatpush1.bf16.msra.mxu0 %v6391_v52  ;;  %5117 = vmatpush1.bf16.msra.mxu1 %v6394_v53  ;;  %v6481_v52 = vld [vmem:[%s8205_s5 + $0x620] ss:$16 sps:$4 sm:$0xff]   ;;  %v6484_v53 = vld [vmem:[%s8205_s5 + $0x628] ss:$16 sps:$4 sm:$0xff]  }
 0x1b5   : > { %4749 = vmatprep.subr.bf16.mxu0 %v6399_v54  ;;  %5118 = vmatprep.subr.bf16.mxu1 %v6402_v55  ;;  %v6489_v54 = vld [vmem:[%s8205_s5 + $0x644] ss:$16 sps:$4 sm:$0xff]   ;;  %v6492_v55 = vld [vmem:[%s8205_s5 + $0x64c] ss:$16 sps:$4 sm:$0xff]  }
 0x1b8   : > { %4750 = vmatpush1.bf16.msra.mxu0 %v6397_v56  ;;  %5119 = vmatpush1.bf16.msra.mxu1 %v6400_v57  ;;  %v6487_v56 = vld [vmem:[%s8205_s5 + $0x640] ss:$16 sps:$4 sm:$0xff]   ;;  %v6490_v57 = vld [vmem:[%s8205_s5 + $0x648] ss:$16 sps:$4 sm:$0xff]  }
 0x1b9   : > { %4751 = vmatprep.subr.bf16.mxu0 %v6405_v58  ;;  %5120 = vmatprep.subr.bf16.mxu1 %v6408_v59  ;;  %v6495_v58 = vld [vmem:[%s8205_s5 + $0x664] ss:$16 sps:$4 sm:$0xff]   ;;  %v6498_v59 = vld [vmem:[%s8205_s5 + $0x66c] ss:$16 sps:$4 sm:$0xff]  }
 0x1bc   : > { %4752 = vmatpush1.bf16.msra.mxu0 %v6403_v60  ;;  %5121 = vmatpush1.bf16.msra.mxu1 %v6406_v61  ;;  %v6493_v60 = vld [vmem:[%s8205_s5 + $0x660] ss:$16 sps:$4 sm:$0xff]   ;;  %v6496_v61 = vld [vmem:[%s8205_s5 + $0x668] ss:$16 sps:$4 sm:$0xff]  }
 0x1bd   : > { %4753 = vmatprep.subr.bf16.mxu0 %v6411_v62  ;;  %5122 = vmatprep.subr.bf16.mxu1 %v6414_v63  ;;  %v6501_v62 = vld [vmem:[%s8205_s5 + $0x684] ss:$16 sps:$4 sm:$0xff]   ;;  %v6504_v63 = vld [vmem:[%s8205_s5 + $0x68c] ss:$16 sps:$4 sm:$0xff]  }
 0x1c0   : > { %4754 = vmatpush1.bf16.msra.mxu0 %v6409_v0  ;;  %5123 = vmatpush1.bf16.msra.mxu1 %v6412_v1  ;;  %v6499_v0 = vld [vmem:[%s8205_s5 + $0x680] ss:$16 sps:$4 sm:$0xff]   ;;  %v6502_v1 = vld [vmem:[%s8205_s5 + $0x688] ss:$16 sps:$4 sm:$0xff]  }
 0x1c1   : > { %4755 = vmatprep.subr.bf16.mxu0 %v6417_v2  ;;  %5124 = vmatprep.subr.bf16.mxu1 %v6420_v3  ;;  %v6507_v2 = vld [vmem:[%s8205_s5 + $0x6a4] ss:$16 sps:$4 sm:$0xff]   ;;  %v6510_v3 = vld [vmem:[%s8205_s5 + $0x6ac] ss:$16 sps:$4 sm:$0xff]  }
 0x1c4   : > { %4756 = vmatpush1.bf16.msra.mxu0 %v6415_v4  ;;  %5125 = vmatpush1.bf16.msra.mxu1 %v6418_v5  ;;  %v6505_v4 = vld [vmem:[%s8205_s5 + $0x6a0] ss:$16 sps:$4 sm:$0xff]   ;;  %v6508_v5 = vld [vmem:[%s8205_s5 + $0x6a8] ss:$16 sps:$4 sm:$0xff]  }
 0x1c5   : > { %4757 = vmatprep.subr.bf16.mxu0 %v6423_v6  ;;  %5126 = vmatprep.subr.bf16.mxu1 %v6426_v7  ;;  %v6513_v6 = vld [vmem:[%s8205_s5 + $0x6c4] ss:$16 sps:$4 sm:$0xff]   ;;  %v6516_v7 = vld [vmem:[%s8205_s5 + $0x6cc] ss:$16 sps:$4 sm:$0xff]  }
 0x1c8   : > { %4758 = vmatpush1.bf16.msra.mxu0 %v6421_v8  ;;  %5127 = vmatpush1.bf16.msra.mxu1 %v6424_v9  ;;  %v6511_v8 = vld [vmem:[%s8205_s5 + $0x6c0] ss:$16 sps:$4 sm:$0xff]   ;;  %v6514_v9 = vld [vmem:[%s8205_s5 + $0x6c8] ss:$16 sps:$4 sm:$0xff]  }
 0x1c9   : > { %4759 = vmatprep.subr.bf16.mxu0 %v6429_v10  ;;  %5128 = vmatprep.subr.bf16.mxu1 %v6432_v11  ;;  %v6519_v10 = vld [vmem:[%s8205_s5 + $0x6e4] ss:$16 sps:$4 sm:$0xff]   ;;  %v6522_v11 = vld [vmem:[%s8205_s5 + $0x6ec] ss:$16 sps:$4 sm:$0xff]  }
 0x1cc   : > { %4760 = vmatpush1.bf16.msra.mxu0 %v6427_v12  ;;  %5129 = vmatpush1.bf16.msra.mxu1 %v6430_v13  ;;  %v6517_v12 = vld [vmem:[%s8205_s5 + $0x6e0] ss:$16 sps:$4 sm:$0xff]   ;;  %v6520_v13 = vld [vmem:[%s8205_s5 + $0x6e8] ss:$16 sps:$4 sm:$0xff]  }
 0x1cd   : > { %4761 = vmatprep.subr.bf16.mxu0 %v6435_v14  ;;  %5130 = vmatprep.subr.bf16.mxu1 %v6438_v15  ;;  %v6525_v14 = vld [vmem:[%s8205_s5 + $0x704] ss:$16 sps:$4 sm:$0xff]   ;;  %v6528_v15 = vld [vmem:[%s8205_s5 + $0x70c] ss:$16 sps:$4 sm:$0xff]  }
 0x1d0   : > { %4762 = vmatpush1.bf16.msra.mxu0 %v6433_v16  ;;  %5131 = vmatpush1.bf16.msra.mxu1 %v6436_v17  ;;  %v6523_v16 = vld [vmem:[%s8205_s5 + $0x700] ss:$16 sps:$4 sm:$0xff]   ;;  %v6526_v17 = vld [vmem:[%s8205_s5 + $0x708] ss:$16 sps:$4 sm:$0xff]  }
 0x1d1   : > { %4763 = vmatprep.subr.bf16.mxu0 %v6441_v18  ;;  %5132 = vmatprep.subr.bf16.mxu1 %v6444_v19  ;;  %v6531_v18 = vld [vmem:[%s8205_s5 + $0x724] ss:$16 sps:$4 sm:$0xff]   ;;  %v6534_v19 = vld [vmem:[%s8205_s5 + $0x72c] ss:$16 sps:$4 sm:$0xff]  }
 0x1d4   : > { %4764 = vmatpush1.bf16.msra.mxu0 %v6439_v20  ;;  %5133 = vmatpush1.bf16.msra.mxu1 %v6442_v21  ;;  %v6529_v20 = vld [vmem:[%s8205_s5 + $0x720] ss:$16 sps:$4 sm:$0xff]   ;;  %v6532_v21 = vld [vmem:[%s8205_s5 + $0x728] ss:$16 sps:$4 sm:$0xff]  }
 0x1d5   : > { %4765 = vmatprep.subr.bf16.mxu0 %v6447_v22  ;;  %5134 = vmatprep.subr.bf16.mxu1 %v6450_v23  ;;  %v6537_v22 = vld [vmem:[%s8205_s5 + $0x744] ss:$16 sps:$4 sm:$0xff]   ;;  %v6540_v23 = vld [vmem:[%s8205_s5 + $0x74c] ss:$16 sps:$4 sm:$0xff]  }
 0x1d8   : > { %4766 = vmatpush1.bf16.msra.mxu0 %v6445_v24  ;;  %5135 = vmatpush1.bf16.msra.mxu1 %v6448_v25  ;;  %v6535_v24 = vld [vmem:[%s8205_s5 + $0x740] ss:$16 sps:$4 sm:$0xff]   ;;  %v6538_v25 = vld [vmem:[%s8205_s5 + $0x748] ss:$16 sps:$4 sm:$0xff]  }
 0x1d9   : > { %4767 = vmatprep.subr.bf16.mxu0 %v6453_v26  ;;  %5136 = vmatprep.subr.bf16.mxu1 %v6456_v27  ;;  %v6543_v26 = vld [vmem:[%s8205_s5 + $0x764] ss:$16 sps:$4 sm:$0xff]   ;;  %v6546_v27 = vld [vmem:[%s8205_s5 + $0x76c] ss:$16 sps:$4 sm:$0xff]  }
 0x1dc   : > { %4768 = vmatpush1.bf16.msra.mxu0 %v6451_v28  ;;  %5137 = vmatpush1.bf16.msra.mxu1 %v6454_v29  ;;  %v6541_v28 = vld [vmem:[%s8205_s5 + $0x760] ss:$16 sps:$4 sm:$0xff]   ;;  %v6544_v29 = vld [vmem:[%s8205_s5 + $0x768] ss:$16 sps:$4 sm:$0xff]  }
 0x1dd   : > { %4769 = vmatprep.subr.bf16.mxu0 %v6459_v30  ;;  %5138 = vmatprep.subr.bf16.mxu1 %v6462_v31  ;;  %v6549_v30 = vld [vmem:[%s8205_s5 + $0x784] ss:$16 sps:$4 sm:$0xff]   ;;  %v6552_v31 = vld [vmem:[%s8205_s5 + $0x78c] ss:$16 sps:$4 sm:$0xff]  }
 0x1e0   : > { %4770 = vmatpush1.bf16.msra.mxu0 %v6457_v32  ;;  %5139 = vmatpush1.bf16.msra.mxu1 %v6460_v33  ;;  %v6547_v32 = vld [vmem:[%s8205_s5 + $0x780] ss:$16 sps:$4 sm:$0xff]   ;;  %v6550_v33 = vld [vmem:[%s8205_s5 + $0x788] ss:$16 sps:$4 sm:$0xff]  }
 0x1e1   : > { %4771 = vmatprep.subr.bf16.mxu0 %v6465_v34  ;;  %5140 = vmatprep.subr.bf16.mxu1 %v6468_v35  ;;  %v6555_v34 = vld [vmem:[%s8205_s5 + $0x7a4] ss:$16 sps:$4 sm:$0xff]   ;;  %v6558_v35 = vld [vmem:[%s8205_s5 + $0x7ac] ss:$16 sps:$4 sm:$0xff]  }
 0x1e4   : > { %4772 = vmatpush1.bf16.msra.mxu0 %v6463_v36  ;;  %5141 = vmatpush1.bf16.msra.mxu1 %v6466_v37  ;;  %v6553_v36 = vld [vmem:[%s8205_s5 + $0x7a0] ss:$16 sps:$4 sm:$0xff]   ;;  %v6556_v37 = vld [vmem:[%s8205_s5 + $0x7a8] ss:$16 sps:$4 sm:$0xff]  }
 0x1e5   : > { %4773 = vmatprep.subr.bf16.mxu0 %v6471_v38  ;;  %5142 = vmatprep.subr.bf16.mxu1 %v6474_v39  ;;  %v6561_v38 = vld [vmem:[%s8205_s5 + $0x7c4] ss:$16 sps:$4 sm:$0xff]   ;;  %v6564_v39 = vld [vmem:[%s8205_s5 + $0x7cc] ss:$16 sps:$4 sm:$0xff]  }
 0x1e8   : > { %4774 = vmatpush1.bf16.msra.mxu0 %v6469_v40  ;;  %5143 = vmatpush1.bf16.msra.mxu1 %v6472_v41  ;;  %v6559_v40 = vld [vmem:[%s8205_s5 + $0x7c0] ss:$16 sps:$4 sm:$0xff]   ;;  %v6562_v41 = vld [vmem:[%s8205_s5 + $0x7c8] ss:$16 sps:$4 sm:$0xff]  }
 0x1e9   : > { %4784 = vmatprep.subr.bf16.mxu0 %v6477_v43  ;;  %5153 = vmatprep.subr.bf16.mxu1 %v6480_v44  ;;  %v6570_v43 = vld [vmem:[%s8205_s5 + $0x7ec] ss:$16 sps:$4 sm:$0xff]   ;;  %v6565_v44 = vld [vmem:[%s8205_s5 + $0x7e0] ss:$16 sps:$4 sm:$0xff]  }
 0x1eb   : > { %4776 = vmatmul.mubr.bf16.vlgmr.msra.gmra.mrb[0].mxu0 %v1362_v45  ;;  %5145 = vmatmul.mubr.bf16.vlgmr.msra.gmra.mrb[0].mxu1 %v1362_v45  ;;  %v6568_v45 = vld [vmem:[%s8205_s5 + $0x7e8] ss:$16 sps:$4 sm:$0xff]  }
 0x1ec   : > { %4785 = vmatpush1.bf16.msra.mxu0 %v6475_v47  ;;  %5154 = vmatpush1.bf16.msra.mxu1 %v6478_v48  ;;  %v1347_v47 = vld [vmem:[%s8821_s0 + $0x30] sm:$0xff]  ;;  %v6576_v48 = vld [vmem:[%s8205_s5 + $0x80c] ss:$16 sps:$4 sm:$0xff]  }
 0x1ed   : > { %4786 = vmatprep.subr.bf16.mxu0 %v6483_v49  ;;  %5155 = vmatprep.subr.bf16.mxu1 %v6486_v50  ;;  %v6571_v49 = vld [vmem:[%s8205_s5 + $0x800] ss:$16 sps:$4 sm:$0xff]   ;;  %v6574_v50 = vld [vmem:[%s8205_s5 + $0x808] ss:$16 sps:$4 sm:$0xff]  }
 0x1ee   : > { %4816 = vmatprep.mubr.bf16.mxu0 %v1365_v51  ;;  %5185 = vmatprep.mubr.bf16.mxu1 %v1365_v51  ;;  %v1364_v51 = vpack.c.bf16 %v1347_v47, %v1347_v47  ;;  %v6666_v47 = vld [vmem:[%s8205_s5 + $0x9ec] ss:$16 sps:$4 sm:$0xff]  }
 0x1f0   : > { %4787 = vmatpush1.bf16.msra.mxu0 %v6481_v52  ;;  %5156 = vmatpush1.bf16.msra.mxu1 %v6484_v53  ;;  %v1350_v52 = vld [vmem:[%s8821_s0 + $0x48] sm:$0xff]  ;;  %v6579_v53 = vld [vmem:[%s8205_s5 + $0x824] ss:$16 sps:$4 sm:$0xff]  }
 0x1f1   : > { %4788 = vmatprep.subr.bf16.mxu0 %v6489_v54  ;;  %5157 = vmatprep.subr.bf16.mxu1 %v6492_v55  ;;  %v6582_v54 = vld [vmem:[%s8205_s5 + $0x82c] ss:$16 sps:$4 sm:$0xff]   ;;  %v1367_v55 = vpack.c.bf16 %v1350_v52, %v1350_v52 }
 0x1f2   : > { %v6672_v52 = vld [vmem:[%s8205_s5 + $0xa0c] ss:$16 sps:$4 sm:$0xff]  }
 0x1f4   : > { %4789 = vmatpush1.bf16.msra.mxu0 %v6487_v56  ;;  %5158 = vmatpush1.bf16.msra.mxu1 %v6490_v57  ;;  %v6577_v56 = vld [vmem:[%s8205_s5 + $0x820] ss:$16 sps:$4 sm:$0xff]   ;;  %v6580_v57 = vld [vmem:[%s8205_s5 + $0x828] ss:$16 sps:$4 sm:$0xff]  }
 0x1f5   : > { %4790 = vmatprep.subr.bf16.mxu0 %v6495_v58  ;;  %5159 = vmatprep.subr.bf16.mxu1 %v6498_v59  ;;  %v6585_v58 = vld [vmem:[%s8205_s5 + $0x844] ss:$16 sps:$4 sm:$0xff]   ;;  %v6588_v59 = vld [vmem:[%s8205_s5 + $0x84c] ss:$16 sps:$4 sm:$0xff]  }
 0x1f8   : > { %4791 = vmatpush1.bf16.msra.mxu0 %v6493_v60  ;;  %5160 = vmatpush1.bf16.msra.mxu1 %v6496_v61  ;;  %v6583_v60 = vld [vmem:[%s8205_s5 + $0x840] ss:$16 sps:$4 sm:$0xff]   ;;  %v6586_v61 = vld [vmem:[%s8205_s5 + $0x848] ss:$16 sps:$4 sm:$0xff]  }
 0x1f9   : > { %4792 = vmatprep.subr.bf16.mxu0 %v6501_v62  ;;  %5161 = vmatprep.subr.bf16.mxu1 %v6504_v63  ;;  %v6591_v62 = vld [vmem:[%s8205_s5 + $0x864] ss:$16 sps:$4 sm:$0xff]   ;;  %v6594_v63 = vld [vmem:[%s8205_s5 + $0x86c] ss:$16 sps:$4 sm:$0xff]  }
 0x1fc   : > { %4793 = vmatpush1.bf16.msra.mxu0 %v6499_v0  ;;  %5162 = vmatpush1.bf16.msra.mxu1 %v6502_v1  ;;  %v6589_v0 = vld [vmem:[%s8205_s5 + $0x860] ss:$16 sps:$4 sm:$0xff]   ;;  %v6592_v1 = vld [vmem:[%s8205_s5 + $0x868] ss:$16 sps:$4 sm:$0xff]  }
 0x1fd   : > { %4794 = vmatprep.subr.bf16.mxu0 %v6507_v2  ;;  %5163 = vmatprep.subr.bf16.mxu1 %v6510_v3  ;;  %v6597_v2 = vld [vmem:[%s8205_s5 + $0x884] ss:$16 sps:$4 sm:$0xff]   ;;  %v6600_v3 = vld [vmem:[%s8205_s5 + $0x88c] ss:$16 sps:$4 sm:$0xff]  }
 0x200   : > { %4795 = vmatpush1.bf16.msra.mxu0 %v6505_v4  ;;  %5164 = vmatpush1.bf16.msra.mxu1 %v6508_v5  ;;  %v6595_v4 = vld [vmem:[%s8205_s5 + $0x880] ss:$16 sps:$4 sm:$0xff]   ;;  %v6598_v5 = vld [vmem:[%s8205_s5 + $0x888] ss:$16 sps:$4 sm:$0xff]  }
 0x201   : > { %4796 = vmatprep.subr.bf16.mxu0 %v6513_v6  ;;  %5165 = vmatprep.subr.bf16.mxu1 %v6516_v7  ;;  %v6603_v6 = vld [vmem:[%s8205_s5 + $0x8a4] ss:$16 sps:$4 sm:$0xff]   ;;  %v6606_v7 = vld [vmem:[%s8205_s5 + $0x8ac] ss:$16 sps:$4 sm:$0xff]  }
 0x204   : > { %4797 = vmatpush1.bf16.msra.mxu0 %v6511_v8  ;;  %5166 = vmatpush1.bf16.msra.mxu1 %v6514_v9  ;;  %v6601_v8 = vld [vmem:[%s8205_s5 + $0x8a0] ss:$16 sps:$4 sm:$0xff]   ;;  %v6604_v9 = vld [vmem:[%s8205_s5 + $0x8a8] ss:$16 sps:$4 sm:$0xff]  }
 0x205   : > { %4798 = vmatprep.subr.bf16.mxu0 %v6519_v10  ;;  %5167 = vmatprep.subr.bf16.mxu1 %v6522_v11  ;;  %v6609_v10 = vld [vmem:[%s8205_s5 + $0x8c4] ss:$16 sps:$4 sm:$0xff]   ;;  %v6612_v11 = vld [vmem:[%s8205_s5 + $0x8cc] ss:$16 sps:$4 sm:$0xff]  }
 0x208   : > { %4799 = vmatpush1.bf16.msra.mxu0 %v6517_v12  ;;  %5168 = vmatpush1.bf16.msra.mxu1 %v6520_v13  ;;  %v6607_v12 = vld [vmem:[%s8205_s5 + $0x8c0] ss:$16 sps:$4 sm:$0xff]   ;;  %v6610_v13 = vld [vmem:[%s8205_s5 + $0x8c8] ss:$16 sps:$4 sm:$0xff]  }
 0x209   : > { %4800 = vmatprep.subr.bf16.mxu0 %v6525_v14  ;;  %5169 = vmatprep.subr.bf16.mxu1 %v6528_v15  ;;  %v6615_v14 = vld [vmem:[%s8205_s5 + $0x8e4] ss:$16 sps:$4 sm:$0xff]   ;;  %v6618_v15 = vld [vmem:[%s8205_s5 + $0x8ec] ss:$16 sps:$4 sm:$0xff]  }
 0x20c   : > { %4801 = vmatpush1.bf16.msra.mxu0 %v6523_v16  ;;  %5170 = vmatpush1.bf16.msra.mxu1 %v6526_v17  ;;  %v6613_v16 = vld [vmem:[%s8205_s5 + $0x8e0] ss:$16 sps:$4 sm:$0xff]   ;;  %v6616_v17 = vld [vmem:[%s8205_s5 + $0x8e8] ss:$16 sps:$4 sm:$0xff]  }
 0x20d   : > { %4802 = vmatprep.subr.bf16.mxu0 %v6531_v18  ;;  %5171 = vmatprep.subr.bf16.mxu1 %v6534_v19  ;;  %v6621_v18 = vld [vmem:[%s8205_s5 + $0x904] ss:$16 sps:$4 sm:$0xff]   ;;  %v6624_v19 = vld [vmem:[%s8205_s5 + $0x90c] ss:$16 sps:$4 sm:$0xff]  }
 0x210   : > { %4803 = vmatpush1.bf16.msra.mxu0 %v6529_v20  ;;  %5172 = vmatpush1.bf16.msra.mxu1 %v6532_v21  ;;  %v6619_v20 = vld [vmem:[%s8205_s5 + $0x900] ss:$16 sps:$4 sm:$0xff]   ;;  %v6622_v21 = vld [vmem:[%s8205_s5 + $0x908] ss:$16 sps:$4 sm:$0xff]  }
 0x211   : > { %4804 = vmatprep.subr.bf16.mxu0 %v6537_v22  ;;  %5173 = vmatprep.subr.bf16.mxu1 %v6540_v23  ;;  %v6627_v22 = vld [vmem:[%s8205_s5 + $0x924] ss:$16 sps:$4 sm:$0xff]   ;;  %v6630_v23 = vld [vmem:[%s8205_s5 + $0x92c] ss:$16 sps:$4 sm:$0xff]  }
 0x214   : > { %4805 = vmatpush1.bf16.msra.mxu0 %v6535_v24  ;;  %5174 = vmatpush1.bf16.msra.mxu1 %v6538_v25  ;;  %v6625_v24 = vld [vmem:[%s8205_s5 + $0x920] ss:$16 sps:$4 sm:$0xff]   ;;  %v6628_v25 = vld [vmem:[%s8205_s5 + $0x928] ss:$16 sps:$4 sm:$0xff]  }
 0x215   : > { %4806 = vmatprep.subr.bf16.mxu0 %v6543_v26  ;;  %5175 = vmatprep.subr.bf16.mxu1 %v6546_v27  ;;  %v6633_v26 = vld [vmem:[%s8205_s5 + $0x944] ss:$16 sps:$4 sm:$0xff]   ;;  %v6636_v27 = vld [vmem:[%s8205_s5 + $0x94c] ss:$16 sps:$4 sm:$0xff]  }
 0x218   : > { %4807 = vmatpush1.bf16.msra.mxu0 %v6541_v28  ;;  %5176 = vmatpush1.bf16.msra.mxu1 %v6544_v29  ;;  %v6631_v28 = vld [vmem:[%s8205_s5 + $0x940] ss:$16 sps:$4 sm:$0xff]   ;;  %v6634_v29 = vld [vmem:[%s8205_s5 + $0x948] ss:$16 sps:$4 sm:$0xff]  }
 0x219   : > { %4808 = vmatprep.subr.bf16.mxu0 %v6549_v30  ;;  %5177 = vmatprep.subr.bf16.mxu1 %v6552_v31  ;;  %v6639_v30 = vld [vmem:[%s8205_s5 + $0x964] ss:$16 sps:$4 sm:$0xff]   ;;  %v6642_v31 = vld [vmem:[%s8205_s5 + $0x96c] ss:$16 sps:$4 sm:$0xff]  }
 0x21c   : > { %4809 = vmatpush1.bf16.msra.mxu0 %v6547_v32  ;;  %5178 = vmatpush1.bf16.msra.mxu1 %v6550_v33  ;;  %v6637_v32 = vld [vmem:[%s8205_s5 + $0x960] ss:$16 sps:$4 sm:$0xff]   ;;  %v6640_v33 = vld [vmem:[%s8205_s5 + $0x968] ss:$16 sps:$4 sm:$0xff]  }
 0x21d   : > { %4810 = vmatprep.subr.bf16.mxu0 %v6555_v34  ;;  %5179 = vmatprep.subr.bf16.mxu1 %v6558_v35  ;;  %v6645_v34 = vld [vmem:[%s8205_s5 + $0x984] ss:$16 sps:$4 sm:$0xff]   ;;  %v6648_v35 = vld [vmem:[%s8205_s5 + $0x98c] ss:$16 sps:$4 sm:$0xff]  }
 0x220   : > { %4811 = vmatpush1.bf16.msra.mxu0 %v6553_v36  ;;  %5180 = vmatpush1.bf16.msra.mxu1 %v6556_v37  ;;  %v6643_v36 = vld [vmem:[%s8205_s5 + $0x980] ss:$16 sps:$4 sm:$0xff]   ;;  %v6646_v37 = vld [vmem:[%s8205_s5 + $0x988] ss:$16 sps:$4 sm:$0xff]  }
 0x221   : > { %4812 = vmatprep.subr.bf16.mxu0 %v6561_v38  ;;  %5181 = vmatprep.subr.bf16.mxu1 %v6564_v39  ;;  %v6651_v38 = vld [vmem:[%s8205_s5 + $0x9a4] ss:$16 sps:$4 sm:$0xff]   ;;  %v6654_v39 = vld [vmem:[%s8205_s5 + $0x9ac] ss:$16 sps:$4 sm:$0xff]  }
 0x224   : > { %4813 = vmatpush1.bf16.msra.mxu0 %v6559_v40  ;;  %5182 = vmatpush1.bf16.msra.mxu1 %v6562_v41  ;;  %v6649_v40 = vld [vmem:[%s8205_s5 + $0x9a0] ss:$16 sps:$4 sm:$0xff]   ;;  %v6652_v41 = vld [vmem:[%s8205_s5 + $0x9a8] ss:$16 sps:$4 sm:$0xff]  }
 0x225   : > { %4814 = vmatprep.subr.bf16.mxu0 %v6567_v42  ;;  %5183 = vmatprep.subr.bf16.mxu1 %v6570_v43  ;;  %v6657_v42 = vld [vmem:[%s8205_s5 + $0x9c4] ss:$16 sps:$4 sm:$0xff]   ;;  %v6660_v43 = vld [vmem:[%s8205_s5 + $0x9cc] ss:$16 sps:$4 sm:$0xff]  }
 0x228   : > { %4815 = vmatpush1.bf16.msra.mxu0 %v6565_v44  ;;  %5184 = vmatpush1.bf16.msra.mxu1 %v6568_v45  ;;  %v6655_v44 = vld [vmem:[%s8205_s5 + $0x9c0] ss:$16 sps:$4 sm:$0xff]   ;;  %v6658_v45 = vld [vmem:[%s8205_s5 + $0x9c8] ss:$16 sps:$4 sm:$0xff]  }
 0x229   : > { %4825 = vmatprep.subr.bf16.mxu0 %v6573_v46  ;;  %5194 = vmatprep.subr.bf16.mxu1 %v6576_v48  ;;  %v6663_v46 = vld [vmem:[%s8205_s5 + $0x9e4] ss:$16 sps:$4 sm:$0xff]   ;;  %v6661_v48 = vld [vmem:[%s8205_s5 + $0x9e0] ss:$16 sps:$4 sm:$0xff]  }
 0x22b   : > { %4817 = vmatmul.mubr.bf16.vlgmr.msra.gmra.mrb[0].mxu0 %v1364_v51  ;;  %5186 = vmatmul.mubr.bf16.vlgmr.msra.gmra.mrb[0].mxu1 %v1364_v51  ;;  %v1349_v51 = vld [vmem:[%s8821_s0 + $0x40] sm:$0xff] }
 0x22c   : > { %4826 = vmatpush1.bf16.msra.mxu0 %v6571_v49  ;;  %5195 = vmatpush1.bf16.msra.mxu1 %v6574_v50  ;;  %v6664_v49 = vld [vmem:[%s8205_s5 + $0x9e8] ss:$16 sps:$4 sm:$0xff]   ;;  %v6669_v50 = vld [vmem:[%s8205_s5 + $0xa04] ss:$16 sps:$4 sm:$0xff]  }
 0x22d   : > { %4827 = vmatprep.subr.bf16.mxu0 %v6579_v53  ;;  %5196 = vmatprep.subr.bf16.mxu1 %v6582_v54  ;;  %v1352_v53 = vld [vmem:[%s8821_s0 + $0x58] sm:$0xff]  ;;  %v1366_v54 = vpack.c.bf16 %v1349_v51, %v1349_v51 }
 0x22e   : > { %4857 = vmatprep.mubr.bf16.mxu0 %v1367_v55  ;;  %5226 = vmatprep.mubr.bf16.mxu1 %v1367_v55  ;;  %v6667_v55 = vld [vmem:[%s8205_s5 + $0xa00] ss:$16 sps:$4 sm:$0xff]   ;;  %v6762_v51 = vld [vmem:[%s8205_s5 + $0xbec] ss:$16 sps:$4 sm:$0xff]  }
 0x230   : > { %4828 = vmatpush1.bf16.msra.mxu0 %v6577_v56  ;;  %5197 = vmatpush1.bf16.msra.mxu1 %v6580_v57  ;;  %v6670_v56 = vld [vmem:[%s8205_s5 + $0xa08] ss:$16 sps:$4 sm:$0xff]   ;;  %v6675_v57 = vld [vmem:[%s8205_s5 + $0xa24] ss:$16 sps:$4 sm:$0xff]  }
 0x231   : > { %4829 = vmatprep.subr.bf16.mxu0 %v6585_v58  ;;  %5198 = vmatprep.subr.bf16.mxu1 %v6588_v59  ;;  %v6678_v58 = vld [vmem:[%s8205_s5 + $0xa2c] ss:$16 sps:$4 sm:$0xff]   ;;  %v1369_v59 = vpack.c.bf16 %v1352_v53, %v1352_v53  ;;  %v6760_v53 = vld [vmem:[%s8205_s5 + $0xbe8] ss:$16 sps:$4 sm:$0xff]  }
 0x234   : > { %4830 = vmatpush1.bf16.msra.mxu0 %v6583_v60  ;;  %5199 = vmatpush1.bf16.msra.mxu1 %v6586_v61  ;;  %v6673_v60 = vld [vmem:[%s8205_s5 + $0xa20] ss:$16 sps:$4 sm:$0xff]   ;;  %v6676_v61 = vld [vmem:[%s8205_s5 + $0xa28] ss:$16 sps:$4 sm:$0xff]  }
 0x235   : > { %4831 = vmatprep.subr.bf16.mxu0 %v6591_v62  ;;  %5200 = vmatprep.subr.bf16.mxu1 %v6594_v63  ;;  %v6681_v62 = vld [vmem:[%s8205_s5 + $0xa44] ss:$16 sps:$4 sm:$0xff]   ;;  %v6684_v63 = vld [vmem:[%s8205_s5 + $0xa4c] ss:$16 sps:$4 sm:$0xff]  }
 0x238   : > { %4832 = vmatpush1.bf16.msra.mxu0 %v6589_v0  ;;  %5201 = vmatpush1.bf16.msra.mxu1 %v6592_v1  ;;  %v6679_v0 = vld [vmem:[%s8205_s5 + $0xa40] ss:$16 sps:$4 sm:$0xff]   ;;  %v6682_v1 = vld [vmem:[%s8205_s5 + $0xa48] ss:$16 sps:$4 sm:$0xff]  }
 0x239   : > { %4833 = vmatprep.subr.bf16.mxu0 %v6597_v2  ;;  %5202 = vmatprep.subr.bf16.mxu1 %v6600_v3  ;;  %v6687_v2 = vld [vmem:[%s8205_s5 + $0xa64] ss:$16 sps:$4 sm:$0xff]   ;;  %v6690_v3 = vld [vmem:[%s8205_s5 + $0xa6c] ss:$16 sps:$4 sm:$0xff]  }
 0x23c   : > { %4834 = vmatpush1.bf16.msra.mxu0 %v6595_v4  ;;  %5203 = vmatpush1.bf16.msra.mxu1 %v6598_v5  ;;  %v6685_v4 = vld [vmem:[%s8205_s5 + $0xa60] ss:$16 sps:$4 sm:$0xff]   ;;  %v6688_v5 = vld [vmem:[%s8205_s5 + $0xa68] ss:$16 sps:$4 sm:$0xff]  }
 0x23d   : > { %4835 = vmatprep.subr.bf16.mxu0 %v6603_v6  ;;  %5204 = vmatprep.subr.bf16.mxu1 %v6606_v7  ;;  %v6693_v6 = vld [vmem:[%s8205_s5 + $0xa84] ss:$16 sps:$4 sm:$0xff]   ;;  %v6696_v7 = vld [vmem:[%s8205_s5 + $0xa8c] ss:$16 sps:$4 sm:$0xff]  }
 0x240   : > { %4836 = vmatpush1.bf16.msra.mxu0 %v6601_v8  ;;  %5205 = vmatpush1.bf16.msra.mxu1 %v6604_v9  ;;  %v6691_v8 = vld [vmem:[%s8205_s5 + $0xa80] ss:$16 sps:$4 sm:$0xff]   ;;  %v6694_v9 = vld [vmem:[%s8205_s5 + $0xa88] ss:$16 sps:$4 sm:$0xff]  }
 0x241   : > { %4837 = vmatprep.subr.bf16.mxu0 %v6609_v10  ;;  %5206 = vmatprep.subr.bf16.mxu1 %v6612_v11  ;;  %v6699_v10 = vld [vmem:[%s8205_s5 + $0xaa4] ss:$16 sps:$4 sm:$0xff]   ;;  %v6702_v11 = vld [vmem:[%s8205_s5 + $0xaac] ss:$16 sps:$4 sm:$0xff]  }
 0x244   : > { %4838 = vmatpush1.bf16.msra.mxu0 %v6607_v12  ;;  %5207 = vmatpush1.bf16.msra.mxu1 %v6610_v13  ;;  %v6697_v12 = vld [vmem:[%s8205_s5 + $0xaa0] ss:$16 sps:$4 sm:$0xff]   ;;  %v6700_v13 = vld [vmem:[%s8205_s5 + $0xaa8] ss:$16 sps:$4 sm:$0xff]  }
 0x245   : > { %4839 = vmatprep.subr.bf16.mxu0 %v6615_v14  ;;  %5208 = vmatprep.subr.bf16.mxu1 %v6618_v15  ;;  %v6705_v14 = vld [vmem:[%s8205_s5 + $0xac4] ss:$16 sps:$4 sm:$0xff]   ;;  %v6708_v15 = vld [vmem:[%s8205_s5 + $0xacc] ss:$16 sps:$4 sm:$0xff]  }
 0x248   : > { %4840 = vmatpush1.bf16.msra.mxu0 %v6613_v16  ;;  %5209 = vmatpush1.bf16.msra.mxu1 %v6616_v17  ;;  %v6703_v16 = vld [vmem:[%s8205_s5 + $0xac0] ss:$16 sps:$4 sm:$0xff]   ;;  %v6706_v17 = vld [vmem:[%s8205_s5 + $0xac8] ss:$16 sps:$4 sm:$0xff]  }
 0x249   : > { %4841 = vmatprep.subr.bf16.mxu0 %v6621_v18  ;;  %5210 = vmatprep.subr.bf16.mxu1 %v6624_v19  ;;  %v6711_v18 = vld [vmem:[%s8205_s5 + $0xae4] ss:$16 sps:$4 sm:$0xff]   ;;  %v6714_v19 = vld [vmem:[%s8205_s5 + $0xaec] ss:$16 sps:$4 sm:$0xff]  }
 0x24c   : > { %4842 = vmatpush1.bf16.msra.mxu0 %v6619_v20  ;;  %5211 = vmatpush1.bf16.msra.mxu1 %v6622_v21  ;;  %v6709_v20 = vld [vmem:[%s8205_s5 + $0xae0] ss:$16 sps:$4 sm:$0xff]   ;;  %v6712_v21 = vld [vmem:[%s8205_s5 + $0xae8] ss:$16 sps:$4 sm:$0xff]  }
 0x24d   : > { %4843 = vmatprep.subr.bf16.mxu0 %v6627_v22  ;;  %5212 = vmatprep.subr.bf16.mxu1 %v6630_v23  ;;  %v6717_v22 = vld [vmem:[%s8205_s5 + $0xb04] ss:$16 sps:$4 sm:$0xff]   ;;  %v6720_v23 = vld [vmem:[%s8205_s5 + $0xb0c] ss:$16 sps:$4 sm:$0xff]  }
 0x250   : > { %4844 = vmatpush1.bf16.msra.mxu0 %v6625_v24  ;;  %5213 = vmatpush1.bf16.msra.mxu1 %v6628_v25  ;;  %v6715_v24 = vld [vmem:[%s8205_s5 + $0xb00] ss:$16 sps:$4 sm:$0xff]   ;;  %v6718_v25 = vld [vmem:[%s8205_s5 + $0xb08] ss:$16 sps:$4 sm:$0xff]  }
 0x251   : > { %4845 = vmatprep.subr.bf16.mxu0 %v6633_v26  ;;  %5214 = vmatprep.subr.bf16.mxu1 %v6636_v27  ;;  %v6723_v26 = vld [vmem:[%s8205_s5 + $0xb24] ss:$16 sps:$4 sm:$0xff]   ;;  %v6726_v27 = vld [vmem:[%s8205_s5 + $0xb2c] ss:$16 sps:$4 sm:$0xff]  }
 0x254   : > { %4846 = vmatpush1.bf16.msra.mxu0 %v6631_v28  ;;  %5215 = vmatpush1.bf16.msra.mxu1 %v6634_v29  ;;  %v6721_v28 = vld [vmem:[%s8205_s5 + $0xb20] ss:$16 sps:$4 sm:$0xff]   ;;  %v6724_v29 = vld [vmem:[%s8205_s5 + $0xb28] ss:$16 sps:$4 sm:$0xff]  }
 0x255   : > { %4847 = vmatprep.subr.bf16.mxu0 %v6639_v30  ;;  %5216 = vmatprep.subr.bf16.mxu1 %v6642_v31  ;;  %v6729_v30 = vld [vmem:[%s8205_s5 + $0xb44] ss:$16 sps:$4 sm:$0xff]   ;;  %v6732_v31 = vld [vmem:[%s8205_s5 + $0xb4c] ss:$16 sps:$4 sm:$0xff]  }
 0x258   : > { %4848 = vmatpush1.bf16.msra.mxu0 %v6637_v32  ;;  %5217 = vmatpush1.bf16.msra.mxu1 %v6640_v33  ;;  %v6727_v32 = vld [vmem:[%s8205_s5 + $0xb40] ss:$16 sps:$4 sm:$0xff]   ;;  %v6730_v33 = vld [vmem:[%s8205_s5 + $0xb48] ss:$16 sps:$4 sm:$0xff]  }
 0x259   : > { %4849 = vmatprep.subr.bf16.mxu0 %v6645_v34  ;;  %5218 = vmatprep.subr.bf16.mxu1 %v6648_v35  ;;  %v6735_v34 = vld [vmem:[%s8205_s5 + $0xb64] ss:$16 sps:$4 sm:$0xff]   ;;  %v6738_v35 = vld [vmem:[%s8205_s5 + $0xb6c] ss:$16 sps:$4 sm:$0xff]  }
 0x25c   : > { %4850 = vmatpush1.bf16.msra.mxu0 %v6643_v36  ;;  %5219 = vmatpush1.bf16.msra.mxu1 %v6646_v37  ;;  %v6733_v36 = vld [vmem:[%s8205_s5 + $0xb60] ss:$16 sps:$4 sm:$0xff]   ;;  %v6736_v37 = vld [vmem:[%s8205_s5 + $0xb68] ss:$16 sps:$4 sm:$0xff]  }
 0x25d   : > { %4851 = vmatprep.subr.bf16.mxu0 %v6651_v38  ;;  %5220 = vmatprep.subr.bf16.mxu1 %v6654_v39  ;;  %v6741_v38 = vld [vmem:[%s8205_s5 + $0xb84] ss:$16 sps:$4 sm:$0xff]   ;;  %v6744_v39 = vld [vmem:[%s8205_s5 + $0xb8c] ss:$16 sps:$4 sm:$0xff]  }
 0x260   : > { %4852 = vmatpush1.bf16.msra.mxu0 %v6649_v40  ;;  %5221 = vmatpush1.bf16.msra.mxu1 %v6652_v41  ;;  %v6739_v40 = vld [vmem:[%s8205_s5 + $0xb80] ss:$16 sps:$4 sm:$0xff]   ;;  %v6742_v41 = vld [vmem:[%s8205_s5 + $0xb88] ss:$16 sps:$4 sm:$0xff]  }
 0x261   : > { %4853 = vmatprep.subr.bf16.mxu0 %v6657_v42  ;;  %5222 = vmatprep.subr.bf16.mxu1 %v6660_v43  ;;  %v6747_v42 = vld [vmem:[%s8205_s5 + $0xba4] ss:$16 sps:$4 sm:$0xff]   ;;  %v6750_v43 = vld [vmem:[%s8205_s5 + $0xbac] ss:$16 sps:$4 sm:$0xff]  }
 0x264   : > { %4854 = vmatpush1.bf16.msra.mxu0 %v6655_v44  ;;  %5223 = vmatpush1.bf16.msra.mxu1 %v6658_v45  ;;  %v6745_v44 = vld [vmem:[%s8205_s5 + $0xba0] ss:$16 sps:$4 sm:$0xff]   ;;  %v6748_v45 = vld [vmem:[%s8205_s5 + $0xba8] ss:$16 sps:$4 sm:$0xff]  }
 0x265   : > { %4855 = vmatprep.subr.bf16.mxu0 %v6663_v46  ;;  %5224 = vmatprep.subr.bf16.mxu1 %v6666_v47  ;;  %v6753_v46 = vld [vmem:[%s8205_s5 + $0xbc4] ss:$16 sps:$4 sm:$0xff]   ;;  %v6756_v47 = vld [vmem:[%s8205_s5 + $0xbcc] ss:$16 sps:$4 sm:$0xff]  }
 0x268   : > { %4856 = vmatpush1.bf16.msra.mxu0 %v6661_v48  ;;  %5225 = vmatpush1.bf16.msra.mxu1 %v6664_v49  ;;  %v6751_v48 = vld [vmem:[%s8205_s5 + $0xbc0] ss:$16 sps:$4 sm:$0xff]   ;;  %v6754_v49 = vld [vmem:[%s8205_s5 + $0xbc8] ss:$16 sps:$4 sm:$0xff]  }
 0x269   : > { %4866 = vmatprep.subr.bf16.mxu0 %v6669_v50  ;;  %5235 = vmatprep.subr.bf16.mxu1 %v6672_v52  ;;  %v6759_v50 = vld [vmem:[%s8205_s5 + $0xbe4] ss:$16 sps:$4 sm:$0xff]   ;;  %v6757_v52 = vld [vmem:[%s8205_s5 + $0xbe0] ss:$16 sps:$4 sm:$0xff]  }
 0x26b   : > { %4858 = vmatmul.mubr.bf16.vlgmr.msra.gmra.mrb[0].mxu0 %v1366_v54  ;;  %5227 = vmatmul.mubr.bf16.vlgmr.msra.gmra.mrb[0].mxu1 %v1366_v54  ;;  %v1351_v54 = vld [vmem:[%s8821_s0 + $0x50] sm:$0xff] }
 0x26c   : > { %4867 = vmatpush1.bf16.msra.mxu0 %v6667_v55  ;;  %5236 = vmatpush1.bf16.msra.mxu1 %v6670_v56  ;;  %v6765_v55 = vld [vmem:[%s8205_s5 + $0xc04] ss:$16 sps:$4 sm:$0xff]   ;;  %v6768_v56 = vld [vmem:[%s8205_s5 + $0xc0c] ss:$16 sps:$4 sm:$0xff]  }
 0x26d   : > { %4868 = vmatprep.subr.bf16.mxu0 %v6675_v57  ;;  %5237 = vmatprep.subr.bf16.mxu1 %v6678_v58  ;;  %v1368_v57 = vpack.c.bf16 %v1351_v54, %v1351_v54  ;;  %v1354_v58 = vld [vmem:[%s8821_s0 + $0x68] sm:$0xff]  ;;  %v6855_v54 = vld [vmem:[%s8205_s5 + $0xde4] ss:$16 sps:$4 sm:$0xff]  }
 0x26e   : > { %4898 = vmatprep.mubr.bf16.mxu0 %v1369_v59  ;;  %5267 = vmatprep.mubr.bf16.mxu1 %v1369_v59  ;;  %v6763_v59 = vld [vmem:[%s8205_s5 + $0xc00] ss:$16 sps:$4 sm:$0xff]  }
 0x270   : > { %4869 = vmatpush1.bf16.msra.mxu0 %v6673_v60  ;;  %5238 = vmatpush1.bf16.msra.mxu1 %v6676_v61  ;;  %v6766_v60 = vld [vmem:[%s8205_s5 + $0xc08] ss:$16 sps:$4 sm:$0xff]   ;;  %v6771_v61 = vld [vmem:[%s8205_s5 + $0xc24] ss:$16 sps:$4 sm:$0xff]  }
 0x271   : > { %4870 = vmatprep.subr.bf16.mxu0 %v6681_v62  ;;  %5239 = vmatprep.subr.bf16.mxu1 %v6684_v63  ;;  %v6774_v62 = vld [vmem:[%s8205_s5 + $0xc2c] ss:$16 sps:$4 sm:$0xff]   ;;  %v1371_v63 = vpack.c.bf16 %v1354_v58, %v1354_v58  ;;  %v1353_v58 = vld [vmem:[%s8821_s0 + $0x60] sm:$0xff] }
 0x274   : > { %4871 = vmatpush1.bf16.msra.mxu0 %v6679_v0  ;;  %5240 = vmatpush1.bf16.msra.mxu1 %v6682_v1  ;;  %v6769_v0 = vld [vmem:[%s8205_s5 + $0xc20] ss:$16 sps:$4 sm:$0xff]   ;;  %v6772_v1 = vld [vmem:[%s8205_s5 + $0xc28] ss:$16 sps:$4 sm:$0xff]  }
 0x275   : > { %4872 = vmatprep.subr.bf16.mxu0 %v6687_v2  ;;  %5241 = vmatprep.subr.bf16.mxu1 %v6690_v3  ;;  %v6777_v2 = vld [vmem:[%s8205_s5 + $0xc44] ss:$16 sps:$4 sm:$0xff]   ;;  %v6780_v3 = vld [vmem:[%s8205_s5 + $0xc4c] ss:$16 sps:$4 sm:$0xff]  }
 0x278   : > { %4873 = vmatpush1.bf16.msra.mxu0 %v6685_v4  ;;  %5242 = vmatpush1.bf16.msra.mxu1 %v6688_v5  ;;  %v6775_v4 = vld [vmem:[%s8205_s5 + $0xc40] ss:$16 sps:$4 sm:$0xff]   ;;  %v6778_v5 = vld [vmem:[%s8205_s5 + $0xc48] ss:$16 sps:$4 sm:$0xff]  }
 0x279   : > { %4874 = vmatprep.subr.bf16.mxu0 %v6693_v6  ;;  %5243 = vmatprep.subr.bf16.mxu1 %v6696_v7  ;;  %v6783_v6 = vld [vmem:[%s8205_s5 + $0xc64] ss:$16 sps:$4 sm:$0xff]   ;;  %v6786_v7 = vld [vmem:[%s8205_s5 + $0xc6c] ss:$16 sps:$4 sm:$0xff]  }
 0x27c   : > { %4875 = vmatpush1.bf16.msra.mxu0 %v6691_v8  ;;  %5244 = vmatpush1.bf16.msra.mxu1 %v6694_v9  ;;  %v6781_v8 = vld [vmem:[%s8205_s5 + $0xc60] ss:$16 sps:$4 sm:$0xff]   ;;  %v6784_v9 = vld [vmem:[%s8205_s5 + $0xc68] ss:$16 sps:$4 sm:$0xff]  }
 0x27d   : > { %4876 = vmatprep.subr.bf16.mxu0 %v6699_v10  ;;  %5245 = vmatprep.subr.bf16.mxu1 %v6702_v11  ;;  %v6789_v10 = vld [vmem:[%s8205_s5 + $0xc84] ss:$16 sps:$4 sm:$0xff]   ;;  %v6792_v11 = vld [vmem:[%s8205_s5 + $0xc8c] ss:$16 sps:$4 sm:$0xff]  }
 0x280   : > { %4877 = vmatpush1.bf16.msra.mxu0 %v6697_v12  ;;  %5246 = vmatpush1.bf16.msra.mxu1 %v6700_v13  ;;  %v6787_v12 = vld [vmem:[%s8205_s5 + $0xc80] ss:$16 sps:$4 sm:$0xff]   ;;  %v6790_v13 = vld [vmem:[%s8205_s5 + $0xc88] ss:$16 sps:$4 sm:$0xff]  }
 0x281   : > { %4878 = vmatprep.subr.bf16.mxu0 %v6705_v14  ;;  %5247 = vmatprep.subr.bf16.mxu1 %v6708_v15  ;;  %v6795_v14 = vld [vmem:[%s8205_s5 + $0xca4] ss:$16 sps:$4 sm:$0xff]   ;;  %v6798_v15 = vld [vmem:[%s8205_s5 + $0xcac] ss:$16 sps:$4 sm:$0xff]  }
 0x284   : > { %4879 = vmatpush1.bf16.msra.mxu0 %v6703_v16  ;;  %5248 = vmatpush1.bf16.msra.mxu1 %v6706_v17  ;;  %v6793_v16 = vld [vmem:[%s8205_s5 + $0xca0] ss:$16 sps:$4 sm:$0xff]   ;;  %v6796_v17 = vld [vmem:[%s8205_s5 + $0xca8] ss:$16 sps:$4 sm:$0xff]  }
 0x285   : > { %4880 = vmatprep.subr.bf16.mxu0 %v6711_v18  ;;  %5249 = vmatprep.subr.bf16.mxu1 %v6714_v19  ;;  %v6801_v18 = vld [vmem:[%s8205_s5 + $0xcc4] ss:$16 sps:$4 sm:$0xff]   ;;  %v6804_v19 = vld [vmem:[%s8205_s5 + $0xccc] ss:$16 sps:$4 sm:$0xff]  }
 0x288   : > { %4881 = vmatpush1.bf16.msra.mxu0 %v6709_v20  ;;  %5250 = vmatpush1.bf16.msra.mxu1 %v6712_v21  ;;  %v6799_v20 = vld [vmem:[%s8205_s5 + $0xcc0] ss:$16 sps:$4 sm:$0xff]   ;;  %v6802_v21 = vld [vmem:[%s8205_s5 + $0xcc8] ss:$16 sps:$4 sm:$0xff]  }
 0x289   : > { %4882 = vmatprep.subr.bf16.mxu0 %v6717_v22  ;;  %5251 = vmatprep.subr.bf16.mxu1 %v6720_v23  ;;  %v6807_v22 = vld [vmem:[%s8205_s5 + $0xce4] ss:$16 sps:$4 sm:$0xff]   ;;  %v6810_v23 = vld [vmem:[%s8205_s5 + $0xcec] ss:$16 sps:$4 sm:$0xff]  }
 0x28c   : > { %4883 = vmatpush1.bf16.msra.mxu0 %v6715_v24  ;;  %5252 = vmatpush1.bf16.msra.mxu1 %v6718_v25  ;;  %v6805_v24 = vld [vmem:[%s8205_s5 + $0xce0] ss:$16 sps:$4 sm:$0xff]   ;;  %v6808_v25 = vld [vmem:[%s8205_s5 + $0xce8] ss:$16 sps:$4 sm:$0xff]  }
 0x28d   : > { %4884 = vmatprep.subr.bf16.mxu0 %v6723_v26  ;;  %5253 = vmatprep.subr.bf16.mxu1 %v6726_v27  ;;  %v6813_v26 = vld [vmem:[%s8205_s5 + $0xd04] ss:$16 sps:$4 sm:$0xff]   ;;  %v6816_v27 = vld [vmem:[%s8205_s5 + $0xd0c] ss:$16 sps:$4 sm:$0xff]  }
 0x290   : > { %4885 = vmatpush1.bf16.msra.mxu0 %v6721_v28  ;;  %5254 = vmatpush1.bf16.msra.mxu1 %v6724_v29  ;;  %v6811_v28 = vld [vmem:[%s8205_s5 + $0xd00] ss:$16 sps:$4 sm:$0xff]   ;;  %v6814_v29 = vld [vmem:[%s8205_s5 + $0xd08] ss:$16 sps:$4 sm:$0xff]  }
 0x291   : > { %4886 = vmatprep.subr.bf16.mxu0 %v6729_v30  ;;  %5255 = vmatprep.subr.bf16.mxu1 %v6732_v31  ;;  %v6819_v30 = vld [vmem:[%s8205_s5 + $0xd24] ss:$16 sps:$4 sm:$0xff]   ;;  %v6822_v31 = vld [vmem:[%s8205_s5 + $0xd2c] ss:$16 sps:$4 sm:$0xff]  }
 0x294   : > { %4887 = vmatpush1.bf16.msra.mxu0 %v6727_v32  ;;  %5256 = vmatpush1.bf16.msra.mxu1 %v6730_v33  ;;  %v6817_v32 = vld [vmem:[%s8205_s5 + $0xd20] ss:$16 sps:$4 sm:$0xff]   ;;  %v6820_v33 = vld [vmem:[%s8205_s5 + $0xd28] ss:$16 sps:$4 sm:$0xff]  }
 0x295   : > { %4888 = vmatprep.subr.bf16.mxu0 %v6735_v34  ;;  %5257 = vmatprep.subr.bf16.mxu1 %v6738_v35  ;;  %v6825_v34 = vld [vmem:[%s8205_s5 + $0xd44] ss:$16 sps:$4 sm:$0xff]   ;;  %v6828_v35 = vld [vmem:[%s8205_s5 + $0xd4c] ss:$16 sps:$4 sm:$0xff]  }
 0x298   : > { %4889 = vmatpush1.bf16.msra.mxu0 %v6733_v36  ;;  %5258 = vmatpush1.bf16.msra.mxu1 %v6736_v37  ;;  %v6823_v36 = vld [vmem:[%s8205_s5 + $0xd40] ss:$16 sps:$4 sm:$0xff]   ;;  %v6826_v37 = vld [vmem:[%s8205_s5 + $0xd48] ss:$16 sps:$4 sm:$0xff]  }
 0x299   : > { %4890 = vmatprep.subr.bf16.mxu0 %v6741_v38  ;;  %5259 = vmatprep.subr.bf16.mxu1 %v6744_v39  ;;  %v6831_v38 = vld [vmem:[%s8205_s5 + $0xd64] ss:$16 sps:$4 sm:$0xff]   ;;  %v6834_v39 = vld [vmem:[%s8205_s5 + $0xd6c] ss:$16 sps:$4 sm:$0xff]  }
 0x29c   : > { %4891 = vmatpush1.bf16.msra.mxu0 %v6739_v40  ;;  %5260 = vmatpush1.bf16.msra.mxu1 %v6742_v41  ;;  %v6829_v40 = vld [vmem:[%s8205_s5 + $0xd60] ss:$16 sps:$4 sm:$0xff]   ;;  %v6832_v41 = vld [vmem:[%s8205_s5 + $0xd68] ss:$16 sps:$4 sm:$0xff]  }
 0x29d   : > { %4892 = vmatprep.subr.bf16.mxu0 %v6747_v42  ;;  %5261 = vmatprep.subr.bf16.mxu1 %v6750_v43  ;;  %v6837_v42 = vld [vmem:[%s8205_s5 + $0xd84] ss:$16 sps:$4 sm:$0xff]   ;;  %v6840_v43 = vld [vmem:[%s8205_s5 + $0xd8c] ss:$16 sps:$4 sm:$0xff]  }
 0x2a0   : > { %4893 = vmatpush1.bf16.msra.mxu0 %v6745_v44  ;;  %5262 = vmatpush1.bf16.msra.mxu1 %v6748_v45  ;;  %v6835_v44 = vld [vmem:[%s8205_s5 + $0xd80] ss:$16 sps:$4 sm:$0xff]   ;;  %v6838_v45 = vld [vmem:[%s8205_s5 + $0xd88] ss:$16 sps:$4 sm:$0xff]  }
 0x2a1   : > { %4894 = vmatprep.subr.bf16.mxu0 %v6753_v46  ;;  %5263 = vmatprep.subr.bf16.mxu1 %v6756_v47  ;;  %v6843_v46 = vld [vmem:[%s8205_s5 + $0xda4] ss:$16 sps:$4 sm:$0xff]   ;;  %v6846_v47 = vld [vmem:[%s8205_s5 + $0xdac] ss:$16 sps:$4 sm:$0xff]  }
 0x2a4   : > { %4895 = vmatpush1.bf16.msra.mxu0 %v6751_v48  ;;  %5264 = vmatpush1.bf16.msra.mxu1 %v6754_v49  ;;  %v6841_v48 = vld [vmem:[%s8205_s5 + $0xda0] ss:$16 sps:$4 sm:$0xff]   ;;  %v6844_v49 = vld [vmem:[%s8205_s5 + $0xda8] ss:$16 sps:$4 sm:$0xff]  }
 0x2a5   : > { %4896 = vmatprep.subr.bf16.mxu0 %v6759_v50  ;;  %5265 = vmatprep.subr.bf16.mxu1 %v6762_v51  ;;  %v6849_v50 = vld [vmem:[%s8205_s5 + $0xdc4] ss:$16 sps:$4 sm:$0xff]   ;;  %v6852_v51 = vld [vmem:[%s8205_s5 + $0xdcc] ss:$16 sps:$4 sm:$0xff]  }
 0x2a8   : > { %4897 = vmatpush1.bf16.msra.mxu0 %v6757_v52  ;;  %5266 = vmatpush1.bf16.msra.mxu1 %v6760_v53  ;;  %v6847_v52 = vld [vmem:[%s8205_s5 + $0xdc0] ss:$16 sps:$4 sm:$0xff]   ;;  %v6850_v53 = vld [vmem:[%s8205_s5 + $0xdc8] ss:$16 sps:$4 sm:$0xff]  }
 0x2a9   : > { %4907 = vmatprep.subr.bf16.mxu0 %v6765_v55  ;;  %5276 = vmatprep.subr.bf16.mxu1 %v6768_v56  ;;  %v6858_v55 = vld [vmem:[%s8205_s5 + $0xdec] ss:$16 sps:$4 sm:$0xff]   ;;  %v6853_v56 = vld [vmem:[%s8205_s5 + $0xde0] ss:$16 sps:$4 sm:$0xff]  }
 0x2ab   : > { %4899 = vmatmul.mubr.bf16.vlgmr.msra.gmra.mrb[0].mxu0 %v1368_v57  ;;  %5268 = vmatmul.mubr.bf16.vlgmr.msra.gmra.mrb[0].mxu1 %v1368_v57  ;;  %v6856_v57 = vld [vmem:[%s8205_s5 + $0xde8] ss:$16 sps:$4 sm:$0xff]  }
 0x2ac   : > { %4908 = vmatpush1.bf16.msra.mxu0 %v6763_v59  ;;  %5277 = vmatpush1.bf16.msra.mxu1 %v6766_v60  ;;  %v6861_v59 = vld [vmem:[%s8205_s5 + $0xe04] ss:$16 sps:$4 sm:$0xff]   ;;  %v6864_v60 = vld [vmem:[%s8205_s5 + $0xe0c] ss:$16 sps:$4 sm:$0xff]  }
 0x2ad   : > { %4909 = vmatprep.subr.bf16.mxu0 %v6771_v61  ;;  %5278 = vmatprep.subr.bf16.mxu1 %v6774_v62  ;;  %v1370_v61 = vpack.c.bf16 %v1353_v58, %v1353_v58  ;;  %v1356_v62 = vld [vmem:[%s8821_s0 + $0x78] sm:$0xff]  ;;  %v6951_v58 = vld [vmem:[%s8205_s5 + $0xfe4] ss:$16 sps:$4 sm:$0xff]  }
 0x2ae   : > { %4939 = vmatprep.mubr.bf16.mxu0 %v1371_v63  ;;  %5308 = vmatprep.mubr.bf16.mxu1 %v1371_v63  ;;  %v6859_v63 = vld [vmem:[%s8205_s5 + $0xe00] ss:$16 sps:$4 sm:$0xff]  }
 0x2b0   : > { %4910 = vmatpush1.bf16.msra.mxu0 %v6769_v0  ;;  %5279 = vmatpush1.bf16.msra.mxu1 %v6772_v1  ;;  %v6862_v0 = vld [vmem:[%s8205_s5 + $0xe08] ss:$16 sps:$4 sm:$0xff]   ;;  %v6867_v1 = vld [vmem:[%s8205_s5 + $0xe24] ss:$16 sps:$4 sm:$0xff]  }
 0x2b1   : > { %4911 = vmatprep.subr.bf16.mxu0 %v6777_v2  ;;  %5280 = vmatprep.subr.bf16.mxu1 %v6780_v3  ;;  %v6870_v2 = vld [vmem:[%s8205_s5 + $0xe2c] ss:$16 sps:$4 sm:$0xff]   ;;  %v1373_v3 = vpack.c.bf16 %v1356_v62, %v1356_v62  ;;  %v1355_v62 = vld [vmem:[%s8821_s0 + $0x70] sm:$0xff] }
 0x2b4   : > { %4912 = vmatpush1.bf16.msra.mxu0 %v6775_v4  ;;  %5281 = vmatpush1.bf16.msra.mxu1 %v6778_v5  ;;  %v6865_v4 = vld [vmem:[%s8205_s5 + $0xe20] ss:$16 sps:$4 sm:$0xff]   ;;  %v6868_v5 = vld [vmem:[%s8205_s5 + $0xe28] ss:$16 sps:$4 sm:$0xff]  }
 0x2b5   : > { %4913 = vmatprep.subr.bf16.mxu0 %v6783_v6  ;;  %5282 = vmatprep.subr.bf16.mxu1 %v6786_v7  ;;  %v6873_v6 = vld [vmem:[%s8205_s5 + $0xe44] ss:$16 sps:$4 sm:$0xff]   ;;  %v6876_v7 = vld [vmem:[%s8205_s5 + $0xe4c] ss:$16 sps:$4 sm:$0xff]  }
 0x2b8   : > { %4914 = vmatpush1.bf16.msra.mxu0 %v6781_v8  ;;  %5283 = vmatpush1.bf16.msra.mxu1 %v6784_v9  ;;  %v6871_v8 = vld [vmem:[%s8205_s5 + $0xe40] ss:$16 sps:$4 sm:$0xff]   ;;  %v6874_v9 = vld [vmem:[%s8205_s5 + $0xe48] ss:$16 sps:$4 sm:$0xff]  }
 0x2b9   : > { %4915 = vmatprep.subr.bf16.mxu0 %v6789_v10  ;;  %5284 = vmatprep.subr.bf16.mxu1 %v6792_v11  ;;  %v6879_v10 = vld [vmem:[%s8205_s5 + $0xe64] ss:$16 sps:$4 sm:$0xff]   ;;  %v6882_v11 = vld [vmem:[%s8205_s5 + $0xe6c] ss:$16 sps:$4 sm:$0xff]  }
 0x2bc   : > { %4916 = vmatpush1.bf16.msra.mxu0 %v6787_v12  ;;  %5285 = vmatpush1.bf16.msra.mxu1 %v6790_v13  ;;  %v6877_v12 = vld [vmem:[%s8205_s5 + $0xe60] ss:$16 sps:$4 sm:$0xff]   ;;  %v6880_v13 = vld [vmem:[%s8205_s5 + $0xe68] ss:$16 sps:$4 sm:$0xff]  }
 0x2bd   : > { %4917 = vmatprep.subr.bf16.mxu0 %v6795_v14  ;;  %5286 = vmatprep.subr.bf16.mxu1 %v6798_v15  ;;  %v6885_v14 = vld [vmem:[%s8205_s5 + $0xe84] ss:$16 sps:$4 sm:$0xff]   ;;  %v6888_v15 = vld [vmem:[%s8205_s5 + $0xe8c] ss:$16 sps:$4 sm:$0xff]  }
 0x2c0   : > { %4918 = vmatpush1.bf16.msra.mxu0 %v6793_v16  ;;  %5287 = vmatpush1.bf16.msra.mxu1 %v6796_v17  ;;  %v6883_v16 = vld [vmem:[%s8205_s5 + $0xe80] ss:$16 sps:$4 sm:$0xff]   ;;  %v6886_v17 = vld [vmem:[%s8205_s5 + $0xe88] ss:$16 sps:$4 sm:$0xff]  }
 0x2c1   : > { %4919 = vmatprep.subr.bf16.mxu0 %v6801_v18  ;;  %5288 = vmatprep.subr.bf16.mxu1 %v6804_v19  ;;  %v6891_v18 = vld [vmem:[%s8205_s5 + $0xea4] ss:$16 sps:$4 sm:$0xff]   ;;  %v6894_v19 = vld [vmem:[%s8205_s5 + $0xeac] ss:$16 sps:$4 sm:$0xff]  }
 0x2c4   : > { %4920 = vmatpush1.bf16.msra.mxu0 %v6799_v20  ;;  %5289 = vmatpush1.bf16.msra.mxu1 %v6802_v21  ;;  %v6889_v20 = vld [vmem:[%s8205_s5 + $0xea0] ss:$16 sps:$4 sm:$0xff]   ;;  %v6892_v21 = vld [vmem:[%s8205_s5 + $0xea8] ss:$16 sps:$4 sm:$0xff]  }
 0x2c5   : > { %4921 = vmatprep.subr.bf16.mxu0 %v6807_v22  ;;  %5290 = vmatprep.subr.bf16.mxu1 %v6810_v23  ;;  %v6897_v22 = vld [vmem:[%s8205_s5 + $0xec4] ss:$16 sps:$4 sm:$0xff]   ;;  %v6900_v23 = vld [vmem:[%s8205_s5 + $0xecc] ss:$16 sps:$4 sm:$0xff]  }
 0x2c8   : > { %4922 = vmatpush1.bf16.msra.mxu0 %v6805_v24  ;;  %5291 = vmatpush1.bf16.msra.mxu1 %v6808_v25  ;;  %v6895_v24 = vld [vmem:[%s8205_s5 + $0xec0] ss:$16 sps:$4 sm:$0xff]   ;;  %v6898_v25 = vld [vmem:[%s8205_s5 + $0xec8] ss:$16 sps:$4 sm:$0xff]  }
 0x2c9   : > { %4923 = vmatprep.subr.bf16.mxu0 %v6813_v26  ;;  %5292 = vmatprep.subr.bf16.mxu1 %v6816_v27  ;;  %v6903_v26 = vld [vmem:[%s8205_s5 + $0xee4] ss:$16 sps:$4 sm:$0xff]   ;;  %v6906_v27 = vld [vmem:[%s8205_s5 + $0xeec] ss:$16 sps:$4 sm:$0xff]  }
 0x2cc   : > { %4924 = vmatpush1.bf16.msra.mxu0 %v6811_v28  ;;  %5293 = vmatpush1.bf16.msra.mxu1 %v6814_v29  ;;  %v6901_v28 = vld [vmem:[%s8205_s5 + $0xee0] ss:$16 sps:$4 sm:$0xff]   ;;  %v6904_v29 = vld [vmem:[%s8205_s5 + $0xee8] ss:$16 sps:$4 sm:$0xff]  }
 0x2cd   : > { %4925 = vmatprep.subr.bf16.mxu0 %v6819_v30  ;;  %5294 = vmatprep.subr.bf16.mxu1 %v6822_v31  ;;  %v6909_v30 = vld [vmem:[%s8205_s5 + $0xf04] ss:$16 sps:$4 sm:$0xff]   ;;  %v6912_v31 = vld [vmem:[%s8205_s5 + $0xf0c] ss:$16 sps:$4 sm:$0xff]  }
 0x2d0   : > { %4926 = vmatpush1.bf16.msra.mxu0 %v6817_v32  ;;  %5295 = vmatpush1.bf16.msra.mxu1 %v6820_v33  ;;  %v6907_v32 = vld [vmem:[%s8205_s5 + $0xf00] ss:$16 sps:$4 sm:$0xff]   ;;  %v6910_v33 = vld [vmem:[%s8205_s5 + $0xf08] ss:$16 sps:$4 sm:$0xff]  }
 0x2d1   : > { %4927 = vmatprep.subr.bf16.mxu0 %v6825_v34  ;;  %5296 = vmatprep.subr.bf16.mxu1 %v6828_v35  ;;  %v6915_v34 = vld [vmem:[%s8205_s5 + $0xf24] ss:$16 sps:$4 sm:$0xff]   ;;  %v6918_v35 = vld [vmem:[%s8205_s5 + $0xf2c] ss:$16 sps:$4 sm:$0xff]  }
 0x2d4   : > { %4928 = vmatpush1.bf16.msra.mxu0 %v6823_v36  ;;  %5297 = vmatpush1.bf16.msra.mxu1 %v6826_v37  ;;  %v6913_v36 = vld [vmem:[%s8205_s5 + $0xf20] ss:$16 sps:$4 sm:$0xff]   ;;  %v6916_v37 = vld [vmem:[%s8205_s5 + $0xf28] ss:$16 sps:$4 sm:$0xff]  }
 0x2d5   : > { %4929 = vmatprep.subr.bf16.mxu0 %v6831_v38  ;;  %5298 = vmatprep.subr.bf16.mxu1 %v6834_v39  ;;  %v6921_v38 = vld [vmem:[%s8205_s5 + $0xf44] ss:$16 sps:$4 sm:$0xff]   ;;  %v6924_v39 = vld [vmem:[%s8205_s5 + $0xf4c] ss:$16 sps:$4 sm:$0xff]  }
 0x2d8   : > { %4930 = vmatpush1.bf16.msra.mxu0 %v6829_v40  ;;  %5299 = vmatpush1.bf16.msra.mxu1 %v6832_v41  ;;  %v6919_v40 = vld [vmem:[%s8205_s5 + $0xf40] ss:$16 sps:$4 sm:$0xff]   ;;  %v6922_v41 = vld [vmem:[%s8205_s5 + $0xf48] ss:$16 sps:$4 sm:$0xff]  }
 0x2d9   : > { %4931 = vmatprep.subr.bf16.mxu0 %v6837_v42  ;;  %5300 = vmatprep.subr.bf16.mxu1 %v6840_v43  ;;  %v6927_v42 = vld [vmem:[%s8205_s5 + $0xf64] ss:$16 sps:$4 sm:$0xff]   ;;  %v6930_v43 = vld [vmem:[%s8205_s5 + $0xf6c] ss:$16 sps:$4 sm:$0xff]  }
 0x2dc   : > { %4932 = vmatpush1.bf16.msra.mxu0 %v6835_v44  ;;  %5301 = vmatpush1.bf16.msra.mxu1 %v6838_v45  ;;  %v6925_v44 = vld [vmem:[%s8205_s5 + $0xf60] ss:$16 sps:$4 sm:$0xff]   ;;  %v6928_v45 = vld [vmem:[%s8205_s5 + $0xf68] ss:$16 sps:$4 sm:$0xff]  }
 0x2dd   : > { %4933 = vmatprep.subr.bf16.mxu0 %v6843_v46  ;;  %5302 = vmatprep.subr.bf16.mxu1 %v6846_v47  ;;  %v6933_v46 = vld [vmem:[%s8205_s5 + $0xf84] ss:$16 sps:$4 sm:$0xff]   ;;  %v6936_v47 = vld [vmem:[%s8205_s5 + $0xf8c] ss:$16 sps:$4 sm:$0xff]  }
 0x2e0   : > { %4934 = vmatpush1.bf16.msra.mxu0 %v6841_v48  ;;  %5303 = vmatpush1.bf16.msra.mxu1 %v6844_v49  ;;  %v6931_v48 = vld [vmem:[%s8205_s5 + $0xf80] ss:$16 sps:$4 sm:$0xff]   ;;  %v6934_v49 = vld [vmem:[%s8205_s5 + $0xf88] ss:$16 sps:$4 sm:$0xff]  }
 0x2e1   : > { %4935 = vmatprep.subr.bf16.mxu0 %v6849_v50  ;;  %5304 = vmatprep.subr.bf16.mxu1 %v6852_v51  ;;  %v6939_v50 = vld [vmem:[%s8205_s5 + $0xfa4] ss:$16 sps:$4 sm:$0xff]   ;;  %v6942_v51 = vld [vmem:[%s8205_s5 + $0xfac] ss:$16 sps:$4 sm:$0xff]  }
 0x2e4   : > { %4936 = vmatpush1.bf16.msra.mxu0 %v6847_v52  ;;  %5305 = vmatpush1.bf16.msra.mxu1 %v6850_v53  ;;  %v6937_v52 = vld [vmem:[%s8205_s5 + $0xfa0] ss:$16 sps:$4 sm:$0xff]   ;;  %v6940_v53 = vld [vmem:[%s8205_s5 + $0xfa8] ss:$16 sps:$4 sm:$0xff]  }
 0x2e5   : > { %4937 = vmatprep.subr.bf16.mxu0 %v6855_v54  ;;  %5306 = vmatprep.subr.bf16.mxu1 %v6858_v55  ;;  %v6945_v54 = vld [vmem:[%s8205_s5 + $0xfc4] ss:$16 sps:$4 sm:$0xff]   ;;  %v6948_v55 = vld [vmem:[%s8205_s5 + $0xfcc] ss:$16 sps:$4 sm:$0xff]  }
 0x2e8   : > { %4938 = vmatpush1.bf16.msra.mxu0 %v6853_v56  ;;  %5307 = vmatpush1.bf16.msra.mxu1 %v6856_v57  ;;  %v6943_v56 = vld [vmem:[%s8205_s5 + $0xfc0] ss:$16 sps:$4 sm:$0xff]   ;;  %v6946_v57 = vld [vmem:[%s8205_s5 + $0xfc8] ss:$16 sps:$4 sm:$0xff]  }
 0x2e9   : > { %4948 = vmatprep.subr.bf16.mxu0 %v6861_v59  ;;  %5317 = vmatprep.subr.bf16.mxu1 %v6864_v60  ;;  %v6954_v59 = vld [vmem:[%s8205_s5 + $0xfec] ss:$16 sps:$4 sm:$0xff]   ;;  %v6949_v60 = vld [vmem:[%s8205_s5 + $0xfe0] ss:$16 sps:$4 sm:$0xff]  }
 0x2eb   : > { %4940 = vmatmul.mubr.bf16.vlgmr.msra.gmra.mrb[0].mxu0 %v1370_v61  ;;  %5309 = vmatmul.mubr.bf16.vlgmr.msra.gmra.mrb[0].mxu1 %v1370_v61  ;;  %v6952_v61 = vld [vmem:[%s8205_s5 + $0xfe8] ss:$16 sps:$4 sm:$0xff]  }
 0x2ec   : > { %4949 = vmatpush1.bf16.msra.mxu0 %v6859_v63  ;;  %5318 = vmatpush1.bf16.msra.mxu1 %v6862_v0  ;;  %v6957_v63 = vld [vmem:[%s8205_s5 + $0x1004] ss:$16 sps:$4 sm:$0xff]   ;;  %v6960_v0 = vld [vmem:[%s8205_s5 + $0x100c] ss:$16 sps:$4 sm:$0xff]  }
 0x2ed   : > { %4950 = vmatprep.subr.bf16.mxu0 %v6867_v1  ;;  %5319 = vmatprep.subr.bf16.mxu1 %v6870_v2  ;;  %v1372_v1 = vpack.c.bf16 %v1355_v62, %v1355_v62  ;;  %v6955_v2 = vld [vmem:[%s8205_s5 + $0x1000] ss:$16 sps:$4 sm:$0xff]  }
 0x2ee   : > { %4980 = vmatprep.mubr.bf16.mxu0 %v1373_v3  ;;  %5349 = vmatprep.mubr.bf16.mxu1 %v1373_v3  ;;  %v6958_v3 = vld [vmem:[%s8205_s5 + $0x1008] ss:$16 sps:$4 sm:$0xff]  }
 0x2f0   : > { %4951 = vmatpush1.bf16.msra.mxu0 %v6865_v4  ;;  %5320 = vmatpush1.bf16.msra.mxu1 %v6868_v5  ;;  %v6963_v4 = vld [vmem:[%s8205_s5 + $0x1024] ss:$16 sps:$4 sm:$0xff]   ;;  %v6966_v5 = vld [vmem:[%s8205_s5 + $0x102c] ss:$16 sps:$4 sm:$0xff]  }
 0x2f1   : > { %4952 = vmatprep.subr.bf16.mxu0 %v6873_v6  ;;  %5321 = vmatprep.subr.bf16.mxu1 %v6876_v7  ;;  %v6961_v6 = vld [vmem:[%s8205_s5 + $0x1020] ss:$16 sps:$4 sm:$0xff]   ;;  %v6964_v7 = vld [vmem:[%s8205_s5 + $0x1028] ss:$16 sps:$4 sm:$0xff]  }
 0x2f4   : > { %4953 = vmatpush1.bf16.msra.mxu0 %v6871_v8  ;;  %5322 = vmatpush1.bf16.msra.mxu1 %v6874_v9  ;;  %v6969_v8 = vld [vmem:[%s8205_s5 + $0x1044] ss:$16 sps:$4 sm:$0xff]   ;;  %v6972_v9 = vld [vmem:[%s8205_s5 + $0x104c] ss:$16 sps:$4 sm:$0xff]  }
 0x2f5   : > { %4954 = vmatprep.subr.bf16.mxu0 %v6879_v10  ;;  %5323 = vmatprep.subr.bf16.mxu1 %v6882_v11  ;;  %v7043_v10 = vmov 0   ;;  %v6967_v11 = vld [vmem:[%s8205_s5 + $0x1040] ss:$16 sps:$4 sm:$0xff]  }
 0x2f8   : > { %4955 = vmatpush1.bf16.msra.mxu0 %v6877_v12  ;;  %5324 = vmatpush1.bf16.msra.mxu1 %v6880_v13  ;;  %v6970_v12 = vld [vmem:[%s8205_s5 + $0x1048] ss:$16 sps:$4 sm:$0xff]   ;;  %v6975_v13 = vld [vmem:[%s8205_s5 + $0x1064] ss:$16 sps:$4 sm:$0xff]  }
 0x2f9   : > { %4956 = vmatprep.subr.bf16.mxu0 %v6885_v14  ;;  %5325 = vmatprep.subr.bf16.mxu1 %v6888_v15  ;;  %v6978_v14 = vld [vmem:[%s8205_s5 + $0x106c] ss:$16 sps:$4 sm:$0xff]   ;;  %v6973_v15 = vld [vmem:[%s8205_s5 + $0x1060] ss:$16 sps:$4 sm:$0xff]  }
 0x2fc   : > { %4957 = vmatpush1.bf16.msra.mxu0 %v6883_v16  ;;  %5326 = vmatpush1.bf16.msra.mxu1 %v6886_v17  ;;  %v6976_v16 = vld [vmem:[%s8205_s5 + $0x1068] ss:$16 sps:$4 sm:$0xff]   ;;  %v6981_v17 = vld [vmem:[%s8205_s5 + $0x1084] ss:$16 sps:$4 sm:$0xff]  }
 0x2fd   : > { %4958 = vmatprep.subr.bf16.mxu0 %v6891_v18  ;;  %5327 = vmatprep.subr.bf16.mxu1 %v6894_v19  ;;  %v6984_v18 = vld [vmem:[%s8205_s5 + $0x108c] ss:$16 sps:$4 sm:$0xff]   ;;  %v6979_v19 = vld [vmem:[%s8205_s5 + $0x1080] ss:$16 sps:$4 sm:$0xff]  }
 0x300   : > { %4959 = vmatpush1.bf16.msra.mxu0 %v6889_v20  ;;  %5328 = vmatpush1.bf16.msra.mxu1 %v6892_v21  ;;  %v6982_v20 = vld [vmem:[%s8205_s5 + $0x1088] ss:$16 sps:$4 sm:$0xff]   ;;  %v6987_v21 = vld [vmem:[%s8205_s5 + $0x10a4] ss:$16 sps:$4 sm:$0xff]  }
 0x301   : > { %4960 = vmatprep.subr.bf16.mxu0 %v6897_v22  ;;  %5329 = vmatprep.subr.bf16.mxu1 %v6900_v23  ;;  %v6990_v22 = vld [vmem:[%s8205_s5 + $0x10ac] ss:$16 sps:$4 sm:$0xff]   ;;  %v6985_v23 = vld [vmem:[%s8205_s5 + $0x10a0] ss:$16 sps:$4 sm:$0xff]  }
 0x304   : > { %4961 = vmatpush1.bf16.msra.mxu0 %v6895_v24  ;;  %5330 = vmatpush1.bf16.msra.mxu1 %v6898_v25  ;;  %v6988_v24 = vld [vmem:[%s8205_s5 + $0x10a8] ss:$16 sps:$4 sm:$0xff]   ;;  %v6993_v25 = vld [vmem:[%s8205_s5 + $0x10c4] ss:$16 sps:$4 sm:$0xff]  }
 0x305   : > { %4962 = vmatprep.subr.bf16.mxu0 %v6903_v26  ;;  %5331 = vmatprep.subr.bf16.mxu1 %v6906_v27  ;;  %v6996_v26 = vld [vmem:[%s8205_s5 + $0x10cc] ss:$16 sps:$4 sm:$0xff]   ;;  %v6991_v27 = vld [vmem:[%s8205_s5 + $0x10c0] ss:$16 sps:$4 sm:$0xff]  }
 0x308   : > { %4963 = vmatpush1.bf16.msra.mxu0 %v6901_v28  ;;  %5332 = vmatpush1.bf16.msra.mxu1 %v6904_v29  ;;  %v6994_v28 = vld [vmem:[%s8205_s5 + $0x10c8] ss:$16 sps:$4 sm:$0xff]   ;;  %v6999_v29 = vld [vmem:[%s8205_s5 + $0x10e4] ss:$16 sps:$4 sm:$0xff]  }
 0x309   : > { %4964 = vmatprep.subr.bf16.mxu0 %v6909_v30  ;;  %5333 = vmatprep.subr.bf16.mxu1 %v6912_v31  ;;  %v7002_v30 = vld [vmem:[%s8205_s5 + $0x10ec] ss:$16 sps:$4 sm:$0xff]   ;;  %v6997_v31 = vld [vmem:[%s8205_s5 + $0x10e0] ss:$16 sps:$4 sm:$0xff]  }
 0x30c   : > { %4965 = vmatpush1.bf16.msra.mxu0 %v6907_v32  ;;  %5334 = vmatpush1.bf16.msra.mxu1 %v6910_v33  ;;  %v7000_v32 = vld [vmem:[%s8205_s5 + $0x10e8] ss:$16 sps:$4 sm:$0xff]   ;;  %v1357_v33 = vld [vmem:[%s8821_s0 + $0x80] sm:$0xff]  ;;  %s1328_s5 = scalar_lea.vmem %s8823_s2, %s8832_s24 }
 0x30d   : > { %4966 = vmatprep.subr.bf16.mxu0 %v6915_v34  ;;  %5335 = vmatprep.subr.bf16.mxu1 %v6918_v35  ;;  %v1374_v34 = vpack.c.bf16 %v1357_v33, %v1357_v33  ;;  %v1921_v35 = vlaneseq }
 0x310   : > { %4967 = vmatpush1.bf16.msra.mxu0 %v6913_v36  ;;  %5336 = vmatpush1.bf16.msra.mxu1 %v6916_v37  ;;  %v1922_v36 = vshrl.u32 %v1921_v35, 7 }
 0x311   : > { %4968 = vmatprep.subr.bf16.mxu0 %v6921_v38  ;;  %5337 = vmatprep.subr.bf16.mxu1 %v6924_v39  ;;  %v1919_v39 = vld [vmem:[%s1328_s5] sm:$0xf] }
 0x312   : > { %v1923_v37 = vsub.s32 0, %v1922_v36  ;;  %v1931_v38 = vsub.s32 2, %v1922_v36 }
 0x314   : > { %4969 = vmatpush1.bf16.msra.mxu0 %v6919_v40  ;;  %5338 = vmatpush1.bf16.msra.mxu1 %v6922_v41  ;;  %v1927_v40 = vsub.s32 1, %v1922_v36  ;;  %v1935_v41 = vsub.s32 3, %v1922_v36 }
 0x315   : > { %4970 = vmatprep.subr.bf16.mxu0 %v6927_v42  ;;  %5339 = vmatprep.subr.bf16.mxu1 %v6930_v43  ;;  %v1924_v42 = vrot.slane %v1919_v39, %v1923_v37  ;;  %v1932_v43 = vrot.slane %v1919_v39, %v1931_v38 }
 0x318   : > { %4971 = vmatpush1.bf16.msra.mxu0 %v6925_v44  ;;  %5340 = vmatpush1.bf16.msra.mxu1 %v6928_v45  ;;  %v1928_v44 = vrot.slane %v1919_v39, %v1927_v40  ;;  %v1936_v45 = vrot.slane %v1919_v39, %v1935_v41 }
 0x319   : > { %4972 = vmatprep.subr.bf16.mxu0 %v6933_v46  ;;  %5341 = vmatprep.subr.bf16.mxu1 %v6936_v47 }
 0x31c   : > { %4973 = vmatpush1.bf16.msra.mxu0 %v6931_v48  ;;  %5342 = vmatpush1.bf16.msra.mxu1 %v6934_v49 }
 0x31d   : > { %4974 = vmatprep.subr.bf16.mxu0 %v6939_v50  ;;  %5343 = vmatprep.subr.bf16.mxu1 %v6942_v51 }
 0x320   : > { %4975 = vmatpush1.bf16.msra.mxu0 %v6937_v52  ;;  %5344 = vmatpush1.bf16.msra.mxu1 %v6940_v53 }
 0x321   : > { %4976 = vmatprep.subr.bf16.mxu0 %v6945_v54  ;;  %5345 = vmatprep.subr.bf16.mxu1 %v6948_v55 }
 0x324   : > { %4977 = vmatpush1.bf16.msra.mxu0 %v6943_v56  ;;  %5346 = vmatpush1.bf16.msra.mxu1 %v6946_v57 }
 0x325   : > { %4978 = vmatprep.subr.bf16.mxu0 %v6951_v58  ;;  %5347 = vmatprep.subr.bf16.mxu1 %v6954_v59 }
 0x328   : > { %4979 = vmatpush1.bf16.msra.mxu0 %v6949_v60  ;;  %5348 = vmatpush1.bf16.msra.mxu1 %v6952_v61 }
 0x329   : > { %4989 = vmatprep.subr.bf16.mxu0 %v6957_v63  ;;  %5358 = vmatprep.subr.bf16.mxu1 %v6960_v0 }
 0x32b   : > { %4981 = vmatmul.mubr.bf16.vlgmr.msra.gmra.mrb[0].mxu0 %v1372_v1  ;;  %5350 = vmatmul.mubr.bf16.vlgmr.msra.gmra.mrb[0].mxu1 %v1372_v1 }
 0x32c   : > { %4990 = vmatpush1.bf16.msra.mxu0 %v6955_v2  ;;  %5359 = vmatpush1.bf16.msra.mxu1 %v6958_v3 }
 0x32d   : > { %4991 = vmatprep.subr.bf16.mxu0 %v6963_v4  ;;  %5360 = vmatprep.subr.bf16.mxu1 %v6966_v5 }
 0x32e   : > { %5021 = vmatprep.mubr.bf16.mxu0 %v7043_v10  ;;  %5390 = vmatprep.mubr.bf16.mxu1 %v7043_v10 }
 0x330   : > { %4992 = vmatpush1.bf16.msra.mxu0 %v6961_v6  ;;  %5361 = vmatpush1.bf16.msra.mxu1 %v6964_v7 }
 0x331   : > { %4993 = vmatprep.subr.bf16.mxu0 %v6969_v8  ;;  %5362 = vmatprep.subr.bf16.mxu1 %v6972_v9 }
 0x334   : > { %4994 = vmatpush1.bf16.msra.mxu0 %v6967_v11  ;;  %5363 = vmatpush1.bf16.msra.mxu1 %v6970_v12 }
 0x335   : > { %4995 = vmatprep.subr.bf16.mxu0 %v6975_v13  ;;  %5364 = vmatprep.subr.bf16.mxu1 %v6978_v14 }
 0x338   : > { %4996 = vmatpush1.bf16.msra.mxu0 %v6973_v15  ;;  %5365 = vmatpush1.bf16.msra.mxu1 %v6976_v16 }
 0x339   : > { %4997 = vmatprep.subr.bf16.mxu0 %v6981_v17  ;;  %5366 = vmatprep.subr.bf16.mxu1 %v6984_v18 }
 0x33c   : > { %4998 = vmatpush1.bf16.msra.mxu0 %v6979_v19  ;;  %5367 = vmatpush1.bf16.msra.mxu1 %v6982_v20 }
 0x33d   : > { %4999 = vmatprep.subr.bf16.mxu0 %v6987_v21  ;;  %5368 = vmatprep.subr.bf16.mxu1 %v6990_v22 }
 0x340   : > { %5000 = vmatpush1.bf16.msra.mxu0 %v6985_v23  ;;  %5369 = vmatpush1.bf16.msra.mxu1 %v6988_v24 }
 0x341   : > { %5001 = vmatprep.subr.bf16.mxu0 %v6993_v25  ;;  %5370 = vmatprep.subr.bf16.mxu1 %v6996_v26 }
 0x344   : > { %5002 = vmatpush1.bf16.msra.mxu0 %v6991_v27  ;;  %5371 = vmatpush1.bf16.msra.mxu1 %v6994_v28 }
 0x345   : > { %5003 = vmatprep.subr.bf16.mxu0 %v6999_v29  ;;  %5372 = vmatprep.subr.bf16.mxu1 %v7002_v30 }
 0x348   : > { %5004 = vmatpush1.bf16.msra.mxu0 %v6997_v31  ;;  %5373 = vmatpush1.bf16.msra.mxu1 %v7000_v32 }
 0x34b   : > { %5022 = vmatmul.mubr.bf16.vlgmr.msra.gmra.mrb[0].mxu0 %v1374_v34  ;;  %5391 = vmatmul.mubr.bf16.vlgmr.msra.gmra.mrb[0].mxu1 %v1374_v34 }
 0x41e   : > { %v5023_v46 = vpop.f32.mrb[0].mxu0  ;;  %v5392_v47 = vpop.f32.mrb[0].mxu1 }
 0x41f   : > { %v6076_v48 = vadd.f32 %v5023_v46, %v1924_v42  ;;  %v6078_v49 = vadd.f32 %v5392_v47, %v1932_v43  ;;  %v5025_v50 = vpop.f32.mrb[1].mxu0  ;;  %v5394_v51 = vpop.f32.mrb[1].mxu1 }
 0x420   : > { %v6077_v52 = vadd.f32 %v5025_v50, %v1928_v44  ;;  %v6079_v53 = vadd.f32 %v5394_v51, %v1936_v45  ;;  %v5027_v54 = vpop.f32.mrb[2].mxu0  ;;  %v5396_v55 = vpop.f32.mrb[2].mxu1 }
 0x421   : > { %v5399_v56 = vmax.f32 %v6076_v48, 0.0  ;;  %v5028_v57 = vpop.f32.mrb[3].mxu0  ;;  %v5397_v58 = vpop.f32.mrb[3].mxu1  ;;  %v5401_v60 = vmax.f32 %v6078_v49, 0.0 }
 0x422   : > { %v5400_v59 = vmax.f32 %v6077_v52, 0.0  ;;  %v5402_v61 = vmax.f32 %v6079_v53, 0.0 }
 0x423   : > { %5403 = vst [vmem:[%s1338_s29] sm:$0xff] %v5399_v56  ;;  %5405 = vst [vmem:[%s1338_s29 + $0x10] sm:$0xff] %v5401_v60 }
 0x424   : > { %5404 = vst [vmem:[%s1338_s29 + $0x8] sm:$0xff] %v5400_v59  ;;  %5406 = vst [vmem:[%s1338_s29 + $0x18] sm:$0xff] %v5402_v61 }
 0x425 PF: > { %s13_s16 = sadd.s32 1, %s7041_s16   ;;  %s8825_s12 = smov %s7029_s13 }
 0x426   : > { %p10_p10 = scmp.ge.s32.totalorder %s13_s16, 4   ;;  %s8826_s13 = smov %s7099_s20 }
 0x427   : > { %s8827_s14 = smov %s7037_s15  ;;  %s8828_s15 = smov %s8830_s17 }
 0x428   :  { %12 = sbr.rel (!%p10_p10) target bundleno = 3 (0x3), region = 96 }

</bundles_post_ra>
